<compile_context>
chip_gen: v7x
topology: tpu7x:2x2x1
jax: 0.10.0
libtpu: 0.0.40
codegen_flags: <defaults>
</compile_context>

<pallas_src>
import functools

import jax
import jax.numpy as jnp
from jax.experimental import pallas as pl
from jax.experimental.pallas import tpu as pltpu

BN_EPS = 1e-5  # PyTorch BatchNorm2d default


def resblock_kernel(x_ref, w1_ref, w2_ref, pr_ref, out_ref,
                    xpad_ref, hpad_ref, col_ref):
    """Fused residual block.

    x_ref    : [N, H, W, C]       unpadded input activation (NHWC, f32)
    w1_ref   : [9*C, C]           conv1 weights (bf16), row blocks ordered ky*3+kx
    w2_ref   : [9*C, C]           conv2 weights (bf16)
    pr_ref   : [4, C]             rows = [gamma1, beta1, gamma2, beta2]
    out_ref  : [N, H, W, C]       output (NHWC, f32)
    xpad_ref : [N, H+2, W+2, C]   VMEM scratch: zero-padded input (f32)
    hpad_ref : [N, H+2, W+2, C]   VMEM scratch: zero-padded intermediate (f32)
    col_ref  : [N*H*W, 9*C]       VMEM scratch: bf16 im2col patch matrix
    """
    N, H, W, C = x_ref.shape
    HP, WP = H + 2, W + 2
    M = N * H * W

    def zero_border(pad_ref):
        # Only the 1-pixel border is zeroed; the interior is written once later.
        pad_ref[:, 0:1, :, :] = jnp.zeros((N, 1, WP, C), pad_ref.dtype)
        pad_ref[:, HP - 1:HP, :, :] = jnp.zeros((N, 1, WP, C), pad_ref.dtype)
        pad_ref[:, 1:HP - 1, 0:1, :] = jnp.zeros((N, HP - 2, 1, C), pad_ref.dtype)
        pad_ref[:, 1:HP - 1, WP - 1:WP, :] = jnp.zeros((N, HP - 2, 1, C),
                                                       pad_ref.dtype)

    def conv3x3(pad_ref, w_ref):
        # im2col fill: 9 shifted windows -> lane-aligned bf16 stores, then a
        # single [M, 9C] @ [9C, C] MXU matmul with f32 accumulation.
        for ky in range(3):
            for kx in range(3):
                t = ky * 3 + kx
                patch = pad_ref[:, ky:ky + H, kx:kx + W, :].reshape(M, C)
                col_ref[:, t * C:(t + 1) * C] = patch.astype(jnp.bfloat16)
        return jnp.dot(col_ref[...], w_ref[...],
                       preferred_element_type=jnp.float32)

    def batchnorm(acc, gamma, beta):
        # Training-mode batch statistics; single pass (sum & sum-of-squares).
        inv_m = 1.0 / M
        mean = jnp.sum(acc, axis=0, keepdims=True) * inv_m
        mean_sq = jnp.sum(acc * acc, axis=0, keepdims=True) * inv_m
        var = mean_sq - mean * mean
        inv_std = jax.lax.rsqrt(var + BN_EPS)
        return (acc - mean) * (inv_std * gamma) + beta

    # ---- pad x into VMEM (border zeroed once, interior written once) --------
    zero_border(xpad_ref)
    xpad_ref[:, 1:H + 1, 1:W + 1, :] = x_ref[...]
    zero_border(hpad_ref)

    # ---- conv1 -> bn1 -> relu -------------------------------------------------
    acc1 = conv3x3(xpad_ref, w1_ref)
    h = jnp.maximum(batchnorm(acc1, pr_ref[0:1, :], pr_ref[1:2, :]), 0.0)
    hpad_ref[:, 1:H + 1, 1:W + 1, :] = h.reshape(N, H, W, C)

    # ---- conv2 -> bn2 -> +residual -> relu ------------------------------------
    acc2 = conv3x3(hpad_ref, w2_ref)
    o = batchnorm(acc2, pr_ref[2:3, :], pr_ref[3:4, :])
    residual = x_ref[...].reshape(M, C)   # contiguous view of the full input
    out_ref[...] = jnp.maximum(o + residual, 0.0).reshape(N, H, W, C)


@jax.jit
def residual_block_forward(x_nchw, w1, b1, g1, be1, w2, b2, g2, be2):
    """Forward pass of ResidualBlockVAE. x_nchw: [N, C, H, W] float32.

    Weights follow PyTorch layout: w*: [C_out, C_in, 3, 3], b*: [C_out],
    BN gamma/beta: [C_out]. Requires C_in == C_out (implied by the residual).
    b1/b2 are accepted for interface parity but are mathematically canceled by
    the training-mode BatchNorm mean subtraction, so the kernel drops them.
    """
    N, C, H, W = x_nchw.shape
    Cout = w1.shape[0]
    assert C == Cout, "residual add requires in_channels == out_channels"
    assert C % 128 == 0, "kernel assumes lane-dense channels (multiple of 128)"

    # NHWC for lane-dense channels.  In a real model keep activations NHWC
    # end-to-end; this transpose only exists to match the PyTorch interface.
    x_nhwc = jnp.transpose(x_nchw, (0, 2, 3, 1))

    # [C_out, C_in, 3, 3] -> [ky, kx, C_in, C_out] -> [9*C_in, C_out], bf16.
    w1p = jnp.transpose(w1, (2, 3, 1, 0)).reshape(9 * C, Cout).astype(jnp.bfloat16)
    w2p = jnp.transpose(w2, (2, 3, 1, 0)).reshape(9 * Cout, Cout).astype(jnp.bfloat16)

    # Per-channel BN params packed into a single [4, C] slab.
    params = jnp.stack([g1, be1, g2, be2], axis=0).astype(jnp.float32)

    vmem = pl.BlockSpec(memory_space=pltpu.MemorySpace.VMEM)
    M = N * H * W

    flops = 2 * (2 * M * (9 * C) * Cout)            # two im2col matmuls
    bytes_accessed = (x_nhwc.size * 4 + w1p.size * 2 + w2p.size * 2
                      + params.size * 4 + M * Cout * 4)
    cost = pl.CostEstimate(flops=flops, transcendentals=2 * Cout,
                           bytes_accessed=bytes_accessed)

    out_nhwc = pl.pallas_call(
        resblock_kernel,
        out_shape=jax.ShapeDtypeStruct((N, H, W, Cout), jnp.float32),
        in_specs=[vmem, vmem, vmem, vmem],
        out_specs=vmem,
        scratch_shapes=[
            pltpu.VMEM((N, H + 2, W + 2, C), jnp.float32),      # padded x
            pltpu.VMEM((N, H + 2, W + 2, Cout), jnp.float32),   # padded h
            pltpu.VMEM((M, 9 * C), jnp.bfloat16),               # im2col patches
        ],
        compiler_params=pltpu.CompilerParams(vmem_limit_bytes=32 * 1024 * 1024),
        cost_estimate=cost,
    )(x_nhwc, w1p, w2p, params)

    return jnp.transpose(out_nhwc, (0, 3, 1, 2))  # back to NCHW


def init_params(key, in_channels, out_channels):
    """PyTorch-style Conv2d init; BatchNorm gamma=1, beta=0."""
    k1, k2, k3, k4 = jax.random.split(key, 4)
    bound1 = 1.0 / (in_channels * 9) ** 0.5
    bound2 = 1.0 / (out_channels * 9) ** 0.5
    w1 = jax.random.uniform(k1, (out_channels, in_channels, 3, 3), jnp.float32,
                            -bound1, bound1)
    b1 = jax.random.uniform(k2, (out_channels,), jnp.float32, -bound1, bound1)
    w2 = jax.random.uniform(k3, (out_channels, out_channels, 3, 3), jnp.float32,
                            -bound2, bound2)
    b2 = jax.random.uniform(k4, (out_channels,), jnp.float32, -bound2, bound2)
    g1 = jnp.ones((out_channels,), jnp.float32)
    be1 = jnp.zeros((out_channels,), jnp.float32)
    g2 = jnp.ones((out_channels,), jnp.float32)
    be2 = jnp.zeros((out_channels,), jnp.float32)
    return w1, b1, g1, be1, w2, b2, g2, be2


def reference_forward(x, w1, b1, g1, be1, w2, b2, g2, be2):
    """Pure-JAX f32 reference matching PyTorch training-mode forward."""
    def conv(x, w, b):
        y = jax.lax.conv_general_dilated(
            x, w, window_strides=(1, 1), padding=((1, 1), (1, 1)),
            dimension_numbers=("NCHW", "OIHW", "NCHW"),
            precision=jax.lax.Precision.HIGHEST)
        return y + b[None, :, None, None]

    def bn(x, g, b):
        mean = jnp.mean(x, axis=(0, 2, 3), keepdims=True)
        var = jnp.mean((x - mean) ** 2, axis=(0, 2, 3), keepdims=True)
        return ((x - mean) * jax.lax.rsqrt(var + BN_EPS)
                * g[None, :, None, None] + b[None, :, None, None])

    out = jax.nn.relu(bn(conv(x, w1, b1), g1, be1))
    out = bn(conv(out, w2, b2), g2, be2)
    return jax.nn.relu(out + x)


if __name__ == "__main__":
    # batch=2, channels=128 (lane-dense), spatial 16x16 -> M = 512 MXU rows.
    N, C, H, W = 2, 128, 16, 16

    key = jax.random.PRNGKey(0)
    k_x, k_p = jax.random.split(key)
    x = jax.random.normal(k_x, (N, C, H, W), jnp.float32)
    params = init_params(k_p, C, C)

    out = jax.block_until_ready(residual_block_forward(x, *params))
    ref = reference_forward(x, *params)

    assert out.shape == ref.shape and out.dtype == ref.dtype
    # bf16 MXU operands (with f32 accumulation) give ~1e-2 max deviation vs the
    # f32 HIGHEST reference at this shape; tolerance set accordingly.
    assert jnp.allclose(out, ref, atol=2.5e-2, rtol=2.5e-2), "mismatch vs reference"

    print("KERNEL_OK")
</pallas_src>

<mosaic_0001>
module attributes {stable_mosaic.version = 11 : i64} {
  func.func @resblock_kernel(%arg0: memref<2x16x16x128xf32, #tpu.memory_space<vmem>>, %arg1: memref<1152x128xbf16, #tpu.memory_space<vmem>>, %arg2: memref<1152x128xbf16, #tpu.memory_space<vmem>>, %arg3: memref<4x128xf32, #tpu.memory_space<vmem>>, %arg4: memref<2x16x16x128xf32, #tpu.memory_space<vmem>>, %arg5: memref<2x18x18x128xf32, #tpu.memory_space<vmem>>, %arg6: memref<2x18x18x128xf32, #tpu.memory_space<vmem>>, %arg7: memref<512x1152xbf16, #tpu.memory_space<vmem>>) attributes {dimension_semantics = [], scalar_prefetch = 0 : i64, scratch_operands = 3 : i64, tpu.core_type = #tpu.core_type<tc>} {
    %cst = arith.constant 0.000000e+00 : f32
    %0 = vector.broadcast %cst : f32 to vector<2x1x18x128xf32>
    %c0 = arith.constant 0 : index
    %c0_0 = arith.constant 0 : index
    %c0_1 = arith.constant 0 : index
    %c0_2 = arith.constant 0 : index
    %1 = vector.load %arg5[%c0, %c0_0, %c0_1, %c0_2] : memref<2x18x18x128xf32, #tpu.memory_space<vmem>>, vector<2x1x18x128xf32>
    tpu.vector_store %arg5[%c0, %c0_0, %c0_1, %c0_2], %0 {strides = array<i32>} : memref<2x18x18x128xf32, #tpu.memory_space<vmem>>, vector<2x1x18x128xf32>,
    %cst_3 = arith.constant 0.000000e+00 : f32
    %2 = vector.broadcast %cst_3 : f32 to vector<2x1x18x128xf32>
    %c0_4 = arith.constant 0 : index
    %c17 = arith.constant 17 : index
    %c0_5 = arith.constant 0 : index
    %c0_6 = arith.constant 0 : index
    %3 = vector.load %arg5[%c0_4, %c17, %c0_5, %c0_6] : memref<2x18x18x128xf32, #tpu.memory_space<vmem>>, vector<2x1x18x128xf32>
    tpu.vector_store %arg5[%c0_4, %c17, %c0_5, %c0_6], %2 {strides = array<i32>} : memref<2x18x18x128xf32, #tpu.memory_space<vmem>>, vector<2x1x18x128xf32>,
    %cst_7 = arith.constant 0.000000e+00 : f32
    %4 = vector.broadcast %cst_7 : f32 to vector<2x16x1x128xf32>
    %c0_8 = arith.constant 0 : index
    %c1 = arith.constant 1 : index
    %c0_9 = arith.constant 0 : index
    %c0_10 = arith.constant 0 : index
    %5 = vector.load %arg5[%c0_8, %c1, %c0_9, %c0_10] : memref<2x18x18x128xf32, #tpu.memory_space<vmem>>, vector<2x16x1x128xf32>
    tpu.vector_store %arg5[%c0_8, %c1, %c0_9, %c0_10], %4 {strides = array<i32>} : memref<2x18x18x128xf32, #tpu.memory_space<vmem>>, vector<2x16x1x128xf32>,
    %cst_11 = arith.constant 0.000000e+00 : f32
    %6 = vector.broadcast %cst_11 : f32 to vector<2x16x1x128xf32>
    %c0_12 = arith.constant 0 : index
    %c1_13 = arith.constant 1 : index
    %c17_14 = arith.constant 17 : index
    %c0_15 = arith.constant 0 : index
    %7 = vector.load %arg5[%c0_12, %c1_13, %c17_14, %c0_15] : memref<2x18x18x128xf32, #tpu.memory_space<vmem>>, vector<2x16x1x128xf32>
    tpu.vector_store %arg5[%c0_12, %c1_13, %c17_14, %c0_15], %6 {strides = array<i32>} : memref<2x18x18x128xf32, #tpu.memory_space<vmem>>, vector<2x16x1x128xf32>,
    %c0_16 = arith.constant 0 : index
    %c0_17 = arith.constant 0 : index
    %c0_18 = arith.constant 0 : index
    %c0_19 = arith.constant 0 : index
    %8 = vector.load %arg0[%c0_16, %c0_17, %c0_18, %c0_19] : memref<2x16x16x128xf32, #tpu.memory_space<vmem>>, vector<2x16x16x128xf32>
    %c0_20 = arith.constant 0 : index
    %c1_21 = arith.constant 1 : index
    %c1_22 = arith.constant 1 : index
    %c0_23 = arith.constant 0 : index
    %9 = vector.load %arg5[%c0_20, %c1_21, %c1_22, %c0_23] : memref<2x18x18x128xf32, #tpu.memory_space<vmem>>, vector<2x16x16x128xf32>
    tpu.vector_store %arg5[%c0_20, %c1_21, %c1_22, %c0_23], %8 {strides = array<i32>} : memref<2x18x18x128xf32, #tpu.memory_space<vmem>>, vector<2x16x16x128xf32>,
    %cst_24 = arith.constant 0.000000e+00 : f32
    %10 = vector.broadcast %cst_24 : f32 to vector<2x1x18x128xf32>
    %c0_25 = arith.constant 0 : index
    %c0_26 = arith.constant 0 : index
    %c0_27 = arith.constant 0 : index
    %c0_28 = arith.constant 0 : index
    %11 = vector.load %arg6[%c0_25, %c0_26, %c0_27, %c0_28] : memref<2x18x18x128xf32, #tpu.memory_space<vmem>>, vector<2x1x18x128xf32>
    tpu.vector_store %arg6[%c0_25, %c0_26, %c0_27, %c0_28], %10 {strides = array<i32>} : memref<2x18x18x128xf32, #tpu.memory_space<vmem>>, vector<2x1x18x128xf32>,
    %cst_29 = arith.constant 0.000000e+00 : f32
    %12 = vector.broadcast %cst_29 : f32 to vector<2x1x18x128xf32>
    %c0_30 = arith.constant 0 : index
    %c17_31 = arith.constant 17 : index
    %c0_32 = arith.constant 0 : index
    %c0_33 = arith.constant 0 : index
    %13 = vector.load %arg6[%c0_30, %c17_31, %c0_32, %c0_33] : memref<2x18x18x128xf32, #tpu.memory_space<vmem>>, vector<2x1x18x128xf32>
    tpu.vector_store %arg6[%c0_30, %c17_31, %c0_32, %c0_33], %12 {strides = array<i32>} : memref<2x18x18x128xf32, #tpu.memory_space<vmem>>, vector<2x1x18x128xf32>,
    %cst_34 = arith.constant 0.000000e+00 : f32
    %14 = vector.broadcast %cst_34 : f32 to vector<2x16x1x128xf32>
    %c0_35 = arith.constant 0 : index
    %c1_36 = arith.constant 1 : index
    %c0_37 = arith.constant 0 : index
    %c0_38 = arith.constant 0 : index
    %15 = vector.load %arg6[%c0_35, %c1_36, %c0_37, %c0_38] : memref<2x18x18x128xf32, #tpu.memory_space<vmem>>, vector<2x16x1x128xf32>
    tpu.vector_store %arg6[%c0_35, %c1_36, %c0_37, %c0_38], %14 {strides = array<i32>} : memref<2x18x18x128xf32, #tpu.memory_space<vmem>>, vector<2x16x1x128xf32>,
    %cst_39 = arith.constant 0.000000e+00 : f32
    %16 = vector.broadcast %cst_39 : f32 to vector<2x16x1x128xf32>
    %c0_40 = arith.constant 0 : index
    %c1_41 = arith.constant 1 : index
    %c17_42 = arith.constant 17 : index
    %c0_43 = arith.constant 0 : index
    %17 = vector.load %arg6[%c0_40, %c1_41, %c17_42, %c0_43] : memref<2x18x18x128xf32, #tpu.memory_space<vmem>>, vector<2x16x1x128xf32>
    tpu.vector_store %arg6[%c0_40, %c1_41, %c17_42, %c0_43], %16 {strides = array<i32>} : memref<2x18x18x128xf32, #tpu.memory_space<vmem>>, vector<2x16x1x128xf32>,
    %c0_44 = arith.constant 0 : index
    %c0_45 = arith.constant 0 : index
    %c0_46 = arith.constant 0 : index
    %c0_47 = arith.constant 0 : index
    %18 = vector.load %arg5[%c0_44, %c0_45, %c0_46, %c0_47] : memref<2x18x18x128xf32, #tpu.memory_space<vmem>>, vector<2x16x16x128xf32>
    %19 = vector.shape_cast %18 : vector<2x16x16x128xf32> to vector<512x128xf32>
    %20 = arith.truncf %19 : vector<512x128xf32> to vector<512x128xbf16>
    %c0_48 = arith.constant 0 : index
    %c0_49 = arith.constant 0 : index
    %21 = vector.load %arg7[%c0_48, %c0_49] : memref<512x1152xbf16, #tpu.memory_space<vmem>>, vector<512x128xbf16>
    tpu.vector_store %arg7[%c0_48, %c0_49], %20 {strides = array<i32>} : memref<512x1152xbf16, #tpu.memory_space<vmem>>, vector<512x128xbf16>,
    %c0_50 = arith.constant 0 : index
    %c0_51 = arith.constant 0 : index
    %c1_52 = arith.constant 1 : index
    %c0_53 = arith.constant 0 : index
    %22 = vector.load %arg5[%c0_50, %c0_51, %c1_52, %c0_53] : memref<2x18x18x128xf32, #tpu.memory_space<vmem>>, vector<2x16x16x128xf32>
    %23 = vector.shape_cast %22 : vector<2x16x16x128xf32> to vector<512x128xf32>
    %24 = arith.truncf %23 : vector<512x128xf32> to vector<512x128xbf16>
    %c0_54 = arith.constant 0 : index
    %c128 = arith.constant 128 : index
    %25 = vector.load %arg7[%c0_54, %c128] : memref<512x1152xbf16, #tpu.memory_space<vmem>>, vector<512x128xbf16>
    tpu.vector_store %arg7[%c0_54, %c128], %24 {strides = array<i32>} : memref<512x1152xbf16, #tpu.memory_space<vmem>>, vector<512x128xbf16>,
    %c0_55 = arith.constant 0 : index
    %c0_56 = arith.constant 0 : index
    %c2 = arith.constant 2 : index
    %c0_57 = arith.constant 0 : index
    %26 = vector.load %arg5[%c0_55, %c0_56, %c2, %c0_57] : memref<2x18x18x128xf32, #tpu.memory_space<vmem>>, vector<2x16x16x128xf32>
    %27 = vector.shape_cast %26 : vector<2x16x16x128xf32> to vector<512x128xf32>
    %28 = arith.truncf %27 : vector<512x128xf32> to vector<512x128xbf16>
    %c0_58 = arith.constant 0 : index
    %c256 = arith.constant 256 : index
    %29 = vector.load %arg7[%c0_58, %c256] : memref<512x1152xbf16, #tpu.memory_space<vmem>>, vector<512x128xbf16>
    tpu.vector_store %arg7[%c0_58, %c256], %28 {strides = array<i32>} : memref<512x1152xbf16, #tpu.memory_space<vmem>>, vector<512x128xbf16>,
    %c0_59 = arith.constant 0 : index
    %c1_60 = arith.constant 1 : index
    %c0_61 = arith.constant 0 : index
    %c0_62 = arith.constant 0 : index
    %30 = vector.load %arg5[%c0_59, %c1_60, %c0_61, %c0_62] : memref<2x18x18x128xf32, #tpu.memory_space<vmem>>, vector<2x16x16x128xf32>
    %31 = vector.shape_cast %30 : vector<2x16x16x128xf32> to vector<512x128xf32>
    %32 = arith.truncf %31 : vector<512x128xf32> to vector<512x128xbf16>
    %c0_63 = arith.constant 0 : index
    %c384 = arith.constant 384 : index
    %33 = vector.load %arg7[%c0_63, %c384] : memref<512x1152xbf16, #tpu.memory_space<vmem>>, vector<512x128xbf16>
    tpu.vector_store %arg7[%c0_63, %c384], %32 {strides = array<i32>} : memref<512x1152xbf16, #tpu.memory_space<vmem>>, vector<512x128xbf16>,
    %c0_64 = arith.constant 0 : index
    %c1_65 = arith.constant 1 : index
    %c1_66 = arith.constant 1 : index
    %c0_67 = arith.constant 0 : index
    %34 = vector.load %arg5[%c0_64, %c1_65, %c1_66, %c0_67] : memref<2x18x18x128xf32, #tpu.memory_space<vmem>>, vector<2x16x16x128xf32>
    %35 = vector.shape_cast %34 : vector<2x16x16x128xf32> to vector<512x128xf32>
    %36 = arith.truncf %35 : vector<512x128xf32> to vector<512x128xbf16>
    %c0_68 = arith.constant 0 : index
    %c512 = arith.constant 512 : index
    %37 = vector.load %arg7[%c0_68, %c512] : memref<512x1152xbf16, #tpu.memory_space<vmem>>, vector<512x128xbf16>
    tpu.vector_store %arg7[%c0_68, %c512], %36 {strides = array<i32>} : memref<512x1152xbf16, #tpu.memory_space<vmem>>, vector<512x128xbf16>,
    %c0_69 = arith.constant 0 : index
    %c1_70 = arith.constant 1 : index
    %c2_71 = arith.constant 2 : index
    %c0_72 = arith.constant 0 : index
    %38 = vector.load %arg5[%c0_69, %c1_70, %c2_71, %c0_72] : memref<2x18x18x128xf32, #tpu.memory_space<vmem>>, vector<2x16x16x128xf32>
    %39 = vector.shape_cast %38 : vector<2x16x16x128xf32> to vector<512x128xf32>
    %40 = arith.truncf %39 : vector<512x128xf32> to vector<512x128xbf16>
    %c0_73 = arith.constant 0 : index
    %c640 = arith.constant 640 : index
    %41 = vector.load %arg7[%c0_73, %c640] : memref<512x1152xbf16, #tpu.memory_space<vmem>>, vector<512x128xbf16>
    tpu.vector_store %arg7[%c0_73, %c640], %40 {strides = array<i32>} : memref<512x1152xbf16, #tpu.memory_space<vmem>>, vector<512x128xbf16>,
    %c0_74 = arith.constant 0 : index
    %c2_75 = arith.constant 2 : index
    %c0_76 = arith.constant 0 : index
    %c0_77 = arith.constant 0 : index
    %42 = vector.load %arg5[%c0_74, %c2_75, %c0_76, %c0_77] : memref<2x18x18x128xf32, #tpu.memory_space<vmem>>, vector<2x16x16x128xf32>
    %43 = vector.shape_cast %42 : vector<2x16x16x128xf32> to vector<512x128xf32>
    %44 = arith.truncf %43 : vector<512x128xf32> to vector<512x128xbf16>
    %c0_78 = arith.constant 0 : index
    %c768 = arith.constant 768 : index
    %45 = vector.load %arg7[%c0_78, %c768] : memref<512x1152xbf16, #tpu.memory_space<vmem>>, vector<512x128xbf16>
    tpu.vector_store %arg7[%c0_78, %c768], %44 {strides = array<i32>} : memref<512x1152xbf16, #tpu.memory_space<vmem>>, vector<512x128xbf16>,
    %c0_79 = arith.constant 0 : index
    %c2_80 = arith.constant 2 : index
    %c1_81 = arith.constant 1 : index
    %c0_82 = arith.constant 0 : index
    %46 = vector.load %arg5[%c0_79, %c2_80, %c1_81, %c0_82] : memref<2x18x18x128xf32, #tpu.memory_space<vmem>>, vector<2x16x16x128xf32>
    %47 = vector.shape_cast %46 : vector<2x16x16x128xf32> to vector<512x128xf32>
    %48 = arith.truncf %47 : vector<512x128xf32> to vector<512x128xbf16>
    %c0_83 = arith.constant 0 : index
    %c896 = arith.constant 896 : index
    %49 = vector.load %arg7[%c0_83, %c896] : memref<512x1152xbf16, #tpu.memory_space<vmem>>, vector<512x128xbf16>
    tpu.vector_store %arg7[%c0_83, %c896], %48 {strides = array<i32>} : memref<512x1152xbf16, #tpu.memory_space<vmem>>, vector<512x128xbf16>,
    %c0_84 = arith.constant 0 : index
    %c2_85 = arith.constant 2 : index
    %c2_86 = arith.constant 2 : index
    %c0_87 = arith.constant 0 : index
    %50 = vector.load %arg5[%c0_84, %c2_85, %c2_86, %c0_87] : memref<2x18x18x128xf32, #tpu.memory_space<vmem>>, vector<2x16x16x128xf32>
    %51 = vector.shape_cast %50 : vector<2x16x16x128xf32> to vector<512x128xf32>
    %52 = arith.truncf %51 : vector<512x128xf32> to vector<512x128xbf16>
    %c0_88 = arith.constant 0 : index
    %c1024 = arith.constant 1024 : index
    %53 = vector.load %arg7[%c0_88, %c1024] : memref<512x1152xbf16, #tpu.memory_space<vmem>>, vector<512x128xbf16>
    tpu.vector_store %arg7[%c0_88, %c1024], %52 {strides = array<i32>} : memref<512x1152xbf16, #tpu.memory_space<vmem>>, vector<512x128xbf16>,
    %c0_89 = arith.constant 0 : index
    %c0_90 = arith.constant 0 : index
    %54 = vector.load %arg7[%c0_89, %c0_90] : memref<512x1152xbf16, #tpu.memory_space<vmem>>, vector<512x1152xbf16>
    %c0_91 = arith.constant 0 : index
    %c0_92 = arith.constant 0 : index
    %55 = vector.load %arg1[%c0_91, %c0_92] : memref<1152x128xbf16, #tpu.memory_space<vmem>>, vector<1152x128xbf16>
    %cst_93 = arith.constant dense<0.000000e+00> : vector<512x128xf32>
    %56 = tpu.matmul %54, %55, %cst_93 {dimension_numbers = #tpu.dot_dimension_numbers<[1], [0], [0], [1], [0, 0, 1, 1], [], []>} : vector<512x1152xbf16>, vector<1152x128xbf16>, vector<512x128xf32> -> vector<512x128xf32>
    %c0_94 = arith.constant 0 : index
    %c0_95 = arith.constant 0 : index
    %57 = vector.load %arg3[%c0_94, %c0_95] : memref<4x128xf32, #tpu.memory_space<vmem>>, vector<1x128xf32>
    %c1_96 = arith.constant 1 : index
    %c0_97 = arith.constant 0 : index
    %58 = vector.load %arg3[%c1_96, %c0_97] : memref<4x128xf32, #tpu.memory_space<vmem>>, vector<1x128xf32>
    %cst_98 = arith.constant dense<0.000000e+00> : vector<128xf32>
    %59 = vector.multi_reduction <add>, %56, %cst_98 [0] : vector<512x128xf32> to vector<128xf32>
    %60 = vector.shape_cast %59 : vector<128xf32> to vector<1x128xf32>
    %cst_99 = arith.constant 0.001953125 : f32
    %61 = vector.broadcast %cst_99 : f32 to vector<1x128xf32>
    %62 = arith.mulf %60, %61 : vector<1x128xf32>
    %63 = arith.mulf %56, %56 : vector<512x128xf32>
    %cst_100 = arith.constant dense<0.000000e+00> : vector<128xf32>
    %64 = vector.multi_reduction <add>, %63, %cst_100 [0] : vector<512x128xf32> to vector<128xf32>
    %65 = vector.shape_cast %64 : vector<128xf32> to vector<1x128xf32>
    %cst_101 = arith.constant 0.001953125 : f32
    %66 = vector.broadcast %cst_101 : f32 to vector<1x128xf32>
    %67 = arith.mulf %65, %66 : vector<1x128xf32>
    %68 = arith.mulf %62, %62 : vector<1x128xf32>
    %69 = arith.subf %67, %68 : vector<1x128xf32>
    %cst_102 = arith.constant 9.99999974E-6 : f32
    %70 = vector.broadcast %cst_102 : f32 to vector<1x128xf32>
    %71 = arith.addf %69, %70 : vector<1x128xf32>
    %72 = math.rsqrt %71 : vector<1x128xf32>
    %73 = vector.broadcast %62 : vector<1x128xf32> to vector<512x128xf32>
    %74 = arith.subf %56, %73 : vector<512x128xf32>
    %75 = arith.mulf %72, %57 : vector<1x128xf32>
    %76 = vector.broadcast %75 : vector<1x128xf32> to vector<512x128xf32>
    %77 = arith.mulf %74, %76 : vector<512x128xf32>
    %78 = vector.broadcast %58 : vector<1x128xf32> to vector<512x128xf32>
    %79 = arith.addf %77, %78 : vector<512x128xf32>
    %cst_103 = arith.constant 0.000000e+00 : f32
    %80 = vector.broadcast %cst_103 : f32 to vector<512x128xf32>
    %81 = arith.maximumf %79, %80 : vector<512x128xf32>
    %82 = vector.shape_cast %81 : vector<512x128xf32> to vector<2x16x16x128xf32>
    %c0_104 = arith.constant 0 : index
    %c1_105 = arith.constant 1 : index
    %c1_106 = arith.constant 1 : index
    %c0_107 = arith.constant 0 : index
    %83 = vector.load %arg6[%c0_104, %c1_105, %c1_106, %c0_107] : memref<2x18x18x128xf32, #tpu.memory_space<vmem>>, vector<2x16x16x128xf32>
    tpu.vector_store %arg6[%c0_104, %c1_105, %c1_106, %c0_107], %82 {strides = array<i32>} : memref<2x18x18x128xf32, #tpu.memory_space<vmem>>, vector<2x16x16x128xf32>,
    %c0_108 = arith.constant 0 : index
    %c0_109 = arith.constant 0 : index
    %c0_110 = arith.constant 0 : index
    %c0_111 = arith.constant 0 : index
    %84 = vector.load %arg6[%c0_108, %c0_109, %c0_110, %c0_111] : memref<2x18x18x128xf32, #tpu.memory_space<vmem>>, vector<2x16x16x128xf32>
    %85 = vector.shape_cast %84 : vector<2x16x16x128xf32> to vector<512x128xf32>
    %86 = arith.truncf %85 : vector<512x128xf32> to vector<512x128xbf16>
    %c0_112 = arith.constant 0 : index
    %c0_113 = arith.constant 0 : index
    %87 = vector.load %arg7[%c0_112, %c0_113] : memref<512x1152xbf16, #tpu.memory_space<vmem>>, vector<512x128xbf16>
    tpu.vector_store %arg7[%c0_112, %c0_113], %86 {strides = array<i32>} : memref<512x1152xbf16, #tpu.memory_space<vmem>>, vector<512x128xbf16>,
    %c0_114 = arith.constant 0 : index
    %c0_115 = arith.constant 0 : index
    %c1_116 = arith.constant 1 : index
    %c0_117 = arith.constant 0 : index
    %88 = vector.load %arg6[%c0_114, %c0_115, %c1_116, %c0_117] : memref<2x18x18x128xf32, #tpu.memory_space<vmem>>, vector<2x16x16x128xf32>
    %89 = vector.shape_cast %88 : vector<2x16x16x128xf32> to vector<512x128xf32>
    %90 = arith.truncf %89 : vector<512x128xf32> to vector<512x128xbf16>
    %c0_118 = arith.constant 0 : index
    %c128_119 = arith.constant 128 : index
    %91 = vector.load %arg7[%c0_118, %c128_119] : memref<512x1152xbf16, #tpu.memory_space<vmem>>, vector<512x128xbf16>
    tpu.vector_store %arg7[%c0_118, %c128_119], %90 {strides = array<i32>} : memref<512x1152xbf16, #tpu.memory_space<vmem>>, vector<512x128xbf16>,
    %c0_120 = arith.constant 0 : index
    %c0_121 = arith.constant 0 : index
    %c2_122 = arith.constant 2 : index
    %c0_123 = arith.constant 0 : index
    %92 = vector.load %arg6[%c0_120, %c0_121, %c2_122, %c0_123] : memref<2x18x18x128xf32, #tpu.memory_space<vmem>>, vector<2x16x16x128xf32>
    %93 = vector.shape_cast %92 : vector<2x16x16x128xf32> to vector<512x128xf32>
    %94 = arith.truncf %93 : vector<512x128xf32> to vector<512x128xbf16>
    %c0_124 = arith.constant 0 : index
    %c256_125 = arith.constant 256 : index
    %95 = vector.load %arg7[%c0_124, %c256_125] : memref<512x1152xbf16, #tpu.memory_space<vmem>>, vector<512x128xbf16>
    tpu.vector_store %arg7[%c0_124, %c256_125], %94 {strides = array<i32>} : memref<512x1152xbf16, #tpu.memory_space<vmem>>, vector<512x128xbf16>,
    %c0_126 = arith.constant 0 : index
    %c1_127 = arith.constant 1 : index
    %c0_128 = arith.constant 0 : index
    %c0_129 = arith.constant 0 : index
    %96 = vector.load %arg6[%c0_126, %c1_127, %c0_128, %c0_129] : memref<2x18x18x128xf32, #tpu.memory_space<vmem>>, vector<2x16x16x128xf32>
    %97 = vector.shape_cast %96 : vector<2x16x16x128xf32> to vector<512x128xf32>
    %98 = arith.truncf %97 : vector<512x128xf32> to vector<512x128xbf16>
    %c0_130 = arith.constant 0 : index
    %c384_131 = arith.constant 384 : index
    %99 = vector.load %arg7[%c0_130, %c384_131] : memref<512x1152xbf16, #tpu.memory_space<vmem>>, vector<512x128xbf16>
    tpu.vector_store %arg7[%c0_130, %c384_131], %98 {strides = array<i32>} : memref<512x1152xbf16, #tpu.memory_space<vmem>>, vector<512x128xbf16>,
    %c0_132 = arith.constant 0 : index
    %c1_133 = arith.constant 1 : index
    %c1_134 = arith.constant 1 : index
    %c0_135 = arith.constant 0 : index
    %100 = vector.load %arg6[%c0_132, %c1_133, %c1_134, %c0_135] : memref<2x18x18x128xf32, #tpu.memory_space<vmem>>, vector<2x16x16x128xf32>
    %101 = vector.shape_cast %100 : vector<2x16x16x128xf32> to vector<512x128xf32>
    %102 = arith.truncf %101 : vector<512x128xf32> to vector<512x128xbf16>
    %c0_136 = arith.constant 0 : index
    %c512_137 = arith.constant 512 : index
    %103 = vector.load %arg7[%c0_136, %c512_137] : memref<512x1152xbf16, #tpu.memory_space<vmem>>, vector<512x128xbf16>
    tpu.vector_store %arg7[%c0_136, %c512_137], %102 {strides = array<i32>} : memref<512x1152xbf16, #tpu.memory_space<vmem>>, vector<512x128xbf16>,
    %c0_138 = arith.constant 0 : index
    %c1_139 = arith.constant 1 : index
    %c2_140 = arith.constant 2 : index
    %c0_141 = arith.constant 0 : index
    %104 = vector.load %arg6[%c0_138, %c1_139, %c2_140, %c0_141] : memref<2x18x18x128xf32, #tpu.memory_space<vmem>>, vector<2x16x16x128xf32>
    %105 = vector.shape_cast %104 : vector<2x16x16x128xf32> to vector<512x128xf32>
    %106 = arith.truncf %105 : vector<512x128xf32> to vector<512x128xbf16>
    %c0_142 = arith.constant 0 : index
    %c640_143 = arith.constant 640 : index
    %107 = vector.load %arg7[%c0_142, %c640_143] : memref<512x1152xbf16, #tpu.memory_space<vmem>>, vector<512x128xbf16>
    tpu.vector_store %arg7[%c0_142, %c640_143], %106 {strides = array<i32>} : memref<512x1152xbf16, #tpu.memory_space<vmem>>, vector<512x128xbf16>,
    %c0_144 = arith.constant 0 : index
    %c2_145 = arith.constant 2 : index
    %c0_146 = arith.constant 0 : index
    %c0_147 = arith.constant 0 : index
    %108 = vector.load %arg6[%c0_144, %c2_145, %c0_146, %c0_147] : memref<2x18x18x128xf32, #tpu.memory_space<vmem>>, vector<2x16x16x128xf32>
    %109 = vector.shape_cast %108 : vector<2x16x16x128xf32> to vector<512x128xf32>
    %110 = arith.truncf %109 : vector<512x128xf32> to vector<512x128xbf16>
    %c0_148 = arith.constant 0 : index
    %c768_149 = arith.constant 768 : index
    %111 = vector.load %arg7[%c0_148, %c768_149] : memref<512x1152xbf16, #tpu.memory_space<vmem>>, vector<512x128xbf16>
    tpu.vector_store %arg7[%c0_148, %c768_149], %110 {strides = array<i32>} : memref<512x1152xbf16, #tpu.memory_space<vmem>>, vector<512x128xbf16>,
    %c0_150 = arith.constant 0 : index
    %c2_151 = arith.constant 2 : index
    %c1_152 = arith.constant 1 : index
    %c0_153 = arith.constant 0 : index
    %112 = vector.load %arg6[%c0_150, %c2_151, %c1_152, %c0_153] : memref<2x18x18x128xf32, #tpu.memory_space<vmem>>, vector<2x16x16x128xf32>
    %113 = vector.shape_cast %112 : vector<2x16x16x128xf32> to vector<512x128xf32>
    %114 = arith.truncf %113 : vector<512x128xf32> to vector<512x128xbf16>
    %c0_154 = arith.constant 0 : index
    %c896_155 = arith.constant 896 : index
    %115 = vector.load %arg7[%c0_154, %c896_155] : memref<512x1152xbf16, #tpu.memory_space<vmem>>, vector<512x128xbf16>
    tpu.vector_store %arg7[%c0_154, %c896_155], %114 {strides = array<i32>} : memref<512x1152xbf16, #tpu.memory_space<vmem>>, vector<512x128xbf16>,
    %c0_156 = arith.constant 0 : index
    %c2_157 = arith.constant 2 : index
    %c2_158 = arith.constant 2 : index
    %c0_159 = arith.constant 0 : index
    %116 = vector.load %arg6[%c0_156, %c2_157, %c2_158, %c0_159] : memref<2x18x18x128xf32, #tpu.memory_space<vmem>>, vector<2x16x16x128xf32>
    %117 = vector.shape_cast %116 : vector<2x16x16x128xf32> to vector<512x128xf32>
    %118 = arith.truncf %117 : vector<512x128xf32> to vector<512x128xbf16>
    %c0_160 = arith.constant 0 : index
    %c1024_161 = arith.constant 1024 : index
    %119 = vector.load %arg7[%c0_160, %c1024_161] : memref<512x1152xbf16, #tpu.memory_space<vmem>>, vector<512x128xbf16>
    tpu.vector_store %arg7[%c0_160, %c1024_161], %118 {strides = array<i32>} : memref<512x1152xbf16, #tpu.memory_space<vmem>>, vector<512x128xbf16>,
    %c0_162 = arith.constant 0 : index
    %c0_163 = arith.constant 0 : index
    %120 = vector.load %arg7[%c0_162, %c0_163] : memref<512x1152xbf16, #tpu.memory_space<vmem>>, vector<512x1152xbf16>
    %c0_164 = arith.constant 0 : index
    %c0_165 = arith.constant 0 : index
    %121 = vector.load %arg2[%c0_164, %c0_165] : memref<1152x128xbf16, #tpu.memory_space<vmem>>, vector<1152x128xbf16>
    %cst_166 = arith.constant dense<0.000000e+00> : vector<512x128xf32>
    %122 = tpu.matmul %120, %121, %cst_166 {dimension_numbers = #tpu.dot_dimension_numbers<[1], [0], [0], [1], [0, 0, 1, 1], [], []>} : vector<512x1152xbf16>, vector<1152x128xbf16>, vector<512x128xf32> -> vector<512x128xf32>
    %c2_167 = arith.constant 2 : index
    %c0_168 = arith.constant 0 : index
    %123 = vector.load %arg3[%c2_167, %c0_168] : memref<4x128xf32, #tpu.memory_space<vmem>>, vector<1x128xf32>
    %c3 = arith.constant 3 : index
    %c0_169 = arith.constant 0 : index
    %124 = vector.load %arg3[%c3, %c0_169] : memref<4x128xf32, #tpu.memory_space<vmem>>, vector<1x128xf32>
    %cst_170 = arith.constant dense<0.000000e+00> : vector<128xf32>
    %125 = vector.multi_reduction <add>, %122, %cst_170 [0] : vector<512x128xf32> to vector<128xf32>
    %126 = vector.shape_cast %125 : vector<128xf32> to vector<1x128xf32>
    %cst_171 = arith.constant 0.001953125 : f32
    %127 = vector.broadcast %cst_171 : f32 to vector<1x128xf32>
    %128 = arith.mulf %126, %127 : vector<1x128xf32>
    %129 = arith.mulf %122, %122 : vector<512x128xf32>
    %cst_172 = arith.constant dense<0.000000e+00> : vector<128xf32>
    %130 = vector.multi_reduction <add>, %129, %cst_172 [0] : vector<512x128xf32> to vector<128xf32>
    %131 = vector.shape_cast %130 : vector<128xf32> to vector<1x128xf32>
    %cst_173 = arith.constant 0.001953125 : f32
    %132 = vector.broadcast %cst_173 : f32 to vector<1x128xf32>
    %133 = arith.mulf %131, %132 : vector<1x128xf32>
    %134 = arith.mulf %128, %128 : vector<1x128xf32>
    %135 = arith.subf %133, %134 : vector<1x128xf32>
    %cst_174 = arith.constant 9.99999974E-6 : f32
    %136 = vector.broadcast %cst_174 : f32 to vector<1x128xf32>
    %137 = arith.addf %135, %136 : vector<1x128xf32>
    %138 = math.rsqrt %137 : vector<1x128xf32>
    %139 = vector.broadcast %128 : vector<1x128xf32> to vector<512x128xf32>
    %140 = arith.subf %122, %139 : vector<512x128xf32>
    %141 = arith.mulf %138, %123 : vector<1x128xf32>
    %142 = vector.broadcast %141 : vector<1x128xf32> to vector<512x128xf32>
    %143 = arith.mulf %140, %142 : vector<512x128xf32>
    %144 = vector.broadcast %124 : vector<1x128xf32> to vector<512x128xf32>
    %145 = arith.addf %143, %144 : vector<512x128xf32>
    %c0_175 = arith.constant 0 : index
    %c0_176 = arith.constant 0 : index
    %c0_177 = arith.constant 0 : index
    %c0_178 = arith.constant 0 : index
    %146 = vector.load %arg0[%c0_175, %c0_176, %c0_177, %c0_178] : memref<2x16x16x128xf32, #tpu.memory_space<vmem>>, vector<2x16x16x128xf32>
    %147 = vector.shape_cast %146 : vector<2x16x16x128xf32> to vector<512x128xf32>
    %148 = arith.addf %145, %147 : vector<512x128xf32>
    %cst_179 = arith.constant 0.000000e+00 : f32
    %149 = vector.broadcast %cst_179 : f32 to vector<512x128xf32>
    %150 = arith.maximumf %148, %149 : vector<512x128xf32>
    %151 = vector.shape_cast %150 : vector<512x128xf32> to vector<2x16x16x128xf32>
    %c0_180 = arith.constant 0 : index
    %c0_181 = arith.constant 0 : index
    %c0_182 = arith.constant 0 : index
    %c0_183 = arith.constant 0 : index
    %152 = vector.load %arg4[%c0_180, %c0_181, %c0_182, %c0_183] : memref<2x16x16x128xf32, #tpu.memory_space<vmem>>, vector<2x16x16x128xf32>
    tpu.vector_store %arg4[%c0_180, %c0_181, %c0_182, %c0_183], %151 {strides = array<i32>} : memref<2x16x16x128xf32, #tpu.memory_space<vmem>>, vector<2x16x16x128xf32>,
    return
  }
}

</mosaic_0001>

<bundles_post_ra>
// kernel: residual_block_forward.1
= control target key start
LH: loop header
LB: loop body
LE: loop exit
PB: predicated region body
PF: predicated region fallthrough
CT: control target
= control target key end

     0   :  { %v15217_v1 = vmov 0   ;;  %v9808_v3 = vmov 0.0   ;;  %s15208_s0 = inlined_call_operand.vmem [shape: f32[2,16,16,128], index: 0, kind: input, shape index: {}]   ;;  %s15209_s1 = inlined_call_operand.vmem [shape: bf16[1152,128], index: 1, kind: input, shape index: {}]   ;;  %s15210_s2 = inlined_call_operand.vmem [shape: bf16[1152,128], index: 2, kind: input, shape index: {}]   ;;  %s15211_s3 = inlined_call_operand.vmem [shape: f32[4,128], index: 3, kind: input, shape index: {}]   ;;  %s15212_s4 = inlined_call_operand.hbm [shape: f32[2,16,16,128], index: 4, kind: output, shape index: {}]  }
   0x1   :  { %v9624_v0 = vld [vmem:[%s15209_s1] sm:$0xff]   ;;  %2320 = vmatprep.subr.bf16.mxu0 %v15217_v1  ;;  %v9845_v2 = vld [vmem:[%s15209_s1 + $0x8] sm:$0xff]   ;;  %19 = vst [vmem:[#allocation2] sm:$0xff] %v9808_v3  ;;  %20 = vst [vmem:[#allocation2 + $0x8] sm:$0xff] %v9808_v3 }
   0x2   :  { %2321 = vmatpush1.bf16.msra.mxu0 %v9624_v0  ;;  %21 = vst [vmem:[#allocation2 + $0x10] sm:$0x3] %v9808_v3  ;;  %22 = vst [vmem:[#allocation2 + $0x1b0] sm:$0xff] %v9808_v3  ;;  %v9626_v4 = vld [vmem:[%s15209_s1 + $0x10] sm:$0xff]   ;;  %v9627_v5 = vld [vmem:[%s15209_s1 + $0x18] sm:$0xff]  }
   0x3   :  { %23 = vst [vmem:[#allocation2 + $0x1b8] sm:$0xff] %v9808_v3  ;;  %24 = vst [vmem:[#allocation2 + $0x1c0] sm:$0x3] %v9808_v3  ;;  %2322 = vmatprep.subr.bf16.mxu0 %v15217_v1  ;;  %v9628_v6 = vld [vmem:[%s15209_s1 + $0x20] sm:$0xff]   ;;  %v9629_v9 = vld [vmem:[%s15209_s1 + $0x28] sm:$0xff]  }
   0x4   :  { %26 = vst [vmem:[#allocation2 + $0x198] sm:$0xff] %v9808_v3  ;;  %27 = vst [vmem:[#allocation2 + $0x1a0] sm:$0xff] %v9808_v3  ;;  %v10019_v11 = vld [vmem:[%s15208_s0] sm:$0xff]  ;;  %v10024_v12 = vld [vmem:[%s15208_s0 + $0x8] sm:$0xff] }
   0x5   :  { %28 = vst [vmem:[#allocation2 + $0x1a8] sm:$0x3] %v9808_v3  ;;  %29 = vst [vmem:[#allocation2 + $0x348] sm:$0xff] %v9808_v3  ;;  %v10030_v13 = vld [vmem:[%s15208_s0 + $0x10] sm:$0xff]  ;;  %v10035_v14 = vld [vmem:[%s15208_s0 + $0x18] sm:$0xff]  ;;  %v496_v0 = vpack.c.bf16 %v10024_v12, %v10019_v11 }
   0x6   :  { %30 = vst [vmem:[#allocation2 + $0x350] sm:$0xff] %v9808_v3  ;;  %31 = vst [vmem:[#allocation2 + $0x358] sm:$0x3] %v9808_v3  ;;  %2323 = vmatpush1.bf16.msra.mxu0 %v9845_v2  ;;  %v10044_v15 = vld [vmem:[%s15208_s0 + $0x20] sm:$0xff]  ;;  %v10049_v16 = vld [vmem:[%s15208_s0 + $0x28] sm:$0xff] }
   0x7   :  { %33 = vst [vmem:[#allocation2 + $0x18] sm:$0x1] %v9808_v3  ;;  %34 = vst [vmem:[#allocation2 + $0x30] sm:$0x1] %v9808_v3  ;;  %2324 = vmatprep.subr.bf16.mxu0 %v15217_v1  ;;  %v10054_v17 = vld [vmem:[%s15208_s0 + $0x30] sm:$0xff]  ;;  %v10061_v18 = vld [vmem:[%s15208_s0 + $0x38] sm:$0xff] }
   0x8   :  { %35 = vst [vmem:[#allocation2 + $0x48] sm:$0x1] %v9808_v3  ;;  %36 = vst [vmem:[#allocation2 + $0x60] sm:$0x1] %v9808_v3  ;;  %v431_v7 = vld [vmem:[#allocation2 + $0x1] sm:$0xff]  ;;  %v9630_v19 = vld [vmem:[%s15209_s1 + $0x30] sm:$0xff]   ;;  %v499_v20 = vpack.c.bf16 %v10061_v18, %v10054_v17 }
   0x9   :  { %37 = vst [vmem:[#allocation2 + $0x78] sm:$0x1] %v9808_v3  ;;  %38 = vst [vmem:[#allocation2 + $0x90] sm:$0x1] %v9808_v3  ;;  %v432_v8 = vld [vmem:[#allocation2 + $0x9] sm:$0xff]  ;;  %v10073_v21 = vld [vmem:[%s15208_s0 + $0x40] sm:$0xff] }
   0xa   :  { %39 = vst [vmem:[#allocation2 + $0xa8] sm:$0x1] %v9808_v3  ;;  %40 = vst [vmem:[#allocation2 + $0xc0] sm:$0x1] %v9808_v3  ;;  %2325 = vmatpush1.bf16.msra.mxu0 %v9626_v4  ;;  %v495_v10 = vpack.c.bf16 %v432_v8, %v431_v7  ;;  %v10078_v22 = vld [vmem:[%s15208_s0 + $0x48] sm:$0xff]  ;;  %v10088_v24 = vld [vmem:[%s15208_s0 + $0x50] sm:$0xff] }
   0xb   :  { %41 = vst [vmem:[#allocation2 + $0xd8] sm:$0x1] %v9808_v3  ;;  %42 = vst [vmem:[#allocation2 + $0xf0] sm:$0x1] %v9808_v3  ;;  %2326 = vmatprep.subr.bf16.mxu0 %v15217_v1  ;;  %v500_v23 = vpack.c.bf16 %v10078_v22, %v10073_v21  ;;  %v10093_v25 = vld [vmem:[%s15208_s0 + $0x58] sm:$0xff]  ;;  %v10102_v27 = vld [vmem:[%s15208_s0 + $0x60] sm:$0xff] }
   0xc   :  { %43 = vst [vmem:[#allocation2 + $0x108] sm:$0x1] %v9808_v3  ;;  %44 = vst [vmem:[#allocation2 + $0x120] sm:$0x1] %v9808_v3  ;;  %2352 = vmatprep.mubr.bf16.mxu0 %v495_v10  ;;  %v501_v26 = vpack.c.bf16 %v10093_v25, %v10088_v24  ;;  %v10107_v28 = vld [vmem:[%s15208_s0 + $0x68] sm:$0xff]  ;;  %v10113_v29 = vld [vmem:[%s15208_s0 + $0x70] sm:$0xff]  ;;  %v497_v10 = vpack.c.bf16 %v10035_v14, %v10030_v13 }
   0xd   :  { %45 = vst [vmem:[#allocation2 + $0x138] sm:$0x1] %v9808_v3  ;;  %46 = vst [vmem:[#allocation2 + $0x150] sm:$0x1] %v9808_v3  ;;  %v9631_v30 = vld [vmem:[%s15209_s1 + $0x38] sm:$0xff]   ;;  %v502_v31 = vpack.c.bf16 %v10107_v28, %v10102_v27  ;;  %v10134_v34 = vld [vmem:[%s15208_s0 + $0x80] sm:$0xff] }
   0xe   :  { %47 = vst [vmem:[#allocation2 + $0x168] sm:$0x1] %v9808_v3  ;;  %48 = vst [vmem:[#allocation2 + $0x180] sm:$0x1] %v9808_v3  ;;  %2327 = vmatpush1.bf16.msra.mxu0 %v9627_v5  ;;  %v10126_v32 = vld [vmem:[%s15208_s0 + $0x78] sm:$0xff]  ;;  %v9632_v35 = vld [vmem:[%s15209_s1 + $0x40] sm:$0xff]  }
   0xf   :  { %49 = vst [vmem:[#allocation2 + $0x1c8] sm:$0x1] %v9808_v3  ;;  %50 = vst [vmem:[#allocation2 + $0x1e0] sm:$0x1] %v9808_v3  ;;  %2328 = vmatprep.subr.bf16.mxu0 %v15217_v1  ;;  %v503_v33 = vpack.c.bf16 %v10126_v32, %v10113_v29  ;;  %v10142_v36 = vld [vmem:[%s15208_s0 + $0x88] sm:$0xff]  ;;  %v10152_v38 = vld [vmem:[%s15208_s0 + $0x90] sm:$0xff] }
  0x10   :  { %51 = vst [vmem:[#allocation2 + $0x1f8] sm:$0x1] %v9808_v3  ;;  %52 = vst [vmem:[#allocation2 + $0x210] sm:$0x1] %v9808_v3  ;;  %v504_v37 = vpack.c.bf16 %v10142_v36, %v10134_v34  ;;  %v10157_v39 = vld [vmem:[%s15208_s0 + $0x98] sm:$0xff]  ;;  %v9633_v41 = vld [vmem:[%s15209_s1 + $0x48] sm:$0xff]  }
  0x11   :  { %53 = vst [vmem:[#allocation2 + $0x228] sm:$0x1] %v9808_v3  ;;  %54 = vst [vmem:[#allocation2 + $0x240] sm:$0x1] %v9808_v3  ;;  %v505_v40 = vpack.c.bf16 %v10157_v39, %v10152_v38  ;;  %v10169_v42 = vld [vmem:[%s15208_s0 + $0xa0] sm:$0xff]  ;;  %v10174_v43 = vld [vmem:[%s15208_s0 + $0xa8] sm:$0xff] }
  0x12   :  { %55 = vst [vmem:[#allocation2 + $0x258] sm:$0x1] %v9808_v3  ;;  %56 = vst [vmem:[#allocation2 + $0x270] sm:$0x1] %v9808_v3  ;;  %2329 = vmatpush1.bf16.msra.mxu0 %v9628_v6  ;;  %v506_v44 = vpack.c.bf16 %v10174_v43, %v10169_v42  ;;  %v10184_v45 = vld [vmem:[%s15208_s0 + $0xb0] sm:$0xff]  ;;  %v10189_v46 = vld [vmem:[%s15208_s0 + $0xb8] sm:$0xff] }
  0x13   :  { %57 = vst [vmem:[#allocation2 + $0x288] sm:$0x1] %v9808_v3  ;;  %58 = vst [vmem:[#allocation2 + $0x2a0] sm:$0x1] %v9808_v3  ;;  %2330 = vmatprep.subr.bf16.mxu0 %v15217_v1  ;;  %v507_v47 = vpack.c.bf16 %v10189_v46, %v10184_v45  ;;  %v10198_v48 = vld [vmem:[%s15208_s0 + $0xc0] sm:$0xff]  ;;  %v10203_v49 = vld [vmem:[%s15208_s0 + $0xc8] sm:$0xff] }
  0x14   :  { %59 = vst [vmem:[#allocation2 + $0x2b8] sm:$0x1] %v9808_v3  ;;  %60 = vst [vmem:[#allocation2 + $0x2d0] sm:$0x1] %v9808_v3  ;;  %v9634_v50 = vld [vmem:[%s15209_s1 + $0x50] sm:$0xff]   ;;  %v508_v51 = vpack.c.bf16 %v10203_v49, %v10198_v48  ;;  %v10220_v53 = vld [vmem:[%s15208_s0 + $0xd8] sm:$0xff] }
  0x15   :  { %61 = vst [vmem:[#allocation2 + $0x2e8] sm:$0x1] %v9808_v3  ;;  %62 = vst [vmem:[#allocation2 + $0x300] sm:$0x1] %v9808_v3  ;;  %v10215_v52 = vld [vmem:[%s15208_s0 + $0xd0] sm:$0xff]  ;;  %v9635_v55 = vld [vmem:[%s15209_s1 + $0x58] sm:$0xff]  }
  0x16   :  { %63 = vst [vmem:[#allocation2 + $0x318] sm:$0x1] %v9808_v3  ;;  %64 = vst [vmem:[#allocation2 + $0x330] sm:$0x1] %v9808_v3  ;;  %2331 = vmatpush1.bf16.msra.mxu0 %v9629_v9  ;;  %v509_v54 = vpack.c.bf16 %v10220_v53, %v10215_v52  ;;  %v9636_v56 = vld [vmem:[%s15209_s1 + $0x60] sm:$0xff]   ;;  %v10243_v58 = vld [vmem:[%s15208_s0 + $0xe8] sm:$0xff] }
  0x17   :  { %65 = vst [vmem:[#allocation2 + $0x29] sm:$0x1] %v9808_v3  ;;  %66 = vst [vmem:[#allocation2 + $0x41] sm:$0x1] %v9808_v3  ;;  %2332 = vmatprep.subr.bf16.mxu0 %v15217_v1  ;;  %v10237_v57 = vld [vmem:[%s15208_s0 + $0xe0] sm:$0xff]  ;;  %v9637_v59 = vld [vmem:[%s15209_s1 + $0x68] sm:$0xff]  }
  0x18   :  { %67 = vst [vmem:[#allocation2 + $0x59] sm:$0x1] %v9808_v3  ;;  %68 = vst [vmem:[#allocation2 + $0x71] sm:$0x1] %v9808_v3  ;;  %v510_v60 = vpack.c.bf16 %v10243_v58, %v10237_v57  ;;  %v9638_v61 = vld [vmem:[%s15209_s1 + $0x70] sm:$0xff]   ;;  %v9639_v62 = vld [vmem:[%s15209_s1 + $0x78] sm:$0xff]  }
  0x19   :  { %69 = vst [vmem:[#allocation2 + $0x89] sm:$0x1] %v9808_v3  ;;  %70 = vst [vmem:[#allocation2 + $0xa1] sm:$0x1] %v9808_v3  ;;  %v9640_v63 = vld [vmem:[%s15209_s1 + $0x80] sm:$0xff]   ;;  %v9641_v5 = vld [vmem:[%s15209_s1 + $0x88] sm:$0xff]  }
  0x1a   :  { %71 = vst [vmem:[#allocation2 + $0xb9] sm:$0x1] %v9808_v3  ;;  %72 = vst [vmem:[#allocation2 + $0xd1] sm:$0x1] %v9808_v3  ;;  %2333 = vmatpush1.bf16.msra.mxu0 %v9630_v19  ;;  %v10269_v2 = vld [vmem:[%s15208_s0 + $0x100] sm:$0xff]  ;;  %v9809_v6 = vmov 0.0|0.0  }
  0x1b   :  { %73 = vst [vmem:[#allocation2 + $0xe9] sm:$0x1] %v9808_v3  ;;  %74 = vst [vmem:[#allocation2 + $0x101] sm:$0x1] %v9808_v3  ;;  %2334 = vmatprep.subr.bf16.mxu0 %v15217_v1  ;;  %v10302_v19 = vld [vmem:[%s15208_s0 + $0x118] sm:$0xff] }
  0x1c   :  { %75 = vst [vmem:[#allocation2 + $0x119] sm:$0x1] %v9808_v3  ;;  %76 = vst [vmem:[#allocation2 + $0x131] sm:$0x1] %v9808_v3 }
  0x1d   :  { %77 = vst [vmem:[#allocation2 + $0x149] sm:$0x1] %v9808_v3  ;;  %78 = vst [vmem:[#allocation2 + $0x161] sm:$0x1] %v9808_v3 }
  0x1e   :  { %79 = vst [vmem:[#allocation2 + $0x179] sm:$0x1] %v9808_v3  ;;  %80 = vst [vmem:[#allocation2 + $0x191] sm:$0x1] %v9808_v3  ;;  %2335 = vmatpush1.bf16.msra.mxu0 %v9631_v30  ;;  %v9643_v30 = vld [vmem:[%s15209_s1 + $0x98] sm:$0xff]  }
  0x1f   :  { %81 = vst [vmem:[#allocation2 + $0x1d9] sm:$0x1] %v9808_v3  ;;  %82 = vst [vmem:[#allocation2 + $0x1f1] sm:$0x1] %v9808_v3  ;;  %2336 = vmatprep.subr.bf16.mxu0 %v15217_v1 }
  0x20   :  { %83 = vst [vmem:[#allocation2 + $0x209] sm:$0x1] %v9808_v3  ;;  %84 = vst [vmem:[#allocation2 + $0x221] sm:$0x1] %v9808_v3 }
  0x21   :  { %85 = vst [vmem:[#allocation2 + $0x239] sm:$0x1] %v9808_v3  ;;  %86 = vst [vmem:[#allocation2 + $0x251] sm:$0x1] %v9808_v3 }
  0x22   :  { %87 = vst [vmem:[#allocation2 + $0x269] sm:$0x1] %v9808_v3  ;;  %88 = vst [vmem:[#allocation2 + $0x281] sm:$0x1] %v9808_v3  ;;  %2337 = vmatpush1.bf16.msra.mxu0 %v9632_v35 }
  0x23   :  { %89 = vst [vmem:[#allocation2 + $0x299] sm:$0x1] %v9808_v3  ;;  %90 = vst [vmem:[#allocation2 + $0x2b1] sm:$0x1] %v9808_v3  ;;  %2338 = vmatprep.subr.bf16.mxu0 %v15217_v1 }
  0x24   :  { %91 = vst [vmem:[#allocation2 + $0x2c9] sm:$0x1] %v9808_v3  ;;  %92 = vst [vmem:[#allocation2 + $0x2e1] sm:$0x1] %v9808_v3 }
  0x25   :  { %93 = vst [vmem:[#allocation2 + $0x2f9] sm:$0x1] %v9808_v3  ;;  %94 = vst [vmem:[#allocation2 + $0x311] sm:$0x1] %v9808_v3 }
  0x26   :  { %95 = vst [vmem:[#allocation2 + $0x329] sm:$0x1] %v9808_v3  ;;  %96 = vst [vmem:[#allocation2 + $0x341] sm:$0x1] %v9808_v3  ;;  %2339 = vmatpush1.bf16.msra.mxu0 %v9633_v41 }
  0x27   :  { %225 = vst [vmem:[#allocation3] sm:$0xff] %v9808_v3  ;;  %226 = vst [vmem:[#allocation3 + $0x8] sm:$0xff] %v9808_v3  ;;  %2340 = vmatprep.subr.bf16.mxu0 %v15217_v1 }
  0x28   :  { %227 = vst [vmem:[#allocation3 + $0x10] sm:$0x3] %v9808_v3  ;;  %228 = vst [vmem:[#allocation3 + $0x1b0] sm:$0xff] %v9808_v3 }
  0x29   :  { %229 = vst [vmem:[#allocation3 + $0x1b8] sm:$0xff] %v9808_v3  ;;  %230 = vst [vmem:[#allocation3 + $0x1c0] sm:$0x3] %v9808_v3 }
  0x2a   :  { %232 = vst [vmem:[#allocation3 + $0x198] sm:$0xff] %v9808_v3  ;;  %233 = vst [vmem:[#allocation3 + $0x1a0] sm:$0xff] %v9808_v3  ;;  %2341 = vmatpush1.bf16.msra.mxu0 %v9634_v50  ;;  %v498_v50 = vpack.c.bf16 %v10049_v16, %v10044_v15 }
  0x2b   :  { %234 = vst [vmem:[#allocation3 + $0x1a8] sm:$0x3] %v9808_v3  ;;  %235 = vst [vmem:[#allocation3 + $0x348] sm:$0xff] %v9808_v3  ;;  %2342 = vmatprep.subr.bf16.mxu0 %v15217_v1 }
  0x2c   :  { %236 = vst [vmem:[#allocation3 + $0x350] sm:$0xff] %v9808_v3  ;;  %237 = vst [vmem:[#allocation3 + $0x358] sm:$0x3] %v9808_v3 }
  0x2d   :  { %239 = vst [vmem:[#allocation3 + $0x18] sm:$0x1] %v9808_v3  ;;  %240 = vst [vmem:[#allocation3 + $0x30] sm:$0x1] %v9808_v3 }
  0x2e   :  { %241 = vst [vmem:[#allocation3 + $0x48] sm:$0x1] %v9808_v3  ;;  %242 = vst [vmem:[#allocation3 + $0x60] sm:$0x1] %v9808_v3  ;;  %2343 = vmatpush1.bf16.msra.mxu0 %v9635_v55  ;;  %v9644_v55 = vld [vmem:[%s15209_s1 + $0xa0] sm:$0xff]  }
  0x2f   :  { %243 = vst [vmem:[#allocation3 + $0x78] sm:$0x1] %v9808_v3  ;;  %244 = vst [vmem:[#allocation3 + $0x90] sm:$0x1] %v9808_v3  ;;  %2344 = vmatprep.subr.bf16.mxu0 %v15217_v1 }
  0x30   :  { %245 = vst [vmem:[#allocation3 + $0xa8] sm:$0x1] %v9808_v3  ;;  %246 = vst [vmem:[#allocation3 + $0xc0] sm:$0x1] %v9808_v3 }
  0x31   :  { %247 = vst [vmem:[#allocation3 + $0xd8] sm:$0x1] %v9808_v3  ;;  %248 = vst [vmem:[#allocation3 + $0xf0] sm:$0x1] %v9808_v3 }
  0x32   :  { %249 = vst [vmem:[#allocation3 + $0x108] sm:$0x1] %v9808_v3  ;;  %250 = vst [vmem:[#allocation3 + $0x120] sm:$0x1] %v9808_v3  ;;  %2345 = vmatpush1.bf16.msra.mxu0 %v9636_v56  ;;  %v10323_v56 = vld [vmem:[%s15208_s0 + $0x120] sm:$0xff] }
  0x33   :  { %251 = vst [vmem:[#allocation3 + $0x138] sm:$0x1] %v9808_v3  ;;  %252 = vst [vmem:[#allocation3 + $0x150] sm:$0x1] %v9808_v3  ;;  %2346 = vmatprep.subr.bf16.mxu0 %v15217_v1 }
  0x34   :  { %253 = vst [vmem:[#allocation3 + $0x168] sm:$0x1] %v9808_v3  ;;  %254 = vst [vmem:[#allocation3 + $0x180] sm:$0x1] %v9808_v3 }
  0x35   :  { %255 = vst [vmem:[#allocation3 + $0x1c8] sm:$0x1] %v9808_v3  ;;  %256 = vst [vmem:[#allocation3 + $0x1e0] sm:$0x1] %v9808_v3 }
  0x36   :  { %257 = vst [vmem:[#allocation3 + $0x1f8] sm:$0x1] %v9808_v3  ;;  %258 = vst [vmem:[#allocation3 + $0x210] sm:$0x1] %v9808_v3  ;;  %2347 = vmatpush1.bf16.msra.mxu0 %v9637_v59  ;;  %v10328_v59 = vld [vmem:[%s15208_s0 + $0x128] sm:$0xff] }
  0x37   :  { %259 = vst [vmem:[#allocation3 + $0x228] sm:$0x1] %v9808_v3  ;;  %260 = vst [vmem:[#allocation3 + $0x240] sm:$0x1] %v9808_v3  ;;  %2348 = vmatprep.subr.bf16.mxu0 %v15217_v1 }
  0x38   :  { %261 = vst [vmem:[#allocation3 + $0x258] sm:$0x1] %v9808_v3  ;;  %262 = vst [vmem:[#allocation3 + $0x270] sm:$0x1] %v9808_v3 }
  0x39   :  { %263 = vst [vmem:[#allocation3 + $0x288] sm:$0x1] %v9808_v3  ;;  %264 = vst [vmem:[#allocation3 + $0x2a0] sm:$0x1] %v9808_v3 }
  0x3a   :  { %265 = vst [vmem:[#allocation3 + $0x2b8] sm:$0x1] %v9808_v3  ;;  %266 = vst [vmem:[#allocation3 + $0x2d0] sm:$0x1] %v9808_v3  ;;  %2349 = vmatpush1.bf16.msra.mxu0 %v9638_v61  ;;  %v9645_v61 = vld [vmem:[%s15209_s1 + $0xa8] sm:$0xff]  }
  0x3b   :  { %267 = vst [vmem:[#allocation3 + $0x2e8] sm:$0x1] %v9808_v3  ;;  %268 = vst [vmem:[#allocation3 + $0x300] sm:$0x1] %v9808_v3  ;;  %2350 = vmatprep.subr.bf16.mxu0 %v15217_v1 }
  0x3c   :  { %269 = vst [vmem:[#allocation3 + $0x318] sm:$0x1] %v9808_v3  ;;  %270 = vst [vmem:[#allocation3 + $0x330] sm:$0x1] %v9808_v3 }
  0x3d   :  { %271 = vst [vmem:[#allocation3 + $0x29] sm:$0x1] %v9808_v3  ;;  %272 = vst [vmem:[#allocation3 + $0x41] sm:$0x1] %v9808_v3 }
  0x3e   :  { %273 = vst [vmem:[#allocation3 + $0x59] sm:$0x1] %v9808_v3  ;;  %274 = vst [vmem:[#allocation3 + $0x71] sm:$0x1] %v9808_v3  ;;  %2351 = vmatpush1.bf16.msra.mxu0 %v9639_v62  ;;  %v514_v62 = vpack.c.bf16 %v10328_v59, %v10323_v56 }
  0x3f   :  { %275 = vst [vmem:[#allocation3 + $0x89] sm:$0x1] %v9808_v3  ;;  %276 = vst [vmem:[#allocation3 + $0xa1] sm:$0x1] %v9808_v3  ;;  %2609 = vmatprep.subr.bf16.mxu0 %v15217_v1 }
  0x40   :  { %277 = vst [vmem:[#allocation3 + $0xb9] sm:$0x1] %v9808_v3  ;;  %278 = vst [vmem:[#allocation3 + $0xd1] sm:$0x1] %v9808_v3 }
  0x41   :  { %279 = vst [vmem:[#allocation3 + $0xe9] sm:$0x1] %v9808_v3  ;;  %280 = vst [vmem:[#allocation3 + $0x101] sm:$0x1] %v9808_v3  ;;  %2353 = vmatmul.mubr.bf16.vlgmr.msra.gmra.mrb[0].mxu0 %v9809_v6 }
  0x42   :  { %281 = vst [vmem:[#allocation3 + $0x119] sm:$0x1] %v9808_v3  ;;  %282 = vst [vmem:[#allocation3 + $0x131] sm:$0x1] %v9808_v3  ;;  %2610 = vmatpush1.bf16.msra.mxu0 %v9640_v63  ;;  %2360 = vmatprep.mubr.bf16.mxu0 %v496_v0  ;;  %v9646_v0 = vld [vmem:[%s15209_s1 + $0xb0] sm:$0xff]  }
  0x43   :  { %283 = vst [vmem:[#allocation3 + $0x149] sm:$0x1] %v9808_v3  ;;  %284 = vst [vmem:[#allocation3 + $0x161] sm:$0x1] %v9808_v3  ;;  %2611 = vmatprep.subr.bf16.mxu0 %v15217_v1 }
  0x44   :  { %285 = vst [vmem:[#allocation3 + $0x179] sm:$0x1] %v9808_v3  ;;  %286 = vst [vmem:[#allocation3 + $0x191] sm:$0x1] %v9808_v3 }
  0x45   :  { %287 = vst [vmem:[#allocation3 + $0x1d9] sm:$0x1] %v9808_v3  ;;  %288 = vst [vmem:[#allocation3 + $0x1f1] sm:$0x1] %v9808_v3 }
  0x46   :  { %289 = vst [vmem:[#allocation3 + $0x209] sm:$0x1] %v9808_v3  ;;  %290 = vst [vmem:[#allocation3 + $0x221] sm:$0x1] %v9808_v3  ;;  %2612 = vmatpush1.bf16.msra.mxu0 %v9641_v5  ;;  %v10354_v5 = vld [vmem:[%s15208_s0 + $0x138] sm:$0xff] }
  0x47   :  { %291 = vst [vmem:[#allocation3 + $0x239] sm:$0x1] %v9808_v3  ;;  %292 = vst [vmem:[#allocation3 + $0x251] sm:$0x1] %v9808_v3  ;;  %2613 = vmatprep.subr.bf16.mxu0 %v15217_v1 }
  0x48   :  { %293 = vst [vmem:[#allocation3 + $0x269] sm:$0x1] %v9808_v3  ;;  %294 = vst [vmem:[#allocation3 + $0x281] sm:$0x1] %v9808_v3 }
  0x49   :  { %295 = vst [vmem:[#allocation3 + $0x299] sm:$0x1] %v9808_v3  ;;  %296 = vst [vmem:[#allocation3 + $0x2b1] sm:$0x1] %v9808_v3 }
  0x4a   :  { %297 = vst [vmem:[#allocation3 + $0x2c9] sm:$0x1] %v9808_v3  ;;  %298 = vst [vmem:[#allocation3 + $0x2e1] sm:$0x1] %v9808_v3 }
  0x4b   :  { %299 = vst [vmem:[#allocation3 + $0x2f9] sm:$0x1] %v9808_v3  ;;  %300 = vst [vmem:[#allocation3 + $0x311] sm:$0x1] %v9808_v3 }
  0x4c   :  { %301 = vst [vmem:[#allocation3 + $0x329] sm:$0x1] %v9808_v3  ;;  %302 = vst [vmem:[#allocation3 + $0x341] sm:$0x1] %v9808_v3  ;;  %v10274_v3 = vld [vmem:[%s15208_s0 + $0x108] sm:$0xff] }
  0x4d   :  { %161 = vst [vmem:[#allocation2 + $0x19] sm:$0xff] %v10019_v11  ;;  %162 = vst [vmem:[#allocation2 + $0x21] sm:$0xff] %v10024_v12  ;;  %v512_v8 = vpack.c.bf16 %v10274_v3, %v10269_v2  ;;  %v9642_v11 = vld [vmem:[%s15209_s1 + $0x90] sm:$0xff]  }
  0x4e   :  { %163 = vst [vmem:[#allocation2 + $0x31] sm:$0xff] %v10030_v13  ;;  %164 = vst [vmem:[#allocation2 + $0x39] sm:$0xff] %v10035_v14  ;;  %v10296_v12 = vld [vmem:[%s15208_s0 + $0x110] sm:$0xff]  ;;  %2614 = vmatpush1.bf16.msra.mxu0 %v9642_v11  ;;  %v9647_v11 = vld [vmem:[%s15209_s1 + $0xb8] sm:$0xff]  }
  0x4f   :  { %165 = vst [vmem:[#allocation2 + $0x49] sm:$0xff] %v10044_v15  ;;  %166 = vst [vmem:[#allocation2 + $0x51] sm:$0xff] %v10049_v16  ;;  %v513_v35 = vpack.c.bf16 %v10302_v19, %v10296_v12  ;;  %2615 = vmatprep.subr.bf16.mxu0 %v15217_v1 }
  0x50   :  { %167 = vst [vmem:[#allocation2 + $0x61] sm:$0xff] %v10054_v17  ;;  %168 = vst [vmem:[#allocation2 + $0x69] sm:$0xff] %v10061_v18  ;;  %v10381_v17 = vld [vmem:[%s15208_s0 + $0x148] sm:$0xff] }
  0x51   :  { %169 = vst [vmem:[#allocation2 + $0x79] sm:$0xff] %v10073_v21  ;;  %170 = vst [vmem:[#allocation2 + $0x81] sm:$0xff] %v10078_v22  ;;  %v10410_v21 = vld [vmem:[%s15208_s0 + $0x158] sm:$0xff] }
  0x52   :  { %171 = vst [vmem:[#allocation2 + $0x91] sm:$0xff] %v10088_v24  ;;  %172 = vst [vmem:[#allocation2 + $0x99] sm:$0xff] %v10093_v25  ;;  %2616 = vmatpush1.bf16.msra.mxu0 %v9643_v30  ;;  %v9648_v30 = vld [vmem:[%s15209_s1 + $0xc0] sm:$0xff]  }
  0x53   :  { %173 = vst [vmem:[#allocation2 + $0xa9] sm:$0xff] %v10102_v27  ;;  %174 = vst [vmem:[#allocation2 + $0xb1] sm:$0xff] %v10107_v28  ;;  %2617 = vmatprep.subr.bf16.mxu0 %v15217_v1 }
  0x54   :  { %175 = vst [vmem:[#allocation2 + $0xc1] sm:$0xff] %v10113_v29  ;;  %176 = vst [vmem:[#allocation2 + $0xc9] sm:$0xff] %v10126_v32  ;;  %v305_v4 = vld [vmem:[#allocation2 + $0x18] sm:$0xff]  ;;  %v306_v7 = vld [vmem:[#allocation2 + $0x20] sm:$0xff] }
  0x55   :  { %177 = vst [vmem:[#allocation2 + $0xd9] sm:$0xff] %v10134_v34  ;;  %178 = vst [vmem:[#allocation2 + $0xe1] sm:$0xff] %v10142_v36  ;;  %v10286_v9 = vpack.c.bf16 %v306_v7, %v305_v4  ;;  %v307_v13 = vld [vmem:[#allocation2 + $0x30] sm:$0xff]  ;;  %v308_v14 = vld [vmem:[#allocation2 + $0x38] sm:$0xff] }
  0x56   :  { %179 = vst [vmem:[#allocation2 + $0xf1] sm:$0xff] %v10152_v38  ;;  %180 = vst [vmem:[#allocation2 + $0xf9] sm:$0xff] %v10157_v39  ;;  %v10313_v41 = vpack.c.bf16 %v308_v14, %v307_v13  ;;  %v309_v15 = vld [vmem:[#allocation2 + $0x48] sm:$0xff]  ;;  %v310_v16 = vld [vmem:[#allocation2 + $0x50] sm:$0xff]  ;;  %2618 = vmatpush1.bf16.msra.mxu0 %v9644_v55 }
  0x57   :  { %181 = vst [vmem:[#allocation2 + $0x109] sm:$0xff] %v10169_v42  ;;  %182 = vst [vmem:[#allocation2 + $0x111] sm:$0xff] %v10174_v43  ;;  %2361 = vmatmul.mubr.bf16.gmra.mrb[4].mxu0 %v10286_v9  ;;  %2619 = vmatprep.subr.bf16.mxu0 %v15217_v1  ;;  %v10340_v63 = vpack.c.bf16 %v310_v16, %v309_v15  ;;  %v10348_v4 = vld [vmem:[%s15208_s0 + $0x130] sm:$0xff]  ;;  %v311_v7 = vld [vmem:[#allocation2 + $0x60] sm:$0xff] }
  0x58   :  { %183 = vst [vmem:[#allocation2 + $0x121] sm:$0xff] %v10184_v45  ;;  %184 = vst [vmem:[#allocation2 + $0x129] sm:$0xff] %v10189_v46  ;;  %2368 = vmatprep.mubr.bf16.mxu0 %v497_v10  ;;  %v312_v10 = vld [vmem:[#allocation2 + $0x68] sm:$0xff]  ;;  %v515_v13 = vpack.c.bf16 %v10354_v5, %v10348_v4  ;;  %v313_v18 = vld [vmem:[#allocation2 + $0x78] sm:$0xff] }
  0x59   :  { %185 = vst [vmem:[#allocation2 + $0x139] sm:$0xff] %v10198_v48  ;;  %186 = vst [vmem:[#allocation2 + $0x141] sm:$0xff] %v10203_v49  ;;  %v10368_v14 = vpack.c.bf16 %v312_v10, %v311_v7  ;;  %v9649_v55 = vld [vmem:[%s15209_s1 + $0xc8] sm:$0xff]   ;;  %v315_v22 = vld [vmem:[#allocation2 + $0x90] sm:$0xff] }
  0x5a   :  { %187 = vst [vmem:[#allocation2 + $0x151] sm:$0xff] %v10215_v52  ;;  %188 = vst [vmem:[#allocation2 + $0x159] sm:$0xff] %v10220_v53  ;;  %2620 = vmatpush1.bf16.msra.mxu0 %v9645_v61  ;;  %v9650_v61 = vld [vmem:[%s15209_s1 + $0xd0] sm:$0xff]   ;;  %v317_v24 = vld [vmem:[#allocation2 + $0xa8] sm:$0xff] }
  0x5b   :  { %189 = vst [vmem:[#allocation2 + $0x169] sm:$0xff] %v10237_v57  ;;  %190 = vst [vmem:[#allocation2 + $0x171] sm:$0xff] %v10243_v58  ;;  %2621 = vmatprep.subr.bf16.mxu0 %v15217_v1  ;;  %v318_v25 = vld [vmem:[#allocation2 + $0xb0] sm:$0xff]  ;;  %v320_v27 = vld [vmem:[#allocation2 + $0xc8] sm:$0xff] }
  0x5c   :  { %193 = vst [vmem:[#allocation2 + $0x1c9] sm:$0xff] %v10269_v2  ;;  %194 = vst [vmem:[#allocation2 + $0x1d1] sm:$0xff] %v10274_v3  ;;  %v9652_v29 = vld [vmem:[%s15209_s1 + $0xe0] sm:$0xff]  }
  0x5d   :  { %195 = vst [vmem:[#allocation2 + $0x1e1] sm:$0xff] %v10296_v12  ;;  %196 = vst [vmem:[#allocation2 + $0x1e9] sm:$0xff] %v10302_v19  ;;  %v323_v32 = vld [vmem:[#allocation2 + $0xf0] sm:$0xff]  ;;  %v324_v34 = vld [vmem:[#allocation2 + $0xf8] sm:$0xff] }
  0x5e   :  { %197 = vst [vmem:[#allocation2 + $0x1f9] sm:$0xff] %v10323_v56  ;;  %198 = vst [vmem:[#allocation2 + $0x201] sm:$0xff] %v10328_v59  ;;  %2622 = vmatpush1.bf16.msra.mxu0 %v9646_v0  ;;  %v10404_v0 = vld [vmem:[%s15208_s0 + $0x150] sm:$0xff] }
  0x5f   :  { %2369 = vmatmul.mubr.bf16.gmra.mrb[8].mxu0 %v10313_v41  ;;  %199 = vst [vmem:[#allocation2 + $0x211] sm:$0xff] %v10348_v4  ;;  %200 = vst [vmem:[#allocation2 + $0x219] sm:$0xff] %v10354_v5  ;;  %2623 = vmatprep.subr.bf16.mxu0 %v15217_v1  ;;  %v517_v7 = vpack.c.bf16 %v10410_v21, %v10404_v0 }
  0x60   :  { %2376 = vmatprep.mubr.bf16.mxu0 %v498_v50  ;;  %v10376_v50 = vld [vmem:[%s15208_s0 + $0x140] sm:$0xff]  ;;  %202 = vst [vmem:[#allocation2 + $0x231] sm:$0xff] %v10381_v17  ;;  %203 = vst [vmem:[#allocation2 + $0x241] sm:$0xff] %v10404_v0 }
  0x61   :  { %201 = vst [vmem:[#allocation2 + $0x229] sm:$0xff] %v10376_v50  ;;  %v516_v15 = vpack.c.bf16 %v10381_v17, %v10376_v50  ;;  %204 = vst [vmem:[#allocation2 + $0x249] sm:$0xff] %v10410_v21 }
  0x62   :  { %2624 = vmatpush1.bf16.msra.mxu0 %v9647_v11  ;;  %v10426_v11 = vld [vmem:[%s15208_s0 + $0x160] sm:$0xff] }
  0x63   :  { %2625 = vmatprep.subr.bf16.mxu0 %v15217_v1  ;;  %205 = vst [vmem:[#allocation2 + $0x259] sm:$0xff] %v10426_v11 }
  0x66   :  { %2626 = vmatpush1.bf16.msra.mxu0 %v9648_v30  ;;  %v10431_v30 = vld [vmem:[%s15208_s0 + $0x168] sm:$0xff] }
  0x67   :  { %2377 = vmatmul.mubr.bf16.gmra.mrb[12].mxu0 %v10340_v63  ;;  %2627 = vmatprep.subr.bf16.mxu0 %v15217_v1  ;;  %206 = vst [vmem:[#allocation2 + $0x261] sm:$0xff] %v10431_v30 }
  0x68   :  { %2384 = vmatprep.mubr.bf16.mxu0 %v499_v20  ;;  %v314_v20 = vld [vmem:[#allocation2 + $0x80] sm:$0xff] }
  0x69   :  { %v10396_v16 = vpack.c.bf16 %v314_v20, %v313_v18  ;;  %v518_v18 = vpack.c.bf16 %v10431_v30, %v10426_v11  ;;  %v10445_v20 = vpack.c.bf16 %v318_v25, %v317_v24  ;;  %v10475_v24 = vld [vmem:[%s15208_s0 + $0x188] sm:$0xff]  ;;  %v321_v25 = vld [vmem:[#allocation2 + $0xd8] sm:$0xff] }
  0x6a   :  { %2628 = vmatpush1.bf16.msra.mxu0 %v9649_v55  ;;  %v10450_v55 = vld [vmem:[%s15208_s0 + $0x170] sm:$0xff]  ;;  %210 = vst [vmem:[#allocation2 + $0x291] sm:$0xff] %v10475_v24 }
  0x6b   :  { %2629 = vmatprep.subr.bf16.mxu0 %v15217_v1  ;;  %207 = vst [vmem:[#allocation2 + $0x271] sm:$0xff] %v10450_v55 }
  0x6e   :  { %2630 = vmatpush1.bf16.msra.mxu0 %v9650_v61  ;;  %v10455_v61 = vld [vmem:[%s15208_s0 + $0x178] sm:$0xff] }
  0x6f   :  { %2385 = vmatmul.mubr.bf16.gmra.mrb[16].mxu0 %v10368_v14  ;;  %2631 = vmatprep.subr.bf16.mxu0 %v15217_v1  ;;  %208 = vst [vmem:[#allocation2 + $0x279] sm:$0xff] %v10455_v61 }
  0x70   :  { %2392 = vmatprep.mubr.bf16.mxu0 %v500_v23  ;;  %v316_v23 = vld [vmem:[#allocation2 + $0x98] sm:$0xff] }
  0x71   :  { %v10421_v10 = vpack.c.bf16 %v316_v23, %v315_v22  ;;  %v319_v22 = vld [vmem:[#allocation2 + $0xc0] sm:$0xff] }
  0x72   :  { %v10470_v23 = vld [vmem:[%s15208_s0 + $0x180] sm:$0xff] }
  0x73   :  { %209 = vst [vmem:[#allocation2 + $0x289] sm:$0xff] %v10470_v23 }
  0x77   :  { %2393 = vmatmul.mubr.bf16.gmra.mrb[20].mxu0 %v10396_v16 }
  0x78   :  { %2400 = vmatprep.mubr.bf16.mxu0 %v501_v26  ;;  %v9651_v26 = vld [vmem:[%s15209_s1 + $0xd8] sm:$0xff]  }
  0x79   :  { %2632 = vmatpush1.bf16.msra.mxu0 %v9651_v26  ;;  %v322_v26 = vld [vmem:[#allocation2 + $0xe0] sm:$0xff] }
  0x7a   :  { %2633 = vmatprep.subr.bf16.mxu0 %v15217_v1 }
  0x7d   :  { %2634 = vmatpush1.bf16.msra.mxu0 %v9652_v29 }
  0x7e   :  { %2635 = vmatprep.subr.bf16.mxu0 %v15217_v1 }
  0x7f   :  { %2401 = vmatmul.mubr.bf16.gmra.mrb[24].mxu0 %v10421_v10 }
  0x80   :  { %2408 = vmatprep.mubr.bf16.mxu0 %v502_v31  ;;  %v10465_v31 = vpack.c.bf16 %v320_v27, %v319_v22  ;;  %v10494_v22 = vld [vmem:[%s15208_s0 + $0x190] sm:$0xff]  ;;  %v10499_v27 = vld [vmem:[%s15208_s0 + $0x198] sm:$0xff] }
  0x81   :  { %211 = vst [vmem:[#allocation2 + $0x2a1] sm:$0xff] %v10494_v22  ;;  %212 = vst [vmem:[#allocation2 + $0x2a9] sm:$0xff] %v10499_v27 }
  0x87   :  { %2409 = vmatmul.mubr.bf16.gmra.mrb[28].mxu0 %v10445_v20 }
  0x88   :  { %2416 = vmatprep.mubr.bf16.mxu0 %v503_v33  ;;  %v10489_v33 = vpack.c.bf16 %v322_v26, %v321_v25 }
  0x8f   :  { %2417 = vmatmul.mubr.bf16.gmra.mrb[32].mxu0 %v10465_v31 }
  0x90   :  { %2424 = vmatprep.mubr.bf16.mxu0 %v504_v37 }
  0x97   :  { %2425 = vmatmul.mubr.bf16.gmra.mrb[36].mxu0 %v10489_v33 }
  0x98   :  { %2432 = vmatprep.mubr.bf16.mxu0 %v505_v40 }
  0x99   :  { %9 = vsyncpa [#allocation6], 0  ;;  %v10509_v37 = vpack.c.bf16 %v324_v34, %v323_v32  ;;  %v10514_v25 = vld [vmem:[%s15208_s0 + $0x1a0] sm:$0xff]  ;;  %v10519_v26 = vld [vmem:[%s15208_s0 + $0x1a8] sm:$0xff]  ;;  %v15354_v11 = vpack.c.bf16 %v10475_v24, %v10470_v23 }
  0x9a   :  { %213 = vst [vmem:[#allocation2 + $0x2b9] sm:$0xff] %v10514_v25  ;;  %214 = vst [vmem:[#allocation2 + $0x2c1] sm:$0xff] %v10519_v26  ;;  %v9653_v38 = vld [vmem:[%s15209_s1 + $0xe8] sm:$0xff]   ;;  %v326_v29 = vld [vmem:[#allocation2 + $0x110] sm:$0xff]  ;;  %v15356_v23 = vpack.c.bf16 %v10519_v26, %v10514_v25 }
  0x9b   :  { %v325_v40 = vld [vmem:[#allocation2 + $0x108] sm:$0xff]  ;;  %2636 = vmatpush1.bf16.msra.mxu0 %v9653_v38  ;;  %v10538_v34 = vld [vmem:[%s15208_s0 + $0x1b0] sm:$0xff]  ;;  %v10543_v39 = vld [vmem:[%s15208_s0 + $0x1b8] sm:$0xff] }
  0x9c   :  { %2637 = vmatprep.subr.bf16.mxu0 %v15217_v1  ;;  %v10533_v32 = vpack.c.bf16 %v326_v29, %v325_v40  ;;  %215 = vst [vmem:[#allocation2 + $0x2d1] sm:$0xff] %v10538_v34  ;;  %216 = vst [vmem:[#allocation2 + $0x2d9] sm:$0xff] %v10543_v39  ;;  %v327_v43 = vld [vmem:[#allocation2 + $0x120] sm:$0xff]  ;;  %v10563_v29 = vld [vmem:[%s15208_s0 + $0x1c8] sm:$0xff] }
  0x9d   :  { %v10558_v40 = vld [vmem:[%s15208_s0 + $0x1c0] sm:$0xff]  ;;  %218 = vst [vmem:[#allocation2 + $0x2f1] sm:$0xff] %v10563_v29  ;;  %v9654_v45 = vld [vmem:[%s15209_s1 + $0xf0] sm:$0xff]   ;;  %v10587_v46 = vld [vmem:[%s15208_s0 + $0x1d8] sm:$0xff] }
  0x9e   :  { %217 = vst [vmem:[#allocation2 + $0x2e9] sm:$0xff] %v10558_v40  ;;  %v10582_v42 = vld [vmem:[%s15208_s0 + $0x1d0] sm:$0xff]  ;;  %220 = vst [vmem:[#allocation2 + $0x309] sm:$0xff] %v10587_v46  ;;  %v9655_v52 = vld [vmem:[%s15209_s1 + $0xf8] sm:$0xff]   ;;  %v15358_v25 = vpack.c.bf16 %v10563_v29, %v10558_v40 }
  0x9f   :  { %2433 = vmatmul.mubr.bf16.gmra.mrb[40].mxu0 %v10509_v37  ;;  %219 = vst [vmem:[#allocation2 + $0x301] sm:$0xff] %v10582_v42  ;;  %v331_v49 = vld [vmem:[#allocation2 + $0x150] sm:$0xff]  ;;  %v464_v48 = vld [vmem:[#allocation2 + $0x1b9] sm:$0xff]  ;;  %v337_v57 = vld [vmem:[#allocation2 + $0x1c8] sm:$0xff] }
  0xa0   :  { %2440 = vmatprep.mubr.bf16.mxu0 %v506_v44  ;;  %v328_v44 = vld [vmem:[#allocation2 + $0x128] sm:$0xff]  ;;  %2638 = vmatpush1.bf16.msra.mxu0 %v9654_v45  ;;  %v338_v58 = vld [vmem:[#allocation2 + $0x1d0] sm:$0xff]  ;;  %v341_v2 = vld [vmem:[#allocation2 + $0x1f8] sm:$0xff] }
  0xa1   :  { %v10553_v38 = vpack.c.bf16 %v328_v44, %v327_v43  ;;  %v330_v43 = vld [vmem:[#allocation2 + $0x140] sm:$0xff]  ;;  %2639 = vmatprep.subr.bf16.mxu0 %v15217_v1  ;;  %v344_v12 = vld [vmem:[#allocation2 + $0x218] sm:$0xff]  ;;  %v346_v56 = vld [vmem:[#allocation2 + $0x230] sm:$0xff] }
  0xa2   :  { %v342_v3 = vld [vmem:[#allocation2 + $0x200] sm:$0xff]  ;;  %v348_v4 = vld [vmem:[#allocation2 + $0x248] sm:$0xff]  ;;  %v351_v0 = vld [vmem:[#allocation2 + $0x270] sm:$0xff] }
  0xa3   :  { %v350_v50 = vld [vmem:[#allocation2 + $0x260] sm:$0xff]  ;;  %v352_v21 = vld [vmem:[#allocation2 + $0x278] sm:$0xff]  ;;  %v353_v30 = vld [vmem:[#allocation2 + $0x288] sm:$0xff] }
  0xa4   :  { %2640 = vmatpush1.bf16.msra.mxu0 %v9655_v52  ;;  %v340_v52 = vld [vmem:[#allocation2 + $0x1e8] sm:$0xff]  ;;  %v357_v24 = vld [vmem:[#allocation2 + $0x2b8] sm:$0xff] }
  0xa5   :  { %2898 = vmatprep.subr.bf16.mxu0 %v15217_v1  ;;  %v361_v26 = vld [vmem:[#allocation2 + $0x2e8] sm:$0xff]  ;;  %v10716_v40 = vld [vmem:[%s15208_s0 + $0xf8] sm:$0xff] }
  0xa6   :  { %192 = vst [vmem:[#allocation2 + $0x189] sm:$0xff] %v10716_v40 }
  0xa7   :  { %2441 = vmatmul.mubr.bf16.gmra.mrb[44].mxu0 %v10533_v32 }
  0xa8   :  { %2448 = vmatprep.mubr.bf16.mxu0 %v507_v47  ;;  %v329_v47 = vld [vmem:[#allocation2 + $0x138] sm:$0xff] }
  0xa9   :  { %v10577_v44 = vpack.c.bf16 %v330_v43, %v329_v47  ;;  %v10602_v47 = vld [vmem:[%s15208_s0 + $0x1e0] sm:$0xff]  ;;  %v10607_v43 = vld [vmem:[%s15208_s0 + $0x1e8] sm:$0xff] }
  0xaa   :  { %221 = vst [vmem:[#allocation2 + $0x319] sm:$0xff] %v10602_v47  ;;  %222 = vst [vmem:[#allocation2 + $0x321] sm:$0xff] %v10607_v43  ;;  %v526_v53 = vpack.c.bf16 %v10607_v43, %v10602_v47  ;;  %v561_v47 = vld [vmem:[#allocation2 + $0x1a] sm:$0xff]  ;;  %v562_v43 = vld [vmem:[#allocation2 + $0x22] sm:$0xff] }
  0xaf   :  { %2449 = vmatmul.mubr.bf16.gmra.mrb[48].mxu0 %v10553_v38 }
  0xb0   :  { %2456 = vmatprep.mubr.bf16.mxu0 %v508_v51  ;;  %v332_v51 = vld [vmem:[#allocation2 + $0x158] sm:$0xff] }
  0xb1   :  { %v10597_v45 = vpack.c.bf16 %v332_v51, %v331_v49  ;;  %v334_v49 = vld [vmem:[#allocation2 + $0x170] sm:$0xff]  ;;  %v366_v29 = vld [vmem:[#allocation2 + $0x320] sm:$0xff] }
  0xb2   :  { %v463_v51 = vld [vmem:[#allocation2 + $0x1b1] sm:$0xff] }
  0xb3   :  { %v511_v28 = vpack.c.bf16 %v464_v48, %v463_v51  ;;  %v339_v48 = vld [vmem:[#allocation2 + $0x1e0] sm:$0xff] }
  0xb7   :  { %2457 = vmatmul.mubr.bf16.gmra.mrb[52].mxu0 %v10577_v44 }
  0xb8   :  { %2464 = vmatprep.mubr.bf16.mxu0 %v509_v54  ;;  %v333_v54 = vld [vmem:[#allocation2 + $0x168] sm:$0xff] }
  0xb9   :  { %v10621_v36 = vpack.c.bf16 %v334_v49, %v333_v54  ;;  %v10634_v54 = vpack.c.bf16 %v340_v52, %v339_v48  ;;  %v356_v49 = vld [vmem:[#allocation2 + $0x2a8] sm:$0xff]  ;;  %v360_v48 = vld [vmem:[#allocation2 + $0x2d8] sm:$0xff] }
  0xbf   :  { %2465 = vmatmul.mubr.bf16.gmra.mrb[56].mxu0 %v10597_v45 }
  0xc0   :  { %2472 = vmatprep.mubr.bf16.mxu0 %v510_v60  ;;  %v10628_v60 = vpack.c.bf16 %v338_v58, %v337_v57  ;;  %v358_v57 = vld [vmem:[#allocation2 + $0x2c0] sm:$0xff] }
  0xc1   :  { %v10688_v58 = vpack.c.bf16 %v358_v57, %v357_v24  ;;  %v9664_v57 = vld [vmem:[%s15209_s1 + $0x140] sm:$0xff]  }
  0xc7   :  { %2473 = vmatmul.mubr.bf16.gmra.mrb[60].mxu0 %v10621_v36 }
  0xc8   :  { %2480 = vmatprep.mubr.bf16.mxu0 %v511_v28 }
  0xcf   :  { %2481 = vmatmul.mubr.bf16.gmra.mrb[64].mxu0 %v9809_v6  ;;  %v10640_v6 = vpack.c.bf16 %v342_v3, %v341_v2  ;;  %v362_v2 = vld [vmem:[#allocation2 + $0x2f0] sm:$0xff] }
  0xd0   :  { %2488 = vmatprep.mubr.bf16.mxu0 %v512_v8  ;;  %v343_v8 = vld [vmem:[#allocation2 + $0x210] sm:$0xff]  ;;  %v10700_v3 = vpack.c.bf16 %v362_v2, %v361_v26  ;;  %v572_v26 = vld [vmem:[#allocation2 + $0x9a] sm:$0xff] }
  0xd1   :  { %v10646_v19 = vpack.c.bf16 %v344_v12, %v343_v8  ;;  %v364_v8 = vld [vmem:[#allocation2 + $0x308] sm:$0xff] }
  0xd7   :  { %2489 = vmatmul.mubr.bf16.gmra.mrb[68].mxu0 %v10628_v60 }
  0xd8   :  { %2496 = vmatprep.mubr.bf16.mxu0 %v513_v35  ;;  %v345_v35 = vld [vmem:[#allocation2 + $0x228] sm:$0xff] }
  0xd9   :  { %v10652_v59 = vpack.c.bf16 %v346_v56, %v345_v35  ;;  %v10711_v35 = vld [vmem:[%s15208_s0 + $0xf0] sm:$0xff]  ;;  %v559_v56 = vld [vmem:[#allocation2 + $0x2] sm:$0xff] }
  0xda   :  { %191 = vst [vmem:[#allocation2 + $0x181] sm:$0xff] %v10711_v35 }
  0xdf   :  { %2497 = vmatmul.mubr.bf16.gmra.mrb[72].mxu0 %v10634_v54 }
  0xe0   :  { %2504 = vmatprep.mubr.bf16.mxu0 %v514_v62  ;;  %v347_v62 = vld [vmem:[#allocation2 + $0x240] sm:$0xff] }
  0xe1   :  { %v10658_v5 = vpack.c.bf16 %v348_v4, %v347_v62  ;;  %v560_v62 = vld [vmem:[#allocation2 + $0xa] sm:$0xff] }
  0xe2   :  { %v623_v4 = vpack.c.bf16 %v560_v62, %v559_v56  ;;  %v577_v62 = vld [vmem:[#allocation2 + $0xda] sm:$0xff] }
  0xe7   :  { %2505 = vmatmul.mubr.bf16.gmra.mrb[76].mxu0 %v10640_v6 }
  0xe8   :  { %2512 = vmatprep.mubr.bf16.mxu0 %v515_v13  ;;  %v349_v13 = vld [vmem:[#allocation2 + $0x258] sm:$0xff] }
  0xe9   :  { %v10664_v17 = vpack.c.bf16 %v350_v50, %v349_v13  ;;  %v9656_v13 = vld [vmem:[%s15209_s1 + $0x100] sm:$0xff]   ;;  %v9658_v50 = vld [vmem:[%s15209_s1 + $0x110] sm:$0xff]  }
  0xef   :  { %2513 = vmatmul.mubr.bf16.gmra.mrb[80].mxu0 %v10646_v19 }
  0xf0   :  { %2520 = vmatprep.mubr.bf16.mxu0 %v516_v15  ;;  %v15353_v15 = vpack.c.bf16 %v10455_v61, %v10450_v55  ;;  %v15355_v55 = vpack.c.bf16 %v10499_v27, %v10494_v22  ;;  %v355_v61 = vld [vmem:[#allocation2 + $0x2a0] sm:$0xff]  ;;  %v15357_v22 = vpack.c.bf16 %v10543_v39, %v10538_v34  ;;  %v359_v27 = vld [vmem:[#allocation2 + $0x2d0] sm:$0xff]  ;;  %v15359_v39 = vpack.c.bf16 %v10587_v46, %v10582_v42  ;;  %v365_v42 = vld [vmem:[#allocation2 + $0x318] sm:$0xff] }
  0xf1   :  { %v10682_v51 = vpack.c.bf16 %v356_v49, %v355_v61  ;;  %v10694_v52 = vpack.c.bf16 %v360_v48, %v359_v27  ;;  %v363_v34 = vld [vmem:[#allocation2 + $0x300] sm:$0xff]  ;;  %v10724_v46 = vpack.c.bf16 %v366_v29, %v365_v42  ;;  %v9662_v61 = vld [vmem:[%s15209_s1 + $0x130] sm:$0xff]   ;;  %v9665_v27 = vld [vmem:[%s15209_s1 + $0x148] sm:$0xff]  }
  0xf2   :  { %v10706_v12 = vpack.c.bf16 %v364_v8, %v363_v34  ;;  %v568_v49 = vld [vmem:[#allocation2 + $0x6a] sm:$0xff]  ;;  %v574_v8 = vld [vmem:[#allocation2 + $0xb2] sm:$0xff]  ;;  %v575_v42 = vld [vmem:[#allocation2 + $0xc2] sm:$0xff] }
  0xf3   :  { %v573_v34 = vld [vmem:[#allocation2 + $0xaa] sm:$0xff] }
  0xf4   :  { %v576_v29 = vld [vmem:[#allocation2 + $0xca] sm:$0xff] }
  0xf5   :  { %v10805_v56 = vpack.c.bf16 %v576_v29, %v575_v42  ;;  %v595_v42 = vld [vmem:[#allocation2 + $0x1e2] sm:$0xff]  ;;  %v596_v29 = vld [vmem:[#allocation2 + $0x1ea] sm:$0xff] }
  0xf7   :  { %2521 = vmatmul.mubr.bf16.gmra.mrb[84].mxu0 %v10652_v59 }
  0xf8   :  { %2528 = vmatprep.mubr.bf16.mxu0 %v517_v7  ;;  %v10670_v7 = vpack.c.bf16 %v352_v21, %v351_v0  ;;  %v9659_v0 = vld [vmem:[%s15209_s1 + $0x118] sm:$0xff]  }
  0xff   :  { %2529 = vmatmul.mubr.bf16.gmra.mrb[88].mxu0 %v10658_v5 }
 0x100   :  { %2536 = vmatprep.mubr.bf16.mxu0 %v518_v18  ;;  %v354_v18 = vld [vmem:[#allocation2 + $0x290] sm:$0xff] }
 0x101   :  { %v10676_v28 = vpack.c.bf16 %v354_v18, %v353_v30  ;;  %v566_v30 = vld [vmem:[#allocation2 + $0x52] sm:$0xff]  ;;  %v9661_v18 = vld [vmem:[%s15209_s1 + $0x128] sm:$0xff]  }
 0x107   :  { %2537 = vmatmul.mubr.bf16.gmra.mrb[92].mxu0 %v10664_v17 }
 0x108   :  { %2544 = vmatprep.mubr.bf16.mxu0 %v15353_v15  ;;  %v564_v15 = vld [vmem:[#allocation2 + $0x3a] sm:$0xff] }
 0x10f   :  { %2545 = vmatmul.mubr.bf16.gmra.mrb[96].mxu0 %v10670_v7 }
 0x110   :  { %2552 = vmatprep.mubr.bf16.mxu0 %v15354_v11  ;;  %v9660_v11 = vld [vmem:[%s15209_s1 + $0x120] sm:$0xff]  }
 0x117   :  { %2553 = vmatmul.mubr.bf16.gmra.mrb[100].mxu0 %v10676_v28 }
 0x118   :  { %2560 = vmatprep.mubr.bf16.mxu0 %v15355_v55 }
 0x11f   :  { %2561 = vmatmul.mubr.bf16.gmra.mrb[104].mxu0 %v10682_v51 }
 0x120   :  { %2568 = vmatprep.mubr.bf16.mxu0 %v15356_v23  ;;  %v9663_v23 = vld [vmem:[%s15209_s1 + $0x138] sm:$0xff]  }
 0x127   :  { %2569 = vmatmul.mubr.bf16.gmra.mrb[108].mxu0 %v10688_v58 }
 0x128   :  { %2576 = vmatprep.mubr.bf16.mxu0 %v15357_v22  ;;  %v570_v22 = vld [vmem:[#allocation2 + $0x82] sm:$0xff] }
 0x12f   :  { %2577 = vmatmul.mubr.bf16.gmra.mrb[112].mxu0 %v10694_v52 }
 0x130   :  { %2584 = vmatprep.mubr.bf16.mxu0 %v15358_v25  ;;  %v9666_v25 = vld [vmem:[%s15209_s1 + $0x150] sm:$0xff]  }
 0x137   :  { %2585 = vmatmul.mubr.bf16.gmra.mrb[116].mxu0 %v10700_v3 }
 0x138   :  { %2592 = vmatprep.mubr.bf16.mxu0 %v15359_v39  ;;  %v9667_v39 = vld [vmem:[%s15209_s1 + $0x158] sm:$0xff]  }
 0x13f   :  { %2593 = vmatmul.mubr.bf16.gmra.mrb[120].mxu0 %v10706_v12 }
 0x140   :  { %2600 = vmatprep.mubr.bf16.mxu0 %v526_v53  ;;  %v9657_v53 = vld [vmem:[%s15209_s1 + $0x108] sm:$0xff]  }
 0x147   :  { %2601 = vmatmul.mubr.bf16.gmra.mrb[124].mxu0 %v10724_v46 }
 0x148   :  { %2641 = vmatprep.mubr.bf16.mxu0 %v10286_v9  ;;  %v10736_v9 = vpack.c.bf16 %v562_v43, %v561_v47  ;;  %v580_v47 = vld [vmem:[#allocation2 + $0xfa] sm:$0xff] }
 0x14f   :  { %2642 = vmatmul.mubr.bf16.vlgmr.msra.gmra.mrb[0].mxu0 %v623_v4  ;;  %v578_v4 = vld [vmem:[#allocation2 + $0xe2] sm:$0xff] }
 0x150   :  { %2899 = vmatpush1.bf16.msra.mxu0 %v9656_v13  ;;  %2649 = vmatprep.mubr.bf16.mxu0 %v10313_v41  ;;  %v563_v41 = vld [vmem:[#allocation2 + $0x32] sm:$0xff]  ;;  %v10813_v13 = vpack.c.bf16 %v578_v4, %v577_v62  ;;  %v598_v62 = vld [vmem:[#allocation2 + $0x202] sm:$0xff] }
 0x151   :  { %2900 = vmatprep.subr.bf16.mxu0 %v15217_v1  ;;  %v10748_v21 = vpack.c.bf16 %v564_v15, %v563_v41  ;;  %v584_v15 = vld [vmem:[#allocation2 + $0x12a] sm:$0xff] }
 0x154   :  { %2901 = vmatpush1.bf16.msra.mxu0 %v9657_v53  ;;  %v581_v53 = vld [vmem:[#allocation2 + $0x10a] sm:$0xff] }
 0x155   :  { %2902 = vmatprep.subr.bf16.mxu0 %v15217_v1 }
 0x157   :  { %2650 = vmatmul.mubr.bf16.gmra.mrb[4].mxu0 %v10736_v9 }
 0x158   :  { %2657 = vmatprep.mubr.bf16.mxu0 %v10340_v63  ;;  %2903 = vmatpush1.bf16.msra.mxu0 %v9658_v50  ;;  %v565_v63 = vld [vmem:[#allocation2 + $0x4a] sm:$0xff]  ;;  %v582_v50 = vld [vmem:[#allocation2 + $0x112] sm:$0xff] }
 0x159   :  { %2904 = vmatprep.subr.bf16.mxu0 %v15217_v1  ;;  %v10760_v55 = vpack.c.bf16 %v566_v30, %v565_v63  ;;  %v10825_v41 = vpack.c.bf16 %v582_v50, %v581_v53  ;;  %v586_v63 = vld [vmem:[#allocation2 + $0x142] sm:$0xff]  ;;  %v604_v50 = vld [vmem:[#allocation2 + $0x24a] sm:$0xff] }
 0x15c   :  { %2905 = vmatpush1.bf16.msra.mxu0 %v9659_v0 }
 0x15d   :  { %2906 = vmatprep.subr.bf16.mxu0 %v15217_v1 }
 0x15f   :  { %2658 = vmatmul.mubr.bf16.gmra.mrb[8].mxu0 %v10748_v21 }
 0x160   :  { %2665 = vmatprep.mubr.bf16.mxu0 %v10368_v14  ;;  %2907 = vmatpush1.bf16.msra.mxu0 %v9660_v11  ;;  %v567_v14 = vld [vmem:[#allocation2 + $0x62] sm:$0xff]  ;;  %v585_v11 = vld [vmem:[#allocation2 + $0x13a] sm:$0xff] }
 0x161   :  { %2908 = vmatprep.subr.bf16.mxu0 %v15217_v1  ;;  %v10772_v24 = vpack.c.bf16 %v568_v49, %v567_v14  ;;  %v10837_v30 = vpack.c.bf16 %v586_v63, %v585_v11  ;;  %v718_v14 = vld [vmem:[#allocation2 + $0x188] sm:$0xff]  ;;  %v608_v11 = vld [vmem:[#allocation2 + $0x27a] sm:$0xff] }
 0x164   :  { %2909 = vmatpush1.bf16.msra.mxu0 %v9661_v18  ;;  %v588_v18 = vld [vmem:[#allocation2 + $0x15a] sm:$0xff] }
 0x165   :  { %2910 = vmatprep.subr.bf16.mxu0 %v15217_v1 }
 0x167   :  { %2666 = vmatmul.mubr.bf16.gmra.mrb[12].mxu0 %v10760_v55 }
 0x168   :  { %2673 = vmatprep.mubr.bf16.mxu0 %v10396_v16  ;;  %2911 = vmatpush1.bf16.msra.mxu0 %v9662_v61  ;;  %v569_v16 = vld [vmem:[#allocation2 + $0x7a] sm:$0xff] }
 0x169   :  { %2912 = vmatprep.subr.bf16.mxu0 %v15217_v1  ;;  %v10784_v48 = vpack.c.bf16 %v570_v22, %v569_v16  ;;  %v717_v61 = vld [vmem:[#allocation2 + $0x180] sm:$0xff]  ;;  %v589_v16 = vld [vmem:[#allocation2 + $0x16a] sm:$0xff]  ;;  %v590_v22 = vld [vmem:[#allocation2 + $0x172] sm:$0xff] }
 0x16c   :  { %2913 = vmatpush1.bf16.msra.mxu0 %v9663_v23  ;;  %v10851_v23 = vld [vmem:[%s15208_s0 + $0x1f8] sm:$0xff] }
 0x16d   :  { %2914 = vmatprep.subr.bf16.mxu0 %v15217_v1  ;;  %224 = vst [vmem:[#allocation2 + $0x339] sm:$0xff] %v10851_v23 }
 0x16f   :  { %2674 = vmatmul.mubr.bf16.gmra.mrb[16].mxu0 %v10772_v24 }
 0x170   :  { %2681 = vmatprep.mubr.bf16.mxu0 %v10421_v10  ;;  %2915 = vmatpush1.bf16.msra.mxu0 %v9664_v57  ;;  %v571_v10 = vld [vmem:[#allocation2 + $0x92] sm:$0xff]  ;;  %v766_v57 = vpack.c.bf16 %v718_v14, %v717_v61  ;;  %v612_v61 = vld [vmem:[#allocation2 + $0x2aa] sm:$0xff] }
 0x171   :  { %2916 = vmatprep.subr.bf16.mxu0 %v15217_v1  ;;  %v10793_v2 = vpack.c.bf16 %v572_v26, %v571_v10  ;;  %v592_v10 = vld [vmem:[#allocation2 + $0x1ba] sm:$0xff] }
 0x174   :  { %2917 = vmatpush1.bf16.msra.mxu0 %v9665_v27  ;;  %v10860_v27 = vpack.c.bf16 %v590_v22, %v589_v16  ;;  %v616_v16 = vld [vmem:[#allocation2 + $0x2da] sm:$0xff] }
 0x175   :  { %2918 = vmatprep.subr.bf16.mxu0 %v15217_v1 }
 0x177   :  { %2682 = vmatmul.mubr.bf16.gmra.mrb[20].mxu0 %v10784_v48 }
 0x178   :  { %2689 = vmatprep.mubr.bf16.mxu0 %v10445_v20  ;;  %2919 = vmatpush1.bf16.msra.mxu0 %v9666_v25  ;;  %v10801_v20 = vpack.c.bf16 %v574_v8, %v573_v34  ;;  %v591_v25 = vld [vmem:[#allocation2 + $0x1b2] sm:$0xff] }
 0x179   :  { %2920 = vmatprep.subr.bf16.mxu0 %v15217_v1  ;;  %v639_v26 = vpack.c.bf16 %v592_v10, %v591_v25  ;;  %v594_v34 = vld [vmem:[#allocation2 + $0x1d2] sm:$0xff] }
 0x17a   :  { %v618_v25 = vld [vmem:[#allocation2 + $0x2f2] sm:$0xff] }
 0x17c   :  { %2921 = vmatpush1.bf16.msra.mxu0 %v9667_v39  ;;  %v593_v39 = vld [vmem:[#allocation2 + $0x1ca] sm:$0xff] }
 0x17d   :  { %2922 = vmatprep.subr.bf16.mxu0 %v15217_v1  ;;  %v10865_v8 = vpack.c.bf16 %v594_v34, %v593_v39 }
 0x17f   :  { %2690 = vmatmul.mubr.bf16.gmra.mrb[24].mxu0 %v10793_v2 }
 0x180   :  { %2697 = vmatprep.mubr.bf16.mxu0 %v10465_v31  ;;  %v9668_v31 = vld [vmem:[%s15209_s1 + $0x160] sm:$0xff]  }
 0x181   :  { %2923 = vmatpush1.bf16.msra.mxu0 %v9668_v31  ;;  %v10869_v31 = vpack.c.bf16 %v596_v29, %v595_v42  ;;  %v621_v29 = vld [vmem:[#allocation2 + $0x31a] sm:$0xff] }
 0x182   :  { %2924 = vmatprep.subr.bf16.mxu0 %v15217_v1 }
 0x187   :  { %2698 = vmatmul.mubr.bf16.gmra.mrb[28].mxu0 %v10801_v20 }
 0x188   :  { %2705 = vmatprep.mubr.bf16.mxu0 %v10489_v33  ;;  %v579_v33 = vld [vmem:[#allocation2 + $0xf2] sm:$0xff] }
 0x189   :  { %v10817_v43 = vpack.c.bf16 %v580_v47, %v579_v33  ;;  %v600_v33 = vld [vmem:[#allocation2 + $0x21a] sm:$0xff] }
 0x18f   :  { %2706 = vmatmul.mubr.bf16.gmra.mrb[32].mxu0 %v10805_v56 }
 0x190   :  { %2713 = vmatprep.mubr.bf16.mxu0 %v10509_v37  ;;  %v9669_v37 = vld [vmem:[%s15209_s1 + $0x168] sm:$0xff]  }
 0x191   :  { %2925 = vmatpush1.bf16.msra.mxu0 %v9669_v37  ;;  %v602_v37 = vld [vmem:[#allocation2 + $0x232] sm:$0xff] }
 0x192   :  { %2926 = vmatprep.subr.bf16.mxu0 %v15217_v1 }
 0x197   :  { %2714 = vmatmul.mubr.bf16.gmra.mrb[36].mxu0 %v10813_v13 }
 0x198   :  { %2721 = vmatprep.mubr.bf16.mxu0 %v10533_v32  ;;  %v583_v32 = vld [vmem:[#allocation2 + $0x122] sm:$0xff] }
 0x199   :  { %v10829_v0 = vpack.c.bf16 %v584_v15, %v583_v32  ;;  %v606_v15 = vld [vmem:[#allocation2 + $0x262] sm:$0xff] }
 0x19f   :  { %2722 = vmatmul.mubr.bf16.gmra.mrb[40].mxu0 %v10817_v43 }
 0x1a0   :  { %2729 = vmatprep.mubr.bf16.mxu0 %v10553_v38  ;;  %v9670_v38 = vld [vmem:[%s15209_s1 + $0x170] sm:$0xff]  }
 0x1a1   :  { %2927 = vmatpush1.bf16.msra.mxu0 %v9670_v38 }
 0x1a2   :  { %2928 = vmatprep.subr.bf16.mxu0 %v15217_v1 }
 0x1a7   :  { %2730 = vmatmul.mubr.bf16.gmra.mrb[44].mxu0 %v10825_v41 }
 0x1a8   :  { %2737 = vmatprep.mubr.bf16.mxu0 %v10577_v44  ;;  %v587_v44 = vld [vmem:[#allocation2 + $0x152] sm:$0xff] }
 0x1a9   :  { %v10841_v49 = vpack.c.bf16 %v588_v18, %v587_v44  ;;  %v610_v44 = vld [vmem:[#allocation2 + $0x292] sm:$0xff] }
 0x1af   :  { %2738 = vmatmul.mubr.bf16.gmra.mrb[48].mxu0 %v10829_v0 }
 0x1b0   :  { %2745 = vmatprep.mubr.bf16.mxu0 %v10597_v45  ;;  %v10846_v45 = vld [vmem:[%s15208_s0 + $0x1f0] sm:$0xff] }
 0x1b1   :  { %223 = vst [vmem:[#allocation2 + $0x331] sm:$0xff] %v10846_v45 }
 0x1b7   :  { %2746 = vmatmul.mubr.bf16.gmra.mrb[52].mxu0 %v10837_v30 }
 0x1b8   :  { %2753 = vmatprep.mubr.bf16.mxu0 %v10621_v36  ;;  %v9671_v36 = vld [vmem:[%s15209_s1 + $0x178] sm:$0xff]   ;;  %v749_v39 = vld [vmem:[#allocation2 + $0x330] sm:$0xff] }
 0x1b9   :  { %2929 = vmatpush1.bf16.msra.mxu0 %v9671_v36 }
 0x1ba   :  { %3187 = vmatprep.subr.bf16.mxu0 %v15217_v1 }
 0x1bf   :  { %2754 = vmatmul.mubr.bf16.gmra.mrb[56].mxu0 %v10841_v49 }
 0x1c0   :  { %2761 = vmatprep.mubr.bf16.mxu0 %v766_v57  ;;  %v614_v57 = vld [vmem:[#allocation2 + $0x2c2] sm:$0xff] }
 0x1c7   :  { %2762 = vmatmul.mubr.bf16.gmra.mrb[60].mxu0 %v10860_v27 }
 0x1c8   :  { %2769 = vmatprep.mubr.bf16.mxu0 %v10628_v60  ;;  %v597_v60 = vld [vmem:[#allocation2 + $0x1fa] sm:$0xff] }
 0x1c9   :  { %v10873_v4 = vpack.c.bf16 %v598_v62, %v597_v60  ;;  %v815_v62 = vld [vmem:[#allocation2 + $0x19] sm:$0xff] }
 0x1cf   :  { %2770 = vmatmul.mubr.bf16.gmra.mrb[64].mxu0 %v639_v26  ;;  %v620_v26 = vld [vmem:[#allocation2 + $0x30a] sm:$0xff] }
 0x1d0   :  { %2777 = vmatprep.mubr.bf16.mxu0 %v10634_v54  ;;  %v599_v54 = vld [vmem:[#allocation2 + $0x212] sm:$0xff] }
 0x1d1   :  { %v10877_v47 = vpack.c.bf16 %v600_v33, %v599_v54  ;;  %v9672_v33 = vld [vmem:[%s15209_s1 + $0x180] sm:$0xff]  }
 0x1d7   :  { %2778 = vmatmul.mubr.bf16.gmra.mrb[68].mxu0 %v10865_v8 }
 0x1d8   :  { %2785 = vmatprep.mubr.bf16.mxu0 %v10640_v6  ;;  %v601_v6 = vld [vmem:[#allocation2 + $0x22a] sm:$0xff] }
 0x1d9   :  { %v10881_v53 = vpack.c.bf16 %v602_v37, %v601_v6  ;;  %v817_v6 = vld [vmem:[#allocation2 + $0x31] sm:$0xff]  ;;  %v818_v37 = vld [vmem:[#allocation2 + $0x39] sm:$0xff] }
 0x1df   :  { %2786 = vmatmul.mubr.bf16.gmra.mrb[72].mxu0 %v10869_v31 }
 0x1e0   :  { %2793 = vmatprep.mubr.bf16.mxu0 %v10646_v19  ;;  %v603_v19 = vld [vmem:[#allocation2 + $0x242] sm:$0xff] }
 0x1e1   :  { %v10885_v32 = vpack.c.bf16 %v604_v50, %v603_v19  ;;  %v9673_v19 = vld [vmem:[%s15209_s1 + $0x188] sm:$0xff]   ;;  %v9674_v50 = vld [vmem:[%s15209_s1 + $0x190] sm:$0xff]  }
 0x1e7   :  { %2794 = vmatmul.mubr.bf16.gmra.mrb[76].mxu0 %v10873_v4 }
 0x1e8   :  { %2801 = vmatprep.mubr.bf16.mxu0 %v10652_v59  ;;  %v605_v59 = vld [vmem:[#allocation2 + $0x25a] sm:$0xff] }
 0x1e9   :  { %v10889_v38 = vpack.c.bf16 %v606_v15, %v605_v59  ;;  %v820_v59 = vld [vmem:[#allocation2 + $0x51] sm:$0xff] }
 0x1ea   :  { %v9675_v15 = vld [vmem:[%s15209_s1 + $0x198] sm:$0xff]  }
 0x1ef   :  { %2802 = vmatmul.mubr.bf16.gmra.mrb[80].mxu0 %v10877_v47 }
 0x1f0   :  { %2809 = vmatprep.mubr.bf16.mxu0 %v10658_v5  ;;  %v607_v5 = vld [vmem:[#allocation2 + $0x272] sm:$0xff] }
 0x1f1   :  { %v10893_v63 = vpack.c.bf16 %v608_v11, %v607_v5  ;;  %v9676_v11 = vld [vmem:[%s15209_s1 + $0x1a0] sm:$0xff]  }
 0x1f7   :  { %2810 = vmatmul.mubr.bf16.gmra.mrb[84].mxu0 %v10881_v53 }
 0x1f8   :  { %2817 = vmatprep.mubr.bf16.mxu0 %v10664_v17  ;;  %v609_v17 = vld [vmem:[#allocation2 + $0x28a] sm:$0xff] }
 0x1f9   :  { %v10897_v18 = vpack.c.bf16 %v610_v44, %v609_v17  ;;  %v822_v17 = vld [vmem:[#allocation2 + $0x69] sm:$0xff] }
 0x1fa   :  { %v9677_v44 = vld [vmem:[%s15209_s1 + $0x1a8] sm:$0xff]  }
 0x1ff   :  { %2818 = vmatmul.mubr.bf16.gmra.mrb[88].mxu0 %v10885_v32 }
 0x200   :  { %2825 = vmatprep.mubr.bf16.mxu0 %v10670_v7  ;;  %v611_v7 = vld [vmem:[#allocation2 + $0x2a2] sm:$0xff] }
 0x201   :  { %v10901_v14 = vpack.c.bf16 %v612_v61, %v611_v7  ;;  %v9678_v61 = vld [vmem:[%s15209_s1 + $0x1b0] sm:$0xff]  }
 0x207   :  { %2826 = vmatmul.mubr.bf16.gmra.mrb[92].mxu0 %v10889_v38 }
 0x208   :  { %2833 = vmatprep.mubr.bf16.mxu0 %v10676_v28  ;;  %v613_v28 = vld [vmem:[#allocation2 + $0x2ba] sm:$0xff] }
 0x209   :  { %v10905_v36 = vpack.c.bf16 %v614_v57, %v613_v28  ;;  %v824_v28 = vld [vmem:[#allocation2 + $0x81] sm:$0xff]  ;;  %v9679_v57 = vld [vmem:[%s15209_s1 + $0x1b8] sm:$0xff]  }
 0x20f   :  { %2834 = vmatmul.mubr.bf16.gmra.mrb[96].mxu0 %v10893_v63 }
 0x210   :  { %2841 = vmatprep.mubr.bf16.mxu0 %v10682_v51  ;;  %v615_v51 = vld [vmem:[#allocation2 + $0x2d2] sm:$0xff] }
 0x211   :  { %v10909_v22 = vpack.c.bf16 %v616_v16, %v615_v51  ;;  %v9680_v16 = vld [vmem:[%s15209_s1 + $0x1c0] sm:$0xff]  }
 0x217   :  { %2842 = vmatmul.mubr.bf16.gmra.mrb[100].mxu0 %v10897_v18 }
 0x218   :  { %2849 = vmatprep.mubr.bf16.mxu0 %v10688_v58  ;;  %v617_v58 = vld [vmem:[#allocation2 + $0x2ea] sm:$0xff] }
 0x219   :  { %v10913_v10 = vpack.c.bf16 %v618_v25, %v617_v58  ;;  %v826_v58 = vld [vmem:[#allocation2 + $0x99] sm:$0xff]  ;;  %v9681_v25 = vld [vmem:[%s15209_s1 + $0x1c8] sm:$0xff]  }
 0x21f   :  { %2850 = vmatmul.mubr.bf16.gmra.mrb[104].mxu0 %v10901_v14 }
 0x220   :  { %2857 = vmatprep.mubr.bf16.mxu0 %v10694_v52  ;;  %v619_v52 = vld [vmem:[#allocation2 + $0x302] sm:$0xff] }
 0x221   :  { %v10917_v34 = vpack.c.bf16 %v620_v26, %v619_v52  ;;  %v9682_v26 = vld [vmem:[%s15209_s1 + $0x1d0] sm:$0xff]  }
 0x227   :  { %2858 = vmatmul.mubr.bf16.gmra.mrb[108].mxu0 %v10905_v36 }
 0x228   :  { %2865 = vmatprep.mubr.bf16.mxu0 %v10700_v3  ;;  %v750_v3 = vld [vmem:[#allocation2 + $0x338] sm:$0xff] }
 0x229   :  { %v782_v42 = vpack.c.bf16 %v750_v3, %v749_v39  ;;  %v828_v39 = vld [vmem:[#allocation2 + $0xb1] sm:$0xff] }
 0x22f   :  { %2866 = vmatmul.mubr.bf16.gmra.mrb[112].mxu0 %v10909_v22 }
 0x230   :  { %2873 = vmatprep.mubr.bf16.mxu0 %v10706_v12  ;;  %v622_v12 = vld [vmem:[#allocation2 + $0x322] sm:$0xff] }
 0x231   :  { %v10920_v60 = vpack.c.bf16 %v622_v12, %v621_v29  ;;  %v829_v29 = vld [vmem:[#allocation2 + $0xc1] sm:$0xff]  ;;  %v830_v12 = vld [vmem:[#allocation2 + $0xc9] sm:$0xff] }
 0x237   :  { %2874 = vmatmul.mubr.bf16.gmra.mrb[116].mxu0 %v10913_v10 }
 0x238   :  { %2881 = vmatprep.mubr.bf16.mxu0 %v10724_v46  ;;  %v816_v46 = vld [vmem:[#allocation2 + $0x21] sm:$0xff] }
 0x239   :  { %v879_v54 = vpack.c.bf16 %v816_v46, %v815_v62  ;;  %v831_v62 = vld [vmem:[#allocation2 + $0xd9] sm:$0xff]  ;;  %v832_v46 = vld [vmem:[#allocation2 + $0xe1] sm:$0xff] }
 0x23f   :  { %2882 = vmatmul.mubr.bf16.gmra.mrb[120].mxu0 %v10917_v34 }
 0x240   :  { %2889 = vmatprep.mubr.bf16.mxu0 %v782_v42  ;;  %v9683_v42 = vld [vmem:[%s15209_s1 + $0x1d8] sm:$0xff]  }
 0x247   :  { %2890 = vmatmul.mubr.bf16.gmra.mrb[124].mxu0 %v10920_v60 }
 0x248   :  { %2930 = vmatprep.mubr.bf16.mxu0 %v10736_v9  ;;  %v10932_v9 = vpack.c.bf16 %v818_v37, %v817_v6  ;;  %v834_v6 = vld [vmem:[#allocation2 + $0xf9] sm:$0xff] }
 0x24f   :  { %2931 = vmatmul.mubr.bf16.vlgmr.msra.gmra.mrb[0].mxu0 %v879_v54  ;;  %v11001_v54 = vpack.c.bf16 %v832_v46, %v831_v62  ;;  %v9695_v62 = vld [vmem:[%s15209_s1 + $0x238] sm:$0xff]  }
 0x250   :  { %3188 = vmatpush1.bf16.msra.mxu0 %v9672_v33  ;;  %2938 = vmatprep.mubr.bf16.mxu0 %v10748_v21  ;;  %v819_v21 = vld [vmem:[#allocation2 + $0x49] sm:$0xff]  ;;  %v833_v33 = vld [vmem:[#allocation2 + $0xf1] sm:$0xff] }
 0x251   :  { %3189 = vmatprep.subr.bf16.mxu0 %v15217_v1  ;;  %v10944_v5 = vpack.c.bf16 %v820_v59, %v819_v21  ;;  %v11009_v37 = vpack.c.bf16 %v834_v6, %v833_v33  ;;  %v837_v21 = vld [vmem:[#allocation2 + $0x121] sm:$0xff]  ;;  %v838_v59 = vld [vmem:[#allocation2 + $0x129] sm:$0xff]  ;;  %v1328_v46 = vld [vmem:[#allocation2 + $0x32] sm:$0xff] }
 0x252   :  { %v848_v33 = vld [vmem:[#allocation2 + $0x1d1] sm:$0xff] }
 0x254   :  { %3190 = vmatpush1.bf16.msra.mxu0 %v9673_v19  ;;  %v836_v19 = vld [vmem:[#allocation2 + $0x111] sm:$0xff] }
 0x255   :  { %3191 = vmatprep.subr.bf16.mxu0 %v15217_v1 }
 0x257   :  { %2939 = vmatmul.mubr.bf16.gmra.mrb[4].mxu0 %v10932_v9 }
 0x258   :  { %2946 = vmatprep.mubr.bf16.mxu0 %v10760_v55  ;;  %3192 = vmatpush1.bf16.msra.mxu0 %v9674_v50  ;;  %v821_v55 = vld [vmem:[#allocation2 + $0x61] sm:$0xff] }
 0x259   :  { %3193 = vmatprep.subr.bf16.mxu0 %v15217_v1  ;;  %v10956_v7 = vpack.c.bf16 %v822_v17, %v821_v55  ;;  %v9686_v55 = vld [vmem:[%s15209_s1 + $0x200] sm:$0xff]  }
 0x25a   :  { %8675 = vmatprep.subr.bf16.mxu1 %v9686_v55 }
 0x25b   :  { %8676 = vmatpush3.bf16.msra.mxu1 %v9686_v55  ;;  %v852_v55 = vld [vmem:[#allocation2 + $0x201] sm:$0xff] }
 0x25c   :  { %3194 = vmatpush1.bf16.msra.mxu0 %v9675_v15  ;;  %v11021_v15 = vpack.c.bf16 %v838_v59, %v837_v21  ;;  %v850_v21 = vld [vmem:[#allocation2 + $0x1e9] sm:$0xff] }
 0x25d   :  { %3195 = vmatprep.subr.bf16.mxu0 %v15217_v1 }
 0x25f   :  { %2947 = vmatmul.mubr.bf16.gmra.mrb[8].mxu0 %v10944_v5 }
 0x260   :  { %2954 = vmatprep.mubr.bf16.mxu0 %v10772_v24  ;;  %3196 = vmatpush1.bf16.msra.mxu0 %v9676_v11  ;;  %v823_v24 = vld [vmem:[#allocation2 + $0x79] sm:$0xff]  ;;  %v840_v11 = vld [vmem:[#allocation2 + $0x141] sm:$0xff] }
 0x261   :  { %3197 = vmatprep.subr.bf16.mxu0 %v15217_v1  ;;  %v10968_v51 = vpack.c.bf16 %v824_v28, %v823_v24  ;;  %v9689_v24 = vld [vmem:[%s15209_s1 + $0x210] sm:$0xff]  }
 0x264   :  { %3198 = vmatpush1.bf16.msra.mxu0 %v9677_v44  ;;  %v841_v44 = vld [vmem:[#allocation2 + $0x151] sm:$0xff] }
 0x265   :  { %3199 = vmatprep.subr.bf16.mxu0 %v15217_v1 }
 0x267   :  { %2955 = vmatmul.mubr.bf16.gmra.mrb[12].mxu0 %v10956_v7 }
 0x268   :  { %2962 = vmatprep.mubr.bf16.mxu0 %v10784_v48  ;;  %3200 = vmatpush1.bf16.msra.mxu0 %v9678_v61  ;;  %v825_v48 = vld [vmem:[#allocation2 + $0x91] sm:$0xff]  ;;  %v842_v61 = vld [vmem:[#allocation2 + $0x159] sm:$0xff] }
 0x269   :  { %3201 = vmatprep.subr.bf16.mxu0 %v15217_v1  ;;  %v10980_v52 = vpack.c.bf16 %v826_v58, %v825_v48  ;;  %v11042_v28 = vpack.c.bf16 %v842_v61, %v841_v44  ;;  %v9691_v48 = vld [vmem:[%s15209_s1 + $0x220] sm:$0xff]  }
 0x26a   :  { %v973_v58 = vld [vmem:[#allocation2 + $0x182] sm:$0xff] }
 0x26b   :  { %v1335_v44 = vld [vmem:[#allocation2 + $0x82] sm:$0xff] }
 0x26c   :  { %3202 = vmatpush1.bf16.msra.mxu0 %v9679_v57  ;;  %v843_v57 = vld [vmem:[#allocation2 + $0x169] sm:$0xff] }
 0x26d   :  { %3203 = vmatprep.subr.bf16.mxu0 %v15217_v1 }
 0x26f   :  { %2963 = vmatmul.mubr.bf16.gmra.mrb[16].mxu0 %v10968_v51 }
 0x270   :  { %2970 = vmatprep.mubr.bf16.mxu0 %v10793_v2  ;;  %3204 = vmatpush1.bf16.msra.mxu0 %v9680_v16  ;;  %v827_v2 = vld [vmem:[#allocation2 + $0xa9] sm:$0xff]  ;;  %v844_v16 = vld [vmem:[#allocation2 + $0x171] sm:$0xff] }
 0x271   :  { %3205 = vmatprep.subr.bf16.mxu0 %v15217_v1  ;;  %v10989_v3 = vpack.c.bf16 %v828_v39, %v827_v2  ;;  %v9693_v39 = vld [vmem:[%s15209_s1 + $0x228] sm:$0xff]  }
 0x274   :  { %3206 = vmatpush1.bf16.msra.mxu0 %v9681_v25  ;;  %v974_v25 = vld [vmem:[#allocation2 + $0x18a] sm:$0xff] }
 0x275   :  { %3207 = vmatprep.subr.bf16.mxu0 %v15217_v1  ;;  %v11054_v2 = vpack.c.bf16 %v974_v25, %v973_v58  ;;  %v856_v58 = vld [vmem:[#allocation2 + $0x231] sm:$0xff] }
 0x277   :  { %2971 = vmatmul.mubr.bf16.gmra.mrb[20].mxu0 %v10980_v52 }
 0x278   :  { %2978 = vmatprep.mubr.bf16.mxu0 %v10801_v20  ;;  %3208 = vmatpush1.bf16.msra.mxu0 %v9682_v26  ;;  %v10997_v20 = vpack.c.bf16 %v830_v12, %v829_v29  ;;  %v11052_v26 = vpack.c.bf16 %v844_v16, %v843_v57  ;;  %v894_v29 = vpack.c.bf16 %v10716_v40, %v10711_v35  ;;  %v847_v12 = vld [vmem:[#allocation2 + $0x1c9] sm:$0xff]  ;;  %v849_v40 = vld [vmem:[#allocation2 + $0x1e1] sm:$0xff]  ;;  %v1336_v16 = vld [vmem:[#allocation2 + $0x92] sm:$0xff] }
 0x279   :  { %3209 = vmatprep.subr.bf16.mxu0 %v15217_v1  ;;  %v895_v35 = vpack.c.bf16 %v848_v33, %v847_v12  ;;  %v11075_v59 = vpack.c.bf16 %v850_v21, %v849_v40  ;;  %v858_v12 = vld [vmem:[#allocation2 + $0x249] sm:$0xff]  ;;  %v860_v33 = vld [vmem:[#allocation2 + $0x261] sm:$0xff]  ;;  %v862_v40 = vld [vmem:[#allocation2 + $0x279] sm:$0xff] }
 0x27c   :  { %3210 = vmatpush1.bf16.msra.mxu0 %v9683_v42  ;;  %v9694_v42 = vld [vmem:[%s15209_s1 + $0x230] sm:$0xff]  }
 0x27d   :  { %3211 = vmatprep.subr.bf16.mxu0 %v15217_v1 }
 0x27f   :  { %2979 = vmatmul.mubr.bf16.gmra.mrb[24].mxu0 %v10989_v3 }
 0x280   :  { %2986 = vmatprep.mubr.bf16.mxu0 %v10805_v56  ;;  %v9684_v56 = vld [vmem:[%s15209_s1 + $0x1e0] sm:$0xff]  }
 0x281   :  { %3212 = vmatpush1.bf16.msra.mxu0 %v9684_v56  ;;  %v1329_v56 = vld [vmem:[#allocation2 + $0x3a] sm:$0xff] }
 0x282   :  { %3213 = vmatprep.subr.bf16.mxu0 %v15217_v1  ;;  %v1392_v6 = vpack.c.bf16 %v1329_v56, %v1328_v46  ;;  %v1340_v46 = vld [vmem:[#allocation2 + $0xc2] sm:$0xff]  ;;  %v1341_v56 = vld [vmem:[#allocation2 + $0xca] sm:$0xff] }
 0x284   :  { %8691 = vmatprep.mubr.bf16.mxu1 %v1392_v6  ;;  %v1398_v6 = vpack.c.bf16 %v1341_v56, %v1340_v46  ;;  %v1353_v46 = vld [vmem:[#allocation2 + $0x15a] sm:$0xff]  ;;  %v872_v56 = vld [vmem:[#allocation2 + $0x2f1] sm:$0xff] }
 0x287   :  { %2987 = vmatmul.mubr.bf16.gmra.mrb[28].mxu0 %v10997_v20 }
 0x288   :  { %2994 = vmatprep.mubr.bf16.mxu0 %v10813_v13  ;;  %v835_v13 = vld [vmem:[#allocation2 + $0x109] sm:$0xff] }
 0x289   :  { %v11013_v50 = vpack.c.bf16 %v836_v19, %v835_v13  ;;  %v1330_v13 = vld [vmem:[#allocation2 + $0x4a] sm:$0xff]  ;;  %v1331_v19 = vld [vmem:[#allocation2 + $0x52] sm:$0xff] }
 0x28f   :  { %2995 = vmatmul.mubr.bf16.gmra.mrb[32].mxu0 %v11001_v54 }
 0x290   :  { %3002 = vmatprep.mubr.bf16.mxu0 %v10817_v43  ;;  %v9685_v43 = vld [vmem:[%s15209_s1 + $0x1e8] sm:$0xff]  }
 0x291   :  { %3214 = vmatpush1.bf16.msra.mxu0 %v9685_v43  ;;  %v1393_v43 = vpack.c.bf16 %v1331_v19, %v1330_v13  ;;  %v1342_v13 = vld [vmem:[#allocation2 + $0xda] sm:$0xff]  ;;  %v1343_v19 = vld [vmem:[#allocation2 + $0xe2] sm:$0xff] }
 0x292   :  { %3215 = vmatprep.subr.bf16.mxu0 %v15217_v1 }
 0x297   :  { %3003 = vmatmul.mubr.bf16.gmra.mrb[36].mxu0 %v11009_v37 }
 0x298   :  { %3010 = vmatprep.mubr.bf16.mxu0 %v10825_v41  ;;  %v839_v41 = vld [vmem:[#allocation2 + $0x139] sm:$0xff] }
 0x299   :  { %v11028_v17 = vpack.c.bf16 %v840_v11, %v839_v41  ;;  %v1332_v41 = vld [vmem:[#allocation2 + $0x62] sm:$0xff]  ;;  %v1333_v11 = vld [vmem:[#allocation2 + $0x6a] sm:$0xff] }
 0x29f   :  { %3011 = vmatmul.mubr.bf16.gmra.mrb[40].mxu0 %v11013_v50 }
 0x2a0   :  { %3018 = vmatprep.mubr.bf16.mxu0 %v10829_v0  ;;  %v9687_v0 = vld [vmem:[%s15209_s1 + $0x1f0] sm:$0xff]  }
 0x2a1   :  { %3216 = vmatpush1.bf16.msra.mxu0 %v9687_v0  ;;  %v1394_v0 = vpack.c.bf16 %v1333_v11, %v1332_v41  ;;  %v1345_v41 = vld [vmem:[#allocation2 + $0xfa] sm:$0xff]  ;;  %v864_v11 = vld [vmem:[#allocation2 + $0x291] sm:$0xff] }
 0x2a2   :  { %3217 = vmatprep.subr.bf16.mxu0 %v15217_v1 }
 0x2a7   :  { %3019 = vmatmul.mubr.bf16.gmra.mrb[44].mxu0 %v11021_v15 }
 0x2a8   :  { %3026 = vmatprep.mubr.bf16.mxu0 %v10837_v30  ;;  %v9688_v30 = vld [vmem:[%s15209_s1 + $0x208] sm:$0xff]  }
 0x2a9   :  { %8677 = vmatprep.subr.bf16.mxu1 %v9688_v30 }
 0x2aa   :  { %8678 = vmatpush3.bf16.msra.mxu1 %v9688_v30  ;;  %v1334_v30 = vld [vmem:[#allocation2 + $0x7a] sm:$0xff] }
 0x2ab   :  { %8679 = vmatprep.subr.bf16.mxu1 %v9689_v24  ;;  %v1395_v61 = vpack.c.bf16 %v1335_v44, %v1334_v30  ;;  %v1347_v30 = vld [vmem:[#allocation2 + $0x112] sm:$0xff] }
 0x2ae   :  { %8680 = vmatpush3.bf16.msra.mxu1 %v9689_v24 }
 0x2af   :  { %3027 = vmatmul.mubr.bf16.gmra.mrb[48].mxu0 %v11028_v17 }
 0x2b0   :  { %3034 = vmatprep.mubr.bf16.mxu0 %v10841_v49  ;;  %v9690_v49 = vld [vmem:[%s15209_s1 + $0x218] sm:$0xff]  }
 0x2b1   :  { %8681 = vmatprep.subr.bf16.mxu1 %v9690_v49 }
 0x2b2   :  { %8682 = vmatpush3.bf16.msra.mxu1 %v9690_v49  ;;  %v854_v49 = vld [vmem:[#allocation2 + $0x219] sm:$0xff] }
 0x2b3   :  { %8683 = vmatprep.subr.bf16.mxu1 %v9691_v48 }
 0x2b6   :  { %8684 = vmatpush3.bf16.msra.mxu1 %v9691_v48  ;;  %v1337_v48 = vld [vmem:[#allocation2 + $0x9a] sm:$0xff] }
 0x2b7   :  { %3035 = vmatmul.mubr.bf16.gmra.mrb[52].mxu0 %v11042_v28  ;;  %8685 = vmatprep.subr.bf16.mxu1 %v9693_v39  ;;  %v1396_v25 = vpack.c.bf16 %v1337_v48, %v1336_v16  ;;  %v1349_v16 = vld [vmem:[#allocation2 + $0x12a] sm:$0xff]  ;;  %v868_v48 = vld [vmem:[#allocation2 + $0x2c1] sm:$0xff] }
 0x2b8   :  { %3042 = vmatprep.mubr.bf16.mxu0 %v10860_v27  ;;  %v9692_v27 = vld [vmem:[%s15209_s1 + $0x1f8] sm:$0xff]  }
 0x2b9   :  { %3218 = vmatpush1.bf16.msra.mxu0 %v9692_v27  ;;  %v1338_v27 = vld [vmem:[#allocation2 + $0xaa] sm:$0xff] }
 0x2ba   :  { %8686 = vmatpush3.bf16.msra.mxu1 %v9693_v39  ;;  %v1339_v39 = vld [vmem:[#allocation2 + $0xb2] sm:$0xff] }
 0x2bb   :  { %8687 = vmatprep.subr.bf16.mxu1 %v9694_v42 }
 0x2be   :  { %8688 = vmatpush3.bf16.msra.mxu1 %v9694_v42  ;;  %v1397_v42 = vpack.c.bf16 %v1339_v39, %v1338_v27  ;;  %v1351_v27 = vld [vmem:[#allocation2 + $0x142] sm:$0xff] }
 0x2bf   :  { %3043 = vmatmul.mubr.bf16.gmra.mrb[56].mxu0 %v11052_v26  ;;  %8689 = vmatprep.subr.bf16.mxu1 %v9695_v62 }
 0x2c0   :  { %3050 = vmatprep.mubr.bf16.mxu0 %v11054_v2 }
 0x2c2   :  { %8690 = vmatpush3.bf16.msra.mxu1 %v9695_v62 }
 0x2c3   :  { %6321 = vmatprep.subr.bf16.mxu1 %v15217_v1 }
 0x2c5   :  { %8692 = vmatmul.mubr.bf16.vlgmr.msra.gmra.mrb[0].mxu1 %v1393_v43  ;;  %v1399_v43 = vpack.c.bf16 %v1343_v19, %v1342_v13  ;;  %v1355_v13 = vld [vmem:[#allocation2 + $0x172] sm:$0xff] }
 0x2c6   :  { %8695 = vmatprep.mubr.bf16.mxu1 %v1394_v0  ;;  %v1346_v0 = vld [vmem:[#allocation2 + $0x10a] sm:$0xff] }
 0x2c7   :  { %3051 = vmatmul.mubr.bf16.gmra.mrb[60].mxu0 %v894_v29  ;;  %v1401_v44 = vpack.c.bf16 %v1347_v30, %v1346_v0 }
 0x2c8   :  { %3058 = vmatprep.mubr.bf16.mxu0 %v10865_v8  ;;  %v851_v8 = vld [vmem:[#allocation2 + $0x1f9] sm:$0xff] }
 0x2c9   :  { %v11079_v24 = vpack.c.bf16 %v852_v55, %v851_v8  ;;  %v1344_v8 = vld [vmem:[#allocation2 + $0xf2] sm:$0xff] }
 0x2ca   :  { %v1400_v55 = vpack.c.bf16 %v1345_v41, %v1344_v8  ;;  %v1358_v8 = vld [vmem:[#allocation2 + $0x19a] sm:$0xff]  ;;  %v1359_v41 = vld [vmem:[#allocation2 + $0x1a2] sm:$0xff] }
 0x2cb   :  { %v1407_v0 = vpack.c.bf16 %v1359_v41, %v1358_v8 }
 0x2cd   :  { %8696 = vmatmul.mubr.bf16.gmra.mrb[4].mxu1 %v1395_v61 }
 0x2ce   :  { %8699 = vmatprep.mubr.bf16.mxu1 %v1396_v25  ;;  %v1350_v25 = vld [vmem:[#allocation2 + $0x13a] sm:$0xff] }
 0x2cf   :  { %3059 = vmatmul.mubr.bf16.gmra.mrb[64].mxu0 %v895_v35  ;;  %v1403_v39 = vpack.c.bf16 %v1351_v27, %v1350_v25  ;;  %v1074_v25 = vld [vmem:[#allocation2 + $0x48] sm:$0xff]  ;;  %v1075_v27 = vld [vmem:[#allocation2 + $0x50] sm:$0xff] }
 0x2d0   :  { %3066 = vmatprep.mubr.bf16.mxu0 %v10869_v31  ;;  %v853_v31 = vld [vmem:[#allocation2 + $0x211] sm:$0xff] }
 0x2d1   :  { %v11083_v57 = vpack.c.bf16 %v854_v49, %v853_v31  ;;  %v866_v31 = vld [vmem:[#allocation2 + $0x2a9] sm:$0xff] }
 0x2d5   :  { %8700 = vmatmul.mubr.bf16.gmra.mrb[8].mxu1 %v1397_v42 }
 0x2d6   :  { %8703 = vmatprep.mubr.bf16.mxu1 %v1398_v6  ;;  %v1354_v6 = vld [vmem:[#allocation2 + $0x16a] sm:$0xff] }
 0x2d7   :  { %3067 = vmatmul.mubr.bf16.gmra.mrb[68].mxu0 %v11075_v59  ;;  %v1405_v19 = vpack.c.bf16 %v1355_v13, %v1354_v6  ;;  %v1080_v13 = vld [vmem:[#allocation2 + $0x90] sm:$0xff] }
 0x2d8   :  { %3074 = vmatprep.mubr.bf16.mxu0 %v10873_v4  ;;  %v855_v4 = vld [vmem:[#allocation2 + $0x229] sm:$0xff] }
 0x2d9   :  { %v11087_v29 = vpack.c.bf16 %v856_v58, %v855_v4  ;;  %v1348_v4 = vld [vmem:[#allocation2 + $0x122] sm:$0xff] }
 0x2da   :  { %v1402_v58 = vpack.c.bf16 %v1349_v16, %v1348_v4  ;;  %v1362_v4 = vld [vmem:[#allocation2 + $0x1fa] sm:$0xff]  ;;  %v1363_v16 = vld [vmem:[#allocation2 + $0x202] sm:$0xff] }
 0x2dd   :  { %8704 = vmatmul.mubr.bf16.gmra.mrb[12].mxu1 %v1399_v43 }
 0x2de   :  { %8707 = vmatprep.mubr.bf16.mxu1 %v1400_v55  ;;  %v1006_v55 = vld [vmem:[#allocation2 + $0x33a] sm:$0xff] }
 0x2df   :  { %3075 = vmatmul.mubr.bf16.gmra.mrb[72].mxu0 %v11079_v24 }
 0x2e0   :  { %3082 = vmatprep.mubr.bf16.mxu0 %v10877_v47  ;;  %v857_v47 = vld [vmem:[#allocation2 + $0x241] sm:$0xff] }
 0x2e1   :  { %v11091_v62 = vpack.c.bf16 %v858_v12, %v857_v47  ;;  %v870_v47 = vld [vmem:[#allocation2 + $0x2d9] sm:$0xff] }
 0x2e5   :  { %8708 = vmatmul.mubr.bf16.gmra.mrb[16].mxu1 %v1401_v44  ;;  %v1360_v44 = vld [vmem:[#allocation2 + $0x1e2] sm:$0xff] }
 0x2e6   :  { %8711 = vmatprep.mubr.bf16.mxu1 %v1402_v58 }
 0x2e7   :  { %3083 = vmatmul.mubr.bf16.gmra.mrb[76].mxu0 %v11083_v57 }
 0x2e8   :  { %3090 = vmatprep.mubr.bf16.mxu0 %v10881_v53  ;;  %v859_v53 = vld [vmem:[#allocation2 + $0x259] sm:$0xff] }
 0x2e9   :  { %v11095_v35 = vpack.c.bf16 %v860_v33, %v859_v53  ;;  %v1352_v53 = vld [vmem:[#allocation2 + $0x152] sm:$0xff] }
 0x2ea   :  { %v1404_v33 = vpack.c.bf16 %v1353_v46, %v1352_v53  ;;  %v1367_v53 = vld [vmem:[#allocation2 + $0x232] sm:$0xff] }
 0x2ed   :  { %8712 = vmatmul.mubr.bf16.gmra.mrb[20].mxu1 %v1403_v39  ;;  %v1364_v39 = vld [vmem:[#allocation2 + $0x212] sm:$0xff] }
 0x2ee   :  { %8715 = vmatprep.mubr.bf16.mxu1 %v1404_v33  ;;  %v1079_v33 = vld [vmem:[#allocation2 + $0x80] sm:$0xff] }
 0x2ef   :  { %3091 = vmatmul.mubr.bf16.gmra.mrb[80].mxu0 %v11087_v29 }
 0x2f0   :  { %3098 = vmatprep.mubr.bf16.mxu0 %v10885_v32  ;;  %v861_v32 = vld [vmem:[#allocation2 + $0x271] sm:$0xff] }
 0x2f1   :  { %v11099_v21 = vpack.c.bf16 %v862_v40, %v861_v32  ;;  %v874_v32 = vld [vmem:[#allocation2 + $0x309] sm:$0xff] }
 0x2f5   :  { %8716 = vmatmul.mubr.bf16.gmra.mrb[24].mxu1 %v1405_v19  ;;  %v1368_v19 = vld [vmem:[#allocation2 + $0x242] sm:$0xff] }
 0x2f6   :  { %8719 = vmatprep.mubr.bf16.mxu1 %v11054_v2 }
 0x2f7   :  { %3099 = vmatmul.mubr.bf16.gmra.mrb[84].mxu0 %v11091_v62 }
 0x2f8   :  { %3106 = vmatprep.mubr.bf16.mxu0 %v10889_v38  ;;  %v863_v38 = vld [vmem:[#allocation2 + $0x289] sm:$0xff] }
 0x2f9   :  { %v11103_v61 = vpack.c.bf16 %v864_v11, %v863_v38  ;;  %v876_v38 = vld [vmem:[#allocation2 + $0x321] sm:$0xff]  ;;  %v1005_v11 = vld [vmem:[#allocation2 + $0x332] sm:$0xff] }
 0x2fa   :  { %v11130_v30 = vpack.c.bf16 %v1006_v55, %v1005_v11  ;;  %v1083_v11 = vld [vmem:[#allocation2 + $0xb0] sm:$0xff] }
 0x2fd   :  { %8720 = vmatmul.mubr.bf16.gmra.mrb[28].mxu1 %v1407_v0  ;;  %v1084_v0 = vld [vmem:[#allocation2 + $0xc0] sm:$0xff] }
 0x2ff   :  { %3107 = vmatmul.mubr.bf16.gmra.mrb[88].mxu0 %v11095_v35 }
 0x300   :  { %3114 = vmatprep.mubr.bf16.mxu0 %v10893_v63  ;;  %v865_v63 = vld [vmem:[#allocation2 + $0x2a1] sm:$0xff] }
 0x301   :  { %v11107_v49 = vpack.c.bf16 %v866_v31, %v865_v63  ;;  %v1361_v63 = vld [vmem:[#allocation2 + $0x1ea] sm:$0xff]  ;;  %v1073_v31 = vld [vmem:[#allocation2 + $0x38] sm:$0xff] }
 0x307   :  { %3115 = vmatmul.mubr.bf16.gmra.mrb[92].mxu0 %v11099_v21 }
 0x308   :  { %3122 = vmatprep.mubr.bf16.mxu0 %v10897_v18  ;;  %v867_v18 = vld [vmem:[#allocation2 + $0x2b9] sm:$0xff] }
 0x309   :  { %v11111_v42 = vpack.c.bf16 %v868_v48, %v867_v18  ;;  %v1408_v18 = vpack.c.bf16 %v1361_v63, %v1360_v44  ;;  %v1409_v48 = vpack.c.bf16 %v1363_v16, %v1362_v4  ;;  %v1374_v63 = vld [vmem:[#allocation2 + $0x28a] sm:$0xff]  ;;  %v1087_v16 = vld [vmem:[#allocation2 + $0xe0] sm:$0xff] }
 0x30b   :  { %8723 = vmatprep.mubr.bf16.mxu1 %v1408_v18 }
 0x30c   :  { %8724 = vmatmul.mubr.bf16.gmra.mrb[32].mxu1 %v1409_v48 }
 0x30f   :  { %3123 = vmatmul.mubr.bf16.gmra.mrb[96].mxu0 %v11103_v61 }
 0x310   :  { %3130 = vmatprep.mubr.bf16.mxu0 %v10901_v14  ;;  %v869_v14 = vld [vmem:[#allocation2 + $0x2d1] sm:$0xff] }
 0x311   :  { %v11115_v12 = vpack.c.bf16 %v870_v47, %v869_v14  ;;  %v1365_v14 = vld [vmem:[#allocation2 + $0x21a] sm:$0xff] }
 0x312   :  { %v1410_v47 = vpack.c.bf16 %v1365_v14, %v1364_v39  ;;  %v1379_v39 = vld [vmem:[#allocation2 + $0x2c2] sm:$0xff] }
 0x314   :  { %8727 = vmatprep.mubr.bf16.mxu1 %v1410_v47  ;;  %v1091_v47 = vld [vmem:[#allocation2 + $0x110] sm:$0xff] }
 0x317   :  { %3131 = vmatmul.mubr.bf16.gmra.mrb[100].mxu0 %v11107_v49 }
 0x318   :  { %3138 = vmatprep.mubr.bf16.mxu0 %v10905_v36  ;;  %v871_v36 = vld [vmem:[#allocation2 + $0x2e9] sm:$0xff] }
 0x319   :  { %v11119_v43 = vpack.c.bf16 %v872_v56, %v871_v36  ;;  %v1366_v36 = vld [vmem:[#allocation2 + $0x22a] sm:$0xff] }
 0x31a   :  { %v1411_v46 = vpack.c.bf16 %v1367_v53, %v1366_v36  ;;  %v1092_v53 = vld [vmem:[#allocation2 + $0x120] sm:$0xff] }
 0x31c   :  { %8728 = vmatmul.mubr.bf16.gmra.mrb[36].mxu1 %v1411_v46  ;;  %v1380_v46 = vld [vmem:[#allocation2 + $0x2d2] sm:$0xff] }
 0x31f   :  { %3139 = vmatmul.mubr.bf16.gmra.mrb[104].mxu0 %v11111_v42 }
 0x320   :  { %3146 = vmatprep.mubr.bf16.mxu0 %v10909_v22  ;;  %v873_v22 = vld [vmem:[#allocation2 + $0x301] sm:$0xff] }
 0x321   :  { %v11124_v40 = vpack.c.bf16 %v874_v32, %v873_v22  ;;  %v1369_v22 = vld [vmem:[#allocation2 + $0x24a] sm:$0xff] }
 0x322   :  { %v1412_v32 = vpack.c.bf16 %v1369_v22, %v1368_v19  ;;  %v1095_v22 = vld [vmem:[#allocation2 + $0x140] sm:$0xff] }
 0x324   :  { %8731 = vmatprep.mubr.bf16.mxu1 %v1412_v32 }
 0x327   :  { %3147 = vmatmul.mubr.bf16.gmra.mrb[108].mxu0 %v11115_v12 }
 0x328   :  { %3154 = vmatprep.mubr.bf16.mxu0 %v10913_v10  ;;  %v875_v10 = vld [vmem:[#allocation2 + $0x319] sm:$0xff] }
 0x329   :  { %v11128_v2 = vpack.c.bf16 %v876_v38, %v875_v10  ;;  %v1370_v10 = vld [vmem:[#allocation2 + $0x25a] sm:$0xff]  ;;  %v1371_v38 = vld [vmem:[#allocation2 + $0x262] sm:$0xff] }
 0x32a   :  { %v1413_v8 = vpack.c.bf16 %v1371_v38, %v1370_v10 }
 0x32c   :  { %8732 = vmatmul.mubr.bf16.gmra.mrb[40].mxu1 %v1413_v8  ;;  %v1096_v8 = vld [vmem:[#allocation2 + $0x150] sm:$0xff] }
 0x32f   :  { %3155 = vmatmul.mubr.bf16.gmra.mrb[112].mxu0 %v11119_v43 }
 0x330   :  { %3162 = vmatprep.mubr.bf16.mxu0 %v10917_v34  ;;  %v910_v34 = vpack.c.bf16 %v10851_v23, %v10846_v45  ;;  %v1137_v45 = vpack.c.bf16 %v1075_v27, %v1074_v25  ;;  %v1076_v23 = vld [vmem:[#allocation2 + $0x60] sm:$0xff]  ;;  %v1377_v27 = vld [vmem:[#allocation2 + $0x2aa] sm:$0xff] }
 0x331   :  { %v1376_v25 = vld [vmem:[#allocation2 + $0x2a2] sm:$0xff] }
 0x337   :  { %3163 = vmatmul.mubr.bf16.gmra.mrb[116].mxu0 %v11124_v40 }
 0x338   :  { %3170 = vmatprep.mubr.bf16.mxu0 %v10920_v60  ;;  %v1072_v60 = vld [vmem:[#allocation2 + $0x30] sm:$0xff] }
 0x339   :  { %v1136_v58 = vpack.c.bf16 %v1073_v31, %v1072_v60  ;;  %v1373_v60 = vld [vmem:[#allocation2 + $0x27a] sm:$0xff]  ;;  %v1375_v31 = vld [vmem:[#allocation2 + $0x292] sm:$0xff] }
 0x33a   :  { %v1415_v18 = vpack.c.bf16 %v1375_v31, %v1374_v63  ;;  %v1228_v63 = vld [vmem:[#allocation2 + $0x181] sm:$0xff] }
 0x33f   :  { %3171 = vmatmul.mubr.bf16.gmra.mrb[120].mxu0 %v11128_v2 }
 0x340   :  { %3178 = vmatprep.mubr.bf16.mxu0 %v11130_v30 }
 0x347   :  { %3179 = vmatmul.mubr.bf16.gmra.mrb[124].mxu0 %v910_v34  ;;  %v1372_v34 = vld [vmem:[#allocation2 + $0x272] sm:$0xff] }
 0x348   :  { %3219 = vmatprep.mubr.bf16.mxu0 %v10932_v9  ;;  %v1077_v9 = vld [vmem:[#allocation2 + $0x68] sm:$0xff]  ;;  %v1414_v44 = vpack.c.bf16 %v1373_v60, %v1372_v34 }
 0x349   :  { %v1138_v56 = vpack.c.bf16 %v1077_v9, %v1076_v23  ;;  %v1378_v23 = vld [vmem:[#allocation2 + $0x2ba] sm:$0xff]  ;;  %v1387_v34 = vld [vmem:[#allocation2 + $0x322] sm:$0xff] }
 0x34a   :  { %8735 = vmatprep.mubr.bf16.mxu1 %v1414_v44  ;;  %v1417_v14 = vpack.c.bf16 %v1379_v39, %v1378_v23  ;;  %v1099_v44 = vld [vmem:[#allocation2 + $0x170] sm:$0xff] }
 0x34b   :  { %8736 = vmatmul.mubr.bf16.gmra.mrb[44].mxu1 %v1415_v18  ;;  %v1391_v23 = vld [vmem:[#allocation2 + $0x352] sm:$0xff] }
 0x34f   :  { %3220 = vmatmul.mubr.bf16.vlgmr.msra.gmra.mrb[0].mxu0 %v1136_v58  ;;  %v1088_v58 = vld [vmem:[#allocation2 + $0xf0] sm:$0xff] }
 0x350   :  { %3227 = vmatprep.mubr.bf16.mxu0 %v10944_v5  ;;  %v1078_v5 = vld [vmem:[#allocation2 + $0x78] sm:$0xff] }
 0x351   :  { %v1139_v6 = vpack.c.bf16 %v1079_v33, %v1078_v5  ;;  %v1382_v33 = vld [vmem:[#allocation2 + $0x2ea] sm:$0xff] }
 0x357   :  { %3228 = vmatmul.mubr.bf16.gmra.mrb[4].mxu0 %v1137_v45  ;;  %v1416_v45 = vpack.c.bf16 %v1377_v27, %v1376_v25  ;;  %v1230_v25 = vld [vmem:[#allocation2 + $0x199] sm:$0xff] }
 0x358   :  { %3235 = vmatprep.mubr.bf16.mxu0 %v10956_v7  ;;  %v1081_v7 = vld [vmem:[#allocation2 + $0x98] sm:$0xff] }
 0x359   :  { %v1140_v41 = vpack.c.bf16 %v1081_v7, %v1080_v13  ;;  %8739 = vmatprep.mubr.bf16.mxu1 %v1416_v45 }
 0x35a   :  { %8740 = vmatmul.mubr.bf16.gmra.mrb[48].mxu1 %v1417_v14 }
 0x35f   :  { %3236 = vmatmul.mubr.bf16.gmra.mrb[8].mxu0 %v1138_v56  ;;  %v1381_v56 = vld [vmem:[#allocation2 + $0x2da] sm:$0xff] }
 0x360   :  { %3243 = vmatprep.mubr.bf16.mxu0 %v10968_v51  ;;  %v1082_v51 = vld [vmem:[#allocation2 + $0xa8] sm:$0xff]  ;;  %v1418_v5 = vpack.c.bf16 %v1381_v56, %v1380_v46  ;;  %v1104_v46 = vld [vmem:[#allocation2 + $0x1e0] sm:$0xff] }
 0x361   :  { %v1141_v55 = vpack.c.bf16 %v1083_v11, %v1082_v51  ;;  %v1384_v51 = vld [vmem:[#allocation2 + $0x302] sm:$0xff]  ;;  %v1385_v11 = vld [vmem:[#allocation2 + $0x30a] sm:$0xff] }
 0x362   :  { %8743 = vmatprep.mubr.bf16.mxu1 %v1418_v5  ;;  %v1105_v56 = vld [vmem:[#allocation2 + $0x1e8] sm:$0xff]  ;;  %v1106_v5 = vld [vmem:[#allocation2 + $0x1f8] sm:$0xff] }
 0x367   :  { %3244 = vmatmul.mubr.bf16.gmra.mrb[12].mxu0 %v1139_v6  ;;  %v1383_v6 = vld [vmem:[#allocation2 + $0x2f2] sm:$0xff] }
 0x368   :  { %3251 = vmatprep.mubr.bf16.mxu0 %v10980_v52  ;;  %v1085_v52 = vld [vmem:[#allocation2 + $0xc8] sm:$0xff]  ;;  %v1419_v13 = vpack.c.bf16 %v1383_v6, %v1382_v33  ;;  %v1107_v33 = vld [vmem:[#allocation2 + $0x200] sm:$0xff] }
 0x369   :  { %v1142_v4 = vpack.c.bf16 %v1085_v52, %v1084_v0  ;;  %v1386_v0 = vld [vmem:[#allocation2 + $0x31a] sm:$0xff]  ;;  %v1098_v52 = vld [vmem:[#allocation2 + $0x168] sm:$0xff] }
 0x36a   :  { %8744 = vmatmul.mubr.bf16.gmra.mrb[52].mxu1 %v1419_v13  ;;  %v1421_v60 = vpack.c.bf16 %v1387_v34, %v1386_v0  ;;  %v1113_v34 = vld [vmem:[#allocation2 + $0x248] sm:$0xff] }
 0x36f   :  { %3252 = vmatmul.mubr.bf16.gmra.mrb[16].mxu0 %v1140_v41  ;;  %v1097_v41 = vld [vmem:[#allocation2 + $0x158] sm:$0xff] }
 0x370   :  { %3259 = vmatprep.mubr.bf16.mxu0 %v10989_v3  ;;  %v1086_v3 = vld [vmem:[#allocation2 + $0xd8] sm:$0xff] }
 0x371   :  { %v1143_v48 = vpack.c.bf16 %v1087_v16, %v1086_v3 }
 0x377   :  { %3260 = vmatmul.mubr.bf16.gmra.mrb[20].mxu0 %v1141_v55  ;;  %v1148_v55 = vpack.c.bf16 %v1097_v41, %v1096_v8  ;;  %v1111_v41 = vld [vmem:[#allocation2 + $0x230] sm:$0xff] }
 0x378   :  { %3267 = vmatprep.mubr.bf16.mxu0 %v10997_v20  ;;  %v1089_v20 = vld [vmem:[#allocation2 + $0xf8] sm:$0xff] }
 0x379   :  { %v1144_v9 = vpack.c.bf16 %v1089_v20, %v1088_v58  ;;  %v1100_v58 = vld [vmem:[#allocation2 + $0x180] sm:$0xff]  ;;  %v1390_v20 = vld [vmem:[#allocation2 + $0x34a] sm:$0xff] }
 0x37a   :  { %v1423_v39 = vpack.c.bf16 %v1391_v23, %v1390_v20 }
 0x37f   :  { %3268 = vmatmul.mubr.bf16.gmra.mrb[24].mxu0 %v1142_v4  ;;  %v1149_v4 = vpack.c.bf16 %v1099_v44, %v1098_v52  ;;  %v1115_v52 = vld [vmem:[#allocation2 + $0x260] sm:$0xff] }
 0x380   :  { %3275 = vmatprep.mubr.bf16.mxu0 %v11001_v54  ;;  %v1090_v54 = vld [vmem:[#allocation2 + $0x108] sm:$0xff] }
 0x381   :  { %v1145_v36 = vpack.c.bf16 %v1091_v47, %v1090_v54  ;;  %v9772_v54 = vld [vmem:[#allocation2] sm:$0xff] }
 0x382   :  { %v11171_v47 = vpack.c.bf16 %v9772_v54, %v9772_v54 }
 0x387   :  { %3276 = vmatmul.mubr.bf16.gmra.mrb[28].mxu0 %v1143_v48 }
 0x388   :  { %3283 = vmatprep.mubr.bf16.mxu0 %v11009_v37  ;;  %v1093_v37 = vld [vmem:[#allocation2 + $0x128] sm:$0xff] }
 0x389   :  { %v1146_v19 = vpack.c.bf16 %v1093_v37, %v1092_v53  ;;  %v1152_v37 = vpack.c.bf16 %v1105_v56, %v1104_v46  ;;  %v1123_v46 = vld [vmem:[#allocation2 + $0x2c0] sm:$0xff] }
 0x38f   :  { %3284 = vmatmul.mubr.bf16.gmra.mrb[32].mxu0 %v1144_v9 }
 0x390   :  { %3291 = vmatprep.mubr.bf16.mxu0 %v11013_v50  ;;  %v1094_v50 = vld [vmem:[#allocation2 + $0x138] sm:$0xff] }
 0x391   :  { %v1147_v10 = vpack.c.bf16 %v1095_v22, %v1094_v50 }
 0x397   :  { %3292 = vmatmul.mubr.bf16.gmra.mrb[36].mxu0 %v1145_v36 }
 0x398   :  { %3299 = vmatprep.mubr.bf16.mxu0 %v11021_v15  ;;  %v11148_v7 = vpop.f32.mrb[0].mxu1 }
 0x399   :  { %v11150_v32 = vpop.f32.mrb[1].mxu1 }
 0x39a   :  { %v11152_v38 = vpop.f32.mrb[2].mxu1 }
 0x39b   :  { %v11154_v15 = vpop.f32.mrb[3].mxu1 }
 0x39f   :  { %3300 = vmatmul.mubr.bf16.gmra.mrb[40].mxu0 %v1146_v19  ;;  %v1153_v19 = vpack.c.bf16 %v1107_v33, %v1106_v5 }
 0x3a0   :  { %3307 = vmatprep.mubr.bf16.mxu0 %v11028_v17  ;;  %v1420_v17 = vpack.c.bf16 %v1385_v11, %v1384_v51  ;;  %v11159_v31 = vpop.f32.mrb[4].mxu1 }
 0x3a1   :  { %v11161_v18 = vpop.f32.mrb[5].mxu1 }
 0x3a2   :  { %8747 = vmatprep.mubr.bf16.mxu1 %v1420_v17  ;;  %v11163_v3 = vpop.f32.mrb[6].mxu1 }
 0x3a3   :  { %8748 = vmatmul.mubr.bf16.gmra.mrb[56].mxu1 %v1421_v60  ;;  %v11165_v48 = vpop.f32.mrb[7].mxu1 }
 0x3a4   :  { %8751 = vmatprep.mubr.bf16.mxu1 %v11130_v30  ;;  %v1101_v30 = vld [vmem:[#allocation2 + $0x188] sm:$0xff] }
 0x3a5   :  { %v1150_v27 = vpack.c.bf16 %v1101_v30, %v1100_v58  ;;  %v1117_v58 = vld [vmem:[#allocation2 + $0x278] sm:$0xff] }
 0x3a7   :  { %3308 = vmatmul.mubr.bf16.gmra.mrb[44].mxu0 %v1147_v10  ;;  %v1109_v10 = vld [vmem:[#allocation2 + $0x218] sm:$0xff] }
 0x3a8   :  { %3315 = vmatprep.mubr.bf16.mxu0 %v11042_v28  ;;  %v1229_v28 = vld [vmem:[#allocation2 + $0x189] sm:$0xff]  ;;  %v11167_v14 = vpop.f32.mrb[8].mxu1 }
 0x3a9   :  { %v1278_v16 = vpack.c.bf16 %v1229_v28, %v1228_v63  ;;  %v11169_v9 = vpop.f32.mrb[9].mxu1 }
 0x3aa   :  { %v11173_v36 = vpop.f32.mrb[10].mxu1 }
 0x3ab   :  { %8752 = vmatmul.mubr.bf16.gmra.mrb[60].mxu1 %v1423_v39  ;;  %v11175_v53 = vpop.f32.mrb[11].mxu1  ;;  %v1121_v39 = vld [vmem:[#allocation2 + $0x2a8] sm:$0xff] }
 0x3af   :  { %3316 = vmatmul.mubr.bf16.gmra.mrb[48].mxu0 %v1148_v55 }
 0x3b0   :  { %3323 = vmatprep.mubr.bf16.mxu0 %v11052_v26  ;;  %v1231_v26 = vld [vmem:[#allocation2 + $0x1a1] sm:$0xff]  ;;  %v11180_v6 = vpop.f32.mrb[12].mxu1 }
 0x3b1   :  { %v1279_v45 = vpack.c.bf16 %v1231_v26, %v1230_v25  ;;  %v11182_v13 = vpop.f32.mrb[13].mxu1  ;;  %v1119_v25 = vld [vmem:[#allocation2 + $0x290] sm:$0xff] }
 0x3b2   :  { %v11184_v50 = vpop.f32.mrb[14].mxu1 }
 0x3b3   :  { %v11186_v22 = vpop.f32.mrb[15].mxu1 }
 0x3b7   :  { %3324 = vmatmul.mubr.bf16.gmra.mrb[52].mxu0 %v1149_v4 }
 0x3b8   :  { %3331 = vmatprep.mubr.bf16.mxu0 %v1278_v16  ;;  %v11190_v51 = vpop.f32.mrb[16].mxu1 }
 0x3b9   :  { %v11192_v11 = vpop.f32.mrb[17].mxu1 }
 0x3ba   :  { %v11194_v17 = vpop.f32.mrb[18].mxu1 }
 0x3bb   :  { %v11196_v0 = vpop.f32.mrb[19].mxu1 }
 0x3bf   :  { %3332 = vmatmul.mubr.bf16.gmra.mrb[56].mxu0 %v1150_v27 }
 0x3c0   :  { %3339 = vmatprep.mubr.bf16.mxu0 %v1279_v45  ;;  %v11200_v44 = vpop.f32.mrb[20].mxu1 }
 0x3c1   :  { %v11202_v63 = vpop.f32.mrb[21].mxu1 }
 0x3c2   :  { %v11204_v4 = vpop.f32.mrb[22].mxu1 }
 0x3c3   :  { %v11206_v16 = vpop.f32.mrb[23].mxu1 }
 0x3c7   :  { %3340 = vmatmul.mubr.bf16.gmra.mrb[60].mxu0 %v11171_v47 }
 0x3c8   :  { %3347 = vmatprep.mubr.bf16.mxu0 %v11075_v59  ;;  %v1108_v59 = vld [vmem:[#allocation2 + $0x210] sm:$0xff]  ;;  %v11210_v26 = vpop.f32.mrb[24].mxu1 }
 0x3c9   :  { %v1154_v8 = vpack.c.bf16 %v1109_v10, %v1108_v59  ;;  %v11212_v27 = vpop.f32.mrb[25].mxu1  ;;  %v1125_v59 = vld [vmem:[#allocation2 + $0x2d8] sm:$0xff] }
 0x3ca   :  { %v11214_v45 = vpop.f32.mrb[26].mxu1 }
 0x3cb   :  { %v11216_v23 = vpop.f32.mrb[27].mxu1 }
 0x3cf   :  { %3348 = vmatmul.mubr.bf16.gmra.mrb[64].mxu0 %v1152_v37 }
 0x3d0   :  { %3355 = vmatprep.mubr.bf16.mxu0 %v11079_v24  ;;  %v1110_v24 = vld [vmem:[#allocation2 + $0x228] sm:$0xff]  ;;  %v11220_v56 = vpop.f32.mrb[28].mxu1 }
 0x3d1   :  { %v1155_v55 = vpack.c.bf16 %v1111_v41, %v1110_v24  ;;  %v11222_v37 = vpop.f32.mrb[29].mxu1 }
 0x3d2   :  { %v11224_v33 = vpop.f32.mrb[30].mxu1 }
 0x3d7   :  { %3356 = vmatmul.mubr.bf16.gmra.mrb[68].mxu0 %v1153_v19  ;;  %v11226_v19 = vpop.f32.mrb[31].mxu1 }
 0x3d8   :  { %3363 = vmatprep.mubr.bf16.mxu0 %v11083_v57  ;;  %v1112_v57 = vld [vmem:[#allocation2 + $0x240] sm:$0xff] }
 0x3d9   :  { %v1156_v60 = vpack.c.bf16 %v1113_v34, %v1112_v57 }
 0x3df   :  { %3364 = vmatmul.mubr.bf16.gmra.mrb[72].mxu0 %v1154_v8  ;;  %v1127_v8 = vld [vmem:[#allocation2 + $0x2f0] sm:$0xff]  ;;  %v11230_v24 = vpop.f32.mrb[32].mxu1 }
 0x3e0   :  { %3371 = vmatprep.mubr.bf16.mxu0 %v11087_v29  ;;  %v1114_v29 = vld [vmem:[#allocation2 + $0x258] sm:$0xff] }
 0x3e1   :  { %v1157_v28 = vpack.c.bf16 %v1115_v52, %v1114_v29 }
 0x3e7   :  { %3372 = vmatmul.mubr.bf16.gmra.mrb[76].mxu0 %v1155_v55  ;;  %v11232_v55 = vpop.f32.mrb[33].mxu1 }
 0x3e8   :  { %3379 = vmatprep.mubr.bf16.mxu0 %v11091_v62  ;;  %v1116_v62 = vld [vmem:[#allocation2 + $0x270] sm:$0xff]  ;;  %v11237_v29 = vpop.f32.mrb[34].mxu1 }
 0x3e9   :  { %v1158_v30 = vpack.c.bf16 %v1117_v58, %v1116_v62  ;;  %v11239_v52 = vpop.f32.mrb[35].mxu1  ;;  %v1128_v62 = vld [vmem:[#allocation2 + $0x300] sm:$0xff]  ;;  %v1129_v58 = vld [vmem:[#allocation2 + $0x308] sm:$0xff] }
 0x3ef   :  { %3380 = vmatmul.mubr.bf16.gmra.mrb[80].mxu0 %v1156_v60 }
 0x3f0   :  { %3387 = vmatprep.mubr.bf16.mxu0 %v11095_v35  ;;  %v1118_v35 = vld [vmem:[#allocation2 + $0x288] sm:$0xff] }
 0x3f1   :  { %v1159_v20 = vpack.c.bf16 %v1119_v25, %v1118_v35  ;;  %v1164_v25 = vpack.c.bf16 %v1129_v58, %v1128_v62  ;;  %v1263_v62 = vld [vmem:[#allocation2 + $0x351] sm:$0xff] }
 0x3f7   :  { %3388 = vmatmul.mubr.bf16.gmra.mrb[84].mxu0 %v1157_v28 }
 0x3f8   :  { %3395 = vmatprep.mubr.bf16.mxu0 %v11099_v21  ;;  %v1120_v21 = vld [vmem:[#allocation2 + $0x2a0] sm:$0xff] }
 0x3f9   :  { %v1160_v54 = vpack.c.bf16 %v1121_v39, %v1120_v21 }
 0x3ff   :  { %3396 = vmatmul.mubr.bf16.gmra.mrb[88].mxu0 %v1158_v30 }
 0x400   :  { %3403 = vmatprep.mubr.bf16.mxu0 %v11103_v61  ;;  %v1122_v61 = vld [vmem:[#allocation2 + $0x2b8] sm:$0xff] }
 0x401   :  { %v1161_v5 = vpack.c.bf16 %v1123_v46, %v1122_v61  ;;  %v1260_v61 = vld [vmem:[#allocation2 + $0x331] sm:$0xff]  ;;  %v11252_v46 = vpop.f32.mrb[36].mxu1 }
 0x407   :  { %3404 = vmatmul.mubr.bf16.gmra.mrb[92].mxu0 %v1159_v20 }
 0x408   :  { %3411 = vmatprep.mubr.bf16.mxu0 %v11107_v49  ;;  %v1124_v49 = vld [vmem:[#allocation2 + $0x2d0] sm:$0xff] }
 0x409   :  { %v1162_v10 = vpack.c.bf16 %v1125_v59, %v1124_v49  ;;  %v11254_v49 = vpop.f32.mrb[37].mxu1 }
 0x40f   :  { %3412 = vmatmul.mubr.bf16.gmra.mrb[96].mxu0 %v1160_v54  ;;  %v1131_v54 = vld [vmem:[#allocation2 + $0x320] sm:$0xff] }
 0x410   :  { %3419 = vmatprep.mubr.bf16.mxu0 %v11111_v42  ;;  %v1126_v42 = vld [vmem:[#allocation2 + $0x2e8] sm:$0xff] }
 0x411   :  { %v1163_v60 = vpack.c.bf16 %v1127_v8, %v1126_v42 }
 0x417   :  { %3420 = vmatmul.mubr.bf16.gmra.mrb[100].mxu0 %v1161_v5 }
 0x418   :  { %3427 = vmatprep.mubr.bf16.mxu0 %v11115_v12 }
 0x41f   :  { %3428 = vmatmul.mubr.bf16.gmra.mrb[104].mxu0 %v1162_v10 }
 0x420   :  { %3435 = vmatprep.mubr.bf16.mxu0 %v11119_v43 }
 0x422   :  { %v3221_v41 = vpop.f32.mrb[0].mxu0 }
 0x423   :  { %v11235_v57 = vadd.f32 %v11150_v32, %v3221_v41  ;;  %v3223_v34 = vpop.f32.mrb[1].mxu0 }
 0x424   :  { %v3224_v12 = vpop.f32.mrb[2].mxu0 }
 0x425   :  { %15360 = vst [vmem:[#allocation8_spill] sm:$0xff] %v11235_v57  ;;  %v11242_v28 = vadd.f32 %v11154_v15, %v3224_v12  ;;  %v3226_v43 = vpop.f32.mrb[3].mxu0  ;;  %v1130_v15 = vld [vmem:[#allocation2 + $0x318] sm:$0xff] }
 0x426   :  { %v1165_v10 = vpack.c.bf16 %v1131_v54, %v1130_v15  ;;  %v1133_v12 = vld [vmem:[#allocation2 + $0x338] sm:$0xff]  ;;  %v1262_v43 = vld [vmem:[#allocation2 + $0x349] sm:$0xff] }
 0x427   :  { %15361 = vst [vmem:[#allocation9_spill] sm:$0xff] %v11242_v28  ;;  %3436 = vmatmul.mubr.bf16.gmra.mrb[108].mxu0 %v1163_v60  ;;  %v1132_v60 = vld [vmem:[#allocation2 + $0x330] sm:$0xff] }
 0x428   :  { %3443 = vmatprep.mubr.bf16.mxu0 %v11124_v40  ;;  %v1261_v40 = vld [vmem:[#allocation2 + $0x339] sm:$0xff] }
 0x429   :  { %v1294_v8 = vpack.c.bf16 %v1261_v40, %v1260_v61 }
 0x42a   :  { %v3229_v30 = vpop.f32.mrb[4].mxu0 }
 0x42b   :  { %v11246_v32 = vadd.f32 %v11148_v7, %v3229_v30  ;;  %v3231_v35 = vpop.f32.mrb[5].mxu0 }
 0x42c   :  { %v3232_v20 = vpop.f32.mrb[6].mxu0  ;;  %v1166_v35 = vpack.c.bf16 %v1133_v12, %v1132_v60 }
 0x42d   :  { %v11249_v21 = vadd.f32 %v11152_v38, %v3232_v20  ;;  %v3234_v39 = vpop.f32.mrb[7].mxu0  ;;  %v11259_v38 = vpop.f32.mrb[38].mxu1  ;;  %v1295_v20 = vpack.c.bf16 %v1263_v62, %v1262_v43  ;;  %v9696_v62 = vld [vmem:[%s15210_s2] sm:$0xff]  }
 0x42e   :  { %v11261_v41 = vpop.f32.mrb[39].mxu1  ;;  %6322 = vmatpush1.bf16.msra.mxu1 %v9696_v62  ;;  %v9698_v62 = vld [vmem:[%s15210_s2 + $0x10] sm:$0xff]  }
 0x42f   :  { %15362 = vst [vmem:[#allocation10_spill] sm:$0xff] %v11249_v21  ;;  %3444 = vmatmul.mubr.bf16.gmra.mrb[112].mxu0 %v1164_v25  ;;  %v11272_v15 = vpop.f32.mrb[40].mxu1  ;;  %6323 = vmatprep.subr.bf16.mxu1 %v15217_v1 }
 0x430   :  { %3451 = vmatprep.mubr.bf16.mxu0 %v11128_v2  ;;  %v11274_v61 = vpop.f32.mrb[41].mxu1 }
 0x432   :  { %v3237_v5 = vpop.f32.mrb[8].mxu0 }
 0x433   :  { %v11257_v7 = vadd.f32 %v11161_v18, %v3237_v5  ;;  %v3239_v59 = vpop.f32.mrb[9].mxu0  ;;  %v11279_v5 = vpop.f32.mrb[42].mxu1 }
 0x434   :  { %v3240_v42 = vpop.f32.mrb[10].mxu0 }
 0x435   :  { %15363 = vst [vmem:[#allocation11_spill] sm:$0xff] %v11257_v7  ;;  %v11264_v2 = vadd.f32 %v11165_v48, %v3240_v42  ;;  %v3242_v34 = vpop.f32.mrb[11].mxu0 }
 0x437   :  { %15364 = vst [vmem:[#allocation12_spill] sm:$0xff] %v11264_v2  ;;  %3452 = vmatmul.mubr.bf16.gmra.mrb[116].mxu0 %v1165_v10  ;;  %v11281_v10 = vpop.f32.mrb[43].mxu1 }
 0x438   :  { %3459 = vmatprep.mubr.bf16.mxu0 %v1294_v8 }
 0x43a   :  { %v3245_v18 = vpop.f32.mrb[12].mxu0 }
 0x43b   :  { %v11267_v58 = vadd.f32 %v11159_v31, %v3245_v18  ;;  %v3247_v30 = vpop.f32.mrb[13].mxu0  ;;  %v11296_v18 = vpop.f32.mrb[44].mxu1 }
 0x43c   :  { %v3248_v25 = vpop.f32.mrb[14].mxu0  ;;  %v11298_v30 = vpop.f32.mrb[45].mxu1 }
 0x43d   :  { %15365 = vst [vmem:[#allocation13_spill] sm:$0xff] %v11267_v58  ;;  %v11270_v39 = vadd.f32 %v11163_v3, %v3248_v25  ;;  %v3250_v48 = vpop.f32.mrb[15].mxu0 }
 0x43f   :  { %15366 = vst [vmem:[#allocation14_spill] sm:$0xff] %v11270_v39  ;;  %3460 = vmatmul.mubr.bf16.gmra.mrb[120].mxu0 %v1166_v35  ;;  %v11303_v35 = vpop.f32.mrb[46].mxu1 }
 0x440   :  { %3467 = vmatprep.mubr.bf16.mxu0 %v1295_v20 }
 0x442   :  { %v3253_v54 = vpop.f32.mrb[16].mxu0 }
 0x443   :  { %v11277_v40 = vadd.f32 %v11169_v9, %v3253_v54  ;;  %v3255_v31 = vpop.f32.mrb[17].mxu0  ;;  %v9697_v54 = vld [vmem:[%s15210_s2 + $0x8] sm:$0xff]  }
 0x444   :  { %v3256_v59 = vpop.f32.mrb[18].mxu0  ;;  %6324 = vmatpush1.bf16.msra.mxu1 %v9697_v54 }
 0x445   :  { %15367 = vst [vmem:[#allocation15_spill] sm:$0xff] %v11277_v40  ;;  %v11284_v3 = vadd.f32 %v11175_v53, %v3256_v59  ;;  %v3258_v42 = vpop.f32.mrb[19].mxu0  ;;  %6325 = vmatprep.subr.bf16.mxu1 %v15217_v1 }
 0x447   :  { %15368 = vst [vmem:[#allocation16_spill] sm:$0xff] %v11284_v3  ;;  %3468 = vmatmul.mubr.bf16.gmra.mrb[124].mxu0 %v11171_v47 }
 0x448   :  { %6326 = vmatpush1.bf16.msra.mxu1 %v9698_v62 }
 0x449   :  { %6327 = vmatprep.subr.bf16.mxu1 %v15217_v1  ;;  %v3842_v1 = vmul.f32 %v11264_v2, %v11264_v2 }
 0x44a   :  { %v3261_v8 = vpop.f32.mrb[20].mxu0 }
 0x44b   :  { %v11288_v34 = vadd.f32 %v11167_v14, %v3261_v8  ;;  %v3263_v60 = vpop.f32.mrb[21].mxu0 }
 0x44c   :  { %v3264_v12 = vpop.f32.mrb[22].mxu0 }
 0x44d   :  { %15369 = vst [vmem:[#allocation17_spill] sm:$0xff] %v11288_v34  ;;  %v11291_v9 = vadd.f32 %v11173_v36, %v3264_v12  ;;  %v3266_v43 = vpop.f32.mrb[23].mxu0  ;;  %v11305_v36 = vpop.f32.mrb[47].mxu1  ;;  %v3837_v12 = vmul.f32 %v11235_v57, %v11235_v57 }
 0x44e   :  { %v3767_v43 = vadd.f32 %v11242_v28, %v11235_v57  ;;  %v3840_v57 = vmul.f32 %v11249_v21, %v11249_v21 }
 0x44f   :  { %15370 = vst [vmem:[#allocation18_spill] sm:$0xff] %v11291_v9 }
 0x452   :  { %v3269_v53 = vpop.f32.mrb[24].mxu0 }
 0x453   :  { %v11301_v47 = vadd.f32 %v11182_v13, %v3269_v53  ;;  %v3271_v14 = vpop.f32.mrb[25].mxu0  ;;  %v11332_v53 = vpop.f32.mrb[48].mxu1 }
 0x454   :  { %v3272_v25 = vpop.f32.mrb[26].mxu0  ;;  %v11334_v14 = vpop.f32.mrb[49].mxu1 }
 0x455   :  { %15371 = vst [vmem:[#allocation19_spill] sm:$0xff] %v11301_v47  ;;  %v11309_v20 = vadd.f32 %v11186_v22, %v3272_v25  ;;  %v3274_v48 = vpop.f32.mrb[27].mxu0  ;;  %v3838_v22 = vmul.f32 %v11242_v28, %v11242_v28 }
 0x456   :  { %v3768_v48 = vadd.f32 %v3767_v43, %v11246_v32  ;;  %v3841_v43 = vmul.f32 %v11257_v7, %v11257_v7 }
 0x457   :  { %15372 = vst [vmem:[#allocation20_spill] sm:$0xff] %v11309_v20  ;;  %v3901_v25 = vadd.f32 %v3838_v22, %v3837_v12 }
 0x45a   :  { %v3277_v31 = vpop.f32.mrb[28].mxu0 }
 0x45b   :  { %v11315_v13 = vadd.f32 %v11180_v6, %v3277_v31  ;;  %v3279_v59 = vpop.f32.mrb[29].mxu0  ;;  %v3839_v6 = vmul.f32 %v11246_v32, %v11246_v32 }
 0x45c   :  { %v3280_v42 = vpop.f32.mrb[30].mxu0  ;;  %v11340_v59 = vpop.f32.mrb[50].mxu1 }
 0x45d   :  { %15373 = vst [vmem:[#allocation21_spill] sm:$0xff] %v11315_v13  ;;  %v11319_v8 = vadd.f32 %v11184_v50, %v3280_v42  ;;  %v3282_v60 = vpop.f32.mrb[31].mxu0  ;;  %v3902_v28 = vadd.f32 %v3901_v25, %v3839_v6 }
 0x45e   :  { %v11342_v60 = vpop.f32.mrb[51].mxu1 }
 0x45f   :  { %15374 = vst [vmem:[#allocation22_spill] sm:$0xff] %v11319_v8  ;;  %v3903_v62 = vadd.f32 %v3902_v28, %v3840_v57  ;;  %v3843_v28 = vmul.f32 %v11267_v58, %v11267_v58 }
 0x461   :  { %v3904_v25 = vadd.f32 %v3903_v62, %v3841_v43 }
 0x462   :  { %v3285_v50 = vpop.f32.mrb[32].mxu0 }
 0x463   :  { %v11338_v54 = vadd.f32 %v11192_v11, %v3285_v50  ;;  %v3287_v31 = vpop.f32.mrb[33].mxu0  ;;  %v3769_v11 = vadd.f32 %v3768_v48, %v11249_v21  ;;  %v3905_v62 = vadd.f32 %v3904_v25, %v3842_v1  ;;  %v3845_v1 = vmul.f32 %v11277_v40, %v11277_v40 }
 0x464   :  { %v3288_v42 = vpop.f32.mrb[34].mxu0  ;;  %v9699_v31 = vld [vmem:[%s15210_s2 + $0x18] sm:$0xff]  }
 0x465   :  { %v11348_v22 = vadd.f32 %v11196_v0, %v3288_v42  ;;  %v3290_v12 = vpop.f32.mrb[35].mxu0  ;;  %v3770_v50 = vadd.f32 %v3769_v11, %v11257_v7  ;;  %6328 = vmatpush1.bf16.msra.mxu1 %v9699_v31  ;;  %v3906_v21 = vadd.f32 %v3905_v62, %v3843_v28  ;;  %v9700_v31 = vld [vmem:[%s15210_s2 + $0x20] sm:$0xff]  }
 0x466   :  { %v15376_v12 = vmov 0  }
 0x467   :  { %6329 = vmatprep.subr.bf16.mxu1 %v15376_v12  ;;  %v3771_v57 = vadd.f32 %v3770_v50, %v11264_v2 }
 0x469   :  { %v3772_v7 = vadd.f32 %v3771_v57, %v11267_v58  ;;  %6330 = vmatpush1.bf16.msra.mxu1 %v9700_v31 }
 0x46a   :  { %v3293_v6 = vpop.f32.mrb[36].mxu0  ;;  %6331 = vmatprep.subr.bf16.mxu1 %v15376_v12 }
 0x46b   :  { %v11360_v0 = vadd.f32 %v11190_v51, %v3293_v6  ;;  %v3295_v42 = vpop.f32.mrb[37].mxu0  ;;  %v3844_v51 = vmul.f32 %v11270_v39, %v11270_v39  ;;  %v11375_v6 = vpop.f32.mrb[52].mxu1 }
 0x46c   :  { %v3296_v48 = vpop.f32.mrb[38].mxu0  ;;  %v11377_v42 = vpop.f32.mrb[53].mxu1 }
 0x46d   :  { %15375 = vst [vmem:[#allocation23_spill] sm:$0xff] %v11360_v0  ;;  %v11367_v11 = vadd.f32 %v11194_v17, %v3296_v48  ;;  %v3298_v43 = vpop.f32.mrb[39].mxu0  ;;  %v3773_v17 = vadd.f32 %v3772_v7, %v11270_v39  ;;  %v11385_v57 = vpop.f32.mrb[54].mxu1  ;;  %v3907_v62 = vadd.f32 %v3906_v21, %v3844_v51 }
 0x46e   :  { %v11387_v43 = vpop.f32.mrb[55].mxu1 }
 0x46f   :  { %15377 = vst [vmem:[#allocation24_spill] sm:$0xff] %v11367_v11  ;;  %v3774_v58 = vadd.f32 %v3773_v17, %v11277_v40  ;;  %v3908_v2 = vadd.f32 %v3907_v62, %v3845_v1 }
 0x471   :  { %v3775_v31 = vadd.f32 %v3774_v58, %v11284_v3 }
 0x472   :  { %v3301_v50 = vpop.f32.mrb[40].mxu0 }
 0x473   :  { %v11383_v25 = vadd.f32 %v11202_v63, %v3301_v50  ;;  %v3303_v48 = vpop.f32.mrb[41].mxu0  ;;  %v3846_v63 = vmul.f32 %v11284_v3, %v11284_v3  ;;  %v3847_v50 = vmul.f32 %v11288_v34, %v11288_v34  ;;  %v3776_v17 = vadd.f32 %v3775_v31, %v11288_v34 }
 0x474   :  { %v3304_v28 = vpop.f32.mrb[42].mxu0  ;;  %v9701_v48 = vld [vmem:[%s15210_s2 + $0x28] sm:$0xff]  }
 0x475   :  { %15378 = vst [vmem:[#allocation25_spill] sm:$0xff] %v11383_v25  ;;  %v11392_v7 = vadd.f32 %v11206_v16, %v3304_v28  ;;  %v3306_v39 = vpop.f32.mrb[43].mxu0  ;;  %v3909_v51 = vadd.f32 %v3908_v2, %v3846_v63  ;;  %6332 = vmatpush1.bf16.msra.mxu1 %v9701_v48  ;;  %v3848_v28 = vmul.f32 %v11291_v9, %v11291_v9  ;;  %v9702_v48 = vld [vmem:[%s15210_s2 + $0x30] sm:$0xff]  }
 0x476   :  { %6333 = vmatprep.subr.bf16.mxu1 %v15376_v12  ;;  %v3777_v2 = vadd.f32 %v3776_v17, %v11291_v9  ;;  %v3849_v63 = vmul.f32 %v11301_v47, %v11301_v47  ;;  %v9703_v9 = vld [vmem:[%s15210_s2 + $0x38] sm:$0xff]  }
 0x477   :  { %15379 = vst [vmem:[#allocation26_spill] sm:$0xff] %v11392_v7  ;;  %v3910_v58 = vadd.f32 %v3909_v51, %v3847_v50  ;;  %v11419_v50 = vpop.f32.mrb[56].mxu1 }
 0x478   :  { %v3778_v31 = vadd.f32 %v3777_v2, %v11301_v47  ;;  %v11421_v51 = vpop.f32.mrb[57].mxu1 }
 0x479   :  { %6334 = vmatpush1.bf16.msra.mxu1 %v9702_v48 }
 0x47a   :  { %v3309_v21 = vpop.f32.mrb[44].mxu0  ;;  %6335 = vmatprep.subr.bf16.mxu1 %v15376_v12  ;;  %v3779_v2 = vadd.f32 %v3778_v31, %v11309_v20 }
 0x47b   :  { %v11404_v16 = vadd.f32 %v11200_v44, %v3309_v21  ;;  %v3311_v39 = vpop.f32.mrb[45].mxu0  ;;  %v3911_v44 = vadd.f32 %v3910_v58, %v3848_v28 }
 0x47c   :  { %v3312_v1 = vpop.f32.mrb[46].mxu0 }
 0x47d   :  { %v11410_v62 = vadd.f32 %v11204_v4, %v3312_v1  ;;  %v3314_v3 = vpop.f32.mrb[47].mxu0  ;;  %v3912_v4 = vadd.f32 %v3911_v44, %v3849_v63  ;;  %v11428_v1 = vpop.f32.mrb[58].mxu1  ;;  %v3851_v63 = vmul.f32 %v11315_v13, %v11315_v13  ;;  %6336 = vmatpush1.bf16.msra.mxu1 %v9703_v9 }
 0x47e   :  { %v3850_v3 = vmul.f32 %v11309_v20, %v11309_v20  ;;  %v11430_v28 = vpop.f32.mrb[59].mxu1  ;;  %v3853_v20 = vmul.f32 %v11338_v54, %v11338_v54  ;;  %6337 = vmatprep.subr.bf16.mxu1 %v15376_v12 }
 0x482   :  { %v3317_v21 = vpop.f32.mrb[48].mxu0 }
 0x483   :  { %v11426_v17 = vadd.f32 %v11212_v27, %v3317_v21  ;;  %v3319_v39 = vpop.f32.mrb[49].mxu0  ;;  %v3913_v27 = vadd.f32 %v3912_v4, %v3850_v3  ;;  %v3780_v21 = vadd.f32 %v3779_v2, %v11315_v13 }
 0x484   :  { %v3320_v58 = vpop.f32.mrb[50].mxu0  ;;  %v3852_v39 = vmul.f32 %v11319_v8, %v11319_v8 }
 0x485   :  { %v11437_v44 = vadd.f32 %v11216_v23, %v3320_v58  ;;  %v3322_v47 = vpop.f32.mrb[51].mxu0  ;;  %v3914_v48 = vadd.f32 %v3913_v27, %v3851_v63  ;;  %v3781_v31 = vadd.f32 %v3780_v21, %v11319_v8  ;;  %v3854_v21 = vmul.f32 %v11348_v22, %v11348_v22 }
 0x487   :  { %v3915_v3 = vadd.f32 %v3914_v48, %v3852_v39  ;;  %v3782_v58 = vadd.f32 %v3781_v31, %v11338_v54  ;;  %v11464_v48 = vpop.f32.mrb[60].mxu1 }
 0x489   :  { %v3916_v27 = vadd.f32 %v3915_v3, %v3853_v20  ;;  %v3783_v8 = vadd.f32 %v3782_v58, %v11348_v22 }
 0x48a   :  { %v3325_v34 = vpop.f32.mrb[52].mxu0 }
 0x48b   :  { %v11449_v23 = vadd.f32 %v11210_v26, %v3325_v34  ;;  %v3327_v47 = vpop.f32.mrb[53].mxu0  ;;  %v3855_v26 = vmul.f32 %v11360_v0, %v11360_v0  ;;  %v9704_v34 = vld [vmem:[%s15210_s2 + $0x40] sm:$0xff]   ;;  %v3917_v39 = vadd.f32 %v3916_v27, %v3854_v21 }
 0x48c   :  { %v3328_v4 = vpop.f32.mrb[54].mxu0  ;;  %6338 = vmatpush1.bf16.msra.mxu1 %v9704_v34  ;;  %v11470_v47 = vpop.f32.mrb[61].mxu1  ;;  %v3857_v34 = vmul.f32 %v11383_v25, %v11383_v25 }
 0x48d   :  { %v11454_v2 = vadd.f32 %v11214_v45, %v3328_v4  ;;  %v3330_v63 = vpop.f32.mrb[55].mxu0  ;;  %v3784_v45 = vadd.f32 %v3783_v8, %v11360_v0  ;;  %v11472_v3 = vpop.f32.mrb[62].mxu1  ;;  %6339 = vmatprep.subr.bf16.mxu1 %v15376_v12  ;;  %v3918_v58 = vadd.f32 %v3917_v39, %v3855_v26  ;;  %v9705_v26 = vld [vmem:[%s15210_s2 + $0x48] sm:$0xff]  }
 0x48e   :  { %v3856_v63 = vmul.f32 %v11367_v11, %v11367_v11  ;;  %v11480_v21 = vpop.f32.mrb[63].mxu1 }
 0x490   :  { %6340 = vmatpush1.bf16.msra.mxu1 %v9705_v26 }
 0x491   :  { %6341 = vmatprep.subr.bf16.mxu1 %v15376_v12 }
 0x492   :  { %v3333_v9 = vpop.f32.mrb[56].mxu0 }
 0x493   :  { %v11468_v20 = vadd.f32 %v11222_v37, %v3333_v9  ;;  %v3335_v31 = vpop.f32.mrb[57].mxu0  ;;  %v3785_v37 = vadd.f32 %v3784_v45, %v11367_v11  ;;  %v3919_v9 = vadd.f32 %v3918_v58, %v3856_v63  ;;  %v3859_v63 = vmul.f32 %v11404_v16, %v11404_v16 }
 0x494   :  { %v3336_v4 = vpop.f32.mrb[58].mxu0 }
 0x495   :  { %v11478_v27 = vadd.f32 %v11226_v19, %v3336_v4  ;;  %v3338_v8 = vpop.f32.mrb[59].mxu0  ;;  %v3786_v31 = vadd.f32 %v3785_v37, %v11383_v25  ;;  %v3920_v0 = vadd.f32 %v3919_v9, %v3857_v34  ;;  %v3858_v19 = vmul.f32 %v11392_v7, %v11392_v7 }
 0x497   :  { %v3787_v58 = vadd.f32 %v3786_v31, %v11392_v7  ;;  %v3921_v9 = vadd.f32 %v3920_v0, %v3858_v19  ;;  %v3861_v31 = vmul.f32 %v11426_v17, %v11426_v17 }
 0x499   :  { %v3788_v25 = vadd.f32 %v3787_v58, %v11404_v16  ;;  %v3922_v11 = vadd.f32 %v3921_v9, %v3859_v63  ;;  %v3863_v9 = vmul.f32 %v11449_v23, %v11449_v23 }
 0x49a   :  { %v3341_v39 = vpop.f32.mrb[60].mxu0 }
 0x49b   :  { %v11492_v4 = vadd.f32 %v11220_v56, %v3341_v39  ;;  %v3343_v8 = vpop.f32.mrb[61].mxu0  ;;  %v3860_v56 = vmul.f32 %v11410_v62, %v11410_v62  ;;  %v3789_v39 = vadd.f32 %v3788_v25, %v11410_v62 }
 0x49c   :  { %v3344_v45 = vpop.f32.mrb[62].mxu0 }
 0x49d   :  { %v11499_v37 = vadd.f32 %v11224_v33, %v3344_v45  ;;  %v3346_v34 = vpop.f32.mrb[63].mxu0  ;;  %v3923_v45 = vadd.f32 %v3922_v11, %v3860_v56  ;;  %v3790_v0 = vadd.f32 %v3789_v39, %v11426_v17 }
 0x49e   :  { %v3862_v34 = vmul.f32 %v11437_v44, %v11437_v44 }
 0x49f   :  { %v3924_v63 = vadd.f32 %v3923_v45, %v3861_v31  ;;  %v3791_v25 = vadd.f32 %v3790_v0, %v11437_v44  ;;  %v3864_v31 = vmul.f32 %v11454_v2, %v11454_v2 }
 0x4a2   :  { %v3349_v26 = vpop.f32.mrb[64].mxu0 }
 0x4a3   :  { %v11508_v8 = vadd.f32 %v11232_v55, %v3349_v26  ;;  %v3351_v7 = vpop.f32.mrb[65].mxu0  ;;  %v3925_v26 = vadd.f32 %v3924_v63, %v3862_v34 }
 0x4a4   :  { %v3352_v33 = vpop.f32.mrb[66].mxu0  ;;  %v3792_v7 = vadd.f32 %v3791_v25, %v11449_v23 }
 0x4a5   :  { %v11512_v19 = vadd.f32 %v11239_v52, %v3352_v33  ;;  %v3354_v58 = vpop.f32.mrb[67].mxu0  ;;  %v3926_v39 = vadd.f32 %v3925_v26, %v3863_v9  ;;  %v3866_v9 = vmul.f32 %v11478_v27, %v11478_v27 }
 0x4a6   :  { %v3793_v0 = vadd.f32 %v3792_v7, %v11454_v2  ;;  %v3865_v58 = vmul.f32 %v11468_v20, %v11468_v20  ;;  %v3867_v7 = vmul.f32 %v11492_v4, %v11492_v4 }
 0x4a7   :  { %v3927_v63 = vadd.f32 %v3926_v39, %v3864_v31 }
 0x4a8   :  { %v3794_v34 = vadd.f32 %v3793_v0, %v11468_v20 }
 0x4a9   :  { %v3928_v25 = vadd.f32 %v3927_v63, %v3865_v58  ;;  %v3868_v58 = vmul.f32 %v11499_v37, %v11499_v37 }
 0x4aa   :  { %v3357_v55 = vpop.f32.mrb[68].mxu0 }
 0x4ab   :  { %v11521_v11 = vadd.f32 %v11230_v24, %v3357_v55  ;;  %v3359_v56 = vpop.f32.mrb[69].mxu0  ;;  %v3929_v31 = vadd.f32 %v3928_v25, %v3866_v9 }
 0x4ac   :  { %v3360_v52 = vpop.f32.mrb[70].mxu0  ;;  %v3795_v56 = vadd.f32 %v3794_v34, %v11478_v27  ;;  %v3869_v34 = vmul.f32 %v11508_v8, %v11508_v8 }
 0x4ad   :  { %v11526_v33 = vadd.f32 %v11237_v29, %v3360_v52  ;;  %v3362_v45 = vpop.f32.mrb[71].mxu0  ;;  %v3930_v0 = vadd.f32 %v3929_v31, %v3867_v7 }
 0x4ae   :  { %v3796_v45 = vadd.f32 %v3795_v56, %v11492_v4 }
 0x4b0   :  { %v3797_v63 = vadd.f32 %v3796_v45, %v11499_v37  ;;  %v3871_v45 = vmul.f32 %v11521_v11, %v11521_v11 }
 0x4b2   :  { %v3365_v24 = vpop.f32.mrb[72].mxu0  ;;  %v3798_v25 = vadd.f32 %v3797_v63, %v11508_v8 }
 0x4b3   :  { %v11535_v55 = vadd.f32 %v11254_v49, %v3365_v24  ;;  %v3367_v26 = vpop.f32.mrb[73].mxu0 }
 0x4b4   :  { %v3368_v29 = vpop.f32.mrb[74].mxu0  ;;  %v3799_v31 = vadd.f32 %v3798_v25, %v11512_v19 }
 0x4b5   :  { %15380 = vst [vmem:[#allocation27_spill] sm:$0xff] %v11535_v55  ;;  %v11541_v52 = vadd.f32 %v11261_v41, %v3368_v29  ;;  %v3370_v39 = vpop.f32.mrb[75].mxu0  ;;  %v3931_v29 = vadd.f32 %v3930_v0, %v3868_v58 }
 0x4b6   :  { %v3870_v39 = vmul.f32 %v11512_v19, %v11512_v19 }
 0x4b7   :  { %15381 = vst [vmem:[#allocation28_spill] sm:$0xff] %v11541_v52  ;;  %v3932_v7 = vadd.f32 %v3931_v29, %v3869_v34  ;;  %v3872_v34 = vmul.f32 %v11526_v33, %v11526_v33 }
 0x4ba   :  { %v3373_v49 = vpop.f32.mrb[76].mxu0 }
 0x4bb   :  { %v11550_v24 = vadd.f32 %v11252_v46, %v3373_v49  ;;  %v3375_v26 = vpop.f32.mrb[77].mxu0  ;;  %v3933_v49 = vadd.f32 %v3932_v7, %v3870_v39 }
 0x4bc   :  { %v3376_v41 = vpop.f32.mrb[78].mxu0  ;;  %v3800_v26 = vadd.f32 %v3799_v31, %v11521_v11 }
 0x4bd   :  { %v11554_v9 = vadd.f32 %v11259_v38, %v3376_v41  ;;  %v3378_v56 = vpop.f32.mrb[79].mxu0  ;;  %v3934_v63 = vadd.f32 %v3933_v49, %v3871_v45  ;;  %v3874_v45 = vmul.f32 %v11541_v52, %v11541_v52 }
 0x4be   :  { %v3801_v25 = vadd.f32 %v3800_v26, %v11526_v33  ;;  %v3873_v56 = vmul.f32 %v11535_v55, %v11535_v55  ;;  %v3875_v26 = vmul.f32 %v11550_v24, %v11550_v24 }
 0x4bf   :  { %v3935_v7 = vadd.f32 %v3934_v63, %v3872_v34 }
 0x4c0   :  { %v3802_v39 = vadd.f32 %v3801_v25, %v11535_v55 }
 0x4c1   :  { %v3936_v31 = vadd.f32 %v3935_v7, %v3873_v56  ;;  %v3876_v56 = vmul.f32 %v11554_v9, %v11554_v9 }
 0x4c2   :  { %v3381_v46 = vpop.f32.mrb[80].mxu0 }
 0x4c3   :  { %v11563_v0 = vadd.f32 %v11274_v61, %v3381_v46  ;;  %v3383_v58 = vpop.f32.mrb[81].mxu0  ;;  %v3937_v34 = vadd.f32 %v3936_v31, %v3874_v45 }
 0x4c4   :  { %v3384_v38 = vpop.f32.mrb[82].mxu0  ;;  %v3803_v58 = vadd.f32 %v3802_v39, %v11541_v52 }
 0x4c5   :  { %v11568_v41 = vadd.f32 %v11281_v10, %v3384_v38  ;;  %v3386_v29 = vpop.f32.mrb[83].mxu0  ;;  %v3938_v25 = vadd.f32 %v3937_v34, %v3875_v26  ;;  %v3877_v39 = vmul.f32 %v11563_v0, %v11563_v0 }
 0x4c6   :  { %v3804_v29 = vadd.f32 %v3803_v58, %v11550_v24 }
 0x4c8   :  { %v3805_v7 = vadd.f32 %v3804_v29, %v11554_v9 }
 0x4ca   :  { %v3389_v61 = vpop.f32.mrb[84].mxu0  ;;  %v3806_v31 = vadd.f32 %v3805_v7, %v11563_v0 }
 0x4cb   :  { %v11577_v46 = vadd.f32 %v11272_v15, %v3389_v61  ;;  %v3391_v49 = vpop.f32.mrb[85].mxu0 }
 0x4cc   :  { %v3392_v10 = vpop.f32.mrb[86].mxu0  ;;  %v3807_v34 = vadd.f32 %v3806_v31, %v11568_v41  ;;  %v9706_v31 = vld [vmem:[%s15210_s2 + $0x50] sm:$0xff]  }
 0x4cd   :  { %v11583_v38 = vadd.f32 %v11279_v5, %v3392_v10  ;;  %v3394_v63 = vpop.f32.mrb[87].mxu0  ;;  %v3939_v10 = vadd.f32 %v3938_v25, %v3876_v56  ;;  %v3879_v29 = vmul.f32 %v11577_v46, %v11577_v46  ;;  %6342 = vmatpush1.bf16.msra.mxu1 %v9706_v31 }
 0x4ce   :  { %v3878_v63 = vmul.f32 %v11568_v41, %v11568_v41  ;;  %6343 = vmatprep.subr.bf16.mxu1 %v15376_v12 }
 0x4cf   :  { %v3940_v26 = vadd.f32 %v3939_v10, %v3877_v39  ;;  %v3880_v39 = vmul.f32 %v11583_v38, %v11583_v38 }
 0x4d2   :  { %v3397_v15 = vpop.f32.mrb[88].mxu0 }
 0x4d3   :  { %v11592_v61 = vadd.f32 %v11298_v30, %v3397_v15  ;;  %v3399_v49 = vpop.f32.mrb[89].mxu0  ;;  %v3941_v15 = vadd.f32 %v3940_v26, %v3878_v63 }
 0x4d4   :  { %v3400_v5 = vpop.f32.mrb[90].mxu0  ;;  %v3808_v49 = vadd.f32 %v3807_v34, %v11577_v46  ;;  %v9707_v34 = vld [vmem:[%s15210_s2 + $0x58] sm:$0xff]  }
 0x4d5   :  { %v11596_v45 = vadd.f32 %v11305_v36, %v3400_v5  ;;  %v3402_v58 = vpop.f32.mrb[91].mxu0  ;;  %v3942_v7 = vadd.f32 %v3941_v15, %v3879_v29  ;;  %v3881_v26 = vmul.f32 %v11592_v61, %v11592_v61  ;;  %6344 = vmatpush1.bf16.msra.mxu1 %v9707_v34  ;;  %v9710_v34 = vld [vmem:[%s15210_s2 + $0x68] sm:$0xff]  }
 0x4d6   :  { %v9709_v58 = vld [vmem:[%s15210_s2 + $0x200] sm:$0xff]   ;;  %6345 = vmatprep.subr.bf16.mxu1 %v15376_v12 }
 0x4d7   :  { %8755 = vmatprep.subr.bf16.mxu0 %v9709_v58 }
 0x4d8   :  { %8756 = vmatpush3.bf16.msra.mxu0 %v9709_v58 }
 0x4da   :  { %v3405_v30 = vpop.f32.mrb[92].mxu0 }
 0x4db   :  { %v11605_v25 = vadd.f32 %v11296_v18, %v3405_v30  ;;  %v3407_v56 = vpop.f32.mrb[93].mxu0  ;;  %v3809_v18 = vadd.f32 %v3808_v49, %v11583_v38  ;;  %v9711_v30 = vld [vmem:[%s15210_s2 + $0x208] sm:$0xff]   ;;  %v3882_v49 = vmul.f32 %v11596_v45, %v11596_v45 }
 0x4dc   :  { %v3408_v36 = vpop.f32.mrb[94].mxu0  ;;  %8757 = vmatprep.subr.bf16.mxu0 %v9711_v30 }
 0x4dd   :  { %v11610_v5 = vadd.f32 %v11303_v35, %v3408_v36  ;;  %v3410_v10 = vpop.f32.mrb[95].mxu0  ;;  %v3943_v35 = vadd.f32 %v3942_v7, %v3880_v39  ;;  %v3810_v63 = vadd.f32 %v3809_v18, %v11592_v61  ;;  %8758 = vmatpush3.bf16.msra.mxu0 %v9711_v30  ;;  %v9712_v18 = vld [vmem:[%s15210_s2 + $0x210] sm:$0xff]   ;;  %v9714_v30 = vld [vmem:[%s15210_s2 + $0x218] sm:$0xff]  }
 0x4de   :  { %v3883_v10 = vmul.f32 %v11605_v25, %v11605_v25  ;;  %8759 = vmatprep.subr.bf16.mxu0 %v9712_v18 }
 0x4df   :  { %15382 = vst [vmem:[#allocation29_spill] sm:$0xff] %v11610_v5  ;;  %v3944_v15 = vadd.f32 %v3943_v35, %v3881_v26  ;;  %v3811_v39 = vadd.f32 %v3810_v63, %v11596_v45 }
 0x4e1   :  { %v3945_v26 = vadd.f32 %v3944_v15, %v3882_v49  ;;  %v3812_v35 = vadd.f32 %v3811_v39, %v11605_v25  ;;  %8760 = vmatpush3.bf16.msra.mxu0 %v9712_v18 }
 0x4e2   :  { %v3413_v29 = vpop.f32.mrb[96].mxu0  ;;  %8761 = vmatprep.subr.bf16.mxu0 %v9714_v30 }
 0x4e3   :  { %v11632_v56 = vadd.f32 %v11334_v14, %v3413_v29  ;;  %v3415_v36 = vpop.f32.mrb[97].mxu0  ;;  %v9708_v14 = vld [vmem:[%s15210_s2 + $0x60] sm:$0xff]   ;;  %v3946_v63 = vadd.f32 %v3945_v26, %v3883_v10  ;;  %v3813_v15 = vadd.f32 %v3812_v35, %v11610_v5  ;;  %v9713_v26 = vld [vmem:[%s15210_s2 + $0x70] sm:$0xff]  }
 0x4e4   :  { %v3416_v7 = vpop.f32.mrb[98].mxu0  ;;  %6346 = vmatpush1.bf16.msra.mxu1 %v9708_v14 }
 0x4e5   :  { %15383 = vst [vmem:[#allocation30_spill] sm:$0xff] %v11632_v56  ;;  %v11639_v31 = vadd.f32 %v11342_v60, %v3416_v7  ;;  %v3418_v58 = vpop.f32.mrb[99].mxu0  ;;  %6347 = vmatprep.subr.bf16.mxu1 %v15376_v12  ;;  %v3884_v60 = vmul.f32 %v11610_v5, %v11610_v5  ;;  %v3885_v49 = vmul.f32 %v11632_v56, %v11632_v56 }
 0x4e6   :  { %v3814_v58 = vadd.f32 %v3813_v15, %v11632_v56  ;;  %8762 = vmatpush3.bf16.msra.mxu0 %v9714_v30  ;;  %v9717_v30 = vld [vmem:[%s15210_s2 + $0x228] sm:$0xff]  }
 0x4e7   :  { %15384 = vst [vmem:[#allocation31_spill] sm:$0xff] %v11639_v31  ;;  %v3947_v10 = vadd.f32 %v3946_v63, %v3884_v60  ;;  %v9716_v60 = vld [vmem:[%s15210_s2 + $0x78] sm:$0xff]   ;;  %v4432_v15 = vld [vmem:[#allocation3 + $0x1] sm:$0xff] }
 0x4e8   :  { %6348 = vmatpush1.bf16.msra.mxu1 %v9710_v34  ;;  %v3886_v34 = vmul.f32 %v11639_v31, %v11639_v31 }
 0x4e9   :  { %6349 = vmatprep.subr.bf16.mxu1 %v15376_v12  ;;  %v3948_v35 = vadd.f32 %v3947_v10, %v3885_v49  ;;  %v4433_v49 = vld [vmem:[#allocation3 + $0x9] sm:$0xff] }
 0x4ea   :  { %v3421_v29 = vpop.f32.mrb[100].mxu0 }
 0x4eb   :  { %v11661_v36 = vadd.f32 %v11332_v53, %v3421_v29  ;;  %v3423_v7 = vpop.f32.mrb[101].mxu0  ;;  %v9715_v53 = vld [vmem:[%s15210_s2 + $0x220] sm:$0xff]  }
 0x4ec   :  { %v3424_v39 = vpop.f32.mrb[102].mxu0  ;;  %6350 = vmatpush1.bf16.msra.mxu1 %v9713_v26  ;;  %8763 = vmatprep.subr.bf16.mxu0 %v9715_v53  ;;  %v3949_v7 = vadd.f32 %v3948_v35, %v3886_v34 }
 0x4ed   :  { %v11666_v14 = vadd.f32 %v11340_v59, %v3424_v39  ;;  %v3426_v18 = vpop.f32.mrb[103].mxu0  ;;  %6351 = vmatprep.subr.bf16.mxu1 %v15376_v12  ;;  %v3815_v59 = vadd.f32 %v3814_v58, %v11639_v31  ;;  %v3887_v63 = vmul.f32 %v11661_v36, %v11661_v36  ;;  %8764 = vmatpush3.bf16.msra.mxu0 %v9715_v53  ;;  %v9773_v31 = vld [vmem:[#allocation2] sm:$0xff] }
 0x4ee   :  { %v4496_v18 = vpack.c.bf16 %v4433_v49, %v4432_v15  ;;  %8765 = vmatprep.subr.bf16.mxu0 %v9717_v30  ;;  %v11690_v53 = vpack.c.bf16 %v9773_v31, %v9773_v31  ;;  %v9719_v31 = vld [vmem:[%s15210_s2 + $0x80] sm:$0xff]  }
 0x4ef   :  { %v3816_v39 = vadd.f32 %v3815_v59, %v11661_v36  ;;  %v3950_v56 = vadd.f32 %v3949_v7, %v3887_v63  ;;  %v3888_v5 = vmul.f32 %v11666_v14, %v11666_v14  ;;  %v9720_v59 = vld [vmem:[%s15210_s2 + $0x238] sm:$0xff]  }
 0x4f0   :  { %6352 = vmatpush1.bf16.msra.mxu1 %v9716_v60  ;;  %15385 = vst [vmem:[#allocation32_spill] sm:$0xff] %v11690_v53  ;;  %6353 = vmatprep.mubr.bf16.mxu1 %v4496_v18 }
 0x4f1   :  { %6610 = vmatprep.subr.bf16.mxu1 %v15376_v12  ;;  %8766 = vmatpush3.bf16.msra.mxu0 %v9717_v30  ;;  %v3951_v60 = vadd.f32 %v3950_v56, %v3888_v5 }
 0x4f2   :  { %v3429_v29 = vpop.f32.mrb[104].mxu0 }
 0x4f3   :  { %v11688_v10 = vadd.f32 %v11377_v42, %v3429_v29  ;;  %v3431_v58 = vpop.f32.mrb[105].mxu0  ;;  %v9718_v42 = vld [vmem:[%s15210_s2 + $0x230] sm:$0xff]   ;;  %6354 = vmatmul.mubr.bf16.vlgmr.msra.gmra.mrb[64].mxu1 %v11690_v53 }
 0x4f4   :  { %v3432_v26 = vpop.f32.mrb[106].mxu0  ;;  %8767 = vmatprep.subr.bf16.mxu0 %v9718_v42  ;;  %6611 = vmatpush1.bf16.msra.mxu1 %v9719_v31 }
 0x4f5   :  { %v11696_v35 = vadd.f32 %v11387_v43, %v3432_v26  ;;  %v3434_v34 = vpop.f32.mrb[107].mxu0  ;;  %v3817_v43 = vadd.f32 %v3816_v39, %v11666_v14  ;;  %v3889_v63 = vmul.f32 %v11688_v10, %v11688_v10  ;;  %6612 = vmatprep.subr.bf16.mxu1 %v15376_v12  ;;  %8768 = vmatpush3.bf16.msra.mxu0 %v9718_v42 }
 0x4f6   :  { %8769 = vmatprep.subr.bf16.mxu0 %v9720_v59 }
 0x4f7   :  { %v3818_v29 = vadd.f32 %v3817_v43, %v11688_v10  ;;  %v3952_v15 = vadd.f32 %v3951_v60, %v3889_v63  ;;  %v3890_v49 = vmul.f32 %v11696_v35, %v11696_v35 }
 0x4f9   :  { %v3819_v18 = vadd.f32 %v3818_v29, %v11696_v35  ;;  %8770 = vmatpush3.bf16.msra.mxu0 %v9720_v59  ;;  %v3953_v34 = vadd.f32 %v3952_v15, %v3890_v49 }
 0x4fa   :  { %v3437_v30 = vpop.f32.mrb[108].mxu0 }
 0x4fb   :  { %v11716_v7 = vadd.f32 %v11375_v6, %v3437_v30  ;;  %v3439_v39 = vpop.f32.mrb[109].mxu0  ;;  %v9721_v6 = vld [vmem:[%s15210_s2 + $0x88] sm:$0xff]  }
 0x4fc   :  { %v3440_v58 = vpop.f32.mrb[110].mxu0  ;;  %6613 = vmatpush1.bf16.msra.mxu1 %v9721_v6 }
 0x4fd   :  { %15386 = vst [vmem:[#allocation33_spill] sm:$0xff] %v11716_v7  ;;  %v3891_v26 = vmul.f32 %v11716_v7, %v11716_v7  ;;  %v11722_v5 = vadd.f32 %v11385_v57, %v3440_v58  ;;  %v3442_v56 = vpop.f32.mrb[111].mxu0  ;;  %v3820_v42 = vadd.f32 %v3819_v18, %v11716_v7  ;;  %6614 = vmatprep.subr.bf16.mxu1 %v15376_v12 }
 0x4ff   :  { %v3954_v31 = vadd.f32 %v3953_v34, %v3891_v26  ;;  %v3892_v43 = vmul.f32 %v11722_v5, %v11722_v5  ;;  %v3821_v60 = vadd.f32 %v3820_v42, %v11722_v5 }
 0x501   :  { %v3955_v30 = vadd.f32 %v3954_v31, %v3892_v43 }
 0x502   :  { %v3445_v63 = vpop.f32.mrb[112].mxu0 }
 0x503   :  { %v11732_v57 = vadd.f32 %v11421_v51, %v3445_v63  ;;  %v3447_v29 = vpop.f32.mrb[113].mxu0 }
 0x504   :  { %v3448_v59 = vpop.f32.mrb[114].mxu0 }
 0x505   :  { %v3822_v15 = vadd.f32 %v3821_v60, %v11732_v57  ;;  %v3893_v49 = vmul.f32 %v11732_v57, %v11732_v57  ;;  %v11739_v39 = vadd.f32 %v11430_v28, %v3448_v59  ;;  %v3450_v58 = vpop.f32.mrb[115].mxu0 }
 0x507   :  { %15387 = vst [vmem:[#allocation34_spill] sm:$0xff] %v11739_v39  ;;  %v3956_v18 = vadd.f32 %v3955_v30, %v3893_v49  ;;  %v3823_v26 = vadd.f32 %v3822_v15, %v11739_v39  ;;  %v3894_v51 = vmul.f32 %v11739_v39, %v11739_v39  ;;  %v15411_v39 = vld [vmem:[#allocation30_spill] sm:$0xff] }
 0x509   :  { %v3957_v56 = vadd.f32 %v3956_v18, %v3894_v51 }
 0x50a   :  { %v3453_v34 = vpop.f32.mrb[116].mxu0 }
 0x50b   :  { %v11745_v42 = vadd.f32 %v11419_v50, %v3453_v34  ;;  %v3455_v6 = vpop.f32.mrb[117].mxu0  ;;  %v9722_v50 = vld [vmem:[%s15210_s2 + $0x90] sm:$0xff]  }
 0x50c   :  { %v3456_v31 = vpop.f32.mrb[118].mxu0  ;;  %6615 = vmatpush1.bf16.msra.mxu1 %v9722_v50 }
 0x50d   :  { %v3824_v43 = vadd.f32 %v3823_v26, %v11745_v42  ;;  %v3895_v28 = vmul.f32 %v11745_v42, %v11745_v42  ;;  %v11751_v63 = vadd.f32 %v11428_v1, %v3456_v31  ;;  %v3458_v60 = vpop.f32.mrb[119].mxu0  ;;  %6616 = vmatprep.subr.bf16.mxu1 %v15376_v12 }
 0x50f   :  { %v3958_v29 = vadd.f32 %v3957_v56, %v3895_v28  ;;  %v3825_v59 = vadd.f32 %v3824_v43, %v11751_v63  ;;  %v3896_v30 = vmul.f32 %v11751_v63, %v11751_v63 }
 0x511   :  { %v3959_v15 = vadd.f32 %v3958_v29, %v3896_v30 }
 0x512   :  { %v3461_v49 = vpop.f32.mrb[120].mxu0 }
 0x513   :  { %v11760_v58 = vadd.f32 %v11470_v47, %v3461_v49  ;;  %v3463_v18 = vpop.f32.mrb[121].mxu0 }
 0x514   :  { %v3464_v1 = vpop.f32.mrb[122].mxu0 }
 0x515   :  { %15388 = vst [vmem:[#allocation35_spill] sm:$0xff] %v11760_v58  ;;  %v3826_v26 = vadd.f32 %v3825_v59, %v11760_v58  ;;  %v3897_v51 = vmul.f32 %v11760_v58, %v11760_v58  ;;  %v11767_v56 = vadd.f32 %v11480_v21, %v3464_v1  ;;  %v3466_v34 = vpop.f32.mrb[123].mxu0 }
 0x517   :  { %15389 = vst [vmem:[#allocation36_spill] sm:$0xff] %v11767_v56  ;;  %v3960_v6 = vadd.f32 %v3959_v15, %v3897_v51  ;;  %v3827_v31 = vadd.f32 %v3826_v26, %v11767_v56  ;;  %v3898_v47 = vmul.f32 %v11767_v56, %v11767_v56  ;;  %v15412_v56 = vld [vmem:[#allocation31_spill] sm:$0xff] }
 0x519   :  { %v3961_v43 = vadd.f32 %v3960_v6, %v3898_v47 }
 0x51a   :  { %v3469_v28 = vpop.f32.mrb[124].mxu0 }
 0x51b   :  { %v11773_v60 = vadd.f32 %v11464_v48, %v3469_v28  ;;  %v3471_v29 = vpop.f32.mrb[125].mxu0  ;;  %v9723_v48 = vld [vmem:[%s15210_s2 + $0x98] sm:$0xff]  }
 0x51c   :  { %v3472_v59 = vpop.f32.mrb[126].mxu0  ;;  %6617 = vmatpush1.bf16.msra.mxu1 %v9723_v48  ;;  %v9724_v48 = vld [vmem:[%s15210_s2 + $0xa0] sm:$0xff]  }
 0x51d   :  { %15390 = vst [vmem:[#allocation37_spill] sm:$0xff] %v11773_v60  ;;  %v3828_v30 = vadd.f32 %v3827_v31, %v11773_v60  ;;  %v3899_v21 = vmul.f32 %v11773_v60, %v11773_v60  ;;  %v11779_v50 = vadd.f32 %v11472_v3, %v3472_v59  ;;  %v3474_v15 = vpop.f32.mrb[127].mxu0  ;;  %6618 = vmatprep.subr.bf16.mxu1 %v15376_v12 }
 0x51f   :  { %v3962_v49 = vadd.f32 %v3961_v43, %v3899_v21  ;;  %v3829_v18 = vadd.f32 %v3828_v30, %v11779_v50  ;;  %v3900_v1 = vmul.f32 %v11779_v50, %v11779_v50  ;;  %v4040_v21 = vlaneseq }
 0x520   :  { %6619 = vmatpush1.bf16.msra.mxu1 %v9724_v48  ;;  %v15398_v48 = vld [vmem:[#allocation14_spill] sm:$0xff] }
 0x521   :  { %v3830_v26 = vrot.slane %v3829_v18, 4  ;;  %v3963_v51 = vadd.f32 %v3962_v49, %v3900_v1  ;;  %v11794_v1 = vshrl.u32 %v4040_v21, 7  ;;  %6620 = vmatprep.subr.bf16.mxu1 %v15376_v12  ;;  %v15407_v21 = vld [vmem:[#allocation25_spill] sm:$0xff] }
 0x523   :  { %v3831_v34 = vadd.f32 %v3830_v26, %v3829_v18  ;;  %v3964_v6 = vrot.slane %v3963_v51, 4  ;;  %15391 = vst [vmem:[#allocation38_spill] sm:$0xff] %v11794_v1  ;;  %v15410_v18 = vsub.s32 0, %v11794_v1 }
 0x525   :  { %v3832_v3 = vrot.slane %v3831_v34, 2  ;;  %v3965_v31 = vadd.f32 %v3964_v6, %v3963_v51  ;;  %v15392_v6 = vld [vmem:[#allocation8_spill] sm:$0xff] }
 0x527   :  { %v3833_v47 = vadd.f32 %v3832_v3, %v3831_v34  ;;  %v3966_v43 = vrot.slane %v3965_v31, 2  ;;  %v15393_v3 = vld [vmem:[#allocation9_spill] sm:$0xff]  ;;  %v15405_v34 = vld [vmem:[#allocation23_spill] sm:$0xff] }
 0x529   :  { %v3834_v28 = vrot.slane %v3833_v47, 1  ;;  %v3967_v29 = vadd.f32 %v3966_v43, %v3965_v31  ;;  %v15394_v43 = vld [vmem:[#allocation10_spill] sm:$0xff] }
 0x52a   :  { %v15404_v31 = vld [vmem:[#allocation22_spill] sm:$0xff] }
 0x52b   :  { %v3835_v59 = vadd.f32 %v3834_v28, %v3833_v47  ;;  %v3968_v30 = vrot.slane %v3967_v29, 1  ;;  %v15399_v47 = vld [vmem:[#allocation16_spill] sm:$0xff]  ;;  %v15400_v28 = vld [vmem:[#allocation17_spill] sm:$0xff] }
 0x52d   :  { %v11788_v15 = vmul.f32 0.001953125, %v3835_v59  ;;  %v3969_v53 = vadd.f32 %v3968_v30, %v3967_v29  ;;  %v15396_v59 = vld [vmem:[#allocation12_spill] sm:$0xff] }
 0x52e   :  { %v15406_v30 = vld [vmem:[#allocation24_spill] sm:$0xff] }
 0x52f   :  { %v3970_v7 = vmul.f32 0.001953125, %v3969_v53  ;;  %v3971_v49 = vmul.f32 %v11788_v15, %v11788_v15  ;;  %v3765_v53 = vld [vmem:[%s15211_s3] sm:$0x1]  ;;  %v4023_v60 = vsub.f32 %v15411_v39, %v11788_v15  ;;  %v4026_v29 = vsub.f32 %v11666_v14, %v11788_v15 }
 0x530   :  { %v4028_v39 = vsub.f32 %v11696_v35, %v11788_v15  ;;  %v15415_v13 = vsub.f32 %v15392_v6, %v11788_v15 }
 0x531   :  { %v3972_v26 = vsub.f32 %v3970_v7, %v3971_v49  ;;  %v15395_v7 = vld [vmem:[#allocation11_spill] sm:$0xff] }
 0x533   :  { %v3973_v51 = vadd.f32 1e-05, %v3972_v26  ;;  %v15408_v26 = vld [vmem:[#allocation26_spill] sm:$0xff] }
 0x535   :  { %9768 = vrsqrt.f32 %v3973_v51  ;;  %v9725_v51 = vld [vmem:[%s15210_s2 + $0xa8] sm:$0xff]  }
 0x536   :  { %6621 = vmatpush1.bf16.msra.mxu1 %v9725_v51  ;;  %v15414_v51 = vsub.f32 %v11779_v50, %v11788_v15  ;;  %v15418_v50 = vsub.f32 %v15394_v43, %v11788_v15 }
 0x537   :  { %6622 = vmatprep.subr.bf16.mxu1 %v15376_v12 }
 0x53f   :  { %v9769_v52 = vpop.eup %9768 }
 0x540   :  { %v4039_v40 = vmul.f32 %v9769_v52, %v3765_v53  ;;  %v15409_v53 = vld [vmem:[#allocation29_spill] sm:$0xff]  ;;  %v11932_v52 = vld [vmem:[%s15211_s3 + $0x1] ss:$0 sm:$0xff] }
 0x542   :  { %v11921_v55 = vrot.slane %v4039_v40, %v15410_v18  ;;  %v4027_v40 = vsub.f32 %v11688_v10, %v11788_v15  ;;  %v15413_v18 = vld [vmem:[#allocation33_spill] sm:$0xff]  ;;  %v15416_v10 = vsub.f32 %v15393_v3, %v11788_v15 }
 0x543   :  { %v4029_v58 = vsub.f32 %v15413_v18, %v11788_v15  ;;  %v15417_v18 = vsub.f32 %v11246_v32, %v11788_v15 }
 0x544   :  { %v4107_v49 = vmul.f32 %v11921_v55, %v15414_v51  ;;  %v11951_v14 = vmul.f32 %v11921_v55, %v15415_v13  ;;  %v11957_v35 = vmul.f32 %v11921_v55, %v15416_v10  ;;  %v11969_v6 = vmul.f32 %v11921_v55, %v15418_v50  ;;  %v15422_v10 = vld [vmem:[#allocation13_spill] sm:$0xff] }
 0x545   :  { %v11963_v1 = vmul.f32 %v11921_v55, %v15417_v18  ;;  %v15419_v13 = vsub.f32 %v15395_v7, %v11788_v15  ;;  %v15421_v51 = vsub.f32 %v15396_v59, %v11788_v15  ;;  %v15423_v18 = vsub.f32 %v15422_v10, %v11788_v15 }
 0x546   :  { %v4175_v50 = vadd.f32 %v11932_v52, %v4107_v49  ;;  %v15425_v7 = vsub.f32 %v15398_v48, %v11788_v15  ;;  %v15430_v10 = vsub.f32 %v15399_v47, %v11788_v15  ;;  %v15432_v49 = vsub.f32 %v15400_v28, %v11788_v15 }
 0x547   :  { %v11975_v3 = vmul.f32 %v11921_v55, %v15419_v13  ;;  %v11981_v32 = vmul.f32 %v11921_v55, %v15421_v51  ;;  %v11987_v43 = vmul.f32 %v11921_v55, %v15423_v18 }
 0x548   :  { %v11994_v13 = vmul.f32 %v11921_v55, %v15425_v7  ;;  %v12006_v18 = vmul.f32 %v11921_v55, %v15430_v10  ;;  %v12012_v48 = vmul.f32 %v11921_v55, %v15432_v49  ;;  %v15434_v7 = vld [vmem:[#allocation18_spill] sm:$0xff]  ;;  %v15438_v10 = vld [vmem:[#allocation20_spill] sm:$0xff]  ;;  %v4239_v49 = vmax.f32 %v4175_v50, 0.0 }
 0x549   :  { %15420 = vst [vmem:[#allocation8_spill] sm:$0xff] %v11975_v3  ;;  %15424 = vst [vmem:[#allocation9_spill] sm:$0xff] %v11987_v43  ;;  %v15427_v3 = vld [vmem:[#allocation15_spill] sm:$0xff]  ;;  %v15444_v50 = vsub.f32 %v11348_v22, %v11788_v15 }
 0x54a   :  { %15426 = vst [vmem:[#allocation10_spill] sm:$0xff] %v11994_v13  ;;  %v15428_v59 = vsub.f32 %v15427_v3, %v11788_v15  ;;  %15431 = vst [vmem:[#allocation12_spill] sm:$0xff] %v12006_v18  ;;  %v15435_v13 = vsub.f32 %v15434_v7, %v11788_v15  ;;  %v15439_v18 = vsub.f32 %v15438_v10, %v11788_v15 }
 0x54b   :  { %15433 = vst [vmem:[#allocation14_spill] sm:$0xff] %v12012_v48  ;;  %v15440_v48 = vld [vmem:[#allocation21_spill] sm:$0xff]  ;;  %4303 = vst [vmem:[#allocation3 + $0x339] sm:$0xff] %v4239_v49  ;;  %v15451_v49 = vsub.f32 %v11426_v17, %v11788_v15 }
 0x54c   :  { %v12000_v51 = vmul.f32 %v11921_v55, %v15428_v59  ;;  %v12018_v3 = vmul.f32 %v11921_v55, %v15435_v13  ;;  %v15436_v59 = vld [vmem:[#allocation19_spill] sm:$0xff]  ;;  %v12030_v28 = vmul.f32 %v11921_v55, %v15439_v18  ;;  %v15441_v43 = vsub.f32 %v15440_v48, %v11788_v15 }
 0x54d   :  { %v15442_v13 = vsub.f32 %v15404_v31, %v11788_v15  ;;  %v12054_v18 = vmul.f32 %v11921_v55, %v15444_v50  ;;  %v15446_v48 = vsub.f32 %v15406_v30, %v11788_v15  ;;  %v15449_v50 = vsub.f32 %v11404_v16, %v11788_v15 }
 0x54e   :  { %15429 = vst [vmem:[#allocation11_spill] sm:$0xff] %v12000_v51  ;;  %v15437_v51 = vsub.f32 %v15436_v59, %v11788_v15  ;;  %v12036_v7 = vmul.f32 %v11921_v55, %v15441_v43  ;;  %v15445_v43 = vsub.f32 %v15405_v34, %v11788_v15 }
 0x54f   :  { %v12042_v59 = vmul.f32 %v11921_v55, %v15442_v13  ;;  %v15447_v13 = vsub.f32 %v15407_v21, %v11788_v15  ;;  %v12084_v30 = vmul.f32 %v11921_v55, %v15449_v50  ;;  %v15455_v50 = vsub.f32 %v11468_v20, %v11788_v15 }
 0x550   :  { %v12024_v47 = vmul.f32 %v11921_v55, %v15437_v51  ;;  %v15443_v51 = vsub.f32 %v11338_v54, %v11788_v15  ;;  %v12060_v31 = vmul.f32 %v11921_v55, %v15445_v43  ;;  %v12066_v54 = vmul.f32 %v11921_v55, %v15446_v48 }
 0x551   :  { %v12072_v22 = vmul.f32 %v11921_v55, %v15447_v13  ;;  %v15450_v43 = vsub.f32 %v11410_v62, %v11788_v15  ;;  %v15452_v48 = vsub.f32 %v11437_v44, %v11788_v15  ;;  %v15453_v13 = vsub.f32 %v11449_v23, %v11788_v15 }
 0x552   :  { %v12048_v10 = vmul.f32 %v11921_v55, %v15443_v51  ;;  %v15448_v51 = vsub.f32 %v15408_v26, %v11788_v15  ;;  %v12096_v26 = vmul.f32 %v11921_v55, %v15451_v49  ;;  %v12120_v44 = vmul.f32 %v11921_v55, %v15455_v50 }
 0x553   :  { %v12090_v21 = vmul.f32 %v11921_v55, %v15450_v43  ;;  %v12102_v16 = vmul.f32 %v11921_v55, %v15452_v48  ;;  %v12108_v62 = vmul.f32 %v11921_v55, %v15453_v13  ;;  %v15456_v43 = vsub.f32 %v11478_v27, %v11788_v15 }
 0x554   :  { %v12078_v34 = vmul.f32 %v11921_v55, %v15448_v51  ;;  %v15454_v51 = vsub.f32 %v11454_v2, %v11788_v15  ;;  %v15457_v49 = vsub.f32 %v11492_v4, %v11788_v15  ;;  %v15458_v48 = vsub.f32 %v11499_v37, %v11788_v15 }
 0x555   :  { %v12126_v23 = vmul.f32 %v11921_v55, %v15456_v43  ;;  %v15459_v13 = vsub.f32 %v11508_v8, %v11788_v15  ;;  %v15461_v50 = vsub.f32 %v11521_v11, %v11788_v15  ;;  %v15462_v43 = vsub.f32 %v11526_v33, %v11788_v15 }
 0x556   :  { %v12114_v17 = vmul.f32 %v11921_v55, %v15454_v51  ;;  %v12132_v2 = vmul.f32 %v11921_v55, %v15457_v49  ;;  %v12138_v20 = vmul.f32 %v11921_v55, %v15458_v48  ;;  %v15460_v51 = vsub.f32 %v11512_v19, %v11788_v15  ;;  %v15463_v49 = vld [vmem:[#allocation27_spill] sm:$0xff] }
 0x557   :  { %v12144_v27 = vmul.f32 %v11921_v55, %v15459_v13  ;;  %v12156_v37 = vmul.f32 %v11921_v55, %v15461_v50  ;;  %v12162_v8 = vmul.f32 %v11921_v55, %v15462_v43  ;;  %v15464_v48 = vsub.f32 %v15463_v49, %v11788_v15  ;;  %v15465_v13 = vld [vmem:[#allocation28_spill] sm:$0xff] }
 0x558   :  { %v12150_v4 = vmul.f32 %v11921_v55, %v15460_v51  ;;  %v15466_v51 = vsub.f32 %v15465_v13, %v11788_v15  ;;  %v15467_v50 = vsub.f32 %v11550_v24, %v11788_v15  ;;  %v15468_v43 = vsub.f32 %v11554_v9, %v11788_v15 }
 0x559   :  { %v12168_v19 = vmul.f32 %v11921_v55, %v15464_v48  ;;  %v15469_v48 = vsub.f32 %v11563_v0, %v11788_v15 }
 0x55a   :  { %v12174_v11 = vmul.f32 %v11921_v55, %v15466_v51  ;;  %v12180_v33 = vmul.f32 %v11921_v55, %v15467_v50  ;;  %v12186_v49 = vmul.f32 %v11921_v55, %v15468_v43  ;;  %v15470_v51 = vsub.f32 %v11568_v41, %v11788_v15 }
 0x55b   :  { %v12192_v13 = vmul.f32 %v11921_v55, %v15469_v48  ;;  %v15471_v50 = vsub.f32 %v11577_v46, %v11788_v15  ;;  %v15472_v43 = vsub.f32 %v11583_v38, %v11788_v15  ;;  %v15473_v48 = vsub.f32 %v11592_v61, %v11788_v15 }
 0x55c   :  { %v12198_v24 = vmul.f32 %v11921_v55, %v15470_v51  ;;  %v15474_v51 = vsub.f32 %v11596_v45, %v11788_v15  ;;  %v9726_v45 = vld [vmem:[%s15210_s2 + $0xb0] sm:$0xff]  }
 0x55d   :  { %v12204_v9 = vmul.f32 %v11921_v55, %v15471_v50  ;;  %v12210_v0 = vmul.f32 %v11921_v55, %v15472_v43  ;;  %v12216_v41 = vmul.f32 %v11921_v55, %v15473_v48  ;;  %v15475_v50 = vsub.f32 %v11605_v25, %v11788_v15  ;;  %6623 = vmatpush1.bf16.msra.mxu1 %v9726_v45 }
 0x55e   :  { %v12222_v46 = vmul.f32 %v11921_v55, %v15474_v51  ;;  %v15476_v43 = vsub.f32 %v15409_v53, %v11788_v15  ;;  %v12237_v48 = vmul.f32 %v11921_v55, %v4023_v60  ;;  %v15478_v51 = vsub.f32 %v15412_v56, %v11788_v15  ;;  %6624 = vmatprep.subr.bf16.mxu1 %v15376_v12 }
 0x55f   :  { %v12228_v38 = vmul.f32 %v11921_v55, %v15475_v50  ;;  %v15479_v50 = vsub.f32 %v11661_v36, %v11788_v15  ;;  %v12258_v60 = vmul.f32 %v11921_v55, %v4027_v40  ;;  %v12264_v56 = vmul.f32 %v11921_v55, %v4029_v58  ;;  %v15483_v40 = vld [vmem:[#allocation34_spill] sm:$0xff] }
 0x560   :  { %v12234_v61 = vmul.f32 %v11921_v55, %v15476_v43  ;;  %15477 = vst [vmem:[#allocation16_spill] sm:$0xff] %v12237_v48  ;;  %v12246_v25 = vmul.f32 %v11921_v55, %v15478_v51  ;;  %v12255_v43 = vmul.f32 %v11921_v55, %v4026_v29  ;;  %v12261_v48 = vmul.f32 %v11921_v55, %v4028_v39 }
 0x561   :  { %v12252_v53 = vmul.f32 %v11921_v55, %v15479_v50  ;;  %v15481_v51 = vsub.f32 %v11722_v5, %v11788_v15  ;;  %v15482_v50 = vsub.f32 %v11732_v57, %v11788_v15  ;;  %v15484_v39 = vsub.f32 %v15483_v40, %v11788_v15 }
 0x562   :  { %15480 = vst [vmem:[#allocation17_spill] sm:$0xff] %v12261_v48  ;;  %v15485_v58 = vsub.f32 %v11745_v42, %v11788_v15 }
 0x563   :  { %v12270_v36 = vmul.f32 %v11921_v55, %v15481_v51  ;;  %v12276_v29 = vmul.f32 %v11921_v55, %v15482_v50  ;;  %v12282_v48 = vmul.f32 %v11921_v55, %v15484_v39  ;;  %v15487_v51 = vsub.f32 %v11751_v63, %v11788_v15  ;;  %v15488_v50 = vld [vmem:[#allocation35_spill] sm:$0xff]  ;;  %v15490_v39 = vld [vmem:[#allocation36_spill] sm:$0xff] }
 0x564   :  { %v12288_v5 = vmul.f32 %v11921_v55, %v15485_v58  ;;  %v15489_v45 = vsub.f32 %v15488_v50, %v11788_v15  ;;  %v15491_v42 = vsub.f32 %v15490_v39, %v11788_v15  ;;  %v12317_v50 = vadd.f32 %v11932_v52, %v11951_v14 }
 0x565   :  { %v12294_v57 = vmul.f32 %v11921_v55, %v15487_v51  ;;  %v12325_v39 = vadd.f32 %v11932_v52, %v11963_v1  ;;  %v12337_v14 = vadd.f32 %v11932_v52, %v11981_v32 }
 0x566   :  { %15486 = vst [vmem:[#allocation22_spill] sm:$0xff] %v12288_v5  ;;  %v12300_v40 = vmul.f32 %v11921_v55, %v15489_v45  ;;  %v12307_v58 = vmul.f32 %v11921_v55, %v15491_v42  ;;  %v15492_v5 = vld [vmem:[#allocation37_spill] sm:$0xff]  ;;  %v12321_v45 = vadd.f32 %v11932_v52, %v11957_v35  ;;  %v12329_v42 = vadd.f32 %v11932_v52, %v11969_v6 }
 0x567   :  { %v15493_v63 = vsub.f32 %v15492_v5, %v11788_v15  ;;  %15494 = vst [vmem:[#allocation23_spill] sm:$0xff] %v12325_v39  ;;  %v15496_v15 = vld [vmem:[#allocation8_spill] sm:$0xff]  ;;  %v15498_v5 = vld [vmem:[#allocation9_spill] sm:$0xff]  ;;  %v15500_v39 = vld [vmem:[#allocation11_spill] sm:$0xff] }
 0x568   :  { %15495 = vst [vmem:[#allocation24_spill] sm:$0xff] %v12329_v42  ;;  %v12341_v35 = vadd.f32 %v11932_v52, %v15498_v5  ;;  %v12349_v6 = vadd.f32 %v11932_v52, %v15500_v39  ;;  %v15501_v42 = vld [vmem:[#allocation12_spill] sm:$0xff]  ;;  %v12361_v5 = vadd.f32 %v11932_v52, %v12018_v3  ;;  %v12369_v39 = vadd.f32 %v11932_v52, %v12030_v28 }
 0x569   :  { %v12313_v51 = vmul.f32 %v11921_v55, %v15493_v63  ;;  %v12333_v55 = vadd.f32 %v11932_v52, %v15496_v15  ;;  %v15499_v63 = vld [vmem:[#allocation10_spill] sm:$0xff]  ;;  %v12353_v15 = vadd.f32 %v11932_v52, %v15501_v42  ;;  %v12373_v42 = vadd.f32 %v11932_v52, %v12036_v7 }
 0x56a   :  { %v12345_v1 = vadd.f32 %v11932_v52, %v15499_v63  ;;  %v12365_v63 = vadd.f32 %v11932_v52, %v12024_v47  ;;  %v12381_v3 = vadd.f32 %v11932_v52, %v12048_v10  ;;  %v12385_v47 = vadd.f32 %v11932_v52, %v12054_v18 }
 0x56b   :  { %15497 = vst [vmem:[#allocation25_spill] sm:$0xff] %v12333_v55  ;;  %v15502_v55 = vld [vmem:[#allocation14_spill] sm:$0xff]  ;;  %v12389_v28 = vadd.f32 %v11932_v52, %v12060_v31  ;;  %v12393_v7 = vadd.f32 %v11932_v52, %v12066_v54  ;;  %v12401_v10 = vadd.f32 %v11932_v52, %v12078_v34  ;;  %v12405_v18 = vadd.f32 %v11932_v52, %v12084_v30 }
 0x56c   :  { %v12357_v32 = vadd.f32 %v11932_v52, %v15502_v55  ;;  %v12377_v55 = vadd.f32 %v11932_v52, %v12042_v59  ;;  %v12397_v59 = vadd.f32 %v11932_v52, %v12072_v22  ;;  %v12409_v31 = vadd.f32 %v11932_v52, %v12090_v21 }
 0x56d   :  { %v12413_v54 = vadd.f32 %v11932_v52, %v12096_v26  ;;  %v12417_v22 = vadd.f32 %v11932_v52, %v12102_v16  ;;  %v12421_v34 = vadd.f32 %v11932_v52, %v12108_v62  ;;  %v12425_v30 = vadd.f32 %v11932_v52, %v12114_v17 }
 0x56e   :  { %v12429_v21 = vadd.f32 %v11932_v52, %v12120_v44  ;;  %v12433_v26 = vadd.f32 %v11932_v52, %v12126_v23  ;;  %v12437_v16 = vadd.f32 %v11932_v52, %v12132_v2  ;;  %v12441_v62 = vadd.f32 %v11932_v52, %v12138_v20 }
 0x56f   :  { %v12445_v17 = vadd.f32 %v11932_v52, %v12144_v27  ;;  %v12449_v44 = vadd.f32 %v11932_v52, %v12150_v4  ;;  %v12453_v23 = vadd.f32 %v11932_v52, %v12156_v37  ;;  %v12457_v2 = vadd.f32 %v11932_v52, %v12162_v8 }
 0x570   :  { %v12461_v20 = vadd.f32 %v11932_v52, %v12168_v19  ;;  %v12465_v27 = vadd.f32 %v11932_v52, %v12174_v11  ;;  %v12469_v4 = vadd.f32 %v11932_v52, %v12180_v33  ;;  %v12473_v37 = vadd.f32 %v11932_v52, %v12186_v49 }
 0x571   :  { %v12477_v8 = vadd.f32 %v11932_v52, %v12192_v13  ;;  %v12481_v19 = vadd.f32 %v11932_v52, %v12198_v24  ;;  %v12485_v11 = vadd.f32 %v11932_v52, %v12204_v9  ;;  %v12489_v33 = vadd.f32 %v11932_v52, %v12210_v0 }
 0x572   :  { %15503 = vst [vmem:[#allocation26_spill] sm:$0xff] %v12461_v20  ;;  %15504 = vst [vmem:[#allocation29_spill] sm:$0xff] %v12465_v27  ;;  %v12493_v49 = vadd.f32 %v11932_v52, %v12216_v41  ;;  %v12497_v13 = vadd.f32 %v11932_v52, %v12222_v46  ;;  %v12501_v24 = vadd.f32 %v11932_v52, %v12228_v38  ;;  %v9727_v46 = vld [vmem:[%s15210_s2 + $0xb8] sm:$0xff]  }
 0x573   :  { %15505 = vst [vmem:[#allocation30_spill] sm:$0xff] %v12469_v4  ;;  %15506 = vst [vmem:[#allocation31_spill] sm:$0xff] %v12473_v37  ;;  %v12505_v9 = vadd.f32 %v11932_v52, %v12234_v61  ;;  %v12513_v41 = vadd.f32 %v11932_v52, %v12246_v25  ;;  %v12520_v38 = vadd.f32 %v11932_v52, %v12252_v53  ;;  %6625 = vmatpush1.bf16.msra.mxu1 %v9727_v46 }
 0x574   :  { %15507 = vst [vmem:[#allocation33_spill] sm:$0xff] %v12477_v8  ;;  %15508 = vst [vmem:[#allocation13_spill] sm:$0xff] %v12481_v19  ;;  %v12524_v61 = vadd.f32 %v11932_v52, %v12255_v43  ;;  %v12540_v53 = vadd.f32 %v11932_v52, %v12270_v36  ;;  %v12544_v43 = vadd.f32 %v11932_v52, %v12276_v29  ;;  %6626 = vmatprep.subr.bf16.mxu1 %v15376_v12 }
 0x575   :  { %15509 = vst [vmem:[#allocation15_spill] sm:$0xff] %v12485_v11  ;;  %15510 = vst [vmem:[#allocation18_spill] sm:$0xff] %v12489_v33  ;;  %v15515_v11 = vld [vmem:[#allocation16_spill] sm:$0xff]  ;;  %v12560_v36 = vadd.f32 %v11932_v52, %v12300_v40  ;;  %v12564_v29 = vadd.f32 %v11932_v52, %v12307_v58  ;;  %v15277_v46 = vmax.f32 %v12317_v50, 0.0  ;;  %v15532_v40 = vld [vmem:[#allocation25_spill] sm:$0xff]  ;;  %v15285_v58 = vmax.f32 %v12381_v3, 0.0 }
 0x576   :  { %15511 = vst [vmem:[#allocation19_spill] sm:$0xff] %v12493_v49  ;;  %15512 = vst [vmem:[#allocation20_spill] sm:$0xff] %v12497_v13  ;;  %v12509_v0 = vadd.f32 %v11932_v52, %v15515_v11  ;;  %v12528_v11 = vadd.f32 %v11932_v52, %v12258_v60  ;;  %v12548_v60 = vadd.f32 %v11932_v52, %v12282_v48  ;;  %v15537_v12 = vmax.f32 %v12361_v5, 0.0 }
 0x577   :  { %15513 = vst [vmem:[#allocation21_spill] sm:$0xff] %v12501_v24  ;;  %15514 = vst [vmem:[#allocation27_spill] sm:$0xff] %v12505_v9  ;;  %v12569_v48 = vadd.f32 %v11932_v52, %v12313_v51  ;;  %v15283_v51 = vmax.f32 %v12357_v32, 0.0 }
 0x578   :  { %15516 = vst [vmem:[#allocation28_spill] sm:$0xff] %v12509_v0  ;;  %15517 = vst [vmem:[#allocation34_spill] sm:$0xff] %v12513_v41  ;;  %v15519_v0 = vld [vmem:[#allocation17_spill] sm:$0xff]  ;;  %v12536_v41 = vadd.f32 %v11932_v52, %v12264_v56  ;;  %v12556_v56 = vadd.f32 %v11932_v52, %v12294_v57  ;;  %v15530_v57 = vld [vmem:[#allocation23_spill] sm:$0xff] }
 0x579   :  { %15518 = vst [vmem:[#allocation35_spill] sm:$0xff] %v12528_v11  ;;  %v12532_v25 = vadd.f32 %v11932_v52, %v15519_v0  ;;  %15522 = vst [vmem:[#allocation8_spill] sm:$0xff] %v12540_v53  ;;  %v15525_v11 = vld [vmem:[#allocation22_spill] sm:$0xff] }
 0x57a   :  { %15521 = vst [vmem:[#allocation37_spill] sm:$0xff] %v12536_v41  ;;  %15523 = vst [vmem:[#allocation9_spill] sm:$0xff] %v12544_v43  ;;  %v12552_v0 = vadd.f32 %v11932_v52, %v15525_v11  ;;  %v15278_v11 = vmax.f32 %v12321_v45, 0.0  ;;  %v15282_v52 = vmax.f32 %v12353_v15, 0.0  ;;  %v15535_v43 = vmax.f32 %v12345_v1, 0.0 }
 0x57b   :  { %15520 = vst [vmem:[#allocation36_spill] sm:$0xff] %v12532_v25  ;;  %15524 = vst [vmem:[#allocation10_spill] sm:$0xff] %v12548_v60 }
 0x57c   :  { %15526 = vst [vmem:[#allocation11_spill] sm:$0xff] %v12552_v0  ;;  %15527 = vst [vmem:[#allocation12_spill] sm:$0xff] %v12556_v56  ;;  %v15279_v56 = vmax.f32 %v15530_v57, 0.0  ;;  %v15531_v0 = vld [vmem:[#allocation24_spill] sm:$0xff] }
 0x57d   :  { %15528 = vst [vmem:[#allocation14_spill] sm:$0xff] %v12560_v36  ;;  %15529 = vst [vmem:[#allocation16_spill] sm:$0xff] %v12564_v29  ;;  %v15280_v60 = vmax.f32 %v15531_v0, 0.0  ;;  %v15281_v36 = vmax.f32 %v15532_v40, 0.0  ;;  %v4206_v29 = vmax.f32 %v12437_v16, 0.0  ;;  %v15292_v16 = vmax.f32 %v12469_v4, 0.0 }
 0x57e   :  { %4240 = vst [vmem:[#allocation3 + $0x19] sm:$0xff] %v15277_v46  ;;  %4241 = vst [vmem:[#allocation3 + $0x21] sm:$0xff] %v15278_v11  ;;  %v15533_v46 = vmax.f32 %v12337_v14, 0.0  ;;  %v15534_v11 = vmax.f32 %v12341_v35, 0.0 }
 0x57f   :  { %4242 = vst [vmem:[#allocation3 + $0x31] sm:$0xff] %v15279_v56  ;;  %4243 = vst [vmem:[#allocation3 + $0x39] sm:$0xff] %v15280_v60  ;;  %v15284_v56 = vmax.f32 %v12377_v55, 0.0  ;;  %v15536_v60 = vmax.f32 %v12349_v6, 0.0 }
 0x580   :  { %4244 = vst [vmem:[#allocation3 + $0x49] sm:$0xff] %v15281_v36  ;;  %4245 = vst [vmem:[#allocation3 + $0x51] sm:$0xff] %v15533_v46  ;;  %v15286_v46 = vmax.f32 %v12393_v7, 0.0  ;;  %v15291_v36 = vmax.f32 %v12449_v44, 0.0 }
 0x581   :  { %4246 = vst [vmem:[#allocation3 + $0x61] sm:$0xff] %v15534_v11  ;;  %4247 = vst [vmem:[#allocation3 + $0x69] sm:$0xff] %v15535_v43  ;;  %v15538_v43 = vmax.f32 %v12365_v63, 0.0  ;;  %v15288_v11 = vmax.f32 %v12413_v54, 0.0 }
 0x582   :  { %4248 = vst [vmem:[#allocation3 + $0x79] sm:$0xff] %v15536_v60  ;;  %4249 = vst [vmem:[#allocation3 + $0x81] sm:$0xff] %v15282_v52  ;;  %v15539_v60 = vmax.f32 %v12369_v39, 0.0  ;;  %v15540_v52 = vmax.f32 %v12373_v42, 0.0 }
 0x583   :  { %4250 = vst [vmem:[#allocation3 + $0x91] sm:$0xff] %v15283_v51  ;;  %4251 = vst [vmem:[#allocation3 + $0x99] sm:$0xff] %v15537_v12  ;;  %v15287_v51 = vmax.f32 %v12409_v31, 0.0  ;;  %v15541_v12 = vmax.f32 %v12385_v47, 0.0 }
 0x584   :  { %4252 = vst [vmem:[#allocation3 + $0xa9] sm:$0xff] %v15538_v43  ;;  %4253 = vst [vmem:[#allocation3 + $0xb1] sm:$0xff] %v15539_v60  ;;  %v15542_v43 = vmax.f32 %v12389_v28, 0.0  ;;  %v15290_v60 = vmax.f32 %v12445_v17, 0.0 }
 0x585   :  { %4254 = vst [vmem:[#allocation3 + $0xc1] sm:$0xff] %v15540_v52  ;;  %4255 = vst [vmem:[#allocation3 + $0xc9] sm:$0xff] %v15284_v56  ;;  %v15289_v52 = vmax.f32 %v12425_v30, 0.0  ;;  %v15543_v56 = vmax.f32 %v12397_v59, 0.0 }
 0x586   :  { %4256 = vst [vmem:[#allocation3 + $0xd9] sm:$0xff] %v15285_v58  ;;  %4257 = vst [vmem:[#allocation3 + $0xe1] sm:$0xff] %v15541_v12  ;;  %v15544_v58 = vmax.f32 %v12401_v10, 0.0  ;;  %v15545_v12 = vmax.f32 %v12405_v18, 0.0  ;;  %v5329_v4 = vld [vmem:[#allocation3 + $0x32] sm:$0xff] }
 0x587   :  { %4258 = vst [vmem:[#allocation3 + $0xf1] sm:$0xff] %v15542_v43  ;;  %4259 = vst [vmem:[#allocation3 + $0xf9] sm:$0xff] %v15286_v46  ;;  %v4207_v43 = vmax.f32 %v12441_v62, 0.0  ;;  %v15550_v62 = vld [vmem:[#allocation15_spill] sm:$0xff]  ;;  %v15552_v46 = vmax.f32 %v12457_v2, 0.0 }
 0x588   :  { %4260 = vst [vmem:[#allocation3 + $0x109] sm:$0xff] %v15543_v56  ;;  %4261 = vst [vmem:[#allocation3 + $0x111] sm:$0xff] %v15544_v58  ;;  %v15546_v56 = vmax.f32 %v12417_v22, 0.0  ;;  %v15547_v58 = vmax.f32 %v12421_v34, 0.0 }
 0x589   :  { %4262 = vst [vmem:[#allocation3 + $0x121] sm:$0xff] %v15545_v12  ;;  %4263 = vst [vmem:[#allocation3 + $0x129] sm:$0xff] %v15287_v51  ;;  %v15548_v51 = vmax.f32 %v12429_v21, 0.0  ;;  %v5334_v12 = vld [vmem:[#allocation3 + $0x6a] sm:$0xff] }
 0x58a   :  { %4264 = vst [vmem:[#allocation3 + $0x139] sm:$0xff] %v15288_v11  ;;  %4265 = vst [vmem:[#allocation3 + $0x141] sm:$0xff] %v15546_v56  ;;  %v15549_v11 = vmax.f32 %v12433_v26, 0.0 }
 0x58b   :  { %4266 = vst [vmem:[#allocation3 + $0x151] sm:$0xff] %v15547_v58  ;;  %4267 = vst [vmem:[#allocation3 + $0x159] sm:$0xff] %v15289_v52  ;;  %v15556_v58 = vld [vmem:[#allocation34_spill] sm:$0xff] }
 0x58c   :  { %4268 = vst [vmem:[#allocation3 + $0x169] sm:$0xff] %v15548_v51  ;;  %4269 = vst [vmem:[#allocation3 + $0x171] sm:$0xff] %v15549_v11  ;;  %v15551_v51 = vmax.f32 %v12453_v23, 0.0  ;;  %v5330_v11 = vld [vmem:[#allocation3 + $0x3a] sm:$0xff]  ;;  %v5332_v52 = vld [vmem:[#allocation3 + $0x52] sm:$0xff] }
 0x58d   :  { %4270 = vst [vmem:[#allocation3 + $0x181] sm:$0xff] %v4206_v29  ;;  %4271 = vst [vmem:[#allocation3 + $0x189] sm:$0xff] %v4207_v43  ;;  %v15553_v43 = vmax.f32 %v12461_v20, 0.0  ;;  %v15555_v29 = vld [vmem:[#allocation28_spill] sm:$0xff]  ;;  %v15568_v20 = vld [vmem:[#allocation11_spill] sm:$0xff] }
 0x58e   :  { %4272 = vst [vmem:[#allocation3 + $0x1c9] sm:$0xff] %v15290_v60  ;;  %4273 = vst [vmem:[#allocation3 + $0x1d1] sm:$0xff] %v15291_v36  ;;  %v15554_v60 = vmax.f32 %v12465_v27, 0.0  ;;  %v4307_v36 = vld [vmem:[#allocation3 + $0x20] sm:$0xff]  ;;  %v15561_v27 = vld [vmem:[#allocation35_spill] sm:$0xff] }
 0x58f   :  { %4274 = vst [vmem:[#allocation3 + $0x1e1] sm:$0xff] %v15551_v51  ;;  %4275 = vst [vmem:[#allocation3 + $0x1e9] sm:$0xff] %v15552_v46  ;;  %v4306_v51 = vld [vmem:[#allocation3 + $0x18] sm:$0xff]  ;;  %v15557_v46 = vmax.f32 %v12473_v37, 0.0 }
 0x590   :  { %4276 = vst [vmem:[#allocation3 + $0x1f9] sm:$0xff] %v15553_v43  ;;  %4277 = vst [vmem:[#allocation3 + $0x201] sm:$0xff] %v15554_v60  ;;  %v15558_v43 = vmax.f32 %v12477_v8, 0.0  ;;  %v15559_v60 = vmax.f32 %v12481_v19, 0.0  ;;  %v15566_v19 = vld [vmem:[#allocation9_spill] sm:$0xff]  ;;  %v15567_v8 = vld [vmem:[#allocation10_spill] sm:$0xff] }
 0x591   :  { %4278 = vst [vmem:[#allocation3 + $0x211] sm:$0xff] %v15292_v16  ;;  %4279 = vst [vmem:[#allocation3 + $0x219] sm:$0xff] %v15557_v46  ;;  %v15560_v16 = vmax.f32 %v15550_v62, 0.0  ;;  %v15562_v46 = vmax.f32 %v12489_v33, 0.0  ;;  %v5331_v62 = vld [vmem:[#allocation3 + $0x4a] sm:$0xff]  ;;  %v4238_v33 = vmax.f32 %v12569_v48, 0.0 }
 0x592   :  { %4280 = vst [vmem:[#allocation3 + $0x229] sm:$0xff] %v15558_v43  ;;  %4281 = vst [vmem:[#allocation3 + $0x231] sm:$0xff] %v15559_v60  ;;  %v15563_v43 = vmax.f32 %v12493_v49, 0.0  ;;  %v15564_v60 = vmax.f32 %v12497_v13, 0.0  ;;  %v15574_v13 = vld [vmem:[#allocation14_spill] sm:$0xff]  ;;  %v15575_v49 = vld [vmem:[#allocation16_spill] sm:$0xff] }
 0x593   :  { %4282 = vst [vmem:[#allocation3 + $0x241] sm:$0xff] %v15560_v16  ;;  %4283 = vst [vmem:[#allocation3 + $0x249] sm:$0xff] %v15562_v46  ;;  %v15565_v16 = vmax.f32 %v12501_v24, 0.0  ;;  %v15569_v46 = vmax.f32 %v12505_v9, 0.0  ;;  %v15573_v24 = vld [vmem:[#allocation12_spill] sm:$0xff]  ;;  %v4236_v56 = vmax.f32 %v15574_v13, 0.0 }
 0x594   :  { %4284 = vst [vmem:[#allocation3 + $0x259] sm:$0xff] %v15563_v43  ;;  %4285 = vst [vmem:[#allocation3 + $0x261] sm:$0xff] %v15564_v60  ;;  %v15570_v43 = vmax.f32 %v15555_v29, 0.0  ;;  %v15571_v60 = vmax.f32 %v15556_v58, 0.0  ;;  %v4237_v37 = vmax.f32 %v15575_v49, 0.0  ;;  %v15576_v9 = vmax.f32 %v12524_v61, 0.0 }
 0x595   :  { %4286 = vst [vmem:[#allocation3 + $0x271] sm:$0xff] %v15565_v16  ;;  %4287 = vst [vmem:[#allocation3 + $0x279] sm:$0xff] %v15569_v46  ;;  %v15572_v16 = vmax.f32 %v12520_v38, 0.0  ;;  %v15577_v46 = vmax.f32 %v15561_v27, 0.0  ;;  %v15580_v13 = vmax.f32 %v12540_v53, 0.0  ;;  %v15581_v49 = vmax.f32 %v15566_v19, 0.0 }
 0x596   :  { %4288 = vst [vmem:[#allocation3 + $0x289] sm:$0xff] %v15570_v43  ;;  %4289 = vst [vmem:[#allocation3 + $0x291] sm:$0xff] %v15571_v60  ;;  %v15578_v43 = vmax.f32 %v12532_v25, 0.0  ;;  %v15579_v60 = vmax.f32 %v12536_v41, 0.0  ;;  %v15582_v48 = vmax.f32 %v15567_v8, 0.0  ;;  %v12754_v25 = vpack.c.bf16 %v4307_v36, %v4306_v51  ;;  %v4309_v51 = vld [vmem:[#allocation3 + $0x38] sm:$0xff] }
 0x597   :  { %4290 = vst [vmem:[#allocation3 + $0x2a1] sm:$0xff] %v15572_v16  ;;  %4291 = vst [vmem:[#allocation3 + $0x2a9] sm:$0xff] %v15576_v9  ;;  %v5333_v16 = vld [vmem:[#allocation3 + $0x62] sm:$0xff]  ;;  %v15583_v9 = vmax.f32 %v15568_v20, 0.0  ;;  %v12756_v53 = vpack.c.bf16 %v5332_v52, %v5331_v62  ;;  %v15590_v36 = vmax.f32 %v12337_v14, 0.0  ;;  %v4308_v14 = vld [vmem:[#allocation3 + $0x30] sm:$0xff] }
 0x598   :  { %4292 = vst [vmem:[#allocation3 + $0x2b9] sm:$0xff] %v15577_v46  ;;  %4293 = vst [vmem:[#allocation3 + $0x2c1] sm:$0xff] %v15578_v43  ;;  %v15584_v46 = vmax.f32 %v12317_v50, 0.0  ;;  %v15585_v43 = vmax.f32 %v12321_v45, 0.0  ;;  %v12765_v45 = vpack.c.bf16 %v5334_v12, %v5333_v16  ;;  %v15595_v62 = vmax.f32 %v12357_v32, 0.0  ;;  %v5335_v16 = vld [vmem:[#allocation3 + $0x7a] sm:$0xff] }
 0x599   :  { %4294 = vst [vmem:[#allocation3 + $0x2d1] sm:$0xff] %v15579_v60  ;;  %4295 = vst [vmem:[#allocation3 + $0x2d9] sm:$0xff] %v15580_v13  ;;  %v12752_v60 = vpack.c.bf16 %v5330_v11, %v5329_v4  ;;  %v15586_v13 = vmax.f32 %v15573_v24, 0.0  ;;  %v15589_v4 = vmax.f32 %v15532_v40, 0.0  ;;  %v15596_v12 = vmax.f32 %v12361_v5, 0.0 }
 0x59a   :  { %4296 = vst [vmem:[#allocation3 + $0x2e9] sm:$0xff] %v15581_v49  ;;  %4297 = vst [vmem:[#allocation3 + $0x2f1] sm:$0xff] %v15582_v48  ;;  %v4497_v41 = vpack.c.bf16 %v15585_v43, %v15584_v46  ;;  %v15587_v49 = vmax.f32 %v15530_v57, 0.0  ;;  %v15588_v48 = vmax.f32 %v15531_v0, 0.0  ;;  %v15594_v57 = vmax.f32 %v12353_v15, 0.0 }
 0x59b   :  { %4298 = vst [vmem:[#allocation3 + $0x301] sm:$0xff] %v15583_v9  ;;  %4299 = vst [vmem:[#allocation3 + $0x309] sm:$0xff] %v15586_v13  ;;  %8771 = vmatprep.mubr.bf16.mxu0 %v12752_v60  ;;  %v4499_v52 = vpack.c.bf16 %v15590_v36, %v15589_v4  ;;  %v15599_v15 = vmax.f32 %v12373_v42, 0.0  ;;  %v15600_v9 = vmax.f32 %v12377_v55, 0.0  ;;  %v15601_v32 = vmax.f32 %v12381_v3, 0.0  ;;  %v5338_v13 = vld [vmem:[#allocation3 + $0x9a] sm:$0xff] }
 0x59c   :  { %4300 = vst [vmem:[#allocation3 + $0x319] sm:$0xff] %v4236_v56  ;;  %4301 = vst [vmem:[#allocation3 + $0x321] sm:$0xff] %v4237_v37  ;;  %v4498_v50 = vpack.c.bf16 %v15588_v48, %v15587_v49  ;;  %6361 = vmatprep.mubr.bf16.mxu1 %v4497_v41  ;;  %8772 = vmatmul.mubr.bf16.vlgmr.msra.gmra.mrb[128].mxu0 %v12756_v53  ;;  %v15591_v37 = vmax.f32 %v12341_v35, 0.0  ;;  %v15593_v41 = vmax.f32 %v12349_v6, 0.0  ;;  %v15597_v35 = vmax.f32 %v12365_v63, 0.0  ;;  %v5336_v6 = vld [vmem:[#allocation3 + $0x82] sm:$0xff] }
 0x59d   :  { %4302 = vst [vmem:[#allocation3 + $0x331] sm:$0xff] %v4238_v33  ;;  %6362 = vmatmul.mubr.bf16.gmra.mrb[68].mxu1 %v12754_v25  ;;  %v15592_v33 = vmax.f32 %v12345_v1, 0.0  ;;  %8775 = vmatprep.mubr.bf16.mxu0 %v12765_v45  ;;  %v12788_v56 = vpack.c.bf16 %v15596_v12, %v15595_v62  ;;  %v15598_v1 = vmax.f32 %v12369_v39, 0.0  ;;  %v12800_v46 = vpack.c.bf16 %v15600_v9, %v15599_v15  ;;  %v5337_v63 = vld [vmem:[#allocation3 + $0x92] sm:$0xff]  ;;  %v15629_v9 = vld [vmem:[#allocation13_spill] sm:$0xff] }
 0x59e   :  { %6369 = vmatprep.mubr.bf16.mxu1 %v4498_v50  ;;  %v12782_v40 = vpack.c.bf16 %v15594_v57, %v15593_v41  ;;  %v15602_v5 = vmax.f32 %v12385_v47, 0.0  ;;  %v15603_v39 = vmax.f32 %v12389_v28, 0.0  ;;  %v15604_v49 = vmax.f32 %v12393_v7, 0.0 }
 0x59f   :  { %v4500_v0 = vpack.c.bf16 %v15592_v33, %v15591_v37  ;;  %v12794_v11 = vpack.c.bf16 %v15598_v1, %v15597_v35  ;;  %v15605_v42 = vmax.f32 %v12397_v59, 0.0  ;;  %v15606_v55 = vmax.f32 %v12401_v10, 0.0  ;;  %v15619_v35 = vld [vmem:[#allocation26_spill] sm:$0xff]  ;;  %v15621_v1 = vld [vmem:[#allocation29_spill] sm:$0xff] }
 0x5a0   :  { %v12806_v43 = vpack.c.bf16 %v15602_v5, %v15601_v32  ;;  %v12812_v48 = vpack.c.bf16 %v15604_v49, %v15603_v39  ;;  %v15607_v3 = vmax.f32 %v12405_v18, 0.0  ;;  %v15608_v47 = vmax.f32 %v12409_v31, 0.0  ;;  %v15633_v39 = vld [vmem:[#allocation18_spill] sm:$0xff] }
 0x5a1   :  { %v12818_v50 = vpack.c.bf16 %v15606_v55, %v15605_v42  ;;  %v15609_v36 = vmax.f32 %v12413_v54, 0.0  ;;  %v15610_v28 = vmax.f32 %v12417_v22, 0.0  ;;  %v15611_v7 = vmax.f32 %v12421_v34, 0.0  ;;  %v4310_v55 = vld [vmem:[#allocation3 + $0x48] sm:$0xff] }
 0x5a2   :  { %v12824_v4 = vpack.c.bf16 %v15608_v47, %v15607_v3  ;;  %v15612_v59 = vmax.f32 %v12425_v30, 0.0  ;;  %v12838_v10 = vpack.c.bf16 %v4309_v51, %v4308_v14  ;;  %v12840_v41 = vpack.c.bf16 %v5336_v6, %v5335_v16  ;;  %v15625_v16 = vld [vmem:[#allocation31_spill] sm:$0xff] }
 0x5a3   :  { %v12830_v37 = vpack.c.bf16 %v15610_v28, %v15609_v36  ;;  %v15613_v18 = vmax.f32 %v12429_v21, 0.0  ;;  %v15614_v31 = vmax.f32 %v12433_v26, 0.0  ;;  %v15615_v54 = vmax.f32 %v12445_v17, 0.0  ;;  %v15623_v17 = vld [vmem:[#allocation30_spill] sm:$0xff]  ;;  %v15635_v3 = vld [vmem:[#allocation19_spill] sm:$0xff]  ;;  %v15637_v36 = vld [vmem:[#allocation20_spill] sm:$0xff] }
 0x5a4   :  { %v12836_v33 = vpack.c.bf16 %v15612_v59, %v15611_v7  ;;  %v15616_v22 = vmax.f32 %v12449_v44, 0.0  ;;  %v12854_v34 = vpack.c.bf16 %v5338_v13, %v5337_v63  ;;  %v15617_v30 = vmax.f32 %v12453_v23, 0.0  ;;  %8776 = vmatmul.mubr.bf16.gmra.mrb[132].mxu0 %v12840_v41  ;;  %v15627_v23 = vld [vmem:[#allocation33_spill] sm:$0xff]  ;;  %v15631_v63 = vld [vmem:[#allocation15_spill] sm:$0xff] }
 0x5a5   :  { %v12846_v57 = vpack.c.bf16 %v15614_v31, %v15613_v18  ;;  %v15618_v14 = vmax.f32 %v12457_v2, 0.0  ;;  %v15620_v21 = vmax.f32 %v15619_v35, 0.0  ;;  %v15622_v26 = vmax.f32 %v15621_v1, 0.0  ;;  %6370 = vmatmul.mubr.bf16.gmra.mrb[72].mxu1 %v12838_v10  ;;  %v15639_v59 = vld [vmem:[#allocation21_spill] sm:$0xff]  ;;  %v15641_v31 = vld [vmem:[#allocation27_spill] sm:$0xff]  ;;  %v4311_v35 = vld [vmem:[#allocation3 + $0x50] sm:$0xff] }
 0x5a6   :  { %v12852_v62 = vpack.c.bf16 %v15616_v22, %v15615_v54  ;;  %v15624_v44 = vmax.f32 %v15623_v17, 0.0  ;;  %v15626_v6 = vmax.f32 %v15625_v16, 0.0  ;;  %v15628_v2 = vmax.f32 %v15627_v23, 0.0  ;;  %6377 = vmatprep.mubr.bf16.mxu1 %v4499_v52  ;;  %8779 = vmatprep.mubr.bf16.mxu0 %v12854_v34  ;;  %v5340_v1 = vld [vmem:[#allocation3 + $0xb2] sm:$0xff] }
 0x5a7   :  { %v12860_v12 = vpack.c.bf16 %v15618_v14, %v15617_v30  ;;  %v12866_v51 = vpack.c.bf16 %v15622_v26, %v15620_v21  ;;  %v15630_v32 = vmax.f32 %v15629_v9, 0.0  ;;  %v15632_v13 = vmax.f32 %v15631_v63, 0.0  ;;  %v5339_v21 = vld [vmem:[#allocation3 + $0xaa] sm:$0xff]  ;;  %v15652_v63 = vld [vmem:[#allocation8_spill] sm:$0xff] }
 0x5a8   :  { %v12874_v15 = vpack.c.bf16 %v15626_v6, %v15624_v44  ;;  %v15634_v49 = vmax.f32 %v15633_v39, 0.0  ;;  %v15636_v47 = vmax.f32 %v15635_v3, 0.0  ;;  %v15638_v28 = vmax.f32 %v15637_v36, 0.0  ;;  %v15648_v6 = vld [vmem:[#allocation36_spill] sm:$0xff]  ;;  %v5342_v9 = vld [vmem:[#allocation3 + $0xca] sm:$0xff] }
 0x5a9   :  { %v12880_v5 = vpack.c.bf16 %v15630_v32, %v15628_v2  ;;  %v15640_v18 = vmax.f32 %v15639_v59, 0.0  ;;  %v15642_v54 = vmax.f32 %v15641_v31, 0.0  ;;  %v15643_v22 = vmax.f32 %v15555_v29, 0.0  ;;  %v5341_v29 = vld [vmem:[#allocation3 + $0xc2] sm:$0xff] }
 0x5aa   :  { %v12887_v42 = vpack.c.bf16 %v15634_v49, %v15632_v13  ;;  %v12893_v7 = vpack.c.bf16 %v15638_v28, %v15636_v47  ;;  %v15644_v30 = vmax.f32 %v15556_v58, 0.0  ;;  %v15645_v26 = vmax.f32 %v12520_v38, 0.0  ;;  %v15650_v58 = vld [vmem:[#allocation37_spill] sm:$0xff] }
 0x5ab   :  { %v12899_v52 = vpack.c.bf16 %v15642_v54, %v15640_v18  ;;  %v15646_v17 = vmax.f32 %v12524_v61, 0.0  ;;  %v15647_v16 = vmax.f32 %v15561_v27, 0.0  ;;  %v15649_v23 = vmax.f32 %v15648_v6, 0.0  ;;  %v4313_v18 = vld [vmem:[#allocation3 + $0x68] sm:$0xff]  ;;  %v5345_v54 = vld [vmem:[#allocation3 + $0xf2] sm:$0xff] }
 0x5ac   :  { %v12905_v14 = vpack.c.bf16 %v15644_v30, %v15643_v22  ;;  %v15651_v32 = vmax.f32 %v15650_v58, 0.0  ;;  %v15653_v13 = vmax.f32 %v15652_v63, 0.0  ;;  %v15654_v38 = vmax.f32 %v15566_v19, 0.0  ;;  %v4312_v19 = vld [vmem:[#allocation3 + $0x60] sm:$0xff]  ;;  %v9729_v30 = vld [vmem:[%s15210_s2 + $0xc8] sm:$0xff]  }
 0x5ad   :  { %v12911_v44 = vpack.c.bf16 %v15646_v17, %v15645_v26  ;;  %v12917_v2 = vpack.c.bf16 %v15649_v23, %v15647_v16  ;;  %v15655_v61 = vmax.f32 %v15567_v8, 0.0  ;;  %v15656_v27 = vmax.f32 %v15568_v20, 0.0  ;;  %v5343_v8 = vld [vmem:[#allocation3 + $0xda] sm:$0xff]  ;;  %v5344_v31 = vld [vmem:[#allocation3 + $0xe2] sm:$0xff]  ;;  %v5347_v17 = vld [vmem:[#allocation3 + $0x10a] sm:$0xff] }
 0x5ae   :  { %v12923_v39 = vpack.c.bf16 %v15653_v13, %v15651_v32  ;;  %v15657_v3 = vmax.f32 %v15573_v24, 0.0  ;;  %v12937_v36 = vpack.c.bf16 %v4311_v35, %v4310_v55  ;;  %v5398_v28 = vpack.c.bf16 %v5340_v1, %v5339_v21  ;;  %v5346_v22 = vld [vmem:[#allocation3 + $0xfa] sm:$0xff]  ;;  %v9730_v1 = vld [vmem:[%s15210_s2 + $0xd0] sm:$0xff]   ;;  %v5349_v6 = vld [vmem:[#allocation3 + $0x122] sm:$0xff] }
 0x5af   :  { %v12929_v49 = vpack.c.bf16 %v15655_v61, %v15654_v38  ;;  %v5399_v59 = vpack.c.bf16 %v5342_v9, %v5341_v29  ;;  %v9728_v20 = vld [vmem:[%s15210_s2 + $0xc0] sm:$0xff]   ;;  %v12943_v24 = vpack.c.bf16 %v4313_v18, %v4312_v19  ;;  %v5400_v55 = vpack.c.bf16 %v5344_v31, %v5343_v8  ;;  %v4314_v21 = vld [vmem:[#allocation3 + $0x78] sm:$0xff]  ;;  %v5350_v23 = vld [vmem:[#allocation3 + $0x12a] sm:$0xff] }
 0x5b0   :  { %v12935_v47 = vpack.c.bf16 %v15657_v3, %v15656_v27  ;;  %6378 = vmatmul.mubr.bf16.gmra.mrb[76].mxu1 %v12937_v36  ;;  %8780 = vmatmul.mubr.bf16.gmra.mrb[136].mxu0 %v5398_v28  ;;  %v15658_v35 = vmov 0   ;;  %v4315_v26 = vld [vmem:[#allocation3 + $0x80] sm:$0xff]  ;;  %v5348_v16 = vld [vmem:[#allocation3 + $0x112] sm:$0xff]  ;;  %v5403_v58 = vpack.c.bf16 %v5350_v23, %v5349_v6  ;;  %v5355_v18 = vld [vmem:[#allocation3 + $0x16a] sm:$0xff] }
 0x5b1   :  { %6385 = vmatprep.mubr.bf16.mxu1 %v4500_v0  ;;  %8783 = vmatprep.mubr.bf16.mxu0 %v5399_v59  ;;  %v5401_v0 = vpack.c.bf16 %v5346_v22, %v5345_v54  ;;  %v12955_v29 = vpack.c.bf16 %v4315_v26, %v4314_v21  ;;  %v5402_v9 = vpack.c.bf16 %v5348_v16, %v5347_v17  ;;  %v4317_v32 = vld [vmem:[#allocation3 + $0x98] sm:$0xff]  ;;  %v5352_v13 = vld [vmem:[#allocation3 + $0x142] sm:$0xff]  ;;  %v4319_v19 = vld [vmem:[#allocation3 + $0xb0] sm:$0xff] }
 0x5b2   :  { %6627 = vmatpush1.bf16.msra.mxu1 %v9728_v20  ;;  %v5351_v63 = vld [vmem:[#allocation3 + $0x13a] sm:$0xff]  ;;  %v5353_v38 = vld [vmem:[#allocation3 + $0x152] sm:$0xff]  ;;  %v4318_v59 = vld [vmem:[#allocation3 + $0xa8] sm:$0xff] }
 0x5b3   :  { %6628 = vmatprep.subr.bf16.mxu1 %v15658_v35  ;;  %v5354_v61 = vld [vmem:[#allocation3 + $0x15a] sm:$0xff]  ;;  %v5404_v3 = vpack.c.bf16 %v5352_v13, %v5351_v63  ;;  %v5356_v8 = vld [vmem:[#allocation3 + $0x172] sm:$0xff]  ;;  %v5357_v31 = vld [vmem:[#allocation3 + $0x182] sm:$0xff]  ;;  %v12968_v22 = vpack.c.bf16 %v4319_v19, %v4318_v59 }
 0x5b4   :  { %v5405_v28 = vpack.c.bf16 %v5354_v61, %v5353_v38  ;;  %v5358_v54 = vld [vmem:[#allocation3 + $0x18a] sm:$0xff]  ;;  %v5406_v20 = vpack.c.bf16 %v5356_v8, %v5355_v18  ;;  %v5361_v26 = vld [vmem:[#allocation3 + $0x1e2] sm:$0xff]  ;;  %v4322_v23 = vld [vmem:[#allocation3 + $0xd8] sm:$0xff] }
 0x5b5   :  { %v4321_v21 = vld [vmem:[#allocation3 + $0xc8] sm:$0xff]  ;;  %v5366_v63 = vld [vmem:[#allocation3 + $0x21a] sm:$0xff] }
 0x5b6   :  { %6629 = vmatpush1.bf16.msra.mxu1 %v9729_v30  ;;  %v5360_v30 = vld [vmem:[#allocation3 + $0x1a2] sm:$0xff]  ;;  %v5362_v17 = vld [vmem:[#allocation3 + $0x1ea] sm:$0xff] }
 0x5b7   :  { %6630 = vmatprep.subr.bf16.mxu1 %v15658_v35  ;;  %v5409_v6 = vpack.c.bf16 %v5362_v17, %v5361_v26  ;;  %v5369_v59 = vld [vmem:[#allocation3 + $0x242] sm:$0xff]  ;;  %v5370_v19 = vld [vmem:[#allocation3 + $0x24a] sm:$0xff] }
 0x5b8   :  { %6386 = vmatmul.mubr.bf16.gmra.mrb[80].mxu1 %v12943_v24  ;;  %8784 = vmatmul.mubr.bf16.gmra.mrb[140].mxu0 %v5400_v55  ;;  %v5407_v55 = vpack.c.bf16 %v5358_v54, %v5357_v31  ;;  %v5413_v31 = vpack.c.bf16 %v5370_v19, %v5369_v59  ;;  %v4326_v54 = vld [vmem:[#allocation3 + $0x108] sm:$0xff] }
 0x5b9   :  { %6393 = vmatprep.mubr.bf16.mxu1 %v12782_v40  ;;  %8787 = vmatprep.mubr.bf16.mxu0 %v5401_v0  ;;  %v4316_v40 = vld [vmem:[#allocation3 + $0x90] sm:$0xff]  ;;  %v4320_v0 = vld [vmem:[#allocation3 + $0xc0] sm:$0xff]  ;;  %v4329_v17 = vld [vmem:[#allocation3 + $0x128] sm:$0xff] }
 0x5ba   :  { %6631 = vmatpush1.bf16.msra.mxu1 %v9730_v1  ;;  %v12960_v27 = vpack.c.bf16 %v4317_v32, %v4316_v40  ;;  %v12972_v16 = vpack.c.bf16 %v4321_v21, %v4320_v0  ;;  %v5364_v40 = vld [vmem:[#allocation3 + $0x202] sm:$0xff]  ;;  %v5365_v32 = vld [vmem:[#allocation3 + $0x212] sm:$0xff]  ;;  %v5374_v0 = vld [vmem:[#allocation3 + $0x27a] sm:$0xff] }
 0x5bb   :  { %6632 = vmatprep.subr.bf16.mxu1 %v15658_v35  ;;  %v5411_v61 = vpack.c.bf16 %v5366_v63, %v5365_v32  ;;  %v4330_v63 = vld [vmem:[#allocation3 + $0x138] sm:$0xff] }
 0x5c0   :  { %6394 = vmatmul.mubr.bf16.gmra.mrb[84].mxu1 %v12955_v29  ;;  %8788 = vmatmul.mubr.bf16.gmra.mrb[144].mxu0 %v5402_v9  ;;  %v4323_v9 = vld [vmem:[#allocation3 + $0xe0] sm:$0xff] }
 0x5c1   :  { %6401 = vmatprep.mubr.bf16.mxu1 %v12788_v56  ;;  %8791 = vmatprep.mubr.bf16.mxu0 %v5403_v58  ;;  %v9731_v56 = vld [vmem:[%s15210_s2 + $0xd8] sm:$0xff]   ;;  %v12980_v13 = vpack.c.bf16 %v4323_v9, %v4322_v23  ;;  %v5377_v23 = vld [vmem:[#allocation3 + $0x2a2] sm:$0xff]  ;;  %v5378_v9 = vld [vmem:[#allocation3 + $0x2aa] sm:$0xff] }
 0x5c2   :  { %6633 = vmatpush1.bf16.msra.mxu1 %v9731_v56  ;;  %v5363_v58 = vld [vmem:[#allocation3 + $0x1fa] sm:$0xff]  ;;  %v5368_v56 = vld [vmem:[#allocation3 + $0x232] sm:$0xff]  ;;  %v5417_v32 = vpack.c.bf16 %v5378_v9, %v5377_v23  ;;  %v4341_v23 = vld [vmem:[#allocation3 + $0x1e8] sm:$0xff] }
 0x5c3   :  { %6634 = vmatprep.subr.bf16.mxu1 %v15658_v35  ;;  %v5410_v38 = vpack.c.bf16 %v5364_v40, %v5363_v58 }
 0x5c8   :  { %6402 = vmatmul.mubr.bf16.gmra.mrb[88].mxu1 %v12960_v27  ;;  %8792 = vmatmul.mubr.bf16.gmra.mrb[148].mxu0 %v5404_v3  ;;  %v4325_v3 = vld [vmem:[#allocation3 + $0xf8] sm:$0xff] }
 0x5c9   :  { %6409 = vmatprep.mubr.bf16.mxu1 %v12794_v11  ;;  %8795 = vmatprep.mubr.bf16.mxu0 %v5405_v28  ;;  %v5359_v11 = vld [vmem:[#allocation3 + $0x19a] sm:$0xff]  ;;  %v5367_v28 = vld [vmem:[#allocation3 + $0x22a] sm:$0xff] }
 0x5ca   :  { %v5408_v1 = vpack.c.bf16 %v5360_v30, %v5359_v11  ;;  %v5412_v8 = vpack.c.bf16 %v5368_v56, %v5367_v28  ;;  %v5372_v11 = vld [vmem:[#allocation3 + $0x262] sm:$0xff]  ;;  %v5373_v30 = vld [vmem:[#allocation3 + $0x272] sm:$0xff]  ;;  %v5382_v28 = vld [vmem:[#allocation3 + $0x2da] sm:$0xff] }
 0x5cb   :  { %v5415_v26 = vpack.c.bf16 %v5374_v0, %v5373_v30  ;;  %v4465_v30 = vld [vmem:[#allocation3 + $0x1b9] sm:$0xff]  ;;  %v4335_v0 = vld [vmem:[#allocation3 + $0x170] sm:$0xff] }
 0x5d0   :  { %6410 = vmatmul.mubr.bf16.gmra.mrb[92].mxu1 %v12968_v22  ;;  %8796 = vmatmul.mubr.bf16.gmra.mrb[152].mxu0 %v5406_v20  ;;  %v4327_v20 = vld [vmem:[#allocation3 + $0x110] sm:$0xff] }
 0x5d1   :  { %6417 = vmatprep.mubr.bf16.mxu1 %v12800_v46  ;;  %8799 = vmatprep.mubr.bf16.mxu0 %v5407_v55  ;;  %v9732_v46 = vld [vmem:[%s15210_s2 + $0xe0] sm:$0xff]   ;;  %v12992_v21 = vpack.c.bf16 %v4327_v20, %v4326_v54 }
 0x5d2   :  { %6635 = vmatpush1.bf16.msra.mxu1 %v9732_v46  ;;  %v5371_v55 = vld [vmem:[#allocation3 + $0x25a] sm:$0xff]  ;;  %v5376_v46 = vld [vmem:[#allocation3 + $0x292] sm:$0xff] }
 0x5d3   :  { %6636 = vmatprep.subr.bf16.mxu1 %v15658_v35 }
 0x5d8   :  { %6418 = vmatmul.mubr.bf16.gmra.mrb[96].mxu1 %v12972_v16  ;;  %8800 = vmatmul.mubr.bf16.gmra.mrb[156].mxu0 %v5408_v1  ;;  %v5414_v1 = vpack.c.bf16 %v5372_v11, %v5371_v55  ;;  %v9735_v55 = vld [vmem:[%s15210_s2 + $0xf8] sm:$0xff]  }
 0x5d9   :  { %6425 = vmatprep.mubr.bf16.mxu1 %v12806_v43  ;;  %8803 = vmatprep.mubr.bf16.mxu0 %v5409_v6  ;;  %v4324_v43 = vld [vmem:[#allocation3 + $0xf0] sm:$0xff] }
 0x5da   :  { %v12984_v18 = vpack.c.bf16 %v4325_v3, %v4324_v43  ;;  %v5375_v6 = vld [vmem:[#allocation3 + $0x28a] sm:$0xff]  ;;  %v5380_v43 = vld [vmem:[#allocation3 + $0x2c2] sm:$0xff]  ;;  %v5381_v3 = vld [vmem:[#allocation3 + $0x2d2] sm:$0xff] }
 0x5db   :  { %v5416_v40 = vpack.c.bf16 %v5376_v46, %v5375_v6  ;;  %v5419_v19 = vpack.c.bf16 %v5382_v28, %v5381_v3  ;;  %v4464_v11 = vld [vmem:[#allocation3 + $0x1b1] sm:$0xff]  ;;  %v4340_v46 = vld [vmem:[#allocation3 + $0x1e0] sm:$0xff]  ;;  %v4349_v3 = vld [vmem:[#allocation3 + $0x248] sm:$0xff] }
 0x5dc   :  { %v13025_v9 = vpack.c.bf16 %v4341_v23, %v4340_v46 }
 0x5e0   :  { %6426 = vmatmul.mubr.bf16.gmra.mrb[100].mxu1 %v12980_v13  ;;  %8804 = vmatmul.mubr.bf16.gmra.mrb[160].mxu0 %v5410_v38  ;;  %v4331_v38 = vld [vmem:[#allocation3 + $0x140] sm:$0xff] }
 0x5e1   :  { %6433 = vmatprep.mubr.bf16.mxu1 %v12812_v48  ;;  %8807 = vmatprep.mubr.bf16.mxu0 %v5411_v61  ;;  %v9733_v48 = vld [vmem:[%s15210_s2 + $0xe8] sm:$0xff]   ;;  %v5379_v61 = vld [vmem:[#allocation3 + $0x2ba] sm:$0xff]  ;;  %v13004_v56 = vpack.c.bf16 %v4331_v38, %v4330_v63 }
 0x5e2   :  { %6637 = vmatpush1.bf16.msra.mxu1 %v9733_v48  ;;  %v5418_v59 = vpack.c.bf16 %v5380_v43, %v5379_v61  ;;  %v5384_v48 = vld [vmem:[#allocation3 + $0x2f2] sm:$0xff] }
 0x5e3   :  { %6638 = vmatprep.subr.bf16.mxu1 %v15658_v35  ;;  %v4345_v63 = vld [vmem:[#allocation3 + $0x218] sm:$0xff]  ;;  %v4347_v61 = vld [vmem:[#allocation3 + $0x230] sm:$0xff] }
 0x5e8   :  { %6434 = vmatmul.mubr.bf16.gmra.mrb[104].mxu1 %v12984_v18  ;;  %8808 = vmatmul.mubr.bf16.gmra.mrb[164].mxu0 %v5412_v8  ;;  %v4333_v8 = vld [vmem:[#allocation3 + $0x158] sm:$0xff] }
 0x5e9   :  { %6441 = vmatprep.mubr.bf16.mxu1 %v12818_v50  ;;  %8811 = vmatprep.mubr.bf16.mxu0 %v5413_v31  ;;  %v4328_v50 = vld [vmem:[#allocation3 + $0x120] sm:$0xff]  ;;  %v5383_v31 = vld [vmem:[#allocation3 + $0x2ea] sm:$0xff] }
 0x5ea   :  { %v12996_v58 = vpack.c.bf16 %v4329_v17, %v4328_v50  ;;  %v5420_v20 = vpack.c.bf16 %v5384_v48, %v5383_v31  ;;  %v15659_v50 = vld [vmem:[#allocation32_spill] sm:$0xff]  ;;  %v4339_v17 = vld [vmem:[#allocation3 + $0x1d0] sm:$0xff] }
 0x5eb   :  { %v4355_v31 = vld [vmem:[#allocation3 + $0x290] sm:$0xff] }
 0x5f0   :  { %6442 = vmatmul.mubr.bf16.gmra.mrb[108].mxu1 %v12992_v21  ;;  %8812 = vmatmul.mubr.bf16.gmra.mrb[168].mxu0 %v5414_v1  ;;  %v4512_v1 = vpack.c.bf16 %v4465_v30, %v4464_v11  ;;  %v4359_v11 = vld [vmem:[#allocation3 + $0x2c0] sm:$0xff] }
 0x5f1   :  { %6449 = vmatprep.mubr.bf16.mxu1 %v12824_v4  ;;  %8815 = vmatprep.mubr.bf16.mxu0 %v5415_v26  ;;  %v9734_v4 = vld [vmem:[%s15210_s2 + $0xf0] sm:$0xff]  }
 0x5f2   :  { %6639 = vmatpush1.bf16.msra.mxu1 %v9734_v4 }
 0x5f3   :  { %6640 = vmatprep.subr.bf16.mxu1 %v15658_v35 }
 0x5f6   :  { %6641 = vmatpush1.bf16.msra.mxu1 %v9735_v55 }
 0x5f7   :  { %6899 = vmatprep.subr.bf16.mxu1 %v15658_v35 }
 0x5f8   :  { %6450 = vmatmul.mubr.bf16.gmra.mrb[112].mxu1 %v12996_v58  ;;  %8816 = vmatmul.mubr.bf16.gmra.mrb[172].mxu0 %v5416_v40  ;;  %v4342_v40 = vld [vmem:[#allocation3 + $0x1f8] sm:$0xff] }
 0x5f9   :  { %6457 = vmatprep.mubr.bf16.mxu1 %v12830_v37  ;;  %8819 = vmatprep.mubr.bf16.mxu0 %v5417_v32  ;;  %v4332_v37 = vld [vmem:[#allocation3 + $0x150] sm:$0xff]  ;;  %v4343_v32 = vld [vmem:[#allocation3 + $0x200] sm:$0xff] }
 0x5fa   :  { %v13008_v54 = vpack.c.bf16 %v4333_v8, %v4332_v37  ;;  %v13029_v4 = vpack.c.bf16 %v4343_v32, %v4342_v40  ;;  %v4353_v37 = vld [vmem:[#allocation3 + $0x278] sm:$0xff] }
 0x600   :  { %6458 = vmatmul.mubr.bf16.gmra.mrb[116].mxu1 %v13004_v56  ;;  %8820 = vmatmul.mubr.bf16.gmra.mrb[176].mxu0 %v5418_v59  ;;  %v4351_v59 = vld [vmem:[#allocation3 + $0x260] sm:$0xff] }
 0x601   :  { %6465 = vmatprep.mubr.bf16.mxu1 %v12836_v33  ;;  %8823 = vmatprep.mubr.bf16.mxu0 %v5419_v19  ;;  %v4334_v33 = vld [vmem:[#allocation3 + $0x168] sm:$0xff] }
 0x602   :  { %v13016_v26 = vpack.c.bf16 %v4335_v0, %v4334_v33  ;;  %v4360_v33 = vld [vmem:[#allocation3 + $0x2d0] sm:$0xff] }
 0x608   :  { %6466 = vmatmul.mubr.bf16.gmra.mrb[120].mxu1 %v13008_v54  ;;  %8824 = vmatmul.mubr.bf16.gmra.mrb[180].mxu0 %v5420_v20  ;;  %v4357_v20 = vld [vmem:[#allocation3 + $0x2a8] sm:$0xff] }
 0x609   :  { %6473 = vmatprep.mubr.bf16.mxu1 %v12846_v57  ;;  %v4338_v57 = vld [vmem:[#allocation3 + $0x1c8] sm:$0xff] }
 0x60a   :  { %v13021_v6 = vpack.c.bf16 %v4339_v17, %v4338_v57  ;;  %v4362_v17 = vld [vmem:[#allocation3 + $0x2e8] sm:$0xff] }
 0x610   :  { %6474 = vmatmul.mubr.bf16.gmra.mrb[124].mxu1 %v13016_v26 }
 0x611   :  { %6481 = vmatprep.mubr.bf16.mxu1 %v4512_v1 }
 0x618   :  { %6482 = vmatmul.mubr.bf16.gmra.mrb[128].mxu1 %v15659_v50 }
 0x619   :  { %6489 = vmatprep.mubr.bf16.mxu1 %v12852_v62  ;;  %v4344_v62 = vld [vmem:[#allocation3 + $0x210] sm:$0xff] }
 0x61a   :  { %v13033_v38 = vpack.c.bf16 %v4345_v63, %v4344_v62  ;;  %v4364_v63 = vld [vmem:[#allocation3 + $0x300] sm:$0xff] }
 0x620   :  { %6490 = vmatmul.mubr.bf16.gmra.mrb[132].mxu1 %v13021_v6 }
 0x621   :  { %6497 = vmatprep.mubr.bf16.mxu1 %v12860_v12  ;;  %v4346_v12 = vld [vmem:[#allocation3 + $0x228] sm:$0xff] }
 0x622   :  { %v13037_v43 = vpack.c.bf16 %v4347_v61, %v4346_v12  ;;  %v4494_v61 = vld [vmem:[#allocation3 + $0x319] sm:$0xff] }
 0x628   :  { %6498 = vmatmul.mubr.bf16.gmra.mrb[136].mxu1 %v13025_v9 }
 0x629   :  { %6505 = vmatprep.mubr.bf16.mxu1 %v12866_v51  ;;  %v4348_v51 = vld [vmem:[#allocation3 + $0x240] sm:$0xff] }
 0x62a   :  { %v13041_v28 = vpack.c.bf16 %v4349_v3, %v4348_v51  ;;  %v4495_v51 = vld [vmem:[#allocation3 + $0x321] sm:$0xff] }
 0x630   :  { %6506 = vmatmul.mubr.bf16.gmra.mrb[140].mxu1 %v13029_v4 }
 0x631   :  { %6513 = vmatprep.mubr.bf16.mxu1 %v12874_v15  ;;  %v4350_v15 = vld [vmem:[#allocation3 + $0x258] sm:$0xff] }
 0x632   :  { %v13045_v19 = vpack.c.bf16 %v4351_v59, %v4350_v15 }
 0x638   :  { %6514 = vmatmul.mubr.bf16.gmra.mrb[144].mxu1 %v13033_v38 }
 0x639   :  { %6521 = vmatprep.mubr.bf16.mxu1 %v12880_v5  ;;  %v4352_v5 = vld [vmem:[#allocation3 + $0x270] sm:$0xff] }
 0x63a   :  { %v13049_v8 = vpack.c.bf16 %v4353_v37, %v4352_v5  ;;  %v4527_v5 = vpack.c.bf16 %v4495_v51, %v4494_v61 }
 0x640   :  { %6522 = vmatmul.mubr.bf16.gmra.mrb[148].mxu1 %v13037_v43 }
 0x641   :  { %6529 = vmatprep.mubr.bf16.mxu1 %v12887_v42  ;;  %v4354_v42 = vld [vmem:[#allocation3 + $0x288] sm:$0xff] }
 0x642   :  { %v13053_v48 = vpack.c.bf16 %v4355_v31, %v4354_v42  ;;  %v4367_v42 = vld [vmem:[#allocation3 + $0x320] sm:$0xff] }
 0x648   :  { %6530 = vmatmul.mubr.bf16.gmra.mrb[152].mxu1 %v13041_v28 }
 0x649   :  { %6537 = vmatprep.mubr.bf16.mxu1 %v12893_v7  ;;  %v4356_v7 = vld [vmem:[#allocation3 + $0x2a0] sm:$0xff] }
 0x64a   :  { %v13057_v55 = vpack.c.bf16 %v4357_v20, %v4356_v7 }
 0x650   :  { %6538 = vmatmul.mubr.bf16.gmra.mrb[156].mxu1 %v13045_v19 }
 0x651   :  { %6545 = vmatprep.mubr.bf16.mxu1 %v12899_v52  ;;  %v4358_v52 = vld [vmem:[#allocation3 + $0x2b8] sm:$0xff] }
 0x652   :  { %v13061_v30 = vpack.c.bf16 %v4359_v11, %v4358_v52  ;;  %v4560_v11 = vld [vmem:[#allocation3 + $0x2] sm:$0xff] }
 0x658   :  { %6546 = vmatmul.mubr.bf16.gmra.mrb[160].mxu1 %v13049_v8 }
 0x659   :  { %6553 = vmatprep.mubr.bf16.mxu1 %v12905_v14 }
 0x660   :  { %6554 = vmatmul.mubr.bf16.gmra.mrb[164].mxu1 %v13053_v48 }
 0x661   :  { %6561 = vmatprep.mubr.bf16.mxu1 %v12911_v44  ;;  %v4361_v44 = vld [vmem:[#allocation3 + $0x2d8] sm:$0xff] }
 0x662   :  { %v13073_v57 = vpack.c.bf16 %v4361_v44, %v4360_v33  ;;  %v4561_v33 = vld [vmem:[#allocation3 + $0xa] sm:$0xff] }
 0x668   :  { %6562 = vmatmul.mubr.bf16.gmra.mrb[168].mxu1 %v13057_v55 }
 0x669   :  { %6569 = vmatprep.mubr.bf16.mxu1 %v12917_v2 }
 0x66f   :  { %v13065_v14 = vpop.f32.mrb[128].mxu0 }
 0x670   :  { %6570 = vmatmul.mubr.bf16.gmra.mrb[172].mxu1 %v13061_v30  ;;  %v13067_v0 = vpop.f32.mrb[129].mxu0 }
 0x671   :  { %6577 = vmatprep.mubr.bf16.mxu1 %v12923_v39  ;;  %v13069_v1 = vpop.f32.mrb[130].mxu0  ;;  %v4363_v39 = vld [vmem:[#allocation3 + $0x2f0] sm:$0xff] }
 0x672   :  { %v13071_v50 = vpop.f32.mrb[131].mxu0  ;;  %v13085_v32 = vpack.c.bf16 %v4363_v39, %v4362_v17  ;;  %v4624_v39 = vpack.c.bf16 %v4561_v33, %v4560_v11 }
 0x677   :  { %v13077_v2 = vpop.f32.mrb[132].mxu0 }
 0x678   :  { %6578 = vmatmul.mubr.bf16.gmra.mrb[176].mxu1 %v13073_v57  ;;  %v13079_v46 = vpop.f32.mrb[133].mxu0 }
 0x679   :  { %6585 = vmatprep.mubr.bf16.mxu1 %v12929_v49  ;;  %v13081_v23 = vpop.f32.mrb[134].mxu0  ;;  %v4365_v49 = vld [vmem:[#allocation3 + $0x308] sm:$0xff] }
 0x67a   :  { %v13083_v40 = vpop.f32.mrb[135].mxu0  ;;  %v13097_v59 = vpack.c.bf16 %v4365_v49, %v4364_v63  ;;  %v9736_v49 = vld [vmem:[%s15210_s2 + $0x100] sm:$0xff]  }
 0x680   :  { %6586 = vmatmul.mubr.bf16.gmra.mrb[180].mxu1 %v13085_v32 }
 0x681   :  { %6593 = vmatprep.mubr.bf16.mxu1 %v12935_v47  ;;  %v4366_v47 = vld [vmem:[#allocation3 + $0x318] sm:$0xff] }
 0x682   :  { %v13108_v52 = vpack.c.bf16 %v4367_v42, %v4366_v47  ;;  %v4563_v47 = vld [vmem:[#allocation3 + $0x22] sm:$0xff] }
 0x683   :  { %v13089_v62 = vpop.f32.mrb[136].mxu0 }
 0x684   :  { %v13091_v12 = vpop.f32.mrb[137].mxu0 }
 0x685   :  { %v13093_v3 = vpop.f32.mrb[138].mxu0 }
 0x686   :  { %v13095_v15 = vpop.f32.mrb[139].mxu0 }
 0x688   :  { %6594 = vmatmul.mubr.bf16.gmra.mrb[184].mxu1 %v13097_v59 }
 0x689   :  { %6601 = vmatprep.mubr.bf16.mxu1 %v4527_v5  ;;  %v4562_v5 = vld [vmem:[#allocation3 + $0x1a] sm:$0xff] }
 0x68b   :  { %v13100_v37 = vpop.f32.mrb[140].mxu0 }
 0x68c   :  { %v13102_v31 = vpop.f32.mrb[141].mxu0 }
 0x68d   :  { %v13104_v7 = vpop.f32.mrb[142].mxu0 }
 0x68e   :  { %v13106_v20 = vpop.f32.mrb[143].mxu0 }
 0x690   :  { %6602 = vmatmul.mubr.bf16.gmra.mrb[188].mxu1 %v13108_v52 }
 0x691   :  { %6642 = vmatprep.mubr.bf16.mxu1 %v12754_v25  ;;  %v9737_v25 = vld [vmem:[%s15210_s2 + $0x108] sm:$0xff]  }
 0x693   :  { %v13112_v44 = vpop.f32.mrb[144].mxu0 }
 0x694   :  { %v13114_v17 = vpop.f32.mrb[145].mxu0 }
 0x695   :  { %v13116_v63 = vpop.f32.mrb[146].mxu0 }
 0x696   :  { %v13121_v61 = vpop.f32.mrb[147].mxu0 }
 0x698   :  { %6643 = vmatmul.mubr.bf16.vlgmr.msra.gmra.mrb[64].mxu1 %v4624_v39  ;;  %v13139_v39 = vpack.c.bf16 %v4563_v47, %v4562_v5  ;;  %v9740_v5 = vld [vmem:[%s15210_s2 + $0x120] sm:$0xff]  }
 0x699   :  { %6650 = vmatprep.mubr.bf16.mxu1 %v12838_v10  ;;  %6900 = vmatpush1.bf16.msra.mxu1 %v9736_v49  ;;  %v9738_v10 = vld [vmem:[%s15210_s2 + $0x110] sm:$0xff]   ;;  %v9739_v49 = vld [vmem:[%s15210_s2 + $0x118] sm:$0xff]  }
 0x69a   :  { %6901 = vmatprep.subr.bf16.mxu1 %v15658_v35 }
 0x69b   :  { %v13128_v51 = vpop.f32.mrb[148].mxu0 }
 0x69c   :  { %15660 = vst [vmem:[#allocation17_spill] sm:$0xff] %v13128_v51  ;;  %v13130_v42 = vpop.f32.mrb[149].mxu0 }
 0x69d   :  { %v13132_v11 = vpop.f32.mrb[150].mxu0  ;;  %6902 = vmatpush1.bf16.msra.mxu1 %v9737_v25 }
 0x69e   :  { %15661 = vst [vmem:[#allocation22_spill] sm:$0xff] %v13132_v11  ;;  %v13137_v33 = vpop.f32.mrb[151].mxu0  ;;  %6903 = vmatprep.subr.bf16.mxu1 %v15658_v35 }
 0x6a0   :  { %6651 = vmatmul.mubr.bf16.gmra.mrb[68].mxu1 %v13139_v39 }
 0x6a1   :  { %6658 = vmatprep.mubr.bf16.mxu1 %v12937_v36  ;;  %6904 = vmatpush1.bf16.msra.mxu1 %v9738_v10  ;;  %v9741_v36 = vld [vmem:[%s15210_s2 + $0x128] sm:$0xff]  }
 0x6a2   :  { %6905 = vmatprep.subr.bf16.mxu1 %v15658_v35 }
 0x6a3   :  { %v13148_v25 = vpop.f32.mrb[152].mxu0 }
 0x6a4   :  { %15662 = vst [vmem:[#allocation23_spill] sm:$0xff] %v13148_v25  ;;  %v13150_v11 = vpop.f32.mrb[153].mxu0 }
 0x6a5   :  { %v13152_v51 = vpop.f32.mrb[154].mxu0  ;;  %6906 = vmatpush1.bf16.msra.mxu1 %v9739_v49 }
 0x6a6   :  { %15663 = vst [vmem:[#allocation24_spill] sm:$0xff] %v13152_v51  ;;  %v13157_v47 = vpop.f32.mrb[155].mxu0  ;;  %6907 = vmatprep.subr.bf16.mxu1 %v15658_v35 }
 0x6a7   :  { %15664 = vst [vmem:[#allocation25_spill] sm:$0xff] %v13157_v47 }
 0x6a8   :  { %6659 = vmatmul.mubr.bf16.gmra.mrb[72].mxu1 %v12752_v60  ;;  %v9742_v60 = vld [vmem:[%s15210_s2 + $0x130] sm:$0xff]  }
 0x6a9   :  { %6666 = vmatprep.mubr.bf16.mxu1 %v12943_v24  ;;  %6908 = vmatpush1.bf16.msra.mxu1 %v9740_v5  ;;  %v9743_v24 = vld [vmem:[%s15210_s2 + $0x138] sm:$0xff]  }
 0x6aa   :  { %6909 = vmatprep.subr.bf16.mxu1 %v15658_v35 }
 0x6ab   :  { %v13166_v10 = vpop.f32.mrb[156].mxu0 }
 0x6ac   :  { %15665 = vst [vmem:[#allocation28_spill] sm:$0xff] %v13166_v10  ;;  %v13168_v49 = vpop.f32.mrb[157].mxu0 }
 0x6ad   :  { %15666 = vst [vmem:[#allocation34_spill] sm:$0xff] %v13168_v49  ;;  %v13170_v51 = vpop.f32.mrb[158].mxu0  ;;  %6910 = vmatpush1.bf16.msra.mxu1 %v9741_v36 }
 0x6ae   :  { %15667 = vst [vmem:[#allocation35_spill] sm:$0xff] %v13170_v51  ;;  %v13175_v25 = vpop.f32.mrb[159].mxu0  ;;  %6911 = vmatprep.subr.bf16.mxu1 %v15658_v35 }
 0x6af   :  { %15668 = vst [vmem:[#allocation9_spill] sm:$0xff] %v13175_v25  ;;  %v4955_v25 = vld [vmem:[#allocation3 + $0x9a] sm:$0xff] }
 0x6b0   :  { %6667 = vmatmul.mubr.bf16.gmra.mrb[76].mxu1 %v12756_v53  ;;  %v9744_v53 = vld [vmem:[%s15210_s2 + $0x140] sm:$0xff]  }
 0x6b1   :  { %6674 = vmatprep.mubr.bf16.mxu1 %v12955_v29  ;;  %6912 = vmatpush1.bf16.msra.mxu1 %v9742_v60  ;;  %v9745_v29 = vld [vmem:[%s15210_s2 + $0x148] sm:$0xff]  }
 0x6b2   :  { %6913 = vmatprep.subr.bf16.mxu1 %v15658_v35 }
 0x6b3   :  { %v13184_v5 = vpop.f32.mrb[160].mxu0 }
 0x6b4   :  { %15669 = vst [vmem:[#allocation10_spill] sm:$0xff] %v13184_v5  ;;  %v13186_v36 = vpop.f32.mrb[161].mxu0 }
 0x6b5   :  { %15670 = vst [vmem:[#allocation11_spill] sm:$0xff] %v13186_v36  ;;  %v13188_v51 = vpop.f32.mrb[162].mxu0  ;;  %6914 = vmatpush1.bf16.msra.mxu1 %v9743_v24  ;;  %v9754_v36 = vld [vmem:[%s15210_s2 + $0x190] sm:$0xff]  }
 0x6b6   :  { %15671 = vst [vmem:[#allocation12_spill] sm:$0xff] %v13188_v51  ;;  %v13193_v10 = vpop.f32.mrb[163].mxu0  ;;  %6915 = vmatprep.subr.bf16.mxu1 %v15658_v35 }
 0x6b7   :  { %15672 = vst [vmem:[#allocation14_spill] sm:$0xff] %v13193_v10  ;;  %v4947_v10 = vld [vmem:[#allocation3 + $0x3a] sm:$0xff] }
 0x6b8   :  { %6675 = vmatmul.mubr.bf16.gmra.mrb[80].mxu1 %v12765_v45  ;;  %v9746_v45 = vld [vmem:[%s15210_s2 + $0x150] sm:$0xff]  }
 0x6b9   :  { %6682 = vmatprep.mubr.bf16.mxu1 %v12960_v27  ;;  %6916 = vmatpush1.bf16.msra.mxu1 %v9744_v53 }
 0x6ba   :  { %6917 = vmatprep.subr.bf16.mxu1 %v15658_v35 }
 0x6bb   :  { %v13202_v60 = vpop.f32.mrb[164].mxu0 }
 0x6bc   :  { %15673 = vst [vmem:[#allocation16_spill] sm:$0xff] %v13202_v60  ;;  %v13204_v24 = vpop.f32.mrb[165].mxu0  ;;  %v4575_v60 = vld [vmem:[#allocation3 + $0xb2] sm:$0xff] }
 0x6bd   :  { %15674 = vst [vmem:[#allocation26_spill] sm:$0xff] %v13204_v24  ;;  %v13206_v51 = vpop.f32.mrb[166].mxu0  ;;  %6918 = vmatpush1.bf16.msra.mxu1 %v9745_v29 }
 0x6be   :  { %15675 = vst [vmem:[#allocation29_spill] sm:$0xff] %v13206_v51  ;;  %v13211_v5 = vpop.f32.mrb[167].mxu0  ;;  %6919 = vmatprep.subr.bf16.mxu1 %v15658_v35 }
 0x6bf   :  { %15676 = vst [vmem:[#allocation30_spill] sm:$0xff] %v13211_v5 }
 0x6c0   :  { %6683 = vmatmul.mubr.bf16.gmra.mrb[84].mxu1 %v12840_v41  ;;  %v9747_v41 = vld [vmem:[%s15210_s2 + $0x158] sm:$0xff]  }
 0x6c1   :  { %6690 = vmatprep.mubr.bf16.mxu1 %v12968_v22  ;;  %6920 = vmatpush1.bf16.msra.mxu1 %v9746_v45  ;;  %v4574_v45 = vld [vmem:[#allocation3 + $0xaa] sm:$0xff] }
 0x6c2   :  { %6921 = vmatprep.subr.bf16.mxu1 %v15658_v35 }
 0x6c3   :  { %v13217_v27 = vpop.f32.mrb[168].mxu0 }
 0x6c4   :  { %15677 = vst [vmem:[#allocation31_spill] sm:$0xff] %v13217_v27  ;;  %v13219_v53 = vpop.f32.mrb[169].mxu0 }
 0x6c5   :  { %15678 = vst [vmem:[#allocation33_spill] sm:$0xff] %v13219_v53  ;;  %v13221_v29 = vpop.f32.mrb[170].mxu0  ;;  %6922 = vmatpush1.bf16.msra.mxu1 %v9747_v41  ;;  %v4577_v53 = vld [vmem:[#allocation3 + $0xca] sm:$0xff] }
 0x6c6   :  { %15679 = vst [vmem:[#allocation13_spill] sm:$0xff] %v13221_v29  ;;  %v13223_v51 = vpop.f32.mrb[171].mxu0  ;;  %6923 = vmatprep.subr.bf16.mxu1 %v15658_v35 }
 0x6c7   :  { %15680 = vst [vmem:[#allocation15_spill] sm:$0xff] %v13223_v51 }
 0x6c8   :  { %6691 = vmatmul.mubr.bf16.gmra.mrb[88].mxu1 %v12854_v34  ;;  %v13239_v34 = vpack.c.bf16 %v4575_v60, %v4574_v45  ;;  %v4578_v45 = vld [vmem:[#allocation3 + $0xda] sm:$0xff] }
 0x6c9   :  { %6698 = vmatprep.mubr.bf16.mxu1 %v12972_v16 }
 0x6cb   :  { %v13230_v22 = vpop.f32.mrb[172].mxu0 }
 0x6cc   :  { %15681 = vst [vmem:[#allocation18_spill] sm:$0xff] %v13230_v22  ;;  %v13232_v27 = vpop.f32.mrb[173].mxu0  ;;  %v4576_v22 = vld [vmem:[#allocation3 + $0xc2] sm:$0xff] }
 0x6cd   :  { %15682 = vst [vmem:[#allocation19_spill] sm:$0xff] %v13232_v27  ;;  %v13235_v29 = vpop.f32.mrb[174].mxu0  ;;  %v13251_v24 = vpack.c.bf16 %v4577_v53, %v4576_v22 }
 0x6ce   :  { %15683 = vst [vmem:[#allocation20_spill] sm:$0xff] %v13235_v29  ;;  %v13237_v51 = vpop.f32.mrb[175].mxu0 }
 0x6cf   :  { %15684 = vst [vmem:[#allocation21_spill] sm:$0xff] %v13237_v51 }
 0x6d0   :  { %6699 = vmatmul.mubr.bf16.gmra.mrb[92].mxu1 %v13239_v34 }
 0x6d1   :  { %6706 = vmatprep.mubr.bf16.mxu1 %v12980_v13  ;;  %v9748_v13 = vld [vmem:[%s15210_s2 + $0x160] sm:$0xff]  }
 0x6d2   :  { %6924 = vmatpush1.bf16.msra.mxu1 %v9748_v13  ;;  %v9749_v13 = vld [vmem:[%s15210_s2 + $0x168] sm:$0xff]  }
 0x6d3   :  { %v13243_v16 = vpop.f32.mrb[176].mxu0  ;;  %6925 = vmatprep.subr.bf16.mxu1 %v15658_v35 }
 0x6d4   :  { %15685 = vst [vmem:[#allocation27_spill] sm:$0xff] %v13243_v16  ;;  %v13245_v5 = vpop.f32.mrb[177].mxu0  ;;  %v4579_v16 = vld [vmem:[#allocation3 + $0xe2] sm:$0xff] }
 0x6d5   :  { %15686 = vst [vmem:[#allocation36_spill] sm:$0xff] %v13245_v5  ;;  %v13247_v41 = vpop.f32.mrb[178].mxu0  ;;  %v13267_v22 = vpack.c.bf16 %v4579_v16, %v4578_v45 }
 0x6d6   :  { %15687 = vst [vmem:[#allocation37_spill] sm:$0xff] %v13247_v41  ;;  %v13249_v27 = vpop.f32.mrb[179].mxu0  ;;  %6926 = vmatpush1.bf16.msra.mxu1 %v9749_v13  ;;  %v4587_v13 = vld [vmem:[#allocation3 + $0x142] sm:$0xff] }
 0x6d7   :  { %15688 = vst [vmem:[#allocation8_spill] sm:$0xff] %v13249_v27  ;;  %v4581_v27 = vld [vmem:[#allocation3 + $0xfa] sm:$0xff]  ;;  %6927 = vmatprep.subr.bf16.mxu1 %v15658_v35 }
 0x6d8   :  { %6707 = vmatmul.mubr.bf16.gmra.mrb[96].mxu1 %v13251_v24 }
 0x6d9   :  { %6714 = vmatprep.mubr.bf16.mxu1 %v12984_v18  ;;  %v4580_v18 = vld [vmem:[#allocation3 + $0xf2] sm:$0xff] }
 0x6db   :  { %v13258_v60 = vpop.f32.mrb[180].mxu0 }
 0x6dc   :  { %15689 = vst [vmem:[#allocation32_spill] sm:$0xff] %v13258_v60  ;;  %v13260_v5 = vpop.f32.mrb[181].mxu0  ;;  %v13271_v60 = vpack.c.bf16 %v4581_v27, %v4580_v18  ;;  %v4585_v27 = vld [vmem:[#allocation3 + $0x12a] sm:$0xff]  ;;  %v4586_v18 = vld [vmem:[#allocation3 + $0x13a] sm:$0xff] }
 0x6dd   :  { %15690 = vst [vmem:[#allocation39_spill] sm:$0xff] %v13260_v5  ;;  %v13263_v41 = vpop.f32.mrb[182].mxu0 }
 0x6de   :  { %15691 = vst [vmem:[#allocation40_spill] sm:$0xff] %v13263_v41  ;;  %v13265_v53 = vpop.f32.mrb[183].mxu0  ;;  %v4582_v41 = vld [vmem:[#allocation3 + $0x10a] sm:$0xff] }
 0x6df   :  { %15692 = vst [vmem:[#allocation41_spill] sm:$0xff] %v13265_v53  ;;  %v4583_v53 = vld [vmem:[#allocation3 + $0x112] sm:$0xff] }
 0x6e0   :  { %6715 = vmatmul.mubr.bf16.gmra.mrb[100].mxu1 %v13267_v22  ;;  %v13279_v16 = vpack.c.bf16 %v4583_v53, %v4582_v41  ;;  %v13291_v41 = vpack.c.bf16 %v4587_v13, %v4586_v18  ;;  %v4589_v53 = vld [vmem:[#allocation3 + $0x15a] sm:$0xff]  ;;  %v4590_v18 = vld [vmem:[#allocation3 + $0x16a] sm:$0xff]  ;;  %v4591_v13 = vld [vmem:[#allocation3 + $0x172] sm:$0xff] }
 0x6e1   :  { %6722 = vmatprep.mubr.bf16.mxu1 %v12992_v21  ;;  %v4584_v21 = vld [vmem:[#allocation3 + $0x122] sm:$0xff] }
 0x6e2   :  { %v13283_v45 = vpack.c.bf16 %v4585_v27, %v4584_v21  ;;  %v4718_v21 = vld [vmem:[#allocation3 + $0x180] sm:$0xff]  ;;  %v4719_v27 = vld [vmem:[#allocation3 + $0x188] sm:$0xff] }
 0x6e3   :  { %v4767_v5 = vpack.c.bf16 %v4719_v27, %v4718_v21  ;;  %v4595_v27 = vld [vmem:[#allocation3 + $0x1d2] sm:$0xff] }
 0x6e8   :  { %6723 = vmatmul.mubr.bf16.gmra.mrb[104].mxu1 %v13271_v60 }
 0x6e9   :  { %6730 = vmatprep.mubr.bf16.mxu1 %v12996_v58  ;;  %v9750_v58 = vld [vmem:[%s15210_s2 + $0x170] sm:$0xff]  }
 0x6ea   :  { %6928 = vmatpush1.bf16.msra.mxu1 %v9750_v58  ;;  %v9751_v58 = vld [vmem:[%s15210_s2 + $0x178] sm:$0xff]  }
 0x6eb   :  { %6929 = vmatprep.subr.bf16.mxu1 %v15658_v35 }
 0x6ee   :  { %6930 = vmatpush1.bf16.msra.mxu1 %v9751_v58  ;;  %v4596_v58 = vld [vmem:[#allocation3 + $0x1e2] sm:$0xff] }
 0x6ef   :  { %7188 = vmatprep.subr.bf16.mxu1 %v15658_v35 }
 0x6f0   :  { %6731 = vmatmul.mubr.bf16.gmra.mrb[108].mxu1 %v13279_v16 }
 0x6f1   :  { %6738 = vmatprep.mubr.bf16.mxu1 %v13004_v56  ;;  %v4588_v56 = vld [vmem:[#allocation3 + $0x152] sm:$0xff] }
 0x6f8   :  { %6739 = vmatmul.mubr.bf16.gmra.mrb[112].mxu1 %v13283_v45 }
 0x6f9   :  { %6746 = vmatprep.mubr.bf16.mxu1 %v13008_v54  ;;  %v13295_v54 = vpack.c.bf16 %v4589_v53, %v4588_v56  ;;  %v4592_v56 = vld [vmem:[#allocation3 + $0x1b2] sm:$0xff]  ;;  %v4593_v53 = vld [vmem:[#allocation3 + $0x1ba] sm:$0xff] }
 0x6fa   :  { %v4640_v21 = vpack.c.bf16 %v4593_v53, %v4592_v56  ;;  %v4599_v56 = vld [vmem:[#allocation3 + $0x202] sm:$0xff] }
 0x700   :  { %6747 = vmatmul.mubr.bf16.gmra.mrb[116].mxu1 %v13291_v41 }
 0x701   :  { %6754 = vmatprep.mubr.bf16.mxu1 %v13016_v26  ;;  %v13302_v26 = vpack.c.bf16 %v4591_v13, %v4590_v18  ;;  %v4597_v18 = vld [vmem:[#allocation3 + $0x1ea] sm:$0xff] }
 0x702   :  { %v13311_v13 = vpack.c.bf16 %v4597_v18, %v4596_v58  ;;  %v4605_v18 = vld [vmem:[#allocation3 + $0x24a] sm:$0xff] }
 0x708   :  { %6755 = vmatmul.mubr.bf16.gmra.mrb[120].mxu1 %v13295_v54 }
 0x709   :  { %6762 = vmatprep.mubr.bf16.mxu1 %v4767_v5  ;;  %v4594_v5 = vld [vmem:[#allocation3 + $0x1ca] sm:$0xff] }
 0x70a   :  { %v13307_v29 = vpack.c.bf16 %v4595_v27, %v4594_v5  ;;  %v4603_v27 = vld [vmem:[#allocation3 + $0x232] sm:$0xff] }
 0x710   :  { %6763 = vmatmul.mubr.bf16.gmra.mrb[124].mxu1 %v13302_v26 }
 0x711   :  { %6770 = vmatprep.mubr.bf16.mxu1 %v13021_v6  ;;  %v4598_v6 = vld [vmem:[#allocation3 + $0x1fa] sm:$0xff] }
 0x712   :  { %v13315_v53 = vpack.c.bf16 %v4599_v56, %v4598_v6  ;;  %v4607_v56 = vld [vmem:[#allocation3 + $0x262] sm:$0xff] }
 0x718   :  { %6771 = vmatmul.mubr.bf16.gmra.mrb[128].mxu1 %v4640_v21  ;;  %v4601_v21 = vld [vmem:[#allocation3 + $0x21a] sm:$0xff] }
 0x719   :  { %6778 = vmatprep.mubr.bf16.mxu1 %v13025_v9  ;;  %v4600_v9 = vld [vmem:[#allocation3 + $0x212] sm:$0xff] }
 0x71a   :  { %v13319_v5 = vpack.c.bf16 %v4601_v21, %v4600_v9  ;;  %v4609_v21 = vld [vmem:[#allocation3 + $0x27a] sm:$0xff] }
 0x720   :  { %6779 = vmatmul.mubr.bf16.gmra.mrb[132].mxu1 %v13307_v29 }
 0x721   :  { %6786 = vmatprep.mubr.bf16.mxu1 %v13029_v4  ;;  %v4602_v4 = vld [vmem:[#allocation3 + $0x22a] sm:$0xff] }
 0x722   :  { %v13323_v58 = vpack.c.bf16 %v4603_v27, %v4602_v4  ;;  %v4611_v27 = vld [vmem:[#allocation3 + $0x292] sm:$0xff] }
 0x728   :  { %6787 = vmatmul.mubr.bf16.gmra.mrb[136].mxu1 %v13311_v13 }
 0x729   :  { %6794 = vmatprep.mubr.bf16.mxu1 %v13033_v38  ;;  %v4604_v38 = vld [vmem:[#allocation3 + $0x242] sm:$0xff] }
 0x72a   :  { %v13327_v6 = vpack.c.bf16 %v4605_v18, %v4604_v38  ;;  %v4613_v18 = vld [vmem:[#allocation3 + $0x2aa] sm:$0xff] }
 0x730   :  { %6795 = vmatmul.mubr.bf16.gmra.mrb[140].mxu1 %v13315_v53 }
 0x731   :  { %6802 = vmatprep.mubr.bf16.mxu1 %v13037_v43  ;;  %v4606_v43 = vld [vmem:[#allocation3 + $0x25a] sm:$0xff] }
 0x732   :  { %v13331_v9 = vpack.c.bf16 %v4607_v56, %v4606_v43  ;;  %v4615_v56 = vld [vmem:[#allocation3 + $0x2c2] sm:$0xff] }
 0x738   :  { %6803 = vmatmul.mubr.bf16.gmra.mrb[144].mxu1 %v13319_v5 }
 0x739   :  { %6810 = vmatprep.mubr.bf16.mxu1 %v13041_v28  ;;  %v4608_v28 = vld [vmem:[#allocation3 + $0x272] sm:$0xff] }
 0x73a   :  { %v13335_v4 = vpack.c.bf16 %v4609_v21, %v4608_v28  ;;  %v4617_v21 = vld [vmem:[#allocation3 + $0x2da] sm:$0xff] }
 0x740   :  { %6811 = vmatmul.mubr.bf16.gmra.mrb[148].mxu1 %v13323_v58 }
 0x741   :  { %6818 = vmatprep.mubr.bf16.mxu1 %v13045_v19  ;;  %v4610_v19 = vld [vmem:[#allocation3 + $0x28a] sm:$0xff] }
 0x742   :  { %v13339_v38 = vpack.c.bf16 %v4611_v27, %v4610_v19  ;;  %v4619_v27 = vld [vmem:[#allocation3 + $0x2f2] sm:$0xff] }
 0x748   :  { %6819 = vmatmul.mubr.bf16.gmra.mrb[152].mxu1 %v13327_v6 }
 0x749   :  { %6826 = vmatprep.mubr.bf16.mxu1 %v13049_v8  ;;  %v4612_v8 = vld [vmem:[#allocation3 + $0x2a2] sm:$0xff] }
 0x74a   :  { %v13343_v43 = vpack.c.bf16 %v4613_v18, %v4612_v8  ;;  %v4621_v18 = vld [vmem:[#allocation3 + $0x30a] sm:$0xff] }
 0x750   :  { %6827 = vmatmul.mubr.bf16.gmra.mrb[156].mxu1 %v13331_v9 }
 0x751   :  { %6834 = vmatprep.mubr.bf16.mxu1 %v13053_v48  ;;  %v4614_v48 = vld [vmem:[#allocation3 + $0x2ba] sm:$0xff] }
 0x752   :  { %v13347_v28 = vpack.c.bf16 %v4615_v56, %v4614_v48  ;;  %v4750_v48 = vld [vmem:[#allocation3 + $0x330] sm:$0xff] }
 0x758   :  { %6835 = vmatmul.mubr.bf16.gmra.mrb[160].mxu1 %v13335_v4 }
 0x759   :  { %6842 = vmatprep.mubr.bf16.mxu1 %v13057_v55  ;;  %v4616_v55 = vld [vmem:[#allocation3 + $0x2d2] sm:$0xff] }
 0x75a   :  { %v13351_v19 = vpack.c.bf16 %v4617_v21, %v4616_v55  ;;  %v4622_v21 = vld [vmem:[#allocation3 + $0x31a] sm:$0xff] }
 0x760   :  { %6843 = vmatmul.mubr.bf16.gmra.mrb[164].mxu1 %v13339_v38 }
 0x761   :  { %6850 = vmatprep.mubr.bf16.mxu1 %v13061_v30  ;;  %v4618_v30 = vld [vmem:[#allocation3 + $0x2ea] sm:$0xff] }
 0x762   :  { %v13355_v8 = vpack.c.bf16 %v4619_v27, %v4618_v30  ;;  %v4816_v30 = vld [vmem:[#allocation3 + $0x19] sm:$0xff] }
 0x763   :  { %v4946_v27 = vld [vmem:[#allocation3 + $0x32] sm:$0xff] }
 0x768   :  { %6851 = vmatmul.mubr.bf16.gmra.mrb[168].mxu1 %v13343_v43 }
 0x769   :  { %6858 = vmatprep.mubr.bf16.mxu1 %v13073_v57  ;;  %v4620_v57 = vld [vmem:[#allocation3 + $0x302] sm:$0xff] }
 0x76a   :  { %v13359_v56 = vpack.c.bf16 %v4621_v18, %v4620_v57  ;;  %v9752_v57 = vld [vmem:[%s15210_s2 + $0x180] sm:$0xff]  }
 0x770   :  { %6859 = vmatmul.mubr.bf16.gmra.mrb[172].mxu1 %v13347_v28 }
 0x771   :  { %6866 = vmatprep.mubr.bf16.mxu1 %v13085_v32  ;;  %v4751_v32 = vld [vmem:[#allocation3 + $0x338] sm:$0xff] }
 0x772   :  { %v4783_v55 = vpack.c.bf16 %v4751_v32, %v4750_v48  ;;  %v5009_v48 = vpack.c.bf16 %v4947_v10, %v4946_v27  ;;  %v9753_v32 = vld [vmem:[%s15210_s2 + $0x188] sm:$0xff]  }
 0x773   :  { %v4820_v27 = vld [vmem:[#allocation3 + $0x49] sm:$0xff] }
 0x778   :  { %6867 = vmatmul.mubr.bf16.gmra.mrb[176].mxu1 %v13351_v19 }
 0x779   :  { %6874 = vmatprep.mubr.bf16.mxu1 %v13097_v59  ;;  %v4623_v59 = vld [vmem:[#allocation3 + $0x322] sm:$0xff] }
 0x77a   :  { %v13362_v51 = vpack.c.bf16 %v4623_v59, %v4622_v21  ;;  %v4948_v21 = vld [vmem:[#allocation3 + $0x4a] sm:$0xff]  ;;  %v4949_v59 = vld [vmem:[#allocation3 + $0x52] sm:$0xff] }
 0x77b   :  { %v5010_v10 = vpack.c.bf16 %v4949_v59, %v4948_v21  ;;  %v4822_v21 = vld [vmem:[#allocation3 + $0x61] sm:$0xff]  ;;  %v4823_v59 = vld [vmem:[#allocation3 + $0x69] sm:$0xff] }
 0x780   :  { %6875 = vmatmul.mubr.bf16.gmra.mrb[180].mxu1 %v13355_v8 }
 0x781   :  { %6882 = vmatprep.mubr.bf16.mxu1 %v13108_v52  ;;  %v4817_v52 = vld [vmem:[#allocation3 + $0x21] sm:$0xff] }
 0x782   :  { %v4880_v18 = vpack.c.bf16 %v4817_v52, %v4816_v30  ;;  %v9755_v52 = vld [vmem:[%s15210_s2 + $0x198] sm:$0xff]  }
 0x788   :  { %6883 = vmatmul.mubr.bf16.gmra.mrb[184].mxu1 %v13359_v56 }
 0x789   :  { %6890 = vmatprep.mubr.bf16.mxu1 %v4783_v55  ;;  %v4819_v55 = vld [vmem:[#allocation3 + $0x39] sm:$0xff] }
 0x790   :  { %6891 = vmatmul.mubr.bf16.gmra.mrb[188].mxu1 %v13362_v51 }
 0x791   :  { %6931 = vmatprep.mubr.bf16.mxu1 %v13139_v39  ;;  %v4818_v39 = vld [vmem:[#allocation3 + $0x31] sm:$0xff] }
 0x792   :  { %v13376_v30 = vpack.c.bf16 %v4819_v55, %v4818_v39  ;;  %v9757_v55 = vld [vmem:[%s15210_s2 + $0x1a8] sm:$0xff]  }
 0x798   :  { %6932 = vmatmul.mubr.bf16.vlgmr.msra.gmra.mrb[64].mxu1 %v4880_v18  ;;  %v4950_v18 = vld [vmem:[#allocation3 + $0x62] sm:$0xff] }
 0x799   :  { %6939 = vmatprep.mubr.bf16.mxu1 %v5009_v48  ;;  %7189 = vmatpush1.bf16.msra.mxu1 %v9752_v57  ;;  %v4821_v57 = vld [vmem:[#allocation3 + $0x51] sm:$0xff] }
 0x79a   :  { %7190 = vmatprep.subr.bf16.mxu1 %v15658_v35  ;;  %v4951_v48 = vld [vmem:[#allocation3 + $0x6a] sm:$0xff]  ;;  %v13387_v39 = vpack.c.bf16 %v4821_v57, %v4820_v27  ;;  %v13398_v57 = vpack.c.bf16 %v4823_v59, %v4822_v21  ;;  %v9760_v21 = vld [vmem:[%s15210_s2 + $0x1c0] sm:$0xff]  }
 0x79b   :  { %v9758_v27 = vld [vmem:[%s15210_s2 + $0x1b0] sm:$0xff]  }
 0x79d   :  { %7191 = vmatpush1.bf16.msra.mxu1 %v9753_v32  ;;  %v9756_v32 = vld [vmem:[%s15210_s2 + $0x1a0] sm:$0xff]  }
 0x79e   :  { %7192 = vmatprep.subr.bf16.mxu1 %v15658_v35 }
 0x7a0   :  { %6940 = vmatmul.mubr.bf16.gmra.mrb[68].mxu1 %v13376_v30 }
 0x7a1   :  { %6947 = vmatprep.mubr.bf16.mxu1 %v5010_v10  ;;  %7193 = vmatpush1.bf16.msra.mxu1 %v9754_v36  ;;  %v5011_v36 = vpack.c.bf16 %v4951_v48, %v4950_v18  ;;  %v4952_v10 = vld [vmem:[#allocation3 + $0x7a] sm:$0xff] }
 0x7a2   :  { %7194 = vmatprep.subr.bf16.mxu1 %v15658_v35  ;;  %v9759_v48 = vld [vmem:[%s15210_s2 + $0x1b8] sm:$0xff]  }
 0x7a5   :  { %7195 = vmatpush1.bf16.msra.mxu1 %v9755_v52  ;;  %v4953_v52 = vld [vmem:[#allocation3 + $0x82] sm:$0xff] }
 0x7a6   :  { %7196 = vmatprep.subr.bf16.mxu1 %v15658_v35  ;;  %v5012_v18 = vpack.c.bf16 %v4953_v52, %v4952_v10  ;;  %v9761_v52 = vld [vmem:[%s15210_s2 + $0x1c8] sm:$0xff]  }
 0x7a8   :  { %6948 = vmatmul.mubr.bf16.gmra.mrb[72].mxu1 %v13387_v39 }
 0x7a9   :  { %6955 = vmatprep.mubr.bf16.mxu1 %v5011_v36  ;;  %7197 = vmatpush1.bf16.msra.mxu1 %v9756_v32  ;;  %v4824_v32 = vld [vmem:[#allocation3 + $0x79] sm:$0xff]  ;;  %v4825_v36 = vld [vmem:[#allocation3 + $0x81] sm:$0xff] }
 0x7aa   :  { %7198 = vmatprep.subr.bf16.mxu1 %v15658_v35  ;;  %v13409_v59 = vpack.c.bf16 %v4825_v36, %v4824_v32  ;;  %v4829_v36 = vld [vmem:[#allocation3 + $0xb1] sm:$0xff] }
 0x7ad   :  { %7199 = vmatpush1.bf16.msra.mxu1 %v9757_v55  ;;  %v4954_v55 = vld [vmem:[#allocation3 + $0x92] sm:$0xff] }
 0x7ae   :  { %7200 = vmatprep.subr.bf16.mxu1 %v15658_v35  ;;  %v5013_v10 = vpack.c.bf16 %v4955_v25, %v4954_v55  ;;  %v4828_v25 = vld [vmem:[#allocation3 + $0xa9] sm:$0xff] }
 0x7af   :  { %v13426_v55 = vpack.c.bf16 %v4829_v36, %v4828_v25  ;;  %v4834_v25 = vld [vmem:[#allocation3 + $0xf1] sm:$0xff]  ;;  %v4835_v36 = vld [vmem:[#allocation3 + $0xf9] sm:$0xff] }
 0x7b0   :  { %6956 = vmatmul.mubr.bf16.gmra.mrb[76].mxu1 %v13398_v57 }
 0x7b1   :  { %6963 = vmatprep.mubr.bf16.mxu1 %v5012_v18  ;;  %7201 = vmatpush1.bf16.msra.mxu1 %v9758_v27  ;;  %v4826_v27 = vld [vmem:[#allocation3 + $0x91] sm:$0xff]  ;;  %v4827_v18 = vld [vmem:[#allocation3 + $0x99] sm:$0xff] }
 0x7b2   :  { %7202 = vmatprep.subr.bf16.mxu1 %v15658_v35  ;;  %v13420_v32 = vpack.c.bf16 %v4827_v18, %v4826_v27  ;;  %v4832_v27 = vld [vmem:[#allocation3 + $0xd9] sm:$0xff]  ;;  %v4833_v18 = vld [vmem:[#allocation3 + $0xe1] sm:$0xff] }
 0x7b5   :  { %7203 = vmatpush1.bf16.msra.mxu1 %v9759_v48  ;;  %v9762_v48 = vld [vmem:[%s15210_s2 + $0x1d0] sm:$0xff]  }
 0x7b6   :  { %7204 = vmatprep.subr.bf16.mxu1 %v15658_v35 }
 0x7b8   :  { %6964 = vmatmul.mubr.bf16.gmra.mrb[80].mxu1 %v13409_v59 }
 0x7b9   :  { %6971 = vmatprep.mubr.bf16.mxu1 %v5013_v10  ;;  %7205 = vmatpush1.bf16.msra.mxu1 %v9760_v21  ;;  %v9763_v21 = vld [vmem:[%s15210_s2 + $0x1d8] sm:$0xff]   ;;  %v4830_v10 = vld [vmem:[#allocation3 + $0xc1] sm:$0xff] }
 0x7ba   :  { %7206 = vmatprep.subr.bf16.mxu1 %v15658_v35 }
 0x7bd   :  { %7207 = vmatpush1.bf16.msra.mxu1 %v9761_v52  ;;  %v4831_v52 = vld [vmem:[#allocation3 + $0xc9] sm:$0xff] }
 0x7be   :  { %7208 = vmatprep.subr.bf16.mxu1 %v15658_v35 }
 0x7c0   :  { %6972 = vmatmul.mubr.bf16.gmra.mrb[84].mxu1 %v13420_v32 }
 0x7c1   :  { %6979 = vmatprep.mubr.bf16.mxu1 %v13239_v34  ;;  %7209 = vmatpush1.bf16.msra.mxu1 %v9762_v48  ;;  %v13434_v34 = vpack.c.bf16 %v4831_v52, %v4830_v10  ;;  %v13438_v48 = vpack.c.bf16 %v4833_v18, %v4832_v27  ;;  %v4837_v10 = vld [vmem:[#allocation3 + $0x111] sm:$0xff]  ;;  %v4838_v27 = vld [vmem:[#allocation3 + $0x121] sm:$0xff]  ;;  %v4839_v18 = vld [vmem:[#allocation3 + $0x129] sm:$0xff] }
 0x7c2   :  { %7210 = vmatprep.subr.bf16.mxu1 %v15658_v35 }
 0x7c5   :  { %7211 = vmatpush1.bf16.msra.mxu1 %v9763_v21  ;;  %v13446_v21 = vpack.c.bf16 %v4835_v36, %v4834_v25  ;;  %v4841_v25 = vld [vmem:[#allocation3 + $0x141] sm:$0xff] }
 0x7c6   :  { %7212 = vmatprep.subr.bf16.mxu1 %v15658_v35 }
 0x7c8   :  { %6980 = vmatmul.mubr.bf16.gmra.mrb[88].mxu1 %v13426_v55 }
 0x7c9   :  { %6987 = vmatprep.mubr.bf16.mxu1 %v13251_v24  ;;  %v9764_v24 = vld [vmem:[%s15210_s2 + $0x1e0] sm:$0xff]  }
 0x7ca   :  { %7213 = vmatpush1.bf16.msra.mxu1 %v9764_v24  ;;  %v13458_v24 = vpack.c.bf16 %v4839_v18, %v4838_v27  ;;  %v4845_v27 = vld [vmem:[#allocation3 + $0x171] sm:$0xff]  ;;  %v4974_v18 = vld [vmem:[#allocation3 + $0x182] sm:$0xff] }
 0x7cb   :  { %7214 = vmatprep.subr.bf16.mxu1 %v15658_v35 }
 0x7d0   :  { %6988 = vmatmul.mubr.bf16.gmra.mrb[92].mxu1 %v13434_v34 }
 0x7d1   :  { %6995 = vmatprep.mubr.bf16.mxu1 %v13267_v22  ;;  %v4836_v22 = vld [vmem:[#allocation3 + $0x109] sm:$0xff] }
 0x7d2   :  { %v13450_v52 = vpack.c.bf16 %v4837_v10, %v4836_v22  ;;  %v4842_v22 = vld [vmem:[#allocation3 + $0x151] sm:$0xff]  ;;  %v4843_v10 = vld [vmem:[#allocation3 + $0x159] sm:$0xff] }
 0x7d8   :  { %6996 = vmatmul.mubr.bf16.gmra.mrb[96].mxu1 %v13438_v48 }
 0x7d9   :  { %7003 = vmatprep.mubr.bf16.mxu1 %v13271_v60  ;;  %v9765_v60 = vld [vmem:[%s15210_s2 + $0x1e8] sm:$0xff]  }
 0x7da   :  { %7215 = vmatpush1.bf16.msra.mxu1 %v9765_v60  ;;  %v13470_v60 = vpack.c.bf16 %v4843_v10, %v4842_v22  ;;  %v4847_v22 = vld [vmem:[#allocation3 + $0x189] sm:$0xff] }
 0x7db   :  { %7216 = vmatprep.subr.bf16.mxu1 %v15658_v35 }
 0x7e0   :  { %7004 = vmatmul.mubr.bf16.gmra.mrb[100].mxu1 %v13446_v21 }
 0x7e1   :  { %7011 = vmatprep.mubr.bf16.mxu1 %v13279_v16  ;;  %v4840_v16 = vld [vmem:[#allocation3 + $0x139] sm:$0xff] }
 0x7e2   :  { %v13462_v36 = vpack.c.bf16 %v4841_v25, %v4840_v16  ;;  %v4975_v16 = vld [vmem:[#allocation3 + $0x18a] sm:$0xff] }
 0x7e3   :  { %v5023_v25 = vpack.c.bf16 %v4975_v16, %v4974_v18  ;;  %v4850_v16 = vld [vmem:[#allocation3 + $0x1e1] sm:$0xff] }
 0x7e8   :  { %7012 = vmatmul.mubr.bf16.gmra.mrb[104].mxu1 %v13450_v52 }
 0x7e9   :  { %7019 = vmatprep.mubr.bf16.mxu1 %v13283_v45  ;;  %v9766_v45 = vld [vmem:[%s15210_s2 + $0x1f0] sm:$0xff]  }
 0x7ea   :  { %7217 = vmatpush1.bf16.msra.mxu1 %v9766_v45  ;;  %v4846_v45 = vld [vmem:[#allocation3 + $0x181] sm:$0xff] }
 0x7eb   :  { %7218 = vmatprep.subr.bf16.mxu1 %v15658_v35  ;;  %v9767_v35 = vld [vmem:[%s15210_s2 + $0x1f8] sm:$0xff]   ;;  %v13486_v10 = vpack.c.bf16 %v4847_v22, %v4846_v45  ;;  %v4853_v22 = vld [vmem:[#allocation3 + $0x201] sm:$0xff] }
 0x7ec   :  { %v4852_v45 = vld [vmem:[#allocation3 + $0x1f9] sm:$0xff] }
 0x7ed   :  { %v13495_v49 = vpack.c.bf16 %v4853_v22, %v4852_v45  ;;  %v4861_v22 = vld [vmem:[#allocation3 + $0x261] sm:$0xff] }
 0x7ee   :  { %7219 = vmatpush1.bf16.msra.mxu1 %v9767_v35 }
 0x7f0   :  { %7020 = vmatmul.mubr.bf16.gmra.mrb[108].mxu1 %v13458_v24 }
 0x7f1   :  { %7027 = vmatprep.mubr.bf16.mxu1 %v13291_v41  ;;  %v4844_v41 = vld [vmem:[#allocation3 + $0x169] sm:$0xff] }
 0x7f8   :  { %7028 = vmatmul.mubr.bf16.gmra.mrb[112].mxu1 %v13462_v36 }
 0x7f9   :  { %7035 = vmatprep.mubr.bf16.mxu1 %v13295_v54  ;;  %v13474_v54 = vpack.c.bf16 %v4845_v27, %v4844_v41  ;;  %v4848_v41 = vld [vmem:[#allocation3 + $0x1c9] sm:$0xff]  ;;  %v4849_v27 = vld [vmem:[#allocation3 + $0x1d1] sm:$0xff] }
 0x7fa   :  { %v4896_v18 = vpack.c.bf16 %v4849_v27, %v4848_v41  ;;  %v4855_v41 = vld [vmem:[#allocation3 + $0x219] sm:$0xff] }
 0x800   :  { %7036 = vmatmul.mubr.bf16.gmra.mrb[116].mxu1 %v13470_v60 }
 0x801   :  { %7043 = vmatprep.mubr.bf16.mxu1 %v13302_v26  ;;  %v13483_v26 = vld [vmem:[%s15210_s2 + $0x200] sm:$0xff]  }
 0x802   :  { %8835 = vmatprep.subr.bf16.mxu1 %v13483_v26 }
 0x808   :  { %7044 = vmatmul.mubr.bf16.gmra.mrb[120].mxu1 %v13474_v54 }
 0x809   :  { %7051 = vmatprep.mubr.bf16.mxu1 %v5023_v25  ;;  %v4851_v25 = vld [vmem:[#allocation3 + $0x1e9] sm:$0xff] }
 0x80a   :  { %v13491_v35 = vpack.c.bf16 %v4851_v25, %v4850_v16  ;;  %v4859_v25 = vld [vmem:[#allocation3 + $0x249] sm:$0xff] }
 0x810   :  { %7052 = vmatmul.mubr.bf16.gmra.mrb[124].mxu1 %v13486_v10 }
 0x811   :  { %7059 = vmatprep.mubr.bf16.mxu1 %v13307_v29  ;;  %v4854_v29 = vld [vmem:[#allocation3 + $0x211] sm:$0xff] }
 0x812   :  { %v13499_v27 = vpack.c.bf16 %v4855_v41, %v4854_v29  ;;  %v4863_v41 = vld [vmem:[#allocation3 + $0x279] sm:$0xff] }
 0x818   :  { %7060 = vmatmul.mubr.bf16.gmra.mrb[128].mxu1 %v4896_v18  ;;  %v4857_v18 = vld [vmem:[#allocation3 + $0x231] sm:$0xff] }
 0x819   :  { %7067 = vmatprep.mubr.bf16.mxu1 %v13311_v13  ;;  %v4856_v13 = vld [vmem:[#allocation3 + $0x229] sm:$0xff] }
 0x81a   :  { %v13503_v16 = vpack.c.bf16 %v4857_v18, %v4856_v13  ;;  %v4865_v18 = vld [vmem:[#allocation3 + $0x291] sm:$0xff] }
 0x820   :  { %7068 = vmatmul.mubr.bf16.gmra.mrb[132].mxu1 %v13491_v35 }
 0x821   :  { %7075 = vmatprep.mubr.bf16.mxu1 %v13315_v53  ;;  %v4858_v53 = vld [vmem:[#allocation3 + $0x241] sm:$0xff] }
 0x822   :  { %v13507_v45 = vpack.c.bf16 %v4859_v25, %v4858_v53  ;;  %v4867_v25 = vld [vmem:[#allocation3 + $0x2a9] sm:$0xff] }
 0x828   :  { %7076 = vmatmul.mubr.bf16.gmra.mrb[136].mxu1 %v13495_v49 }
 0x829   :  { %7083 = vmatprep.mubr.bf16.mxu1 %v13319_v5  ;;  %v4860_v5 = vld [vmem:[#allocation3 + $0x259] sm:$0xff] }
 0x82a   :  { %v13511_v29 = vpack.c.bf16 %v4861_v22, %v4860_v5  ;;  %v4869_v22 = vld [vmem:[#allocation3 + $0x2c1] sm:$0xff] }
 0x830   :  { %7084 = vmatmul.mubr.bf16.gmra.mrb[140].mxu1 %v13499_v27 }
 0x831   :  { %7091 = vmatprep.mubr.bf16.mxu1 %v13323_v58  ;;  %v4862_v58 = vld [vmem:[#allocation3 + $0x271] sm:$0xff] }
 0x832   :  { %v13515_v13 = vpack.c.bf16 %v4863_v41, %v4862_v58  ;;  %v4871_v41 = vld [vmem:[#allocation3 + $0x2d9] sm:$0xff] }
 0x838   :  { %7092 = vmatmul.mubr.bf16.gmra.mrb[144].mxu1 %v13503_v16 }
 0x839   :  { %7099 = vmatprep.mubr.bf16.mxu1 %v13327_v6  ;;  %v4864_v6 = vld [vmem:[#allocation3 + $0x289] sm:$0xff] }
 0x83a   :  { %v13519_v53 = vpack.c.bf16 %v4865_v18, %v4864_v6  ;;  %v4873_v18 = vld [vmem:[#allocation3 + $0x2f1] sm:$0xff] }
 0x840   :  { %7100 = vmatmul.mubr.bf16.gmra.mrb[148].mxu1 %v13507_v45 }
 0x841   :  { %7107 = vmatprep.mubr.bf16.mxu1 %v13331_v9  ;;  %v4866_v9 = vld [vmem:[#allocation3 + $0x2a1] sm:$0xff] }
 0x842   :  { %v13523_v5 = vpack.c.bf16 %v4867_v25, %v4866_v9  ;;  %v4875_v25 = vld [vmem:[#allocation3 + $0x309] sm:$0xff] }
 0x848   :  { %7108 = vmatmul.mubr.bf16.gmra.mrb[152].mxu1 %v13511_v29 }
 0x849   :  { %7115 = vmatprep.mubr.bf16.mxu1 %v13335_v4  ;;  %v4868_v4 = vld [vmem:[#allocation3 + $0x2b9] sm:$0xff] }
 0x84a   :  { %v13527_v58 = vpack.c.bf16 %v4869_v22, %v4868_v4  ;;  %v4877_v22 = vld [vmem:[#allocation3 + $0x321] sm:$0xff] }
 0x850   :  { %7116 = vmatmul.mubr.bf16.gmra.mrb[156].mxu1 %v13515_v13 }
 0x851   :  { %7123 = vmatprep.mubr.bf16.mxu1 %v13339_v38  ;;  %v4870_v38 = vld [vmem:[#allocation3 + $0x2d1] sm:$0xff] }
 0x852   :  { %v13531_v6 = vpack.c.bf16 %v4871_v41, %v4870_v38  ;;  %v5006_v38 = vld [vmem:[#allocation3 + $0x332] sm:$0xff] }
 0x858   :  { %7124 = vmatmul.mubr.bf16.gmra.mrb[160].mxu1 %v13519_v53 }
 0x859   :  { %7131 = vmatprep.mubr.bf16.mxu1 %v13343_v43  ;;  %v4872_v43 = vld [vmem:[#allocation3 + $0x2e9] sm:$0xff] }
 0x85a   :  { %v13535_v9 = vpack.c.bf16 %v4873_v18, %v4872_v43  ;;  %v4879_v18 = vld [vmem:[#allocation3 + $0x339] sm:$0xff] }
 0x860   :  { %7132 = vmatmul.mubr.bf16.gmra.mrb[164].mxu1 %v13523_v5 }
 0x861   :  { %7139 = vmatprep.mubr.bf16.mxu1 %v13347_v28  ;;  %v4874_v28 = vld [vmem:[#allocation3 + $0x301] sm:$0xff] }
 0x862   :  { %v13539_v4 = vpack.c.bf16 %v4875_v25, %v4874_v28  ;;  %v5074_v25 = vld [vmem:[#allocation3 + $0x38] sm:$0xff] }
 0x868   :  { %7140 = vmatmul.mubr.bf16.gmra.mrb[168].mxu1 %v13527_v58 }
 0x869   :  { %7147 = vmatprep.mubr.bf16.mxu1 %v13351_v19  ;;  %v4876_v19 = vld [vmem:[#allocation3 + $0x319] sm:$0xff] }
 0x86a   :  { %v13543_v41 = vpack.c.bf16 %v4877_v22, %v4876_v19  ;;  %v9775_v19 = vld [vmem:[%s15210_s2 + $0x208] sm:$0xff]  }
 0x86b   :  { %v5075_v22 = vld [vmem:[#allocation3 + $0x48] sm:$0xff] }
 0x870   :  { %7148 = vmatmul.mubr.bf16.gmra.mrb[172].mxu1 %v13531_v6 }
 0x871   :  { %7155 = vmatprep.mubr.bf16.mxu1 %v13355_v8  ;;  %v5007_v8 = vld [vmem:[#allocation3 + $0x33a] sm:$0xff] }
 0x872   :  { %v13545_v43 = vpack.c.bf16 %v5007_v8, %v5006_v38  ;;  %v5076_v38 = vld [vmem:[#allocation3 + $0x50] sm:$0xff] }
 0x873   :  { %v5138_v8 = vpack.c.bf16 %v5076_v38, %v5075_v22  ;;  %v9780_v22 = vld [vmem:[%s15210_s2 + $0x230] sm:$0xff]  }
 0x874   :  { %v5081_v38 = vld [vmem:[#allocation3 + $0x90] sm:$0xff] }
 0x878   :  { %7156 = vmatmul.mubr.bf16.gmra.mrb[176].mxu1 %v13535_v9 }
 0x879   :  { %7163 = vmatprep.mubr.bf16.mxu1 %v13359_v56  ;;  %v4878_v56 = vld [vmem:[#allocation3 + $0x331] sm:$0xff] }
 0x87a   :  { %v13549_v28 = vpack.c.bf16 %v4879_v18, %v4878_v56  ;;  %v9778_v18 = vld [vmem:[%s15210_s2 + $0x220] sm:$0xff]  }
 0x880   :  { %7164 = vmatmul.mubr.bf16.gmra.mrb[180].mxu1 %v13539_v4 }
 0x881   :  { %7171 = vmatprep.mubr.bf16.mxu1 %v13362_v51  ;;  %v5073_v51 = vld [vmem:[#allocation3 + $0x30] sm:$0xff] }
 0x882   :  { %v5137_v47 = vpack.c.bf16 %v5074_v25, %v5073_v51  ;;  %v5079_v51 = vld [vmem:[#allocation3 + $0x78] sm:$0xff]  ;;  %v5080_v25 = vld [vmem:[#allocation3 + $0x80] sm:$0xff] }
 0x888   :  { %7172 = vmatmul.mubr.bf16.gmra.mrb[184].mxu1 %v13543_v41 }
 0x889   :  { %7179 = vmatprep.mubr.bf16.mxu1 %v13545_v43 }
 0x890   :  { %7180 = vmatmul.mubr.bf16.gmra.mrb[188].mxu1 %v13549_v28 }
 0x891   :  { %7220 = vmatprep.mubr.bf16.mxu1 %v13376_v30  ;;  %v9776_v30 = vld [vmem:[%s15210_s2 + $0x210] sm:$0xff]  }
 0x898   :  { %7221 = vmatmul.mubr.bf16.vlgmr.msra.gmra.mrb[64].mxu1 %v5137_v47  ;;  %v9777_v47 = vld [vmem:[%s15210_s2 + $0x218] sm:$0xff]  }
 0x899   :  { %7228 = vmatprep.mubr.bf16.mxu1 %v13387_v39  ;;  %8843 = vmatpush3.bf16.msra.mxu1 %v13483_v26  ;;  %v5077_v39 = vld [vmem:[#allocation3 + $0x60] sm:$0xff]  ;;  %v5078_v26 = vld [vmem:[#allocation3 + $0x68] sm:$0xff] }
 0x89a   :  { %8836 = vmatprep.subr.bf16.mxu1 %v9775_v19  ;;  %v5139_v56 = vpack.c.bf16 %v5078_v26, %v5077_v39  ;;  %v5084_v39 = vld [vmem:[#allocation3 + $0xb0] sm:$0xff] }
 0x89d   :  { %8844 = vmatpush3.bf16.msra.mxu1 %v9775_v19  ;;  %v5140_v19 = vpack.c.bf16 %v5080_v25, %v5079_v51  ;;  %v5088_v51 = vld [vmem:[#allocation3 + $0xe0] sm:$0xff] }
 0x89e   :  { %8837 = vmatprep.subr.bf16.mxu1 %v9776_v30 }
 0x8a0   :  { %7229 = vmatmul.mubr.bf16.gmra.mrb[68].mxu1 %v5138_v8  ;;  %v5082_v8 = vld [vmem:[#allocation3 + $0x98] sm:$0xff] }
 0x8a1   :  { %7236 = vmatprep.mubr.bf16.mxu1 %v13398_v57  ;;  %8845 = vmatpush3.bf16.msra.mxu1 %v9776_v30  ;;  %v9779_v57 = vld [vmem:[%s15210_s2 + $0x228] sm:$0xff]   ;;  %v5141_v30 = vpack.c.bf16 %v5082_v8, %v5081_v38  ;;  %v5093_v8 = vld [vmem:[#allocation3 + $0x120] sm:$0xff] }
 0x8a2   :  { %8838 = vmatprep.subr.bf16.mxu1 %v9777_v47 }
 0x8a5   :  { %8846 = vmatpush3.bf16.msra.mxu1 %v9777_v47  ;;  %v5083_v47 = vld [vmem:[#allocation3 + $0xa8] sm:$0xff] }
 0x8a6   :  { %8839 = vmatprep.subr.bf16.mxu1 %v9778_v18  ;;  %v5142_v26 = vpack.c.bf16 %v5084_v39, %v5083_v47  ;;  %v5095_v47 = vld [vmem:[#allocation3 + $0x138] sm:$0xff] }
 0x8a8   :  { %7237 = vmatmul.mubr.bf16.gmra.mrb[72].mxu1 %v5139_v56  ;;  %v5086_v56 = vld [vmem:[#allocation3 + $0xc8] sm:$0xff] }
 0x8a9   :  { %7244 = vmatprep.mubr.bf16.mxu1 %v13409_v59  ;;  %8847 = vmatpush3.bf16.msra.mxu1 %v9778_v18  ;;  %v9781_v59 = vld [vmem:[%s15210_s2 + $0x238] sm:$0xff]  }
 0x8aa   :  { %8840 = vmatprep.subr.bf16.mxu1 %v9779_v57 }
 0x8ad   :  { %8848 = vmatpush3.bf16.msra.mxu1 %v9779_v57  ;;  %v5087_v57 = vld [vmem:[#allocation3 + $0xd8] sm:$0xff] }
 0x8ae   :  { %8841 = vmatprep.subr.bf16.mxu1 %v9780_v22  ;;  %v5144_v25 = vpack.c.bf16 %v5088_v51, %v5087_v57  ;;  %v5231_v57 = vld [vmem:[#allocation3 + $0x199] sm:$0xff] }
 0x8af   :  { %v5101_v51 = vld [vmem:[#allocation3 + $0x180] sm:$0xff] }
 0x8b0   :  { %7245 = vmatmul.mubr.bf16.gmra.mrb[76].mxu1 %v5140_v19  ;;  %v5089_v19 = vld [vmem:[#allocation3 + $0xf0] sm:$0xff] }
 0x8b1   :  { %7252 = vmatprep.mubr.bf16.mxu1 %v13420_v32  ;;  %8849 = vmatpush3.bf16.msra.mxu1 %v9780_v22  ;;  %v5085_v32 = vld [vmem:[#allocation3 + $0xc0] sm:$0xff] }
 0x8b2   :  { %8842 = vmatprep.subr.bf16.mxu1 %v9781_v59  ;;  %v5143_v18 = vpack.c.bf16 %v5086_v56, %v5085_v32  ;;  %v5099_v56 = vld [vmem:[#allocation3 + $0x168] sm:$0xff] }
 0x8b5   :  { %8850 = vmatpush3.bf16.msra.mxu1 %v9781_v59  ;;  %v5091_v59 = vld [vmem:[#allocation3 + $0x108] sm:$0xff] }
 0x8b8   :  { %7253 = vmatmul.mubr.bf16.gmra.mrb[80].mxu1 %v5141_v30 }
 0x8b9   :  { %7260 = vmatprep.mubr.bf16.mxu1 %v13426_v55  ;;  %v5090_v55 = vld [vmem:[#allocation3 + $0xf8] sm:$0xff] }
 0x8ba   :  { %v5145_v22 = vpack.c.bf16 %v5090_v55, %v5089_v19 }
 0x8c0   :  { %7261 = vmatmul.mubr.bf16.gmra.mrb[84].mxu1 %v5142_v26  ;;  %v5097_v26 = vld [vmem:[#allocation3 + $0x150] sm:$0xff] }
 0x8c1   :  { %7268 = vmatprep.mubr.bf16.mxu1 %v13434_v34  ;;  %v5092_v34 = vld [vmem:[#allocation3 + $0x110] sm:$0xff] }
 0x8c2   :  { %v5146_v38 = vpack.c.bf16 %v5092_v34, %v5091_v59  ;;  %v5106_v59 = vld [vmem:[#allocation3 + $0x1e8] sm:$0xff] }
 0x8c8   :  { %7269 = vmatmul.mubr.bf16.gmra.mrb[88].mxu1 %v5143_v18 }
 0x8c9   :  { %7276 = vmatprep.mubr.bf16.mxu1 %v13438_v48  ;;  %v5094_v48 = vld [vmem:[#allocation3 + $0x128] sm:$0xff] }
 0x8ca   :  { %v5147_v30 = vpack.c.bf16 %v5094_v48, %v5093_v8  ;;  %v5109_v48 = vld [vmem:[#allocation3 + $0x210] sm:$0xff] }
 0x8d0   :  { %7277 = vmatmul.mubr.bf16.gmra.mrb[92].mxu1 %v5144_v25  ;;  %v5102_v25 = vld [vmem:[#allocation3 + $0x188] sm:$0xff] }
 0x8d1   :  { %7284 = vmatprep.mubr.bf16.mxu1 %v13446_v21  ;;  %v5096_v21 = vld [vmem:[#allocation3 + $0x140] sm:$0xff]  ;;  %v5151_v55 = vpack.c.bf16 %v5102_v25, %v5101_v51 }
 0x8d2   :  { %v5148_v39 = vpack.c.bf16 %v5096_v21, %v5095_v47  ;;  %v5111_v21 = vld [vmem:[#allocation3 + $0x228] sm:$0xff]  ;;  %v5121_v51 = vld [vmem:[#allocation3 + $0x2a0] sm:$0xff] }
 0x8d8   :  { %7285 = vmatmul.mubr.bf16.gmra.mrb[96].mxu1 %v5145_v22 }
 0x8d9   :  { %7292 = vmatprep.mubr.bf16.mxu1 %v13450_v52  ;;  %v5098_v52 = vld [vmem:[#allocation3 + $0x158] sm:$0xff] }
 0x8da   :  { %v5149_v32 = vpack.c.bf16 %v5098_v52, %v5097_v26  ;;  %v5113_v26 = vld [vmem:[#allocation3 + $0x240] sm:$0xff] }
 0x8e0   :  { %7293 = vmatmul.mubr.bf16.gmra.mrb[100].mxu1 %v5146_v38  ;;  %v5108_v38 = vld [vmem:[#allocation3 + $0x200] sm:$0xff] }
 0x8e1   :  { %7300 = vmatprep.mubr.bf16.mxu1 %v13458_v24  ;;  %v5100_v24 = vld [vmem:[#allocation3 + $0x170] sm:$0xff] }
 0x8e2   :  { %v5150_v18 = vpack.c.bf16 %v5100_v24, %v5099_v56  ;;  %v5117_v24 = vld [vmem:[#allocation3 + $0x270] sm:$0xff] }
 0x8e8   :  { %7301 = vmatmul.mubr.bf16.gmra.mrb[104].mxu1 %v5147_v30  ;;  %v5110_v30 = vld [vmem:[#allocation3 + $0x218] sm:$0xff] }
 0x8e9   :  { %7308 = vmatprep.mubr.bf16.mxu1 %v13462_v36  ;;  %v5232_v36 = vld [vmem:[#allocation3 + $0x1a1] sm:$0xff]  ;;  %v5155_v47 = vpack.c.bf16 %v5110_v30, %v5109_v48 }
 0x8ea   :  { %v5280_v19 = vpack.c.bf16 %v5232_v36, %v5231_v57  ;;  %v5119_v57 = vld [vmem:[#allocation3 + $0x288] sm:$0xff] }
 0x8f0   :  { %7309 = vmatmul.mubr.bf16.gmra.mrb[108].mxu1 %v5148_v39 }
 0x8f1   :  { %7316 = vmatprep.mubr.bf16.mxu1 %v13470_v60  ;;  %v9782_v60 = vld [vmem:[#allocation2] sm:$0xff] }
 0x8f2   :  { %v13589_v22 = vpack.c.bf16 %v9782_v60, %v9782_v60  ;;  %v5125_v60 = vld [vmem:[#allocation3 + $0x2d0] sm:$0xff] }
 0x8f8   :  { %7317 = vmatmul.mubr.bf16.gmra.mrb[112].mxu1 %v5149_v32  ;;  %v5115_v32 = vld [vmem:[#allocation3 + $0x258] sm:$0xff] }
 0x8f9   :  { %7324 = vmatprep.mubr.bf16.mxu1 %v13474_v54  ;;  %v5105_v54 = vld [vmem:[#allocation3 + $0x1e0] sm:$0xff] }
 0x8fa   :  { %v5153_v34 = vpack.c.bf16 %v5106_v59, %v5105_v54 }
 0x900   :  { %7325 = vmatmul.mubr.bf16.gmra.mrb[116].mxu1 %v5150_v18 }
 0x901   :  { %7332 = vmatprep.mubr.bf16.mxu1 %v13486_v10  ;;  %v5107_v10 = vld [vmem:[#allocation3 + $0x1f8] sm:$0xff] }
 0x902   :  { %v5154_v8 = vpack.c.bf16 %v5108_v38, %v5107_v10 }
 0x908   :  { %7333 = vmatmul.mubr.bf16.gmra.mrb[120].mxu1 %v5151_v55 }
 0x909   :  { %7340 = vmatprep.mubr.bf16.mxu1 %v5280_v19  ;;  %v5123_v19 = vld [vmem:[#allocation3 + $0x2b8] sm:$0xff] }
 0x910   :  { %7341 = vmatmul.mubr.bf16.gmra.mrb[124].mxu1 %v13589_v22 }
 0x911   :  { %7348 = vmatprep.mubr.bf16.mxu1 %v13491_v35  ;;  %v5112_v35 = vld [vmem:[#allocation3 + $0x230] sm:$0xff] }
 0x912   :  { %v5156_v39 = vpack.c.bf16 %v5112_v35, %v5111_v21  ;;  %v5130_v21 = vld [vmem:[#allocation3 + $0x308] sm:$0xff] }
 0x918   :  { %7349 = vmatmul.mubr.bf16.gmra.mrb[128].mxu1 %v5153_v34  ;;  %v5128_v34 = vld [vmem:[#allocation3 + $0x2f0] sm:$0xff] }
 0x919   :  { %7356 = vmatprep.mubr.bf16.mxu1 %v13495_v49  ;;  %v5114_v49 = vld [vmem:[#allocation3 + $0x248] sm:$0xff] }
 0x91a   :  { %v5157_v52 = vpack.c.bf16 %v5114_v49, %v5113_v26 }
 0x920   :  { %7357 = vmatmul.mubr.bf16.gmra.mrb[132].mxu1 %v5154_v8 }
 0x921   :  { %7364 = vmatprep.mubr.bf16.mxu1 %v13499_v27  ;;  %v5116_v27 = vld [vmem:[#allocation3 + $0x260] sm:$0xff] }
 0x922   :  { %v5158_v56 = vpack.c.bf16 %v5116_v27, %v5115_v32  ;;  %v5132_v32 = vld [vmem:[#allocation3 + $0x320] sm:$0xff] }
 0x928   :  { %7365 = vmatmul.mubr.bf16.gmra.mrb[136].mxu1 %v5155_v47  ;;  %v5129_v47 = vld [vmem:[#allocation3 + $0x300] sm:$0xff] }
 0x929   :  { %7372 = vmatprep.mubr.bf16.mxu1 %v13503_v16  ;;  %v5118_v16 = vld [vmem:[#allocation3 + $0x278] sm:$0xff]  ;;  %v5165_v49 = vpack.c.bf16 %v5130_v21, %v5129_v47 }
 0x92a   :  { %v5159_v18 = vpack.c.bf16 %v5118_v16, %v5117_v24  ;;  %v5392_v21 = vld [vmem:[#allocation3 + $0x352] sm:$0xff] }
 0x930   :  { %7373 = vmatmul.mubr.bf16.gmra.mrb[140].mxu1 %v5156_v39 }
 0x931   :  { %7380 = vmatprep.mubr.bf16.mxu1 %v13507_v45  ;;  %v5120_v45 = vld [vmem:[#allocation3 + $0x290] sm:$0xff] }
 0x932   :  { %v5160_v36 = vpack.c.bf16 %v5120_v45, %v5119_v57  ;;  %v5134_v45 = vld [vmem:[#allocation3 + $0x338] sm:$0xff] }
 0x938   :  { %7381 = vmatmul.mubr.bf16.gmra.mrb[144].mxu1 %v5157_v52  ;;  %v5131_v52 = vld [vmem:[#allocation3 + $0x318] sm:$0xff] }
 0x939   :  { %7388 = vmatprep.mubr.bf16.mxu1 %v13511_v29  ;;  %v5122_v29 = vld [vmem:[#allocation3 + $0x2a8] sm:$0xff]  ;;  %v5166_v16 = vpack.c.bf16 %v5132_v32, %v5131_v52 }
 0x93a   :  { %v5161_v25 = vpack.c.bf16 %v5122_v29, %v5121_v51 }
 0x940   :  { %7389 = vmatmul.mubr.bf16.gmra.mrb[148].mxu1 %v5158_v56 }
 0x941   :  { %7396 = vmatprep.mubr.bf16.mxu1 %v13515_v13  ;;  %v5124_v13 = vld [vmem:[#allocation3 + $0x2c0] sm:$0xff] }
 0x942   :  { %v5162_v55 = vpack.c.bf16 %v5124_v13, %v5123_v19 }
 0x948   :  { %7397 = vmatmul.mubr.bf16.gmra.mrb[152].mxu1 %v5159_v18  ;;  %v5264_v18 = vld [vmem:[#allocation3 + $0x351] sm:$0xff] }
 0x949   :  { %7404 = vmatprep.mubr.bf16.mxu1 %v13519_v53  ;;  %v5126_v53 = vld [vmem:[#allocation3 + $0x2d8] sm:$0xff] }
 0x94a   :  { %v5163_v54 = vpack.c.bf16 %v5126_v53, %v5125_v60  ;;  %v5385_v60 = vld [vmem:[#allocation3 + $0x302] sm:$0xff]  ;;  %v5386_v53 = vld [vmem:[#allocation3 + $0x30a] sm:$0xff] }
 0x950   :  { %7405 = vmatmul.mubr.bf16.gmra.mrb[156].mxu1 %v5160_v36 }
 0x951   :  { %7412 = vmatprep.mubr.bf16.mxu1 %v13523_v5  ;;  %v5127_v5 = vld [vmem:[#allocation3 + $0x2e8] sm:$0xff] }
 0x952   :  { %v5164_v30 = vpack.c.bf16 %v5128_v34, %v5127_v5  ;;  %v5421_v5 = vpack.c.bf16 %v5386_v53, %v5385_v60  ;;  %v5387_v34 = vld [vmem:[#allocation3 + $0x31a] sm:$0xff] }
 0x958   :  { %7413 = vmatmul.mubr.bf16.gmra.mrb[160].mxu1 %v5161_v25 }
 0x959   :  { %7420 = vmatprep.mubr.bf16.mxu1 %v13527_v58 }
 0x960   :  { %7421 = vmatmul.mubr.bf16.gmra.mrb[164].mxu1 %v5162_v55 }
 0x961   :  { %7428 = vmatprep.mubr.bf16.mxu1 %v13531_v6 }
 0x968   :  { %7429 = vmatmul.mubr.bf16.gmra.mrb[168].mxu1 %v5163_v54 }
 0x969   :  { %7436 = vmatprep.mubr.bf16.mxu1 %v13535_v9 }
 0x96b   :  { %v7222_v59 = vpop.f32.mrb[64].mxu1 }
 0x96c   :  { %v13605_v10 = vadd.f32 %v13067_v0, %v7222_v59  ;;  %v7224_v38 = vpop.f32.mrb[65].mxu1 }
 0x96d   :  { %v7225_v58 = vpop.f32.mrb[66].mxu1  ;;  %v5388_v38 = vld [vmem:[#allocation3 + $0x322] sm:$0xff] }
 0x96e   :  { %v13608_v8 = vadd.f32 %v13071_v50, %v7225_v58  ;;  %v7227_v48 = vpop.f32.mrb[67].mxu1  ;;  %v5422_v47 = vpack.c.bf16 %v5388_v38, %v5387_v34 }
 0x970   :  { %7437 = vmatmul.mubr.bf16.gmra.mrb[172].mxu1 %v5164_v30 }
 0x971   :  { %7444 = vmatprep.mubr.bf16.mxu1 %v13539_v4 }
 0x973   :  { %v7230_v6 = vpop.f32.mrb[68].mxu1 }
 0x974   :  { %v13612_v9 = vadd.f32 %v13065_v14, %v7230_v6  ;;  %v7232_v35 = vpop.f32.mrb[69].mxu1 }
 0x975   :  { %v7233_v39 = vpop.f32.mrb[70].mxu1 }
 0x976   :  { %v13615_v0 = vadd.f32 %v13069_v1, %v7233_v39  ;;  %v7235_v26 = vpop.f32.mrb[71].mxu1  ;;  %v5263_v1 = vld [vmem:[#allocation3 + $0x349] sm:$0xff] }
 0x977   :  { %v5296_v29 = vpack.c.bf16 %v5264_v18, %v5263_v1 }
 0x978   :  { %7445 = vmatmul.mubr.bf16.gmra.mrb[176].mxu1 %v5165_v49 }
 0x979   :  { %7452 = vmatprep.mubr.bf16.mxu1 %v13543_v41  ;;  %v5133_v41 = vld [vmem:[#allocation3 + $0x330] sm:$0xff] }
 0x97a   :  { %v5167_v19 = vpack.c.bf16 %v5134_v45, %v5133_v41 }
 0x97b   :  { %v7238_v50 = vpop.f32.mrb[72].mxu1 }
 0x97c   :  { %v13619_v4 = vadd.f32 %v13079_v46, %v7238_v50  ;;  %v7240_v27 = vpop.f32.mrb[73].mxu1 }
 0x97d   :  { %v7241_v56 = vpop.f32.mrb[74].mxu1 }
 0x97e   :  { %v13622_v14 = vadd.f32 %v13083_v40, %v7241_v56  ;;  %v7243_v24 = vpop.f32.mrb[75].mxu1 }
 0x980   :  { %7453 = vmatmul.mubr.bf16.gmra.mrb[180].mxu1 %v5166_v16 }
 0x981   :  { %7460 = vmatprep.mubr.bf16.mxu1 %v13549_v28 }
 0x983   :  { %v7246_v57 = vpop.f32.mrb[76].mxu1 }
 0x984   :  { %v13626_v36 = vadd.f32 %v13077_v2, %v7246_v57  ;;  %v7248_v46 = vpop.f32.mrb[77].mxu1 }
 0x985   :  { %v7249_v51 = vpop.f32.mrb[78].mxu1 }
 0x986   :  { %v13629_v25 = vadd.f32 %v13081_v23, %v7249_v51  ;;  %v7251_v40 = vpop.f32.mrb[79].mxu1 }
 0x988   :  { %7461 = vmatmul.mubr.bf16.gmra.mrb[184].mxu1 %v5167_v19 }
 0x989   :  { %7468 = vmatprep.mubr.bf16.mxu1 %v5296_v29 }
 0x98b   :  { %v7254_v13 = vpop.f32.mrb[80].mxu1 }
 0x98c   :  { %v13632_v28 = vadd.f32 %v13091_v12, %v7254_v13  ;;  %v7256_v55 = vpop.f32.mrb[81].mxu1 }
 0x98d   :  { %v7257_v54 = vpop.f32.mrb[82].mxu1  ;;  %v15693_v55 = vld [vmem:[#allocation17_spill] sm:$0xff] }
 0x98e   :  { %v13635_v2 = vadd.f32 %v13095_v15, %v7257_v54  ;;  %v7259_v59 = vpop.f32.mrb[83].mxu1  ;;  %v5391_v15 = vld [vmem:[#allocation3 + $0x34a] sm:$0xff] }
 0x98f   :  { %v5424_v26 = vpack.c.bf16 %v5392_v21, %v5391_v15  ;;  %v15694_v54 = vld [vmem:[#allocation22_spill] sm:$0xff]  ;;  %v15695_v15 = vld [vmem:[#allocation25_spill] sm:$0xff] }
 0x990   :  { %7469 = vmatmul.mubr.bf16.gmra.mrb[188].mxu1 %v13589_v22 }
 0x991   :  { %8827 = vmatprep.mubr.bf16.mxu1 %v5421_v5  ;;  %v7838_v5 = vmul.f32 %v13605_v10, %v13605_v10 }
 0x993   :  { %v7262_v23 = vpop.f32.mrb[84].mxu1 }
 0x994   :  { %v13639_v58 = vadd.f32 %v13089_v62, %v7262_v23  ;;  %v7264_v12 = vpop.f32.mrb[85].mxu1  ;;  %v7840_v23 = vmul.f32 %v13612_v9, %v13612_v9 }
 0x995   :  { %v7265_v48 = vpop.f32.mrb[86].mxu1 }
 0x996   :  { %v13642_v30 = vadd.f32 %v13093_v3, %v7265_v48  ;;  %v7267_v6 = vpop.f32.mrb[87].mxu1 }
 0x998   :  { %8828 = vmatmul.mubr.bf16.vlgmr.msra.gmra.mrb[192].mxu1 %v5422_v47 }
 0x999   :  { %8831 = vmatprep.mubr.bf16.mxu1 %v13545_v43 }
 0x99b   :  { %v7270_v22 = vpop.f32.mrb[88].mxu1 }
 0x99c   :  { %v13646_v35 = vadd.f32 %v13102_v31, %v7270_v22  ;;  %v7272_v39 = vpop.f32.mrb[89].mxu1 }
 0x99d   :  { %v7273_v62 = vpop.f32.mrb[90].mxu1 }
 0x99e   :  { %v13649_v49 = vadd.f32 %v13106_v20, %v7273_v62  ;;  %v7275_v50 = vpop.f32.mrb[91].mxu1 }
 0x99f   :  { %v7842_v50 = vmul.f32 %v13619_v4, %v13619_v4 }
 0x9a0   :  { %8832 = vmatmul.mubr.bf16.gmra.mrb[196].mxu1 %v5424_v26  ;;  %v7841_v26 = vmul.f32 %v13615_v0, %v13615_v0 }
 0x9a3   :  { %v7278_v3 = vpop.f32.mrb[92].mxu1 }
 0x9a4   :  { %v13652_v52 = vadd.f32 %v13100_v37, %v7278_v3  ;;  %v7280_v32 = vpop.f32.mrb[93].mxu1 }
 0x9a5   :  { %v7281_v43 = vpop.f32.mrb[94].mxu1 }
 0x9a6   :  { %v13655_v27 = vadd.f32 %v13104_v7, %v7281_v43  ;;  %v7283_v56 = vpop.f32.mrb[95].mxu1  ;;  %v15696_v43 = vld [vmem:[#allocation23_spill] sm:$0xff] }
 0x9ab   :  { %v7286_v31 = vpop.f32.mrb[96].mxu1 }
 0x9ac   :  { %v13658_v24 = vadd.f32 %v13114_v17, %v7286_v31  ;;  %v7288_v16 = vpop.f32.mrb[97].mxu1 }
 0x9ad   :  { %v7289_v1 = vpop.f32.mrb[98].mxu1 }
 0x9ae   :  { %v13661_v20 = vadd.f32 %v13121_v61, %v7289_v1  ;;  %v7291_v18 = vpop.f32.mrb[99].mxu1  ;;  %v7843_v1 = vmul.f32 %v13622_v14, %v13622_v14 }
 0x9b3   :  { %v7294_v57 = vpop.f32.mrb[100].mxu1 }
 0x9b4   :  { %v13664_v37 = vadd.f32 %v13112_v44, %v7294_v57  ;;  %v7296_v41 = vpop.f32.mrb[101].mxu1  ;;  %v15697_v57 = vld [vmem:[#allocation24_spill] sm:$0xff] }
 0x9b5   :  { %v7297_v45 = vpop.f32.mrb[102].mxu1 }
 0x9b6   :  { %v13667_v7 = vadd.f32 %v13116_v63, %v7297_v45  ;;  %v7299_v46 = vpop.f32.mrb[103].mxu1 }
 0x9bb   :  { %v7302_v51 = vpop.f32.mrb[104].mxu1 }
 0x9bc   :  { %v13670_v17 = vadd.f32 %v13130_v42, %v7302_v51  ;;  %v7304_v29 = vpop.f32.mrb[105].mxu1  ;;  %v7839_v42 = vmul.f32 %v13608_v8, %v13608_v8  ;;  %v7844_v51 = vmul.f32 %v13626_v36, %v13626_v36 }
 0x9bd   :  { %v7305_v40 = vpop.f32.mrb[106].mxu1 }
 0x9be   :  { %v13673_v61 = vadd.f32 %v13137_v33, %v7305_v40  ;;  %v7307_v19 = vpop.f32.mrb[107].mxu1  ;;  %v7768_v33 = vadd.f32 %v13608_v8, %v13605_v10  ;;  %v7902_v48 = vadd.f32 %v7839_v42, %v7838_v5  ;;  %v7846_v42 = vmul.f32 %v13632_v28, %v13632_v28 }
 0x9c0   :  { %v7769_v6 = vadd.f32 %v7768_v33, %v13612_v9  ;;  %v7903_v39 = vadd.f32 %v7902_v48, %v7840_v23  ;;  %v15699_v33 = vld [vmem:[#allocation9_spill] sm:$0xff] }
 0x9c2   :  { %v7770_v62 = vadd.f32 %v7769_v6, %v13615_v0 }
 0x9c3   :  { %v7310_v13 = vpop.f32.mrb[108].mxu1 }
 0x9c4   :  { %v13676_v44 = vadd.f32 %v15693_v55, %v7310_v13  ;;  %v7312_v60 = vpop.f32.mrb[109].mxu1  ;;  %v7771_v3 = vadd.f32 %v7770_v62, %v13619_v4  ;;  %v7845_v13 = vmul.f32 %v13629_v25, %v13629_v25 }
 0x9c5   :  { %v7313_v53 = vpop.f32.mrb[110].mxu1  ;;  %v15698_v60 = vld [vmem:[#allocation34_spill] sm:$0xff] }
 0x9c6   :  { %v13679_v63 = vadd.f32 %v15694_v54, %v7313_v53  ;;  %v7315_v59 = vpop.f32.mrb[111].mxu1  ;;  %v7772_v46 = vadd.f32 %v7771_v3, %v13622_v14 }
 0x9c8   :  { %v7773_v40 = vadd.f32 %v7772_v46, %v13626_v36 }
 0x9ca   :  { %v7774_v59 = vadd.f32 %v7773_v40, %v13629_v25  ;;  %v15703_v40 = vld [vmem:[#allocation11_spill] sm:$0xff] }
 0x9cb   :  { %v7318_v34 = vpop.f32.mrb[112].mxu1 }
 0x9cc   :  { %v13690_v38 = vadd.f32 %v13150_v11, %v7318_v34  ;;  %v7320_v12 = vpop.f32.mrb[113].mxu1  ;;  %v7904_v11 = vadd.f32 %v7903_v39, %v7841_v26  ;;  %v7775_v48 = vadd.f32 %v7774_v59, %v13632_v28  ;;  %v15700_v26 = vld [vmem:[#allocation28_spill] sm:$0xff]  ;;  %v15704_v59 = vld [vmem:[#allocation14_spill] sm:$0xff] }
 0x9cd   :  { %v7321_v47 = vpop.f32.mrb[114].mxu1 }
 0x9ce   :  { %v13694_v21 = vadd.f32 %v15695_v15, %v7321_v47  ;;  %v7323_v22 = vpop.f32.mrb[115].mxu1  ;;  %v7905_v16 = vadd.f32 %v7904_v11, %v7842_v50  ;;  %v7847_v47 = vmul.f32 %v13635_v2, %v13635_v2  ;;  %v7776_v15 = vadd.f32 %v7775_v48, %v13635_v2 }
 0x9cf   :  { %v7848_v22 = vmul.f32 %v13639_v58, %v13639_v58 }
 0x9d0   :  { %v7906_v29 = vadd.f32 %v7905_v16, %v7843_v1  ;;  %v7777_v3 = vadd.f32 %v7776_v15, %v13639_v58 }
 0x9d2   :  { %v7907_v19 = vadd.f32 %v7906_v29, %v7844_v51 }
 0x9d3   :  { %v7326_v32 = vpop.f32.mrb[116].mxu1 }
 0x9d4   :  { %v13703_v56 = vadd.f32 %v15696_v43, %v7326_v32  ;;  %v7328_v31 = vpop.f32.mrb[117].mxu1  ;;  %v7908_v12 = vadd.f32 %v7907_v19, %v7845_v13  ;;  %v15701_v43 = vld [vmem:[#allocation35_spill] sm:$0xff] }
 0x9d5   :  { %v7329_v18 = vpop.f32.mrb[118].mxu1 }
 0x9d6   :  { %v13708_v41 = vadd.f32 %v15697_v57, %v7329_v18  ;;  %v7331_v45 = vpop.f32.mrb[119].mxu1  ;;  %v7909_v6 = vadd.f32 %v7908_v12, %v7846_v42  ;;  %v7849_v18 = vmul.f32 %v13642_v30, %v13642_v30  ;;  %v7778_v57 = vadd.f32 %v7777_v3, %v13642_v30 }
 0x9d7   :  { %v7850_v45 = vmul.f32 %v13646_v35, %v13646_v35 }
 0x9d8   :  { %v7910_v11 = vadd.f32 %v7909_v6, %v7847_v47  ;;  %v7779_v51 = vadd.f32 %v7778_v57, %v13646_v35  ;;  %v7853_v47 = vmul.f32 %v13655_v27, %v13655_v27 }
 0x9da   :  { %v7911_v1 = vadd.f32 %v7910_v11, %v7848_v22  ;;  %v15706_v22 = vld [vmem:[#allocation10_spill] sm:$0xff]  ;;  %v7854_v11 = vmul.f32 %v13658_v24, %v13658_v24 }
 0x9db   :  { %v7334_v55 = vpop.f32.mrb[120].mxu1 }
 0x9dc   :  { %v13717_v53 = vadd.f32 %v15698_v60, %v7334_v55  ;;  %v7336_v54 = vpop.f32.mrb[121].mxu1  ;;  %v7912_v46 = vadd.f32 %v7911_v1, %v7849_v18  ;;  %v7851_v60 = vmul.f32 %v13649_v49, %v13649_v49 }
 0x9dd   :  { %v7337_v5 = vpop.f32.mrb[122].mxu1 }
 0x9de   :  { %v13723_v23 = vadd.f32 %v15699_v33, %v7337_v5  ;;  %v7339_v34 = vpop.f32.mrb[123].mxu1  ;;  %v7913_v55 = vadd.f32 %v7912_v46, %v7850_v45  ;;  %v7780_v33 = vadd.f32 %v7779_v51, %v13649_v49  ;;  %v7855_v45 = vmul.f32 %v13661_v20, %v13661_v20 }
 0x9df   :  { %v7852_v34 = vmul.f32 %v13652_v52, %v13652_v52  ;;  %v7856_v51 = vmul.f32 %v13664_v37, %v13664_v37 }
 0x9e0   :  { %v7914_v12 = vadd.f32 %v7913_v55, %v7851_v60  ;;  %v7781_v48 = vadd.f32 %v7780_v33, %v13652_v52 }
 0x9e2   :  { %v7915_v6 = vadd.f32 %v7914_v12, %v7852_v34 }
 0x9e3   :  { %v7342_v39 = vpop.f32.mrb[124].mxu1 }
 0x9e4   :  { %v13732_v62 = vadd.f32 %v15700_v26, %v7342_v39  ;;  %v7344_v50 = vpop.f32.mrb[125].mxu1  ;;  %v7916_v1 = vadd.f32 %v7915_v6, %v7853_v47  ;;  %v7858_v47 = vmul.f32 %v13670_v17, %v13670_v17 }
 0x9e5   :  { %v7345_v32 = vpop.f32.mrb[126].mxu1  ;;  %v7782_v50 = vadd.f32 %v7781_v48, %v13655_v27  ;;  %v7857_v48 = vmul.f32 %v13667_v7, %v13667_v7 }
 0x9e6   :  { %v13736_v31 = vadd.f32 %v15701_v43, %v7345_v32  ;;  %v7347_v16 = vpop.f32.mrb[127].mxu1  ;;  %v15707_v32 = vld [vmem:[#allocation12_spill] sm:$0xff]  ;;  %v7917_v57 = vadd.f32 %v7916_v1, %v7854_v11 }
 0x9e7   :  { %v7783_v18 = vadd.f32 %v7782_v50, %v13658_v24  ;;  %v15713_v50 = vld [vmem:[#allocation16_spill] sm:$0xff] }
 0x9e8   :  { %15702 = vst [vmem:[#allocation17_spill] sm:$0xff] %v13736_v31  ;;  %v7918_v60 = vadd.f32 %v7917_v57, %v7855_v45 }
 0x9e9   :  { %v7784_v46 = vadd.f32 %v7783_v18, %v13661_v20  ;;  %v15715_v18 = vld [vmem:[#allocation29_spill] sm:$0xff] }
 0x9ea   :  { %v7919_v12 = vadd.f32 %v7918_v60, %v7856_v51  ;;  %v7860_v51 = vmul.f32 %v13676_v44, %v13676_v44  ;;  %v7861_v60 = vmul.f32 %v13679_v63, %v13679_v63 }
 0x9eb   :  { %v7350_v29 = vpop.f32.mrb[128].mxu1 }
 0x9ec   :  { %v13745_v19 = vadd.f32 %v15703_v40, %v7350_v29  ;;  %v7352_v13 = vpop.f32.mrb[129].mxu1  ;;  %v15709_v40 = vld [vmem:[#allocation26_spill] sm:$0xff] }
 0x9ed   :  { %v7353_v54 = vpop.f32.mrb[130].mxu1 }
 0x9ee   :  { %v13750_v42 = vadd.f32 %v15704_v59, %v7353_v54  ;;  %v7355_v5 = vpop.f32.mrb[131].mxu1  ;;  %v7785_v54 = vadd.f32 %v7784_v46, %v13664_v37 }
 0x9ef   :  { %v15711_v5 = vld [vmem:[#allocation30_spill] sm:$0xff] }
 0x9f0   :  { %15705 = vst [vmem:[#allocation22_spill] sm:$0xff] %v13750_v42  ;;  %v7786_v6 = vadd.f32 %v7785_v54, %v13667_v7 }
 0x9f3   :  { %v7358_v15 = vpop.f32.mrb[132].mxu1 }
 0x9f4   :  { %v13759_v39 = vadd.f32 %v15706_v22, %v7358_v15  ;;  %v7360_v26 = vpop.f32.mrb[133].mxu1  ;;  %v7920_v15 = vadd.f32 %v7919_v12, %v7857_v48  ;;  %v7787_v22 = vadd.f32 %v7786_v6, %v13670_v17  ;;  %v7862_v48 = vmul.f32 %v13690_v38, %v13690_v38 }
 0x9f5   :  { %v7361_v3 = vpop.f32.mrb[134].mxu1 }
 0x9f6   :  { %v13765_v43 = vadd.f32 %v15707_v32, %v7361_v3  ;;  %v7363_v16 = vpop.f32.mrb[135].mxu1  ;;  %v7921_v32 = vadd.f32 %v7920_v15, %v7858_v47  ;;  %v7788_v46 = vadd.f32 %v7787_v22, %v13673_v61  ;;  %v15718_v47 = vld [vmem:[#allocation15_spill] sm:$0xff] }
 0x9f7   :  { %v7859_v16 = vmul.f32 %v13673_v61, %v13673_v61 }
 0x9f8   :  { %15708 = vst [vmem:[#allocation25_spill] sm:$0xff] %v13765_v43 }
 0x9fb   :  { %v7366_v29 = vpop.f32.mrb[136].mxu1 }
 0x9fc   :  { %v13774_v13 = vadd.f32 %v15709_v40, %v7366_v29  ;;  %v7368_v55 = vpop.f32.mrb[137].mxu1  ;;  %v7922_v29 = vadd.f32 %v7921_v32, %v7859_v16  ;;  %v7789_v40 = vadd.f32 %v7788_v46, %v13676_v44  ;;  %v7863_v32 = vmul.f32 %v13694_v21, %v13694_v21 }
 0x9fd   :  { %v7369_v59 = vpop.f32.mrb[138].mxu1 }
 0x9fe   :  { %15710 = vst [vmem:[#allocation23_spill] sm:$0xff] %v13774_v13  ;;  %v13778_v33 = vadd.f32 %v15711_v5, %v7369_v59  ;;  %v7371_v34 = vpop.f32.mrb[139].mxu1  ;;  %v7923_v55 = vadd.f32 %v7922_v29, %v7860_v51  ;;  %v15717_v59 = vld [vmem:[#allocation33_spill] sm:$0xff]  ;;  %v7790_v12 = vadd.f32 %v7789_v40, %v13679_v63 }
 0xa00   :  { %15712 = vst [vmem:[#allocation24_spill] sm:$0xff] %v13778_v33 }
 0xa03   :  { %v7374_v26 = vpop.f32.mrb[140].mxu1 }
 0xa04   :  { %v13787_v11 = vadd.f32 %v15713_v50, %v7374_v26  ;;  %v7376_v3 = vpop.f32.mrb[141].mxu1  ;;  %v7924_v26 = vadd.f32 %v7923_v55, %v7861_v60  ;;  %v7791_v50 = vadd.f32 %v7790_v12, %v13690_v38  ;;  %v15721_v60 = vld [vmem:[#allocation13_spill] sm:$0xff]  ;;  %v7865_v12 = vmul.f32 %v13708_v41, %v13708_v41 }
 0xa05   :  { %v7377_v1 = vpop.f32.mrb[142].mxu1 }
 0xa06   :  { %15714 = vst [vmem:[#allocation34_spill] sm:$0xff] %v13787_v11  ;;  %v13792_v57 = vadd.f32 %v15715_v18, %v7377_v1  ;;  %v7379_v45 = vpop.f32.mrb[143].mxu1  ;;  %v7925_v3 = vadd.f32 %v7924_v26, %v7862_v48  ;;  %v7792_v16 = vadd.f32 %v7791_v50, %v13694_v21  ;;  %v7864_v1 = vmul.f32 %v13703_v56, %v13703_v56  ;;  %v15723_v50 = vld [vmem:[#allocation19_spill] sm:$0xff] }
 0xa07   :  { %v15720_v45 = vld [vmem:[#allocation31_spill] sm:$0xff] }
 0xa08   :  { %15716 = vst [vmem:[#allocation9_spill] sm:$0xff] %v13792_v57  ;;  %v7926_v29 = vadd.f32 %v7925_v3, %v7863_v32  ;;  %v7793_v40 = vadd.f32 %v7792_v16, %v13703_v56 }
 0xa0a   :  { %v7794_v48 = vadd.f32 %v7793_v40, %v13708_v41 }
 0xa0b   :  { %v7382_v54 = vpop.f32.mrb[144].mxu1 }
 0xa0c   :  { %v13801_v5 = vadd.f32 %v15717_v59, %v7382_v54  ;;  %v7384_v34 = vpop.f32.mrb[145].mxu1 }
 0xa0d   :  { %v7385_v6 = vpop.f32.mrb[146].mxu1  ;;  %v7927_v34 = vadd.f32 %v7926_v29, %v7864_v1  ;;  %v7867_v1 = vmul.f32 %v13723_v23, %v13723_v23 }
 0xa0e   :  { %v13807_v15 = vadd.f32 %v15718_v47, %v7385_v6  ;;  %v7387_v22 = vpop.f32.mrb[147].mxu1  ;;  %v7866_v6 = vmul.f32 %v13717_v53, %v13717_v53 }
 0xa0f   :  { %v7928_v47 = vadd.f32 %v7927_v34, %v7865_v12  ;;  %v7795_v22 = vadd.f32 %v7794_v48, %v13717_v53  ;;  %v7869_v12 = vmul.f32 %v13736_v31, %v13736_v31 }
 0xa10   :  { %15719 = vst [vmem:[#allocation28_spill] sm:$0xff] %v13807_v15 }
 0xa11   :  { %v7929_v16 = vadd.f32 %v7928_v47, %v7866_v6  ;;  %v7796_v40 = vadd.f32 %v7795_v22, %v13723_v23  ;;  %v15727_v6 = vld [vmem:[#allocation18_spill] sm:$0xff]  ;;  %v7870_v22 = vmul.f32 %v13745_v19, %v13745_v19 }
 0xa13   :  { %v7390_v18 = vpop.f32.mrb[148].mxu1 }
 0xa14   :  { %v13816_v46 = vadd.f32 %v15720_v45, %v7390_v18  ;;  %v7392_v51 = vpop.f32.mrb[149].mxu1  ;;  %v15725_v45 = vld [vmem:[#allocation21_spill] sm:$0xff] }
 0xa15   :  { %v7393_v55 = vpop.f32.mrb[150].mxu1 }
 0xa16   :  { %v13820_v54 = vadd.f32 %v15721_v60, %v7393_v55  ;;  %v7395_v59 = vpop.f32.mrb[151].mxu1  ;;  %v7868_v55 = vmul.f32 %v13732_v62, %v13732_v62  ;;  %v7930_v60 = vadd.f32 %v7929_v16, %v7867_v1 }
 0xa17   :  { %v7797_v59 = vadd.f32 %v7796_v40, %v13732_v62 }
 0xa18   :  { %15722 = vst [vmem:[#allocation35_spill] sm:$0xff] %v13820_v54  ;;  %v7931_v34 = vadd.f32 %v7930_v60, %v7868_v55  ;;  %v7871_v55 = vmul.f32 %v13750_v42, %v13750_v42 }
 0xa1a   :  { %v7932_v1 = vadd.f32 %v7931_v34, %v7869_v12  ;;  %v15733_v12 = vld [vmem:[#allocation8_spill] sm:$0xff] }
 0xa1b   :  { %v7398_v26 = vpop.f32.mrb[152].mxu1 }
 0xa1c   :  { %v13829_v3 = vadd.f32 %v15723_v50, %v7398_v26  ;;  %v7400_v32 = vpop.f32.mrb[153].mxu1  ;;  %v7798_v50 = vadd.f32 %v7797_v59, %v13736_v31  ;;  %v7933_v40 = vadd.f32 %v7932_v1, %v7870_v22  ;;  %v7872_v59 = vmul.f32 %v13759_v39, %v13759_v39 }
 0xa1d   :  { %v7401_v18 = vpop.f32.mrb[154].mxu1  ;;  %v7873_v1 = vmul.f32 %v13765_v43, %v13765_v43 }
 0xa1e   :  { %15724 = vst [vmem:[#allocation11_spill] sm:$0xff] %v13829_v3  ;;  %v13834_v51 = vadd.f32 %v15725_v45, %v7401_v18  ;;  %v7403_v29 = vpop.f32.mrb[155].mxu1  ;;  %v15729_v18 = vld [vmem:[#allocation20_spill] sm:$0xff] }
 0xa1f   :  { %v7799_v29 = vadd.f32 %v7798_v50, %v13745_v19 }
 0xa20   :  { %15726 = vst [vmem:[#allocation14_spill] sm:$0xff] %v13834_v51 }
 0xa21   :  { %v7800_v60 = vadd.f32 %v7799_v29, %v13750_v42  ;;  %v7874_v42 = vmul.f32 %v13774_v13, %v13774_v13 }
 0xa23   :  { %v7406_v48 = vpop.f32.mrb[156].mxu1 }
 0xa24   :  { %v13843_v47 = vadd.f32 %v15727_v6, %v7406_v48  ;;  %v7408_v26 = vpop.f32.mrb[157].mxu1  ;;  %v15731_v6 = vld [vmem:[#allocation36_spill] sm:$0xff] }
 0xa25   :  { %v7409_v32 = vpop.f32.mrb[158].mxu1 }
 0xa26   :  { %15728 = vst [vmem:[#allocation10_spill] sm:$0xff] %v13843_v47  ;;  %v13849_v45 = vadd.f32 %v15729_v18, %v7409_v32  ;;  %v7411_v16 = vpop.f32.mrb[159].mxu1  ;;  %v7934_v32 = vadd.f32 %v7933_v40, %v7871_v55  ;;  %v7801_v18 = vadd.f32 %v7800_v60, %v13759_v39  ;;  %v15735_v55 = vld [vmem:[#allocation27_spill] sm:$0xff] }
 0xa28   :  { %15730 = vst [vmem:[#allocation12_spill] sm:$0xff] %v13849_v45  ;;  %v7935_v16 = vadd.f32 %v7934_v32, %v7872_v59  ;;  %v7802_v29 = vadd.f32 %v7801_v18, %v13765_v43  ;;  %v7875_v59 = vmul.f32 %v13778_v33, %v13778_v33 }
 0xa2b   :  { %v7414_v48 = vpop.f32.mrb[160].mxu1 }
 0xa2c   :  { %v13858_v26 = vadd.f32 %v15731_v6, %v7414_v48  ;;  %v7416_v31 = vpop.f32.mrb[161].mxu1  ;;  %v7936_v48 = vadd.f32 %v7935_v16, %v7873_v1  ;;  %v7876_v16 = vmul.f32 %v13787_v11, %v13787_v11 }
 0xa2d   :  { %v7417_v34 = vpop.f32.mrb[162].mxu1  ;;  %v7803_v31 = vadd.f32 %v7802_v29, %v13774_v13 }
 0xa2e   :  { %15732 = vst [vmem:[#allocation26_spill] sm:$0xff] %v13858_v26  ;;  %v13862_v50 = vadd.f32 %v15733_v12, %v7417_v34  ;;  %v7419_v22 = vpop.f32.mrb[163].mxu1  ;;  %v7937_v34 = vadd.f32 %v7936_v48, %v7874_v42  ;;  %v15737_v12 = vld [vmem:[#allocation37_spill] sm:$0xff]  ;;  %v7877_v42 = vmul.f32 %v13792_v57, %v13792_v57 }
 0xa2f   :  { %v7804_v43 = vadd.f32 %v7803_v31, %v13778_v33  ;;  %v7878_v31 = vmul.f32 %v13801_v5, %v13801_v5 }
 0xa30   :  { %15734 = vst [vmem:[#allocation30_spill] sm:$0xff] %v13862_v50  ;;  %v7938_v1 = vadd.f32 %v7937_v34, %v7875_v59 }
 0xa31   :  { %v7805_v29 = vadd.f32 %v7804_v43, %v13787_v11 }
 0xa33   :  { %v7422_v40 = vpop.f32.mrb[164].mxu1 }
 0xa34   :  { %v13871_v60 = vadd.f32 %v15735_v55, %v7422_v40  ;;  %v7424_v6 = vpop.f32.mrb[165].mxu1  ;;  %v7939_v40 = vadd.f32 %v7938_v1, %v7876_v16  ;;  %v15739_v55 = vld [vmem:[#allocation39_spill] sm:$0xff]  ;;  %v7879_v1 = vmul.f32 %v13807_v15, %v13807_v15 }
 0xa35   :  { %v7425_v32 = vpop.f32.mrb[166].mxu1 }
 0xa36   :  { %15736 = vst [vmem:[#allocation16_spill] sm:$0xff] %v13871_v60  ;;  %v13876_v22 = vadd.f32 %v15737_v12, %v7425_v32  ;;  %v7427_v18 = vpop.f32.mrb[167].mxu1  ;;  %v7806_v32 = vadd.f32 %v7805_v29, %v13792_v57  ;;  %v7940_v43 = vadd.f32 %v7939_v40, %v7877_v42  ;;  %v15745_v42 = vld [vmem:[#allocation40_spill] sm:$0xff] }
 0xa37   :  { %v15741_v18 = vld [vmem:[#allocation41_spill] sm:$0xff] }
 0xa38   :  { %15738 = vst [vmem:[#allocation29_spill] sm:$0xff] %v13876_v22  ;;  %v7807_v59 = vadd.f32 %v7806_v32, %v13801_v5  ;;  %v7941_v16 = vadd.f32 %v7940_v43, %v7878_v31  ;;  %v7881_v43 = vmul.f32 %v13820_v54, %v13820_v54 }
 0xa3b   :  { %v7430_v48 = vpop.f32.mrb[168].mxu1 }
 0xa3c   :  { %v13885_v6 = vadd.f32 %v15739_v55, %v7430_v48  ;;  %v7432_v13 = vpop.f32.mrb[169].mxu1  ;;  %v7808_v48 = vadd.f32 %v7807_v59, %v13807_v15  ;;  %v15743_v55 = vld [vmem:[#allocation32_spill] sm:$0xff]  ;;  %v7882_v15 = vmul.f32 %v13829_v3, %v13829_v3 }
 0xa3d   :  { %v7433_v12 = vpop.f32.mrb[170].mxu1  ;;  %v7880_v13 = vmul.f32 %v13816_v46, %v13816_v46 }
 0xa3e   :  { %15740 = vst [vmem:[#allocation33_spill] sm:$0xff] %v13885_v6  ;;  %v13891_v33 = vadd.f32 %v15741_v18, %v7433_v12  ;;  %v7435_v34 = vpop.f32.mrb[171].mxu1  ;;  %v7942_v12 = vadd.f32 %v7941_v16, %v7879_v1  ;;  %v7809_v18 = vadd.f32 %v7808_v48, %v13816_v46 }
 0xa40   :  { %15742 = vst [vmem:[#allocation15_spill] sm:$0xff] %v13891_v33  ;;  %v7943_v34 = vadd.f32 %v7942_v12, %v7880_v13  ;;  %v7810_v59 = vadd.f32 %v7809_v18, %v13820_v54  ;;  %v7884_v12 = vmul.f32 %v13843_v47, %v13843_v47 }
 0xa43   :  { %v7438_v29 = vpop.f32.mrb[172].mxu1 }
 0xa44   :  { %v13900_v57 = vadd.f32 %v15743_v55, %v7438_v29  ;;  %v7440_v11 = vpop.f32.mrb[173].mxu1  ;;  %v7944_v29 = vadd.f32 %v7943_v34, %v7881_v43  ;;  %v7883_v55 = vmul.f32 %v13834_v51, %v13834_v51  ;;  %v7885_v34 = vmul.f32 %v13849_v45, %v13849_v45 }
 0xa45   :  { %v7441_v40 = vpop.f32.mrb[174].mxu1  ;;  %v7811_v11 = vadd.f32 %v7810_v59, %v13829_v3 }
 0xa46   :  { %15744 = vst [vmem:[#allocation31_spill] sm:$0xff] %v13900_v57  ;;  %v13904_v32 = vadd.f32 %v15745_v42, %v7441_v40  ;;  %v7443_v31 = vpop.f32.mrb[175].mxu1  ;;  %v7945_v48 = vadd.f32 %v7944_v29, %v7882_v15  ;;  %v7886_v29 = vmul.f32 %v13858_v26, %v13858_v26 }
 0xa47   :  { %v7812_v13 = vadd.f32 %v7811_v11, %v13834_v51 }
 0xa48   :  { %15746 = vst [vmem:[#allocation13_spill] sm:$0xff] %v13904_v32  ;;  %v7946_v18 = vadd.f32 %v7945_v48, %v7883_v55  ;;  %v7887_v48 = vmul.f32 %v13862_v50, %v13862_v50 }
 0xa49   :  { %v7813_v31 = vadd.f32 %v7812_v13, %v13843_v47  ;;  %v7888_v13 = vmul.f32 %v13871_v60, %v13871_v60 }
 0xa4a   :  { %v7947_v54 = vadd.f32 %v7946_v18, %v7884_v12 }
 0xa4b   :  { %v7446_v16 = vpop.f32.mrb[176].mxu1  ;;  %v7814_v15 = vadd.f32 %v7813_v31, %v13849_v45 }
 0xa4c   :  { %v7448_v1 = vpop.f32.mrb[177].mxu1  ;;  %v7948_v11 = vadd.f32 %v7947_v54, %v7885_v34  ;;  %v7889_v54 = vmul.f32 %v13876_v22, %v13876_v22 }
 0xa4d   :  { %v7449_v40 = vpop.f32.mrb[178].mxu1  ;;  %v7815_v51 = vadd.f32 %v7814_v15, %v13858_v26  ;;  %v7890_v15 = vmul.f32 %v13885_v6, %v13885_v6 }
 0xa4e   :  { %v7451_v42 = vpop.f32.mrb[179].mxu1  ;;  %v7949_v3 = vadd.f32 %v7948_v11, %v7886_v29 }
 0xa4f   :  { %v7816_v55 = vadd.f32 %v7815_v51, %v13862_v50 }
 0xa50   :  { %v7950_v31 = vadd.f32 %v7949_v3, %v7887_v48  ;;  %v7891_v3 = vmul.f32 %v13891_v33, %v13891_v33 }
 0xa53   :  { %v7454_v43 = vpop.f32.mrb[180].mxu1 }
 0xa54   :  { %v7456_v59 = vpop.f32.mrb[181].mxu1 }
 0xa55   :  { %v7457_v1 = vpop.f32.mrb[182].mxu1  ;;  %v7817_v59 = vadd.f32 %v7816_v55, %v13871_v60 }
 0xa56   :  { %v7459_v42 = vpop.f32.mrb[183].mxu1 }
 0xa57   :  { %v7951_v42 = vadd.f32 %v7950_v31, %v7888_v13  ;;  %v7818_v34 = vadd.f32 %v7817_v59, %v13876_v22  ;;  %v7892_v13 = vmul.f32 %v13900_v57, %v13900_v57 }
 0xa59   :  { %v7952_v51 = vadd.f32 %v7951_v42, %v7889_v54  ;;  %v7819_v29 = vadd.f32 %v7818_v34, %v13885_v6  ;;  %v7893_v42 = vmul.f32 %v13904_v32, %v13904_v32 }
 0xa5b   :  { %v7462_v12 = vpop.f32.mrb[184].mxu1  ;;  %v7820_v55 = vadd.f32 %v7819_v29, %v13891_v33 }
 0xa5c   :  { %v7464_v18 = vpop.f32.mrb[185].mxu1 }
 0xa5d   :  { %v7465_v45 = vpop.f32.mrb[186].mxu1  ;;  %v7953_v18 = vadd.f32 %v7952_v51, %v7890_v15  ;;  %v7821_v59 = vadd.f32 %v7820_v55, %v13900_v57 }
 0xa5e   :  { %v7467_v47 = vpop.f32.mrb[187].mxu1 }
 0xa5f   :  { %v7954_v31 = vadd.f32 %v7953_v18, %v7891_v3  ;;  %v7822_v15 = vadd.f32 %v7821_v59, %v13904_v32 }
 0xa61   :  { %v7955_v22 = vadd.f32 %v7954_v31, %v7892_v13 }
 0xa63   :  { %v7470_v11 = vpop.f32.mrb[188].mxu1  ;;  %v7956_v6 = vadd.f32 %v7955_v22, %v7893_v42 }
 0xa64   :  { %v7472_v50 = vpop.f32.mrb[189].mxu1 }
 0xa65   :  { %v7473_v48 = vpop.f32.mrb[190].mxu1 }
 0xa66   :  { %v7475_v47 = vpop.f32.mrb[191].mxu1 }
 0xa6b   :  { %v8829_v54 = vpop.f32.mrb[192].mxu1 }
 0xa6c   :  { %v13944_v50 = vadd.f32 %v8829_v54, %v7454_v43  ;;  %v7735_v34 = vpop.f32.mrb[193].mxu1 }
 0xa6d   :  { %v13947_v51 = vadd.f32 %v7735_v34, %v7446_v16  ;;  %v8830_v47 = vpop.f32.mrb[194].mxu1 }
 0xa6e   :  { %15747 = vst [vmem:[#allocation19_spill] sm:$0xff] %v13944_v50  ;;  %v13949_v29 = vadd.f32 %v8830_v47, %v7457_v1  ;;  %v7738_v33 = vpop.f32.mrb[195].mxu1  ;;  %v7896_v16 = vmul.f32 %v13944_v50, %v13944_v50 }
 0xa6f   :  { %15748 = vst [vmem:[#allocation21_spill] sm:$0xff] %v13947_v51  ;;  %v7823_v18 = vadd.f32 %v7822_v15, %v13947_v51  ;;  %v7894_v3 = vmul.f32 %v13947_v51, %v13947_v51  ;;  %v13954_v55 = vadd.f32 %v7738_v33, %v7449_v40 }
 0xa70   :  { %15749 = vst [vmem:[#allocation18_spill] sm:$0xff] %v13949_v29  ;;  %v7897_v33 = vmul.f32 %v13949_v29, %v13949_v29 }
 0xa71   :  { %15750 = vst [vmem:[#allocation20_spill] sm:$0xff] %v13954_v55  ;;  %v7957_v13 = vadd.f32 %v7956_v6, %v7894_v3  ;;  %v7824_v43 = vadd.f32 %v7823_v18, %v13954_v55  ;;  %v7895_v31 = vmul.f32 %v13954_v55, %v13954_v55 }
 0xa73   :  { %v7825_v1 = vadd.f32 %v7824_v43, %v13944_v50  ;;  %v7958_v59 = vadd.f32 %v7957_v13, %v7895_v31  ;;  %v8833_v22 = vpop.f32.mrb[196].mxu1 }
 0xa74   :  { %v13962_v42 = vadd.f32 %v8833_v22, %v7470_v11  ;;  %v7751_v54 = vpop.f32.mrb[197].mxu1 }
 0xa75   :  { %v7959_v40 = vadd.f32 %v7958_v59, %v7896_v16  ;;  %v13966_v6 = vadd.f32 %v7751_v54, %v7462_v12  ;;  %v7826_v34 = vadd.f32 %v7825_v1, %v13949_v29  ;;  %v8834_v15 = vpop.f32.mrb[198].mxu1 }
 0xa76   :  { %15751 = vst [vmem:[#allocation36_spill] sm:$0xff] %v13962_v42  ;;  %v13969_v47 = vadd.f32 %v8834_v15, %v7473_v48  ;;  %v7754_v18 = vpop.f32.mrb[199].mxu1  ;;  %v7900_v16 = vmul.f32 %v13962_v42, %v13962_v42 }
 0xa77   :  { %15752 = vst [vmem:[#allocation8_spill] sm:$0xff] %v13966_v6  ;;  %v7827_v3 = vadd.f32 %v7826_v34, %v13966_v6  ;;  %v7898_v13 = vmul.f32 %v13966_v6, %v13966_v6  ;;  %v7960_v11 = vadd.f32 %v7959_v40, %v7897_v33  ;;  %v13974_v43 = vadd.f32 %v7754_v18, %v7465_v45  ;;  %v14119_v6 = vld [vmem:[%s15211_s3 + $0x3] ss:$0 sm:$0xff] }
 0xa78   :  { %15753 = vst [vmem:[#allocation27_spill] sm:$0xff] %v13969_v47  ;;  %v7901_v59 = vmul.f32 %v13969_v47, %v13969_v47 }
 0xa79   :  { %v7961_v31 = vadd.f32 %v7960_v11, %v7898_v13  ;;  %v7828_v22 = vadd.f32 %v7827_v3, %v13974_v43  ;;  %v7899_v12 = vmul.f32 %v13974_v43, %v13974_v43 }
 0xa7b   :  { %v7829_v48 = vadd.f32 %v7828_v22, %v13962_v42  ;;  %v7962_v1 = vadd.f32 %v7961_v31, %v7899_v12 }
 0xa7d   :  { %v7830_v54 = vadd.f32 %v7829_v48, %v13969_v47  ;;  %v7963_v33 = vadd.f32 %v7962_v1, %v7900_v16 }
 0xa7f   :  { %v7831_v45 = vrot.slane %v7830_v54, 4  ;;  %v7964_v40 = vadd.f32 %v7963_v33, %v7901_v59  ;;  %v15762_v33 = vld [vmem:[#allocation35_spill] sm:$0xff] }
 0xa81   :  { %v7832_v34 = vadd.f32 %v7831_v45, %v7830_v54  ;;  %v7965_v15 = vrot.slane %v7964_v40, 4  ;;  %v15763_v54 = vld [vmem:[#allocation11_spill] sm:$0xff]  ;;  %v15764_v45 = vld [vmem:[#allocation14_spill] sm:$0xff] }
 0xa83   :  { %v7833_v18 = vrot.slane %v7832_v34, 2  ;;  %v7966_v3 = vadd.f32 %v7965_v15, %v7964_v40  ;;  %v15761_v15 = vld [vmem:[#allocation28_spill] sm:$0xff]  ;;  %v15776_v40 = vld [vmem:[#allocation13_spill] sm:$0xff] }
 0xa85   :  { %v7834_v13 = vadd.f32 %v7833_v18, %v7832_v34  ;;  %v7967_v11 = vrot.slane %v7966_v3, 2  ;;  %v15760_v18 = vld [vmem:[#allocation9_spill] sm:$0xff] }
 0xa87   :  { %v7835_v32 = vrot.slane %v7834_v13, 1  ;;  %v7968_v57 = vadd.f32 %v7967_v11, %v7966_v3  ;;  %v15758_v3 = vld [vmem:[#allocation24_spill] sm:$0xff] }
 0xa88   :  { %v15766_v11 = vld [vmem:[#allocation12_spill] sm:$0xff] }
 0xa89   :  { %v7836_v60 = vadd.f32 %v7835_v32, %v7834_v13  ;;  %v7969_v26 = vrot.slane %v7968_v57, 1  ;;  %v15755_v13 = vld [vmem:[#allocation22_spill] sm:$0xff] }
 0xa8a   :  { %v15765_v32 = vld [vmem:[#allocation10_spill] sm:$0xff] }
 0xa8b   :  { %v13985_v22 = vmul.f32 0.001953125, %v7836_v60  ;;  %v7970_v31 = vadd.f32 %v7969_v26, %v7968_v57  ;;  %v15768_v26 = vld [vmem:[#allocation38_spill] sm:$0xff] }
 0xa8c   :  { %v15769_v57 = vsub.s32 0, %v15768_v26 }
 0xa8d   :  { %v7971_v12 = vmul.f32 0.001953125, %v7970_v31  ;;  %v7972_v48 = vmul.f32 %v13985_v22, %v13985_v22  ;;  %v15756_v31 = vld [vmem:[#allocation25_spill] sm:$0xff]  ;;  %v8031_v47 = vsub.f32 %v15776_v40, %v13985_v22  ;;  %v15777_v51 = vsub.f32 %v13974_v43, %v13985_v22 }
 0xa8e   :  { %v15778_v16 = vsub.f32 %v13605_v10, %v13985_v22  ;;  %v15780_v40 = vsub.f32 %v13612_v9, %v13985_v22  ;;  %v15781_v10 = vsub.f32 %v13615_v0, %v13985_v22  ;;  %v15783_v9 = vsub.f32 %v13622_v14, %v13985_v22 }
 0xa8f   :  { %v7973_v1 = vsub.f32 %v7971_v12, %v7972_v48  ;;  %v15757_v12 = vld [vmem:[#allocation23_spill] sm:$0xff]  ;;  %v7766_v48 = vld [vmem:[%s15211_s3 + $0x2] sm:$0x1]  ;;  %v15786_v14 = vsub.f32 %v13632_v28, %v13985_v22 }
 0xa91   :  { %v7974_v59 = vadd.f32 1e-05, %v7973_v1  ;;  %v15754_v1 = vld [vmem:[#allocation17_spill] sm:$0xff] }
 0xa93   :  { %9770 = vrsqrt.f32 %v7974_v59  ;;  %v15759_v59 = vld [vmem:[#allocation34_spill] sm:$0xff] }
 0xa9d   :  { %v9771_v60 = vpop.eup %9770 }
 0xa9e   :  { %v8040_v34 = vmul.f32 %v9771_v60, %v7766_v48  ;;  %v15773_v48 = vld [vmem:[#allocation33_spill] sm:$0xff] }
 0xa9f   :  { %v8028_v29 = vsub.f32 %v15773_v48, %v13985_v22  ;;  %v15779_v48 = vsub.f32 %v13608_v8, %v13985_v22  ;;  %v15782_v8 = vsub.f32 %v13619_v4, %v13985_v22  ;;  %v15785_v4 = vsub.f32 %v13629_v25, %v13985_v22 }
 0xaa0   :  { %v14108_v42 = vrot.slane %v8040_v34, %v15769_v57  ;;  %v15774_v57 = vld [vmem:[#allocation15_spill] sm:$0xff] }
 0xaa1   :  { %v8029_v26 = vsub.f32 %v15774_v57, %v13985_v22  ;;  %v15775_v34 = vld [vmem:[#allocation31_spill] sm:$0xff] }
 0xaa2   :  { %v8030_v55 = vsub.f32 %v15775_v34, %v13985_v22  ;;  %v8106_v50 = vmul.f32 %v14108_v42, %v15777_v51  ;;  %v14137_v60 = vmul.f32 %v14108_v42, %v15778_v16  ;;  %v14143_v57 = vmul.f32 %v14108_v42, %v15779_v48  ;;  %v8238_v51 = vld [vmem:[%s15208_s0 + $0x1e8] sm:$0xff] }
 0xaa3   :  { %v14149_v34 = vmul.f32 %v14108_v42, %v15780_v40  ;;  %v14158_v43 = vmul.f32 %v14108_v42, %v15781_v10  ;;  %v14164_v16 = vmul.f32 %v14108_v42, %v15782_v8  ;;  %v14170_v48 = vmul.f32 %v14108_v42, %v15783_v9 }
 0xaa4   :  { %v15784_v40 = vsub.f32 %v13626_v36, %v13985_v22  ;;  %v8174_v10 = vadd.f32 %v14119_v6, %v8106_v50  ;;  %v14183_v8 = vmul.f32 %v14108_v42, %v15785_v4  ;;  %v14189_v9 = vmul.f32 %v14108_v42, %v15786_v14 }
 0xaa5   :  { %v15787_v36 = vsub.f32 %v13635_v2, %v13985_v22  ;;  %v15788_v50 = vsub.f32 %v13639_v58, %v13985_v22  ;;  %v15790_v4 = vsub.f32 %v13642_v30, %v13985_v22  ;;  %v15791_v14 = vsub.f32 %v13646_v35, %v13985_v22 }
 0xaa6   :  { %v14176_v0 = vmul.f32 %v14108_v42, %v15784_v40 }
 0xaa7   :  { %v14195_v40 = vmul.f32 %v14108_v42, %v15787_v36  ;;  %v14201_v25 = vmul.f32 %v14108_v42, %v15788_v50  ;;  %v14207_v28 = vmul.f32 %v14108_v42, %v15790_v4  ;;  %v14213_v2 = vmul.f32 %v14108_v42, %v15791_v14 }
 0xaa8   :  { %v15792_v36 = vsub.f32 %v13649_v49, %v13985_v22  ;;  %v8302_v50 = vadd.f32 %v8238_v51, %v8174_v10  ;;  %v15794_v4 = vsub.f32 %v13655_v27, %v13985_v22  ;;  %v15795_v14 = vsub.f32 %v13658_v24, %v13985_v22 }
 0xaa9   :  { %15789 = vst [vmem:[#allocation37_spill] sm:$0xff] %v14201_v25  ;;  %v15793_v25 = vsub.f32 %v13652_v52, %v13985_v22  ;;  %v15796_v51 = vsub.f32 %v13661_v20, %v13985_v22  ;;  %v15797_v10 = vsub.f32 %v13664_v37, %v13985_v22 }
 0xaaa   :  { %v14219_v58 = vmul.f32 %v14108_v42, %v15792_v36  ;;  %v14231_v35 = vmul.f32 %v14108_v42, %v15794_v4  ;;  %v14237_v49 = vmul.f32 %v14108_v42, %v15795_v14  ;;  %v15799_v36 = vsub.f32 %v13670_v17, %v13985_v22 }
 0xaab   :  { %v14225_v30 = vmul.f32 %v14108_v42, %v15793_v25  ;;  %v14243_v52 = vmul.f32 %v14108_v42, %v15796_v51  ;;  %v14249_v27 = vmul.f32 %v14108_v42, %v15797_v10  ;;  %v15798_v25 = vsub.f32 %v13667_v7, %v13985_v22 }
 0xaac   :  { %v14261_v20 = vmul.f32 %v14108_v42, %v15799_v36  ;;  %v8366_v4 = vmax.f32 %v8302_v50, 0.0  ;;  %v15800_v14 = vsub.f32 %v13673_v61, %v13985_v22  ;;  %v15801_v51 = vsub.f32 %v13676_v44, %v13985_v22 }
 0xaad   :  { %v14255_v24 = vmul.f32 %v14108_v42, %v15798_v25  ;;  %v15802_v10 = vsub.f32 %v13679_v63, %v13985_v22  ;;  %v15803_v50 = vsub.f32 %v13690_v38, %v13985_v22  ;;  %v15804_v25 = vsub.f32 %v13694_v21, %v13985_v22 }
 0xaae   :  { %v14267_v37 = vmul.f32 %v14108_v42, %v15800_v14  ;;  %v14273_v7 = vmul.f32 %v14108_v42, %v15801_v51  ;;  %v15805_v36 = vsub.f32 %v13703_v56, %v13985_v22  ;;  %v15806_v14 = vsub.f32 %v13708_v41, %v13985_v22  ;;  %8430 = vst [vmem:[#allocation5 + $0x1e8] sm:$0xff] %v8366_v4 }
 0xaaf   :  { %v14279_v17 = vmul.f32 %v14108_v42, %v15802_v10  ;;  %v14285_v61 = vmul.f32 %v14108_v42, %v15803_v50  ;;  %v14291_v44 = vmul.f32 %v14108_v42, %v15804_v25  ;;  %v15807_v51 = vsub.f32 %v13717_v53, %v13985_v22 }
 0xab0   :  { %v14297_v63 = vmul.f32 %v14108_v42, %v15805_v36  ;;  %v14303_v38 = vmul.f32 %v14108_v42, %v15806_v14  ;;  %v15808_v10 = vsub.f32 %v13723_v23, %v13985_v22  ;;  %v15809_v50 = vsub.f32 %v13732_v62, %v13985_v22 }
 0xab1   :  { %v14309_v21 = vmul.f32 %v14108_v42, %v15807_v51  ;;  %v15810_v4 = vsub.f32 %v15754_v1, %v13985_v22  ;;  %v15811_v25 = vsub.f32 %v13745_v19, %v13985_v22  ;;  %v15812_v36 = vsub.f32 %v15755_v13, %v13985_v22 }
 0xab2   :  { %v14315_v56 = vmul.f32 %v14108_v42, %v15808_v10  ;;  %v14321_v41 = vmul.f32 %v14108_v42, %v15809_v50  ;;  %v15813_v14 = vsub.f32 %v13759_v39, %v13985_v22  ;;  %v15814_v51 = vsub.f32 %v15756_v31, %v13985_v22 }
 0xab3   :  { %v14327_v53 = vmul.f32 %v14108_v42, %v15810_v4  ;;  %v14333_v23 = vmul.f32 %v14108_v42, %v15811_v25  ;;  %v14339_v62 = vmul.f32 %v14108_v42, %v15812_v36  ;;  %v15815_v10 = vsub.f32 %v15757_v12, %v13985_v22 }
 0xab4   :  { %v14345_v1 = vmul.f32 %v14108_v42, %v15813_v14  ;;  %v14351_v19 = vmul.f32 %v14108_v42, %v15814_v51  ;;  %v15816_v50 = vsub.f32 %v15758_v3, %v13985_v22  ;;  %v15817_v4 = vsub.f32 %v15759_v59, %v13985_v22 }
 0xab5   :  { %v14357_v13 = vmul.f32 %v14108_v42, %v15815_v10  ;;  %v15818_v25 = vsub.f32 %v15760_v18, %v13985_v22  ;;  %v15819_v36 = vsub.f32 %v13801_v5, %v13985_v22  ;;  %v15820_v14 = vsub.f32 %v15761_v15, %v13985_v22 }
 0xab6   :  { %v14363_v39 = vmul.f32 %v14108_v42, %v15816_v50  ;;  %v14369_v31 = vmul.f32 %v14108_v42, %v15817_v4  ;;  %v15821_v51 = vsub.f32 %v13816_v46, %v13985_v22  ;;  %v15822_v10 = vsub.f32 %v15762_v33, %v13985_v22 }
 0xab7   :  { %v14375_v12 = vmul.f32 %v14108_v42, %v15818_v25  ;;  %v14381_v3 = vmul.f32 %v14108_v42, %v15819_v36  ;;  %v14387_v59 = vmul.f32 %v14108_v42, %v15820_v14  ;;  %v15823_v50 = vsub.f32 %v15763_v54, %v13985_v22  ;;  %v15828_v14 = vld [vmem:[#allocation26_spill] sm:$0xff] }
 0xab8   :  { %v14393_v18 = vmul.f32 %v14108_v42, %v15821_v51  ;;  %v14399_v5 = vmul.f32 %v14108_v42, %v15822_v10  ;;  %v15824_v4 = vsub.f32 %v15764_v45, %v13985_v22  ;;  %v15825_v25 = vsub.f32 %v15765_v32, %v13985_v22  ;;  %v15830_v10 = vld [vmem:[#allocation30_spill] sm:$0xff] }
 0xab9   :  { %v14405_v15 = vmul.f32 %v14108_v42, %v15823_v50  ;;  %v15826_v36 = vsub.f32 %v15766_v11, %v13985_v22  ;;  %v15829_v51 = vsub.f32 %v15828_v14, %v13985_v22  ;;  %v15831_v50 = vsub.f32 %v15830_v10, %v13985_v22 }
 0xaba   :  { %v14411_v46 = vmul.f32 %v14108_v42, %v15824_v4  ;;  %v14417_v33 = vmul.f32 %v14108_v42, %v15825_v25  ;;  %v15832_v4 = vld [vmem:[#allocation16_spill] sm:$0xff]  ;;  %v14453_v10 = vmul.f32 %v14108_v42, %v8029_v26  ;;  %v15846_v26 = vld [vmem:[#allocation19_spill] sm:$0xff] }
 0xabb   :  { %v14423_v54 = vmul.f32 %v14108_v42, %v15826_v36  ;;  %v14429_v45 = vmul.f32 %v14108_v42, %v15829_v51  ;;  %v14435_v32 = vmul.f32 %v14108_v42, %v15831_v50  ;;  %v15833_v25 = vsub.f32 %v15832_v4, %v13985_v22  ;;  %v15835_v36 = vld [vmem:[#allocation29_spill] sm:$0xff] }
 0xabc   :  { %v14450_v51 = vmul.f32 %v14108_v42, %v8028_v29  ;;  %15838 = vst [vmem:[#allocation40_spill] sm:$0xff] %v14453_v10  ;;  %v14456_v50 = vmul.f32 %v14108_v42, %v8030_v55  ;;  %v14459_v4 = vmul.f32 %v14108_v42, %v8031_v47  ;;  %v15847_v10 = vsub.f32 %v15846_v26, %v13985_v22  ;;  %v15849_v47 = vld [vmem:[#allocation18_spill] sm:$0xff] }
 0xabd   :  { %15827 = vst [vmem:[#allocation39_spill] sm:$0xff] %v14423_v54  ;;  %v14441_v11 = vmul.f32 %v14108_v42, %v15833_v25  ;;  %v15836_v54 = vsub.f32 %v15835_v36, %v13985_v22  ;;  %v15840_v25 = vld [vmem:[#allocation21_spill] sm:$0xff] }
 0xabe   :  { %15839 = vst [vmem:[#allocation17_spill] sm:$0xff] %v14459_v4  ;;  %v14477_v55 = vmul.f32 %v14108_v42, %v15847_v10  ;;  %v15850_v4 = vsub.f32 %v15849_v47, %v13985_v22  ;;  %v15855_v10 = vld [vmem:[#allocation27_spill] sm:$0xff] }
 0xabf   :  { %15834 = vst [vmem:[#allocation41_spill] sm:$0xff] %v14441_v11  ;;  %v14447_v14 = vmul.f32 %v14108_v42, %v15836_v54  ;;  %v15841_v11 = vsub.f32 %v15840_v25, %v13985_v22  ;;  %v15843_v54 = vld [vmem:[#allocation20_spill] sm:$0xff] }
 0xac0   :  { %15848 = vst [vmem:[#allocation23_spill] sm:$0xff] %v14477_v55  ;;  %v14483_v25 = vmul.f32 %v14108_v42, %v15850_v4  ;;  %v15856_v55 = vsub.f32 %v15855_v10, %v13985_v22  ;;  %v14505_v4 = vadd.f32 %v14119_v6, %v14137_v60  ;;  %v14529_v60 = vadd.f32 %v14119_v6, %v14176_v0  ;;  %v8179_v10 = vld [vmem:[%s15208_s0 + $0x10] sm:$0xff] }
 0xac1   :  { %15837 = vst [vmem:[#allocation32_spill] sm:$0xff] %v14447_v14  ;;  %v14465_v36 = vmul.f32 %v14108_v42, %v15841_v11  ;;  %v15844_v14 = vsub.f32 %v15843_v54, %v13985_v22  ;;  %v15851_v11 = vld [vmem:[#allocation8_spill] sm:$0xff]  ;;  %v14549_v0 = vadd.f32 %v14119_v6, %v14207_v28  ;;  %v14569_v28 = vadd.f32 %v14119_v6, %v14237_v49 }
 0xac2   :  { %v14501_v47 = vmul.f32 %v14108_v42, %v15856_v55  ;;  %v14565_v55 = vadd.f32 %v14119_v6, %v14231_v35  ;;  %v14585_v35 = vadd.f32 %v14119_v6, %v14261_v20  ;;  %v14589_v49 = vadd.f32 %v14119_v6, %v14267_v37 }
 0xac3   :  { %15842 = vst [vmem:[#allocation22_spill] sm:$0xff] %v14465_v36  ;;  %v14471_v29 = vmul.f32 %v14108_v42, %v15844_v14  ;;  %v15852_v36 = vsub.f32 %v15851_v11, %v13985_v22  ;;  %v15853_v14 = vld [vmem:[#allocation36_spill] sm:$0xff]  ;;  %v14513_v11 = vadd.f32 %v14119_v6, %v14149_v34  ;;  %v14537_v34 = vadd.f32 %v14119_v6, %v14189_v9 }
 0xac4   :  { %v14557_v9 = vadd.f32 %v14119_v6, %v14219_v58  ;;  %v14577_v58 = vadd.f32 %v14119_v6, %v14249_v27  ;;  %v14597_v27 = vadd.f32 %v14119_v6, %v14279_v17  ;;  %v14605_v20 = vadd.f32 %v14119_v6, %v14291_v44 }
 0xac5   :  { %15845 = vst [vmem:[#allocation25_spill] sm:$0xff] %v14471_v29  ;;  %v14489_v54 = vmul.f32 %v14108_v42, %v15852_v36  ;;  %v15854_v29 = vsub.f32 %v15853_v14, %v13985_v22  ;;  %v14509_v36 = vadd.f32 %v14119_v6, %v14143_v57  ;;  %v14525_v22 = vadd.f32 %v14119_v6, %v14170_v48 }
 0xac6   :  { %v14533_v57 = vadd.f32 %v14119_v6, %v14183_v8  ;;  %v14553_v8 = vadd.f32 %v14119_v6, %v14213_v2  ;;  %v14573_v2 = vadd.f32 %v14119_v6, %v14243_v52  ;;  %v14593_v52 = vadd.f32 %v14119_v6, %v14273_v7 }
 0xac7   :  { %v14495_v26 = vmul.f32 %v14108_v42, %v15854_v29  ;;  %v14517_v29 = vadd.f32 %v14119_v6, %v14158_v43  ;;  %v14521_v42 = vadd.f32 %v14119_v6, %v14164_v16  ;;  %v14541_v43 = vadd.f32 %v14119_v6, %v14195_v40  ;;  %v15857_v16 = vld [vmem:[#allocation37_spill] sm:$0xff] }
 0xac8   :  { %v14545_v48 = vadd.f32 %v14119_v6, %v15857_v16  ;;  %v14561_v40 = vadd.f32 %v14119_v6, %v14225_v30  ;;  %v14581_v30 = vadd.f32 %v14119_v6, %v14255_v24  ;;  %v14601_v24 = vadd.f32 %v14119_v6, %v14285_v61 }
 0xac9   :  { %v14609_v37 = vadd.f32 %v14119_v6, %v14297_v63  ;;  %v14613_v7 = vadd.f32 %v14119_v6, %v14303_v38  ;;  %v14617_v17 = vadd.f32 %v14119_v6, %v14309_v21  ;;  %v14621_v61 = vadd.f32 %v14119_v6, %v14315_v56 }
 0xaca   :  { %v14625_v44 = vadd.f32 %v14119_v6, %v14321_v41  ;;  %v14629_v63 = vadd.f32 %v14119_v6, %v14327_v53  ;;  %v14633_v38 = vadd.f32 %v14119_v6, %v14333_v23  ;;  %v14637_v21 = vadd.f32 %v14119_v6, %v14339_v62 }
 0xacb   :  { %v14641_v56 = vadd.f32 %v14119_v6, %v14345_v1  ;;  %v14645_v41 = vadd.f32 %v14119_v6, %v14351_v19  ;;  %v14649_v53 = vadd.f32 %v14119_v6, %v14357_v13  ;;  %v14653_v23 = vadd.f32 %v14119_v6, %v14363_v39  ;;  %v8177_v13 = vld [vmem:[%s15208_s0] sm:$0xff]  ;;  %v8178_v39 = vld [vmem:[%s15208_s0 + $0x8] sm:$0xff] }
 0xacc   :  { %15858 = vst [vmem:[#allocation24_spill] sm:$0xff] %v14637_v21  ;;  %v14657_v62 = vadd.f32 %v14119_v6, %v14369_v31  ;;  %v14661_v1 = vadd.f32 %v14119_v6, %v14375_v12  ;;  %v14665_v19 = vadd.f32 %v14119_v6, %v14381_v3  ;;  %v14675_v31 = vadd.f32 %v14119_v6, %v14387_v59  ;;  %v8180_v59 = vld [vmem:[%s15208_s0 + $0x18] sm:$0xff] }
 0xacd   :  { %15859 = vst [vmem:[#allocation34_spill] sm:$0xff] %v14641_v56  ;;  %15860 = vst [vmem:[#allocation9_spill] sm:$0xff] %v14645_v41  ;;  %v14679_v12 = vadd.f32 %v14119_v6, %v14393_v18  ;;  %v14683_v3 = vadd.f32 %v14119_v6, %v14399_v5  ;;  %v14687_v14 = vadd.f32 %v14119_v6, %v14405_v15  ;;  %v8181_v18 = vld [vmem:[%s15208_s0 + $0x20] sm:$0xff]  ;;  %v8182_v5 = vld [vmem:[%s15208_s0 + $0x28] sm:$0xff] }
 0xace   :  { %15861 = vst [vmem:[#allocation28_spill] sm:$0xff] %v14649_v53  ;;  %15862 = vst [vmem:[#allocation35_spill] sm:$0xff] %v14653_v23  ;;  %v14703_v15 = vadd.f32 %v14119_v6, %v14411_v46  ;;  %v14707_v16 = vadd.f32 %v14119_v6, %v14417_v33  ;;  %v8184_v46 = vld [vmem:[%s15208_s0 + $0x38] sm:$0xff]  ;;  %v8185_v33 = vld [vmem:[%s15208_s0 + $0x40] sm:$0xff]  ;;  %v14799_v41 = vadd.f32 %v14119_v6, %v14489_v54 }
 0xacf   :  { %15863 = vst [vmem:[#allocation11_spill] sm:$0xff] %v14657_v62  ;;  %15864 = vst [vmem:[#allocation14_spill] sm:$0xff] %v14661_v1  ;;  %v8187_v1 = vld [vmem:[%s15208_s0 + $0x50] sm:$0xff]  ;;  %v14815_v54 = vadd.f32 %v14119_v6, %v14495_v26  ;;  %v8200_v21 = vld [vmem:[%s15208_s0 + $0xb8] sm:$0xff] }
 0xad0   :  { %15865 = vst [vmem:[#allocation10_spill] sm:$0xff] %v14665_v19  ;;  %15866 = vst [vmem:[#allocation12_spill] sm:$0xff] %v14675_v31  ;;  %v8183_v31 = vld [vmem:[%s15208_s0 + $0x30] sm:$0xff]  ;;  %v14743_v19 = vadd.f32 %v14119_v6, %v14450_v51  ;;  %v8201_v26 = vld [vmem:[%s15208_s0 + $0xc0] sm:$0xff] }
 0xad1   :  { %15867 = vst [vmem:[#allocation38_spill] sm:$0xff] %v14679_v12  ;;  %15868 = vst [vmem:[#allocation33_spill] sm:$0xff] %v14683_v3  ;;  %v14715_v12 = vadd.f32 %v14119_v6, %v14429_v45  ;;  %v14731_v45 = vadd.f32 %v14119_v6, %v14435_v32  ;;  %v8188_v32 = vld [vmem:[%s15208_s0 + $0x58] sm:$0xff]  ;;  %v15886_v62 = vld [vmem:[#allocation22_spill] sm:$0xff] }
 0xad2   :  { %15869 = vst [vmem:[#allocation15_spill] sm:$0xff] %v14687_v14  ;;  %15870 = vst [vmem:[#allocation31_spill] sm:$0xff] %v14703_v15  ;;  %v15872_v14 = vld [vmem:[#allocation39_spill] sm:$0xff]  ;;  %v14771_v23 = vadd.f32 %v14119_v6, %v15886_v62  ;;  %v8191_v53 = vld [vmem:[%s15208_s0 + $0x70] sm:$0xff] }
 0xad3   :  { %15871 = vst [vmem:[#allocation13_spill] sm:$0xff] %v14707_v16  ;;  %v14711_v3 = vadd.f32 %v14119_v6, %v15872_v14  ;;  %15874 = vst [vmem:[#allocation30_spill] sm:$0xff] %v14715_v12  ;;  %v8186_v14 = vld [vmem:[%s15208_s0 + $0x48] sm:$0xff]  ;;  %v15878_v16 = vld [vmem:[#allocation32_spill] sm:$0xff] }
 0xad4   :  { %15875 = vst [vmem:[#allocation16_spill] sm:$0xff] %v14731_v45  ;;  %v15876_v12 = vld [vmem:[#allocation41_spill] sm:$0xff]  ;;  %v14739_v15 = vadd.f32 %v14119_v6, %v15878_v16  ;;  %15880 = vst [vmem:[#allocation20_spill] sm:$0xff] %v14743_v19  ;;  %v14763_v19 = vadd.f32 %v14119_v6, %v14456_v50  ;;  %v8193_v50 = vld [vmem:[%s15208_s0 + $0x80] sm:$0xff] }
 0xad5   :  { %15873 = vst [vmem:[#allocation26_spill] sm:$0xff] %v14711_v3  ;;  %v14735_v3 = vadd.f32 %v14119_v6, %v15876_v12  ;;  %v8189_v12 = vld [vmem:[%s15208_s0 + $0x60] sm:$0xff]  ;;  %v8190_v16 = vld [vmem:[%s15208_s0 + $0x68] sm:$0xff]  ;;  %15887 = vst [vmem:[#allocation36_spill] sm:$0xff] %v14771_v23 }
 0xad6   :  { %15879 = vst [vmem:[#allocation21_spill] sm:$0xff] %v14739_v15  ;;  %v15881_v15 = vld [vmem:[#allocation40_spill] sm:$0xff]  ;;  %15883 = vst [vmem:[#allocation18_spill] sm:$0xff] %v14763_v19  ;;  %v15890_v23 = vld [vmem:[#allocation23_spill] sm:$0xff] }
 0xad7   :  { %15877 = vst [vmem:[#allocation29_spill] sm:$0xff] %v14735_v3  ;;  %v14759_v51 = vadd.f32 %v14119_v6, %v15881_v15  ;;  %v15884_v3 = vld [vmem:[#allocation17_spill] sm:$0xff]  ;;  %v8192_v15 = vld [vmem:[%s15208_s0 + $0x78] sm:$0xff]  ;;  %v14791_v19 = vadd.f32 %v14119_v6, %v15890_v23  ;;  %15893 = vst [vmem:[#allocation41_spill] sm:$0xff] %v14799_v41  ;;  %v14819_v41 = vadd.f32 %v14119_v6, %v14501_v47 }
 0xad8   :  { %v14767_v45 = vadd.f32 %v14119_v6, %v15884_v3  ;;  %v8194_v3 = vld [vmem:[%s15208_s0 + $0x88] sm:$0xff]  ;;  %v8195_v56 = vld [vmem:[%s15208_s0 + $0x90] sm:$0xff]  ;;  %v8197_v23 = vld [vmem:[%s15208_s0 + $0xa0] sm:$0xff]  ;;  %v14840_v47 = vadd.f32 %v8179_v10, %v14513_v11  ;;  %v14870_v10 = vadd.f32 %v8185_v33, %v14537_v34  ;;  %v14888_v34 = vadd.f32 %v8187_v1, %v14545_v48 }
 0xad9   :  { %15882 = vst [vmem:[#allocation19_spill] sm:$0xff] %v14759_v51  ;;  %15891 = vst [vmem:[#allocation37_spill] sm:$0xff] %v14791_v19  ;;  %v14795_v51 = vadd.f32 %v14119_v6, %v14483_v25  ;;  %v8198_v25 = vld [vmem:[%s15208_s0 + $0xa8] sm:$0xff]  ;;  %v14825_v19 = vadd.f32 %v8178_v39, %v14509_v36  ;;  %v14846_v36 = vadd.f32 %v8181_v18, %v14521_v42  ;;  %v8203_v39 = vld [vmem:[%s15208_s0 + $0xd0] sm:$0xff] }
 0xada   :  { %15885 = vst [vmem:[#allocation8_spill] sm:$0xff] %v14767_v45  ;;  %v15888_v45 = vld [vmem:[#allocation25_spill] sm:$0xff]  ;;  %v8205_v11 = vld [vmem:[%s15208_s0 + $0xe0] sm:$0xff]  ;;  %v14864_v42 = vadd.f32 %v8183_v31, %v14529_v60  ;;  %v8207_v18 = vld [vmem:[%s15208_s0 + $0xf0] sm:$0xff]  ;;  %v14894_v31 = vadd.f32 %v8189_v12, %v14553_v8  ;;  %v14912_v8 = vadd.f32 %v8191_v53, %v14561_v40  ;;  %v14918_v1 = vadd.f32 %v8193_v50, %v14569_v28 }
 0xadb   :  { %v14787_v62 = vadd.f32 %v14119_v6, %v15888_v45  ;;  %15892 = vst [vmem:[#allocation39_spill] sm:$0xff] %v14795_v51  ;;  %v8196_v45 = vld [vmem:[%s15208_s0 + $0x98] sm:$0xff]  ;;  %v14822_v51 = vadd.f32 %v8177_v13, %v14505_v4  ;;  %15894 = vst [vmem:[#allocation32_spill] sm:$0xff] %v14825_v19  ;;  %v8202_v6 = vld [vmem:[%s15208_s0 + $0xc8] sm:$0xff]  ;;  %v14843_v4 = vadd.f32 %v8180_v59, %v14517_v29 }
 0xadc   :  { %v14849_v13 = vadd.f32 %v8182_v5, %v14525_v22  ;;  %v8204_v19 = vld [vmem:[%s15208_s0 + $0xd8] sm:$0xff]  ;;  %v8206_v29 = vld [vmem:[%s15208_s0 + $0xe8] sm:$0xff]  ;;  %v14867_v22 = vadd.f32 %v8184_v46, %v14533_v57  ;;  %v14873_v59 = vadd.f32 %v8186_v14, %v14541_v43  ;;  %v8209_v60 = vld [vmem:[%s15208_s0 + $0x100] sm:$0xff]  ;;  %v14891_v43 = vadd.f32 %v8188_v32, %v14549_v0 }
 0xadd   :  { %15889 = vst [vmem:[#allocation27_spill] sm:$0xff] %v14787_v62  ;;  %v8199_v62 = vld [vmem:[%s15208_s0 + $0xb0] sm:$0xff]  ;;  %v8208_v5 = vld [vmem:[%s15208_s0 + $0xf8] sm:$0xff]  ;;  %v8210_v57 = vld [vmem:[%s15208_s0 + $0x108] sm:$0xff]  ;;  %v14897_v46 = vadd.f32 %v8190_v16, %v14557_v9  ;;  %v14915_v9 = vadd.f32 %v8192_v15, %v14565_v55  ;;  %v14921_v32 = vadd.f32 %v8194_v3, %v14573_v2  ;;  %v14933_v55 = vadd.f32 %v8195_v56, %v14577_v58 }
 0xade   :  { %v8211_v33 = vld [vmem:[%s15208_s0 + $0x110] sm:$0xff]  ;;  %v8212_v14 = vld [vmem:[%s15208_s0 + $0x118] sm:$0xff]  ;;  %v8213_v48 = vld [vmem:[%s15208_s0 + $0x120] sm:$0xff]  ;;  %v14936_v28 = vadd.f32 %v8196_v45, %v14581_v30  ;;  %v14939_v2 = vadd.f32 %v8197_v23, %v14585_v35  ;;  %v14942_v53 = vadd.f32 %v8198_v25, %v14589_v49  ;;  %v14954_v30 = vadd.f32 %v8199_v62, %v14593_v52 }
 0xadf   :  { %v8214_v0 = vld [vmem:[%s15208_s0 + $0x128] sm:$0xff]  ;;  %v8215_v12 = vld [vmem:[%s15208_s0 + $0x130] sm:$0xff]  ;;  %v8216_v16 = vld [vmem:[%s15208_s0 + $0x138] sm:$0xff]  ;;  %v14957_v35 = vadd.f32 %v8200_v21, %v14597_v27  ;;  %v14960_v49 = vadd.f32 %v8201_v26, %v14601_v24  ;;  %v14963_v56 = vadd.f32 %v8202_v6, %v14605_v20  ;;  %v14975_v27 = vadd.f32 %v8203_v39, %v14609_v37 }
 0xae0   :  { %v8217_v40 = vld [vmem:[%s15208_s0 + $0x140] sm:$0xff]  ;;  %v8218_v15 = vld [vmem:[%s15208_s0 + $0x148] sm:$0xff]  ;;  %v8219_v50 = vld [vmem:[%s15208_s0 + $0x150] sm:$0xff]  ;;  %v14978_v24 = vadd.f32 %v8204_v19, %v14613_v7  ;;  %v14981_v20 = vadd.f32 %v8205_v11, %v14617_v17  ;;  %v14984_v21 = vadd.f32 %v8206_v29, %v14621_v61  ;;  %v14996_v7 = vadd.f32 %v8207_v18, %v14625_v44 }
 0xae1   :  { %v8220_v58 = vld [vmem:[%s15208_s0 + $0x158] sm:$0xff]  ;;  %v8221_v3 = vld [vmem:[%s15208_s0 + $0x160] sm:$0xff]  ;;  %v8222_v45 = vld [vmem:[%s15208_s0 + $0x168] sm:$0xff]  ;;  %v14999_v17 = vadd.f32 %v8208_v5, %v14629_v63  ;;  %v15002_v61 = vadd.f32 %v8209_v60, %v14633_v38 }
 0xae2   :  { %v8223_v52 = vld [vmem:[%s15208_s0 + $0x170] sm:$0xff]  ;;  %v8224_v62 = vld [vmem:[%s15208_s0 + $0x178] sm:$0xff]  ;;  %v8225_v23 = vld [vmem:[%s15208_s0 + $0x180] sm:$0xff] }
 0xae3   :  { %v8226_v37 = vld [vmem:[%s15208_s0 + $0x188] sm:$0xff]  ;;  %v15895_v19 = vld [vmem:[#allocation24_spill] sm:$0xff]  ;;  %v8227_v26 = vld [vmem:[%s15208_s0 + $0x190] sm:$0xff] }
 0xae4   :  { %v15005_v25 = vadd.f32 %v8210_v57, %v15895_v19  ;;  %v8228_v6 = vld [vmem:[%s15208_s0 + $0x198] sm:$0xff]  ;;  %v8229_v44 = vld [vmem:[%s15208_s0 + $0x1a0] sm:$0xff]  ;;  %v15896_v63 = vld [vmem:[#allocation34_spill] sm:$0xff] }
 0xae5   :  { %v15017_v39 = vadd.f32 %v8211_v33, %v15896_v63  ;;  %v15898_v38 = vld [vmem:[#allocation9_spill] sm:$0xff]  ;;  %v15900_v29 = vld [vmem:[#allocation28_spill] sm:$0xff]  ;;  %v15902_v5 = vld [vmem:[#allocation35_spill] sm:$0xff] }
 0xae6   :  { %v15020_v11 = vadd.f32 %v8212_v14, %v15898_v38  ;;  %v15023_v18 = vadd.f32 %v8213_v48, %v15900_v29  ;;  %v15026_v60 = vadd.f32 %v8214_v0, %v15902_v5  ;;  %v8230_v57 = vld [vmem:[%s15208_s0 + $0x1a8] sm:$0xff]  ;;  %v8231_v19 = vld [vmem:[%s15208_s0 + $0x1b0] sm:$0xff]  ;;  %v8232_v33 = vld [vmem:[%s15208_s0 + $0x1b8] sm:$0xff] }
 0xae7   :  { %15897 = vst [vmem:[#allocation40_spill] sm:$0xff] %v15017_v39  ;;  %v15904_v14 = vld [vmem:[#allocation11_spill] sm:$0xff]  ;;  %v15906_v48 = vld [vmem:[#allocation14_spill] sm:$0xff]  ;;  %v15910_v5 = vld [vmem:[#allocation12_spill] sm:$0xff] }
 0xae8   :  { %15899 = vst [vmem:[#allocation17_spill] sm:$0xff] %v15020_v11  ;;  %15901 = vst [vmem:[#allocation22_spill] sm:$0xff] %v15023_v18  ;;  %v15038_v63 = vadd.f32 %v8215_v12, %v15904_v14  ;;  %v15041_v38 = vadd.f32 %v8216_v16, %v15906_v48  ;;  %v15908_v0 = vld [vmem:[#allocation10_spill] sm:$0xff]  ;;  %v8233_v11 = vld [vmem:[%s15208_s0 + $0x1c0] sm:$0xff] }
 0xae9   :  { %15903 = vst [vmem:[#allocation25_spill] sm:$0xff] %v15026_v60  ;;  %v15044_v29 = vadd.f32 %v8217_v40, %v15908_v0  ;;  %v15047_v60 = vadd.f32 %v8218_v15, %v15910_v5  ;;  %v8235_v18 = vld [vmem:[%s15208_s0 + $0x1d0] sm:$0xff]  ;;  %v8234_v12 = vld [vmem:[%s15208_s0 + $0x1c8] sm:$0xff]  ;;  %v15916_v15 = vld [vmem:[#allocation15_spill] sm:$0xff] }
 0xaea   :  { %15905 = vst [vmem:[#allocation23_spill] sm:$0xff] %v15038_v63  ;;  %15907 = vst [vmem:[#allocation24_spill] sm:$0xff] %v15041_v38  ;;  %v15912_v16 = vld [vmem:[#allocation38_spill] sm:$0xff]  ;;  %v15914_v40 = vld [vmem:[#allocation33_spill] sm:$0xff]  ;;  %v15065_v0 = vadd.f32 %v8221_v3, %v15916_v15 }
 0xaeb   :  { %15909 = vst [vmem:[#allocation34_spill] sm:$0xff] %v15044_v29  ;;  %15911 = vst [vmem:[#allocation9_spill] sm:$0xff] %v15047_v60  ;;  %v15059_v14 = vadd.f32 %v8219_v50, %v15912_v16  ;;  %v15062_v48 = vadd.f32 %v8220_v58, %v15914_v40  ;;  %v15918_v5 = vld [vmem:[#allocation31_spill] sm:$0xff]  ;;  %v8239_v38 = vld [vmem:[%s15208_s0 + $0x1f0] sm:$0xff] }
 0xaec   :  { %15917 = vst [vmem:[#allocation11_spill] sm:$0xff] %v15065_v0  ;;  %v15068_v60 = vadd.f32 %v8222_v45, %v15918_v5  ;;  %v8236_v29 = vld [vmem:[%s15208_s0 + $0x1d8] sm:$0xff]  ;;  %v8237_v50 = vld [vmem:[%s15208_s0 + $0x1e0] sm:$0xff]  ;;  %v15920_v58 = vld [vmem:[#allocation13_spill] sm:$0xff] }
 0xaed   :  { %15913 = vst [vmem:[#allocation28_spill] sm:$0xff] %v15059_v14  ;;  %15915 = vst [vmem:[#allocation35_spill] sm:$0xff] %v15062_v48  ;;  %v15080_v16 = vadd.f32 %v8223_v52, %v15920_v58  ;;  %v15921_v3 = vld [vmem:[#allocation26_spill] sm:$0xff]  ;;  %v15924_v5 = vld [vmem:[#allocation16_spill] sm:$0xff] }
 0xaee   :  { %15919 = vst [vmem:[#allocation14_spill] sm:$0xff] %v15068_v60  ;;  %v15083_v40 = vadd.f32 %v8224_v62, %v15921_v3  ;;  %v15922_v45 = vld [vmem:[#allocation30_spill] sm:$0xff]  ;;  %v15089_v60 = vadd.f32 %v8226_v37, %v15924_v5  ;;  %v8240_v0 = vld [vmem:[%s15208_s0 + $0x1f8] sm:$0xff]  ;;  %v15926_v48 = vld [vmem:[#allocation29_spill] sm:$0xff]  ;;  %s9810_s0 = smov [#allocation5]  }
 0xaef   :  { %v15086_v15 = vadd.f32 %v8225_v23, %v15922_v45  ;;  %v15095_v14 = vadd.f32 %v8227_v26, %v15926_v48  ;;  %v15927_v63 = vld [vmem:[#allocation21_spill] sm:$0xff]  ;;  %v15928_v52 = vld [vmem:[#allocation20_spill] sm:$0xff]  ;;  %v15929_v62 = vld [vmem:[#allocation19_spill] sm:$0xff]  ;;  %s8438_s16 = sshll.u32 %s9810_s0, 4  ;;  %s8439_s16 = int_to_ptr.vmem [resolvable:$true] %s8438_s16 }
 0xaf0   :  { %15925 = vst [vmem:[#allocation12_spill] sm:$0xff] %v15089_v60  ;;  %v15098_v39 = vadd.f32 %v8228_v6, %v15927_v63  ;;  %v15101_v58 = vadd.f32 %v8229_v44, %v15928_v52  ;;  %v15104_v3 = vadd.f32 %v8230_v57, %v15929_v62  ;;  %v15930_v23 = vld [vmem:[#allocation18_spill] sm:$0xff]  ;;  %v15931_v37 = vld [vmem:[#allocation8_spill] sm:$0xff]  ;;  %v15933_v26 = vld [vmem:[#allocation27_spill] sm:$0xff]  ;;  %s9783_s17 = scalar_lea.vmem %s8439_s16, 8192  ;;  %p9788_p1 = scmp.lt.s32.totalorder %s8439_s16, %s8439_s16 }
 0xaf1   :  { %15923 = vst [vmem:[#allocation10_spill] sm:$0xff] %v15086_v15  ;;  %v15107_v45 = vadd.f32 %v8231_v19, %v15930_v23  ;;  %v15110_v5 = vadd.f32 %v8232_v33, %v15931_v37  ;;  %v15932_v60 = vld [vmem:[#allocation36_spill] sm:$0xff]  ;;  %v15116_v48 = vadd.f32 %v8234_v12, %v15933_v26  ;;  %v15934_v6 = vld [vmem:[#allocation37_spill] sm:$0xff]  ;;  %v15935_v44 = vld [vmem:[#allocation39_spill] sm:$0xff]  ;;  %v15128_v19 = vadd.f32 %v8239_v38, %v14815_v54  ;;  %p9784_p0 = scmp.ne.s32.totalorder %s8439_s16, %s9783_s17  ;;  %p9789_p2 = scmp.lt.s32.totalorder %s9783_s17, %s9783_s17 }
 0xaf2   :  { %v15113_v15 = vadd.f32 %v8233_v11, %v15932_v60  ;;  %v15119_v63 = vadd.f32 %v8235_v18, %v15934_v6  ;;  %v15122_v52 = vadd.f32 %v8236_v29, %v15935_v44  ;;  %v15936_v57 = vld [vmem:[#allocation41_spill] sm:$0xff]  ;;  %v15131_v33 = vadd.f32 %v8240_v0, %v14819_v41  ;;  %v15937_v60 = vld [vmem:[#allocation32_spill] sm:$0xff]  ;;  %v15942_v6 = vld [vmem:[#allocation23_spill] sm:$0xff] }
 0xaf3   :  { %v15125_v62 = vadd.f32 %v8237_v50, %v15936_v57  ;;  %v8305_v11 = vmax.f32 %v14822_v51, 0.0  ;;  %v8306_v12 = vmax.f32 %v15937_v60, 0.0  ;;  %v8307_v23 = vmax.f32 %v14840_v47, 0.0  ;;  %v15941_v0 = vld [vmem:[#allocation25_spill] sm:$0xff]  ;;  %p9790_p3 = por %p9789_p2, %p9788_p1 }
 0xaf4   :  { %v8308_v18 = vmax.f32 %v14843_v4, 0.0  ;;  %v8309_v29 = vmax.f32 %v14846_v36, 0.0  ;;  %v8310_v37 = vmax.f32 %v14849_v13, 0.0  ;;  %v8311_v50 = vmax.f32 %v14864_v42, 0.0 }
 0xaf5   :  { %v8312_v54 = vmax.f32 %v14867_v22, 0.0  ;;  %v8313_v38 = vmax.f32 %v14870_v10, 0.0  ;;  %v8314_v41 = vmax.f32 %v14873_v59, 0.0  ;;  %v8315_v51 = vmax.f32 %v14888_v34, 0.0  ;;  %8369 = vst [vmem:[#allocation5] sm:$0xff] %v8305_v11  ;;  %8370 = vst [vmem:[#allocation5 + $0x8] sm:$0xff] %v8306_v12  ;;  %p9791_p4 = pnand %p9790_p3, %p9784_p0 }
 0xaf6   :  { %8371 = vst [vmem:[#allocation5 + $0x10] sm:$0xff] %v8307_v23  ;;  %v8316_v47 = vmax.f32 %v14891_v43, 0.0  ;;  %v8317_v4 = vmax.f32 %v14894_v31, 0.0  ;;  %v8318_v36 = vmax.f32 %v14897_v46, 0.0  ;;  %v8319_v13 = vmax.f32 %v14912_v8, 0.0  ;;  %8372 = vst [vmem:[#allocation5 + $0x18] sm:$0xff] %v8308_v18 }
 0xaf7   :  { %8373 = vst [vmem:[#allocation5 + $0x20] sm:$0xff] %v8309_v29  ;;  %8374 = vst [vmem:[#allocation5 + $0x28] sm:$0xff] %v8310_v37  ;;  %v8320_v42 = vmax.f32 %v14915_v9, 0.0  ;;  %v8321_v22 = vmax.f32 %v14918_v1, 0.0  ;;  %v8322_v10 = vmax.f32 %v14921_v32, 0.0  ;;  %v8323_v59 = vmax.f32 %v14933_v55, 0.0 }
 0xaf8   :  { %8375 = vst [vmem:[#allocation5 + $0x30] sm:$0xff] %v8311_v50  ;;  %8376 = vst [vmem:[#allocation5 + $0x38] sm:$0xff] %v8312_v54  ;;  %v8324_v34 = vmax.f32 %v14936_v28, 0.0  ;;  %v8325_v43 = vmax.f32 %v14939_v2, 0.0  ;;  %v8326_v31 = vmax.f32 %v14942_v53, 0.0  ;;  %v8327_v46 = vmax.f32 %v14954_v30, 0.0 }
 0xaf9   :  { %8377 = vst [vmem:[#allocation5 + $0x40] sm:$0xff] %v8313_v38  ;;  %8378 = vst [vmem:[#allocation5 + $0x48] sm:$0xff] %v8314_v41  ;;  %v8328_v8 = vmax.f32 %v14957_v35, 0.0  ;;  %v8329_v9 = vmax.f32 %v14960_v49, 0.0  ;;  %v8330_v1 = vmax.f32 %v14963_v56, 0.0  ;;  %v8331_v32 = vmax.f32 %v14975_v27, 0.0 }
 0xafa   :  { %8379 = vst [vmem:[#allocation5 + $0x50] sm:$0xff] %v8315_v51  ;;  %8380 = vst [vmem:[#allocation5 + $0x58] sm:$0xff] %v8316_v47  ;;  %v8332_v55 = vmax.f32 %v14978_v24, 0.0  ;;  %v8333_v28 = vmax.f32 %v14981_v20, 0.0  ;;  %v8334_v2 = vmax.f32 %v14984_v21, 0.0  ;;  %v8335_v53 = vmax.f32 %v14996_v7, 0.0 }
 0xafb   :  { %8381 = vst [vmem:[#allocation5 + $0x60] sm:$0xff] %v8317_v4  ;;  %8382 = vst [vmem:[#allocation5 + $0x68] sm:$0xff] %v8318_v36  ;;  %v8336_v30 = vmax.f32 %v14999_v17, 0.0  ;;  %v8337_v35 = vmax.f32 %v15002_v61, 0.0  ;;  %v8338_v49 = vmax.f32 %v15005_v25, 0.0  ;;  %v15938_v56 = vld [vmem:[#allocation40_spill] sm:$0xff] }
 0xafc   :  { %8383 = vst [vmem:[#allocation5 + $0x70] sm:$0xff] %v8319_v13  ;;  %8384 = vst [vmem:[#allocation5 + $0x78] sm:$0xff] %v8320_v42  ;;  %v8339_v27 = vmax.f32 %v15938_v56, 0.0  ;;  %v15939_v24 = vld [vmem:[#allocation17_spill] sm:$0xff]  ;;  %v15940_v21 = vld [vmem:[#allocation22_spill] sm:$0xff]  ;;  %v8342_v26 = vmax.f32 %v15941_v0, 0.0 }
 0xafd   :  { %8385 = vst [vmem:[#allocation5 + $0x80] sm:$0xff] %v8321_v22  ;;  %8386 = vst [vmem:[#allocation5 + $0x88] sm:$0xff] %v8322_v10  ;;  %v8340_v20 = vmax.f32 %v15939_v24, 0.0  ;;  %v8341_v7 = vmax.f32 %v15940_v21, 0.0  ;;  %v8343_v44 = vmax.f32 %v15942_v6, 0.0  ;;  %v15943_v17 = vld [vmem:[#allocation24_spill] sm:$0xff] }
 0xafe   :  { %8387 = vst [vmem:[#allocation5 + $0x90] sm:$0xff] %v8323_v59  ;;  %8388 = vst [vmem:[#allocation5 + $0x98] sm:$0xff] %v8324_v34  ;;  %v8344_v61 = vmax.f32 %v15943_v17, 0.0  ;;  %v15944_v25 = vld [vmem:[#allocation34_spill] sm:$0xff]  ;;  %v15945_v11 = vld [vmem:[#allocation9_spill] sm:$0xff]  ;;  %v8351_v41 = vmax.f32 %v15080_v16, 0.0 }
 0xaff   :  { %8389 = vst [vmem:[#allocation5 + $0xa0] sm:$0xff] %v8325_v43  ;;  %8390 = vst [vmem:[#allocation5 + $0xa8] sm:$0xff] %v8326_v31  ;;  %v8345_v57 = vmax.f32 %v15944_v25, 0.0  ;;  %v8346_v60 = vmax.f32 %v15945_v11, 0.0  ;;  %v15946_v12 = vld [vmem:[#allocation28_spill] sm:$0xff]  ;;  %v15947_v18 = vld [vmem:[#allocation35_spill] sm:$0xff] }
 0xb00   :  { %8391 = vst [vmem:[#allocation5 + $0xb0] sm:$0xff] %v8327_v46  ;;  %8392 = vst [vmem:[#allocation5 + $0xb8] sm:$0xff] %v8328_v8  ;;  %v8347_v23 = vmax.f32 %v15946_v12, 0.0  ;;  %v8348_v29 = vmax.f32 %v15947_v18, 0.0  ;;  %v15948_v37 = vld [vmem:[#allocation11_spill] sm:$0xff]  ;;  %v15949_v54 = vld [vmem:[#allocation14_spill] sm:$0xff] }
 0xb01   :  { %8393 = vst [vmem:[#allocation5 + $0xc0] sm:$0xff] %v8329_v9  ;;  %8394 = vst [vmem:[#allocation5 + $0xc8] sm:$0xff] %v8330_v1  ;;  %v8349_v50 = vmax.f32 %v15948_v37, 0.0  ;;  %v8350_v38 = vmax.f32 %v15949_v54, 0.0  ;;  %v8352_v51 = vmax.f32 %v15083_v40, 0.0  ;;  %v15950_v47 = vld [vmem:[#allocation10_spill] sm:$0xff] }
 0xb02   :  { %8395 = vst [vmem:[#allocation5 + $0xd0] sm:$0xff] %v8331_v32  ;;  %8396 = vst [vmem:[#allocation5 + $0xd8] sm:$0xff] %v8332_v55  ;;  %v8353_v4 = vmax.f32 %v15950_v47, 0.0  ;;  %v15951_v36 = vld [vmem:[#allocation12_spill] sm:$0xff]  ;;  %v8355_v42 = vmax.f32 %v15095_v14, 0.0  ;;  %v8356_v16 = vmax.f32 %v15098_v39, 0.0 }
 0xb03   :  { %8397 = vst [vmem:[#allocation5 + $0xe0] sm:$0xff] %v8333_v28  ;;  %8398 = vst [vmem:[#allocation5 + $0xe8] sm:$0xff] %v8334_v2  ;;  %v8354_v13 = vmax.f32 %v15951_v36, 0.0  ;;  %v8357_v22 = vmax.f32 %v15101_v58, 0.0  ;;  %v8358_v10 = vmax.f32 %v15104_v3, 0.0  ;;  %v8359_v40 = vmax.f32 %v15107_v45, 0.0 }
 0xb04   :  { %8399 = vst [vmem:[#allocation5 + $0xf0] sm:$0xff] %v8335_v53  ;;  %8400 = vst [vmem:[#allocation5 + $0xf8] sm:$0xff] %v8336_v30  ;;  %v8360_v14 = vmax.f32 %v15110_v5, 0.0  ;;  %v8361_v59 = vmax.f32 %v15113_v15, 0.0  ;;  %v8362_v34 = vmax.f32 %v15116_v48, 0.0  ;;  %v8363_v43 = vmax.f32 %v15119_v63, 0.0 }
 0xb05   :  { %8401 = vst [vmem:[#allocation5 + $0x100] sm:$0xff] %v8337_v35  ;;  %8402 = vst [vmem:[#allocation5 + $0x108] sm:$0xff] %v8338_v49  ;;  %v8364_v39 = vmax.f32 %v15122_v52, 0.0  ;;  %v8365_v58 = vmax.f32 %v15125_v62, 0.0  ;;  %v8367_v3 = vmax.f32 %v15128_v19, 0.0  ;;  %v8368_v45 = vmax.f32 %v15131_v33, 0.0 }
 0xb06   :  { %8403 = vst [vmem:[#allocation5 + $0x110] sm:$0xff] %v8339_v27  ;;  %8404 = vst [vmem:[#allocation5 + $0x118] sm:$0xff] %v8340_v20 }
 0xb07   :  { %8405 = vst [vmem:[#allocation5 + $0x120] sm:$0xff] %v8341_v7  ;;  %8406 = vst [vmem:[#allocation5 + $0x128] sm:$0xff] %v8342_v26 }
 0xb08   :  { %8407 = vst [vmem:[#allocation5 + $0x130] sm:$0xff] %v8343_v44  ;;  %8408 = vst [vmem:[#allocation5 + $0x138] sm:$0xff] %v8344_v61 }
 0xb09   :  { %8409 = vst [vmem:[#allocation5 + $0x140] sm:$0xff] %v8345_v57  ;;  %8410 = vst [vmem:[#allocation5 + $0x148] sm:$0xff] %v8346_v60 }
 0xb0a   :  { %8411 = vst [vmem:[#allocation5 + $0x150] sm:$0xff] %v8347_v23  ;;  %8412 = vst [vmem:[#allocation5 + $0x158] sm:$0xff] %v8348_v29 }
 0xb0b   :  { %8413 = vst [vmem:[#allocation5 + $0x160] sm:$0xff] %v8349_v50  ;;  %8414 = vst [vmem:[#allocation5 + $0x168] sm:$0xff] %v8350_v38 }
 0xb0c   :  { %8415 = vst [vmem:[#allocation5 + $0x170] sm:$0xff] %v8351_v41  ;;  %8416 = vst [vmem:[#allocation5 + $0x178] sm:$0xff] %v8352_v51 }
 0xb0d   :  { %8417 = vst [vmem:[#allocation5 + $0x180] sm:$0xff] %v8353_v4  ;;  %8418 = vst [vmem:[#allocation5 + $0x188] sm:$0xff] %v8354_v13 }
 0xb0e   :  { %8419 = vst [vmem:[#allocation5 + $0x190] sm:$0xff] %v8355_v42  ;;  %8420 = vst [vmem:[#allocation5 + $0x198] sm:$0xff] %v8356_v16 }
 0xb0f   :  { %8421 = vst [vmem:[#allocation5 + $0x1a0] sm:$0xff] %v8357_v22  ;;  %8422 = vst [vmem:[#allocation5 + $0x1a8] sm:$0xff] %v8358_v10 }
 0xb10   :  { %8423 = vst [vmem:[#allocation5 + $0x1b0] sm:$0xff] %v8359_v40  ;;  %8424 = vst [vmem:[#allocation5 + $0x1b8] sm:$0xff] %v8360_v14 }
 0xb11   :  { %8425 = vst [vmem:[#allocation5 + $0x1c0] sm:$0xff] %v8361_v59  ;;  %8426 = vst [vmem:[#allocation5 + $0x1c8] sm:$0xff] %v8362_v34 }
 0xb12   :  { %8427 = vst [vmem:[#allocation5 + $0x1d0] sm:$0xff] %v8363_v43  ;;  %8428 = vst [vmem:[#allocation5 + $0x1d8] sm:$0xff] %v8364_v39 }
 0xb13   :  { %8429 = vst [vmem:[#allocation5 + $0x1e0] sm:$0xff] %v8365_v58  ;;  %8431 = vst [vmem:[#allocation5 + $0x1f0] sm:$0xff] %v8367_v3 }
 0xb14   :  { %8432 = vst [vmem:[#allocation5 + $0x1f8] sm:$0xff] %v8368_v45 }
 0xb15   :  { %9794 = shalt.err (!%p9791_p4)
}
 0xb16   :  { %s9795_s20 = scalar_lea.hbm %s15212_s4, 8192 }
 0xb17   :  { %p9796_p5 = scmp.ne.s32.totalorder %s15212_s4, %s9795_s20  ;;  %p9799_p6 = scmp.lt.u32.totalorder %s9795_s20, %s15212_s4 }
 0xb19   :  { %p9801_p7 = pnand %p9799_p6, %p9796_p5 }
 0xb1b   :  { %9804 = shalt.err (!%p9801_p7)
}
 0xb1c   :  { %s9811_s25 = smov 128   ;;  %s9812_s26 = smov 8  }
 0xb1d   :  { %8444 = dma.vmem_to_hbm [thread:$0]  %s8439_s16, 8192, %s15212_s4, [#allocation6], %s9811_s25, %s9811_s25, %s9812_s26  }
 0xb1e   :  { %9805 = dma.done.wait [#allocation6], 8192  }
 0xb1f   :  { %9806 = vsyncadd [#allocation6], 4294959104 }
 0xb20   :  { %8448 = vsyncpa [#allocation6], 1 }

</bundles_post_ra>
